<compile_context>
chip_gen: v5e
topology: v5e:2x2
jax: 0.10.0
libtpu: 0.0.40
codegen_flags: <defaults>
</compile_context>

<pallas_src>
import functools
import math

import jax
import jax.numpy as jnp
from jax import lax
from jax.experimental import pallas as pl
from jax.experimental.pallas import tpu as pltpu


# --------------------------------- compiler / tiling helpers -------------------------------

def _vmem_limit_bytes():
    """~3/4 of physical VMEM, capped at 96 MiB (v5e/v6e -> 96 MiB, v7x -> 48 MiB)."""
    cap = 64 << 20  # conservative fallback (v7x physical)
    try:
        info = pltpu.get_tpu_info()
        cap = int(getattr(info, "vmem_capacity_bytes", 0)) or cap
    except Exception:
        pass
    return int(min(96 << 20, cap * 3 // 4))


_VMEM_LIMIT = _vmem_limit_bytes()


def _cp(*sem):
    return pltpu.CompilerParams(dimension_semantics=tuple(sem),
                                vmem_limit_bytes=_VMEM_LIMIT)


def _largest_divisor_leq(n, cap):
    cap = max(1, min(n, cap))
    for d in range(cap, 0, -1):
        if n % d == 0:
            return d
    return 1


def _batch_tile(total, bytes_per_item, target_bytes=4 << 20):
    """Tile for a leading batch axis: ~2-4 MiB blocks, >=2 grid steps when possible."""
    cap = max(1, min(total // 2 if total >= 4 else total,
                     target_bytes // max(1, bytes_per_item)))
    return _largest_divisor_leq(total, cap)


def _row_tile(total, bytes_per_row, target_bytes=4 << 20, align=16):
    """Tile for a sublane (row) axis: divisor of total, multiple of `align` (bf16 packing) or full."""
    cap = max(1, min(total // 2 if total >= 2 * align else total,
                     target_bytes // max(1, bytes_per_row)))
    for d in range(min(cap, total), 0, -1):
        if total % d == 0 and (d % align == 0 or d == total):
            return d
    return total


def _channel_tile(Cq, H, W, target_bytes=2 << 20):
    """Channel tile for the depthwise conv: multiple of 128 lanes (or the full extent)."""
    cap = max(1, target_bytes // max(1, H * W * 2))
    best = None
    for d in range(Cq, 127, -1):
        if Cq % d == 0 and d % 128 == 0:
            best = d
            if d <= cap:
                return d
    return best if best is not None else Cq


# ----------------------- fused separable 2-D transform (DCT / IDCT) -----------------------

def _sep2d_apply(x, r_ref, l_ref, o_ref):
    """o = L @ x[n] @ R per slice.  Stage 1 is one big (nt*H, W) matmul (bf16 MXU, f32 acc);
    stage 2 is per-slice (H,H)@(H,W) dots (no broadcast copies of the basis)."""
    nt, H, W = x.shape
    xb = x.astype(jnp.bfloat16).reshape(nt * H, W)
    y = jnp.dot(xb, r_ref[...], preferred_element_type=jnp.float32)      # X @ R, merged M
    yb = y.reshape(nt, H, W).astype(jnp.bfloat16)
    l = l_ref[...]
    for i in range(nt):
        o_ref[i] = jnp.dot(l, yb[i],
                           preferred_element_type=jnp.float32).astype(o_ref.dtype)


def _sep2d_kernel(x_ref, r_ref, l_ref, o_ref):
    _sep2d_apply(x_ref[...], r_ref, l_ref, o_ref)


def _sep2d_add_kernel(x_ref, res_ref, r_ref, l_ref, o_ref):
    x = x_ref[...].astype(jnp.float32) + res_ref[...].astype(jnp.float32)
    _sep2d_apply(x, r_ref, l_ref, o_ref)


def sep2d(x, r, l, residual=None, out_dtype=jnp.bfloat16):
    """Per-slice L @ X @ R on (N, H, W); optional fused residual add before the transform."""
    N, H, W = x.shape
    nt = _batch_tile(N, H * W * 4)
    nt = _largest_divisor_leq(N, min(nt, 64))            # bound stage-2 unrolling
    x_spec = pl.BlockSpec((nt, H, W), lambda i: (i, 0, 0))
    m_specs = [pl.BlockSpec((W, W), lambda i: (0, 0)),
               pl.BlockSpec((H, H), lambda i: (0, 0))]
    r_b = r.astype(jnp.bfloat16)
    l_b = l.astype(jnp.bfloat16)
    if residual is None:
        kern, ins, specs = _sep2d_kernel, (x, r_b, l_b), [x_spec] + m_specs
    else:
        kern = _sep2d_add_kernel
        ins = (x, residual, r_b, l_b)
        specs = [x_spec, x_spec] + m_specs
    return pl.pallas_call(
        kern,
        out_shape=jax.ShapeDtypeStruct((N, H, W), out_dtype),
        grid=(N // nt,),
        in_specs=specs,
        out_specs=x_spec,
        compiler_params=_cp("parallel"),
    )(*ins)


# ----------------------------- fused LayerNorm + qkv 1x1 conv -----------------------------

def _ln_qkv_kernel(x_ref, g_ref, b_ref, w_ref, o_ref):
    x = x_ref[...].astype(jnp.float32)                       # (tm, C)
    mu = jnp.mean(x, axis=-1, keepdims=True)
    var = jnp.mean((x - mu) ** 2, axis=-1, keepdims=True)    # unbiased=False
    xn = (x - mu) * lax.rsqrt(var + 1e-5) * g_ref[...] + b_ref[...]
    o_ref[...] = jnp.dot(xn.astype(jnp.bfloat16), w_ref[...],
                         preferred_element_type=jnp.float32).astype(o_ref.dtype)


def ln_qkv(x, gamma, beta, w):
    M, C = x.shape
    N = w.shape[1]
    tm = _row_tile(M, (C + N) * 2)
    return pl.pallas_call(
        _ln_qkv_kernel,
        out_shape=jax.ShapeDtypeStruct((M, N), jnp.bfloat16),
        grid=(M // tm,),
        in_specs=[pl.BlockSpec((tm, C), lambda i: (i, 0)),
                  pl.BlockSpec((1, C), lambda i: (0, 0)),
                  pl.BlockSpec((1, C), lambda i: (0, 0)),
                  pl.BlockSpec((C, N), lambda i: (0, 0))],
        out_specs=pl.BlockSpec((tm, N), lambda i: (i, 0)),
        compiler_params=_cp("parallel"),
    )(x, gamma.reshape(1, C).astype(jnp.float32),
      beta.reshape(1, C).astype(jnp.float32), w.astype(jnp.bfloat16))


# --------------------------------- row-tiled matmul + bias ---------------------------------

def _matmul_bias_kernel(x_ref, w_ref, b_ref, o_ref):
    o_ref[...] = (jnp.dot(x_ref[...], w_ref[...], preferred_element_type=jnp.float32)
                  + b_ref[...]).astype(o_ref.dtype)


def matmul_bias(x, w, b):
    M, K = x.shape
    N = w.shape[1]
    tm = _row_tile(M, (K + N) * 2)
    return pl.pallas_call(
        _matmul_bias_kernel,
        out_shape=jax.ShapeDtypeStruct((M, N), jnp.bfloat16),
        grid=(M // tm,),
        in_specs=[pl.BlockSpec((tm, K), lambda i: (i, 0)),
                  pl.BlockSpec((K, N), lambda i: (0, 0)),
                  pl.BlockSpec((1, N), lambda i: (0, 0))],
        out_specs=pl.BlockSpec((tm, N), lambda i: (i, 0)),
        compiler_params=_cp("parallel"),
    )(x.astype(jnp.bfloat16), w.astype(jnp.bfloat16),
      b.reshape(1, N).astype(jnp.float32))


# ----------------- depthwise 3x3 conv (channel-tiled, halo-only zero padding) --------------

def _dwconv3x3_kernel(x_ref, w_ref, o_ref, pad_ref):
    Hp, Wp, ct = pad_ref.shape
    H, W = Hp - 2, Wp - 2
    # Zero only the 1-pixel halo ring (not the whole scratch), then stage the interior.
    pad_ref[0:1, :, :] = jnp.zeros((1, Wp, ct), jnp.float32)
    pad_ref[Hp - 1:Hp, :, :] = jnp.zeros((1, Wp, ct), jnp.float32)
    pad_ref[1:Hp - 1, 0:1, :] = jnp.zeros((H, 1, ct), jnp.float32)
    pad_ref[1:Hp - 1, Wp - 1:Wp, :] = jnp.zeros((H, 1, ct), jnp.float32)
    pad_ref[1:Hp - 1, 1:Wp - 1, :] = x_ref[0].astype(jnp.float32)
    acc = jnp.zeros((H, W, ct), jnp.float32)
    for dy in range(3):
        for dx in range(3):
            tap = w_ref[dy * 3 + dx, :].reshape(1, 1, ct)
            acc = acc + pad_ref[dy:dy + H, dx:dx + W, :] * tap
    o_ref[0] = acc.astype(o_ref.dtype)


def dwconv3x3(x, w):
    B, H, W, Cq = x.shape
    ct = _channel_tile(Cq, H, W)
    return pl.pallas_call(
        _dwconv3x3_kernel,
        out_shape=jax.ShapeDtypeStruct((B, H, W, Cq), jnp.bfloat16),
        grid=(B, Cq // ct),
        in_specs=[pl.BlockSpec((1, H, W, ct), lambda b, c: (b, 0, 0, c)),
                  pl.BlockSpec((9, ct), lambda b, c: (0, c))],
        out_specs=pl.BlockSpec((1, H, W, ct), lambda b, c: (b, 0, 0, c)),
        scratch_shapes=[pltpu.VMEM((H + 2, W + 2, ct), jnp.float32)],
        compiler_params=_cp("parallel", "parallel"),
    )(x.astype(jnp.bfloat16), w.astype(jnp.float32))


# ------------------- window attention with fused gate MLP (exact-erf GELU) -----------------

def _erf_approx(x):
    # Abramowitz & Stegun 7.1.26 (|err| <= 1.5e-7): f32-level exact erf, Mosaic-safe ops only.
    a1, a2, a3 = 0.254829592, -0.284496736, 1.421413741
    a4, a5, pc = -1.453152027, 1.061405429, 0.3275911
    ax = jnp.abs(x)
    t = 1.0 / (1.0 + pc * ax)
    poly = ((((a5 * t + a4) * t + a3) * t + a2) * t + a1) * t
    e = 1.0 - poly * jnp.exp(-ax * ax)
    return jnp.where(x >= 0, e, -e)


def _gelu_erf(x):
    return 0.5 * x * (1.0 + _erf_approx(x * 0.7071067811865476))


def _window_attn_kernel(temp_ref, q_ref, k_ref, v_ref, wm_ref, bm_ref, o_ref):
    q = q_ref[...]                                            # (wt, ch, S) bf16
    k = k_ref[...]
    v = v_ref[...]
    wt, ch, S = q.shape
    # fused window MLP gate: GELU(v @ Wmlp + b), Linear over the window dim S (bf16 MXU, f32 acc)
    g = jnp.dot(v.reshape(wt * ch, S), wm_ref[...],
                preferred_element_type=jnp.float32) + bm_ref[...]
    gate = _gelu_erf(g).reshape(wt, ch, S)
    # channel attention within each (window, head) group
    temp = temp_ref[pl.program_id(1)]                         # per-head scalar from SMEM
    attn = jnp.einsum('gcs,gds->gcd', q, k, preferred_element_type=jnp.float32) * temp
    attn = attn - jnp.max(attn, axis=-1, keepdims=True)
    p = jnp.exp(attn)
    p = p * pl.reciprocal(jnp.sum(p, axis=-1, keepdims=True), approx=True)
    out = jnp.einsum('gcd,gds->gcs', p.astype(v.dtype), v,
                     preferred_element_type=jnp.float32)
    o_ref[...] = (out * gate).astype(o_ref.dtype)


def window_attention(q, k, v, w_mlp, b_mlp, temperature):
    NH, NW, ch, S = q.shape
    wt = _batch_tile(NW, 6 * ch * S * 2, target_bytes=2 << 20)
    # grid: largest parallel extent (window tiles) first for even v7x megacore splits
    qkv_spec = pl.BlockSpec((None, wt, ch, S), lambda i, h, *_: (h, i, 0, 0))
    grid_spec = pltpu.PrefetchScalarGridSpec(
        num_scalar_prefetch=1,
        grid=(NW // wt, NH),
        in_specs=[qkv_spec, qkv_spec, qkv_spec,
                  pl.BlockSpec((S, S), lambda i, h, *_: (0, 0)),
                  pl.BlockSpec((1, S), lambda i, h, *_: (0, 0))],
        out_specs=qkv_spec,
    )
    return pl.pallas_call(
        _window_attn_kernel,
        out_shape=jax.ShapeDtypeStruct((NH, NW, ch, S), jnp.bfloat16),
        grid_spec=grid_spec,
        compiler_params=_cp("parallel", "parallel"),
    )(temperature.astype(jnp.float32), q.astype(jnp.bfloat16), k.astype(jnp.bfloat16),
      v.astype(jnp.bfloat16), w_mlp.astype(jnp.bfloat16),
      b_mlp.reshape(1, S).astype(jnp.float32))


# ------------------------------------- model glue ------------------------------------------

def dct_matrix(n):
    """Orthonormal DCT-II basis (rows = frequencies).  2-D DCT: Dh @ X @ Dw^T."""
    k = jnp.arange(n, dtype=jnp.float32)[:, None]
    i = jnp.arange(n, dtype=jnp.float32)[None, :]
    d = jnp.sqrt(2.0 / n) * jnp.cos(jnp.pi * (2.0 * i + 1.0) * k / (2.0 * n))
    d = d.at[0, :].set(d[0, :] / jnp.sqrt(2.0))
    return d.astype(jnp.float32)


def init_params(key, C, num_heads, window_size, H, W):
    S = window_size * window_size
    ks = jax.random.split(key, 6)

    def nrm(k, shape, scale):
        return jax.random.normal(k, shape, jnp.float32) * scale

    return dict(
        Dh=dct_matrix(H),
        Dw=dct_matrix(W),
        ln_w=jnp.ones((C,), jnp.float32),            # WithBias_LayerNorm init
        ln_b=jnp.zeros((C,), jnp.float32),
        w_qkv=nrm(ks[0], (C, 3 * C), 0.1),           # Conv2d(C, 3C, 1, bias=False)
        w_dw=nrm(ks[1], (9, 3 * C), 0.1),            # depthwise 3x3, (tap, channel)
        temperature=jnp.ones((num_heads,), jnp.float32) / math.sqrt(float(C)),
        w_mlp=nrm(ks[2], (S, S), 0.05),              # Linear(S, S).weight^T
        b_mlp=nrm(ks[3], (S,), 0.02),
        w_proj=nrm(ks[4], (C, C), 0.1),              # Conv2d(C, C, 1, bias=True)
        b_proj=nrm(ks[5], (C,), 0.02),
    )


@functools.partial(jax.jit, static_argnames=("num_heads", "window_size"))
def freqlc_block_forward(x, p, *, num_heads, window_size):
    B, C, H, W = x.shape
    NH, ws = num_heads, window_size
    ch = C // NH
    S = ws * ws
    Dh, Dw = p['Dh'], p['Dw']

    # ---- DCT2x (fused): X_dct = Dh @ X @ Dw^T per (b, c) slice -> bf16 activation ----
    x_bc = x.reshape(B * C, H, W)
    x_dct_bc = sep2d(x_bc, r=Dw.T, l=Dh, out_dtype=jnp.bfloat16)
    x_dct = x_dct_bc.reshape(B, C, H, W)

    # ---- fused LayerNorm(channels) + qkv 1x1 conv (no bias) ----
    x_cl = x_dct.transpose(0, 2, 3, 1).reshape(B * H * W, C)
    qkv = ln_qkv(x_cl, p['ln_w'], p['ln_b'], p['w_qkv']).reshape(B, H, W, 3 * C)

    # ---- depthwise 3x3 conv (zero padding staged in-kernel, no bias) ----
    qkv = dwconv3x3(qkv, p['w_dw'])

    # ---- check_image_size: reflect-pad spatial dims to multiples of window size ----
    pad_h, pad_w = (-H) % ws, (-W) % ws
    if pad_h or pad_w:
        qkv = jnp.pad(qkv, ((0, 0), (0, pad_h), (0, pad_w), (0, 0)), mode='reflect')
    Hx, Wx = H + pad_h, W + pad_w
    h1, w1 = Hx // ws, Wx // ws
    NW = B * h1 * w1

    # 'b (h1 h) (w1 w) (z head c) -> z head (b h1 w1) c (h w)'
    t = qkv.reshape(B, h1, ws, w1, ws, 3, NH, ch)
    t = t.transpose(5, 6, 0, 1, 3, 7, 2, 4).reshape(3, NH, NW, ch, S)
    q, k, v = t[0], t[1], t[2]

    # ---- fused window attention + gate MLP ----
    out = window_attention(q, k, v, p['w_mlp'], p['b_mlp'], p['temperature'])

    # 'head (b h1 w1) c (h w) -> b (h1 h) (w1 w) (head c)', crop to (H, W)
    o = out.reshape(NH, B, h1, w1, ch, ws, ws)
    o = o.transpose(1, 2, 5, 3, 6, 0, 4).reshape(B, Hx, Wx, C)[:, :H, :W, :]

    # ---- project_out 1x1 conv (with bias) ----
    o = matmul_bias(o.reshape(B * H * W, C), p['w_proj'], p['b_proj'])
    x_attn_bc = o.reshape(B, H, W, C).transpose(0, 3, 1, 2).reshape(B * C, H, W)

    # ---- fused residual add + IDCT2x: X = Dh^T @ (X_dct + X_attn) @ Dw ----
    y = sep2d(x_dct_bc, r=Dw, l=Dh.T, residual=x_attn_bc, out_dtype=jnp.float32)
    return y.reshape(B, C, H, W).astype(x.dtype)


# ------------------------------ pure-JAX reference (sanity check) --------------------------

def reference_forward(x, p, num_heads, window_size):
    PH = jax.lax.Precision.HIGHEST
    B, C, H, W = x.shape
    NH, ws = num_heads, window_size
    ch = C // NH
    S = ws * ws
    Dh, Dw = p['Dh'], p['Dw']
    xd = jnp.einsum('uh,bchw,vw->bcuv', Dh, x, Dw, precision=PH)          # Dh X Dw^T
    xc = xd.transpose(0, 2, 3, 1)
    mu = xc.mean(-1, keepdims=True)
    var = ((xc - mu) ** 2).mean(-1, keepdims=True)
    xn = (xc - mu) / jnp.sqrt(var + 1e-5) * p['ln_w'] + p['ln_b']
    qkv = jnp.matmul(xn, p['w_qkv'], precision=PH)
    xp = jnp.pad(qkv, ((0, 0), (1, 1), (1, 1), (0, 0)))
    acc = jnp.zeros_like(qkv)
    for dy in range(3):
        for dx in range(3):
            acc = acc + xp[:, dy:dy + H, dx:dx + W, :] * p['w_dw'][dy * 3 + dx]
    qkv = acc
    pad_h, pad_w = (-H) % ws, (-W) % ws
    if pad_h or pad_w:
        qkv = jnp.pad(qkv, ((0, 0), (0, pad_h), (0, pad_w), (0, 0)), mode='reflect')
    Hx, Wx = H + pad_h, W + pad_w
    h1, w1 = Hx // ws, Wx // ws
    t = qkv.reshape(B, h1, ws, w1, ws, 3, NH, ch)
    t = t.transpose(5, 6, 0, 1, 3, 7, 2, 4).reshape(3, NH, B * h1 * w1, ch, S)
    q, k, v = t[0], t[1], t[2]
    gate = jax.nn.gelu(jnp.einsum('hncs,st->hnct', v, p['w_mlp'], precision=PH)
                       + p['b_mlp'], approximate=False)
    attn = jnp.einsum('hncs,hnds->hncd', q, k, precision=PH) * p['temperature'][:, None, None, None]
    attn = jax.nn.softmax(attn, axis=-1)
    out = jnp.einsum('hncd,hnds->hncs', attn, v, precision=PH) * gate
    o = out.reshape(NH, B, h1, w1, ch, ws, ws)
    o = o.transpose(1, 2, 5, 3, 6, 0, 4).reshape(B, Hx, Wx, C)[:, :H, :W, :]
    o = jnp.matmul(o, p['w_proj'], precision=PH) + p['b_proj']
    xd = xd + o.transpose(0, 3, 1, 2)
    return jnp.einsum('uh,bchw,vw->bcuv', Dh.T, xd, Dw.T, precision=PH)   # Dh^T X Dw


# ---------------------------------------- main ---------------------------------------------

if __name__ == "__main__":
    B, C, H, W = 2, 16, 16, 16
    num_heads, window_size = 2, 8

    key = jax.random.PRNGKey(0)
    k_x, k_p = jax.random.split(key)
    x = jax.random.normal(k_x, (B, C, H, W), jnp.float32)
    params = init_params(k_p, C, num_heads, window_size, H, W)

    out = freqlc_block_forward(x, params, num_heads=num_heads, window_size=window_size)
    out = jax.block_until_ready(out)
    assert out.shape == (B, C, H, W) and out.dtype == jnp.float32
    assert bool(jnp.all(jnp.isfinite(out)))

    # bf16 MXU operands with f32 accumulation + bf16 inter-kernel activations: compare against
    # the exact f32 reference with a bf16-appropriate (relative) tolerance.
    ref = reference_forward(x, params, num_heads, window_size)
    scale = float(jnp.max(jnp.abs(ref)))
    err = float(jnp.max(jnp.abs(out - ref)))
    assert err <= 2e-2 * scale + 1e-3, f"mismatch vs pure-JAX reference: {err} (scale {scale})"
    print("KERNEL_OK")
</pallas_src>

<mosaic_0001>
module attributes {stable_mosaic.version = 11 : i64} {
  func.func @_sep2d_kernel(%arg0: i32, %arg1: memref<16x16x16xf32, #tpu.memory_space<vmem>>, %arg2: memref<16x16xbf16, #tpu.memory_space<vmem>>, %arg3: memref<16x16xbf16, #tpu.memory_space<vmem>>, %arg4: memref<16x16x16xbf16, #tpu.memory_space<vmem>>) attributes {dimension_semantics = [#tpu.dimension_semantics<parallel>], iteration_bounds = array<i64: 2>, scalar_prefetch = 0 : i64, scratch_operands = 0 : i64, tpu.core_type = #tpu.core_type<tc>, window_params = [{transform_indices = @transform_0, window_bounds = array<i64: 16, 16, 16>}, {pipeline_mode = #tpu.pipeline_mode<synchronous>, transform_indices = @transform_1, window_bounds = array<i64: 16, 16>}, {pipeline_mode = #tpu.pipeline_mode<synchronous>, transform_indices = @transform_2, window_bounds = array<i64: 16, 16>}, {transform_indices = @transform_3, window_bounds = array<i64: 16, 16, 16>}]} {
    %c0 = arith.constant 0 : index
    %c0_0 = arith.constant 0 : index
    %c0_1 = arith.constant 0 : index
    %0 = vector.load %arg1[%c0, %c0_0, %c0_1] : memref<16x16x16xf32, #tpu.memory_space<vmem>>, vector<16x16x16xf32>
    %1 = arith.truncf %0 : vector<16x16x16xf32> to vector<16x16x16xbf16>
    %2 = vector.shape_cast %1 : vector<16x16x16xbf16> to vector<256x16xbf16>
    %c0_2 = arith.constant 0 : index
    %c0_3 = arith.constant 0 : index
    %3 = vector.load %arg2[%c0_2, %c0_3] : memref<16x16xbf16, #tpu.memory_space<vmem>>, vector<16x16xbf16>
    %cst = arith.constant dense<0.000000e+00> : vector<256x16xf32>
    %4 = tpu.matmul %2, %3, %cst {dimension_numbers = #tpu.dot_dimension_numbers<[1], [0], [0], [1], [0, 0, 1, 1], [], []>} : vector<256x16xbf16>, vector<16x16xbf16>, vector<256x16xf32> -> vector<256x16xf32>
    %5 = vector.shape_cast %4 : vector<256x16xf32> to vector<16x16x16xf32>
    %6 = arith.truncf %5 : vector<16x16x16xf32> to vector<16x16x16xbf16>
    %c0_4 = arith.constant 0 : index
    %c0_5 = arith.constant 0 : index
    %7 = vector.load %arg3[%c0_4, %c0_5] : memref<16x16xbf16, #tpu.memory_space<vmem>>, vector<16x16xbf16>
    %8 = vector.extract_strided_slice %6 {offsets = [0, 0, 0], sizes = [1, 16, 16], strides = [1, 1, 1]} : vector<16x16x16xbf16> to vector<1x16x16xbf16>
    %9 = vector.shape_cast %8 : vector<1x16x16xbf16> to vector<16x16xbf16>
    %cst_6 = arith.constant dense<0.000000e+00> : vector<16x16xf32>
    %10 = tpu.matmul %7, %9, %cst_6 {dimension_numbers = #tpu.dot_dimension_numbers<[1], [0], [0], [1], [0, 0, 1, 1], [], []>} : vector<16x16xbf16>, vector<16x16xbf16>, vector<16x16xf32> -> vector<16x16xf32>
    %11 = arith.truncf %10 : vector<16x16xf32> to vector<16x16xbf16>
    %c0_7 = arith.constant 0 : index
    %c0_8 = arith.constant 0 : index
    %c0_9 = arith.constant 0 : index
    %12 = vector.load %arg4[%c0_7, %c0_8, %c0_9] : memref<16x16x16xbf16, #tpu.memory_space<vmem>>, vector<1x16x16xbf16>
    %13 = vector.shape_cast %12 : vector<1x16x16xbf16> to vector<16x16xbf16>
    %14 = vector.shape_cast %11 : vector<16x16xbf16> to vector<1x16x16xbf16>
    tpu.vector_store %arg4[%c0_7, %c0_8, %c0_9], %14 {strides = array<i32>} : memref<16x16x16xbf16, #tpu.memory_space<vmem>>, vector<1x16x16xbf16>,
    %15 = vector.extract_strided_slice %6 {offsets = [1, 0, 0], sizes = [1, 16, 16], strides = [1, 1, 1]} : vector<16x16x16xbf16> to vector<1x16x16xbf16>
    %16 = vector.shape_cast %15 : vector<1x16x16xbf16> to vector<16x16xbf16>
    %cst_10 = arith.constant dense<0.000000e+00> : vector<16x16xf32>
    %17 = tpu.matmul %7, %16, %cst_10 {dimension_numbers = #tpu.dot_dimension_numbers<[1], [0], [0], [1], [0, 0, 1, 1], [], []>} : vector<16x16xbf16>, vector<16x16xbf16>, vector<16x16xf32> -> vector<16x16xf32>
    %18 = arith.truncf %17 : vector<16x16xf32> to vector<16x16xbf16>
    %c1 = arith.constant 1 : index
    %c0_11 = arith.constant 0 : index
    %c0_12 = arith.constant 0 : index
    %19 = vector.load %arg4[%c1, %c0_11, %c0_12] : memref<16x16x16xbf16, #tpu.memory_space<vmem>>, vector<1x16x16xbf16>
    %20 = vector.shape_cast %19 : vector<1x16x16xbf16> to vector<16x16xbf16>
    %21 = vector.shape_cast %18 : vector<16x16xbf16> to vector<1x16x16xbf16>
    tpu.vector_store %arg4[%c1, %c0_11, %c0_12], %21 {strides = array<i32>} : memref<16x16x16xbf16, #tpu.memory_space<vmem>>, vector<1x16x16xbf16>,
    %22 = vector.extract_strided_slice %6 {offsets = [2, 0, 0], sizes = [1, 16, 16], strides = [1, 1, 1]} : vector<16x16x16xbf16> to vector<1x16x16xbf16>
    %23 = vector.shape_cast %22 : vector<1x16x16xbf16> to vector<16x16xbf16>
    %cst_13 = arith.constant dense<0.000000e+00> : vector<16x16xf32>
    %24 = tpu.matmul %7, %23, %cst_13 {dimension_numbers = #tpu.dot_dimension_numbers<[1], [0], [0], [1], [0, 0, 1, 1], [], []>} : vector<16x16xbf16>, vector<16x16xbf16>, vector<16x16xf32> -> vector<16x16xf32>
    %25 = arith.truncf %24 : vector<16x16xf32> to vector<16x16xbf16>
    %c2 = arith.constant 2 : index
    %c0_14 = arith.constant 0 : index
    %c0_15 = arith.constant 0 : index
    %26 = vector.load %arg4[%c2, %c0_14, %c0_15] : memref<16x16x16xbf16, #tpu.memory_space<vmem>>, vector<1x16x16xbf16>
    %27 = vector.shape_cast %26 : vector<1x16x16xbf16> to vector<16x16xbf16>
    %28 = vector.shape_cast %25 : vector<16x16xbf16> to vector<1x16x16xbf16>
    tpu.vector_store %arg4[%c2, %c0_14, %c0_15], %28 {strides = array<i32>} : memref<16x16x16xbf16, #tpu.memory_space<vmem>>, vector<1x16x16xbf16>,
    %29 = vector.extract_strided_slice %6 {offsets = [3, 0, 0], sizes = [1, 16, 16], strides = [1, 1, 1]} : vector<16x16x16xbf16> to vector<1x16x16xbf16>
    %30 = vector.shape_cast %29 : vector<1x16x16xbf16> to vector<16x16xbf16>
    %cst_16 = arith.constant dense<0.000000e+00> : vector<16x16xf32>
    %31 = tpu.matmul %7, %30, %cst_16 {dimension_numbers = #tpu.dot_dimension_numbers<[1], [0], [0], [1], [0, 0, 1, 1], [], []>} : vector<16x16xbf16>, vector<16x16xbf16>, vector<16x16xf32> -> vector<16x16xf32>
    %32 = arith.truncf %31 : vector<16x16xf32> to vector<16x16xbf16>
    %c3 = arith.constant 3 : index
    %c0_17 = arith.constant 0 : index
    %c0_18 = arith.constant 0 : index
    %33 = vector.load %arg4[%c3, %c0_17, %c0_18] : memref<16x16x16xbf16, #tpu.memory_space<vmem>>, vector<1x16x16xbf16>
    %34 = vector.shape_cast %33 : vector<1x16x16xbf16> to vector<16x16xbf16>
    %35 = vector.shape_cast %32 : vector<16x16xbf16> to vector<1x16x16xbf16>
    tpu.vector_store %arg4[%c3, %c0_17, %c0_18], %35 {strides = array<i32>} : memref<16x16x16xbf16, #tpu.memory_space<vmem>>, vector<1x16x16xbf16>,
    %36 = vector.extract_strided_slice %6 {offsets = [4, 0, 0], sizes = [1, 16, 16], strides = [1, 1, 1]} : vector<16x16x16xbf16> to vector<1x16x16xbf16>
    %37 = vector.shape_cast %36 : vector<1x16x16xbf16> to vector<16x16xbf16>
    %cst_19 = arith.constant dense<0.000000e+00> : vector<16x16xf32>
    %38 = tpu.matmul %7, %37, %cst_19 {dimension_numbers = #tpu.dot_dimension_numbers<[1], [0], [0], [1], [0, 0, 1, 1], [], []>} : vector<16x16xbf16>, vector<16x16xbf16>, vector<16x16xf32> -> vector<16x16xf32>
    %39 = arith.truncf %38 : vector<16x16xf32> to vector<16x16xbf16>
    %c4 = arith.constant 4 : index
    %c0_20 = arith.constant 0 : index
    %c0_21 = arith.constant 0 : index
    %40 = vector.load %arg4[%c4, %c0_20, %c0_21] : memref<16x16x16xbf16, #tpu.memory_space<vmem>>, vector<1x16x16xbf16>
    %41 = vector.shape_cast %40 : vector<1x16x16xbf16> to vector<16x16xbf16>
    %42 = vector.shape_cast %39 : vector<16x16xbf16> to vector<1x16x16xbf16>
    tpu.vector_store %arg4[%c4, %c0_20, %c0_21], %42 {strides = array<i32>} : memref<16x16x16xbf16, #tpu.memory_space<vmem>>, vector<1x16x16xbf16>,
    %43 = vector.extract_strided_slice %6 {offsets = [5, 0, 0], sizes = [1, 16, 16], strides = [1, 1, 1]} : vector<16x16x16xbf16> to vector<1x16x16xbf16>
    %44 = vector.shape_cast %43 : vector<1x16x16xbf16> to vector<16x16xbf16>
    %cst_22 = arith.constant dense<0.000000e+00> : vector<16x16xf32>
    %45 = tpu.matmul %7, %44, %cst_22 {dimension_numbers = #tpu.dot_dimension_numbers<[1], [0], [0], [1], [0, 0, 1, 1], [], []>} : vector<16x16xbf16>, vector<16x16xbf16>, vector<16x16xf32> -> vector<16x16xf32>
    %46 = arith.truncf %45 : vector<16x16xf32> to vector<16x16xbf16>
    %c5 = arith.constant 5 : index
    %c0_23 = arith.constant 0 : index
    %c0_24 = arith.constant 0 : index
    %47 = vector.load %arg4[%c5, %c0_23, %c0_24] : memref<16x16x16xbf16, #tpu.memory_space<vmem>>, vector<1x16x16xbf16>
    %48 = vector.shape_cast %47 : vector<1x16x16xbf16> to vector<16x16xbf16>
    %49 = vector.shape_cast %46 : vector<16x16xbf16> to vector<1x16x16xbf16>
    tpu.vector_store %arg4[%c5, %c0_23, %c0_24], %49 {strides = array<i32>} : memref<16x16x16xbf16, #tpu.memory_space<vmem>>, vector<1x16x16xbf16>,
    %50 = vector.extract_strided_slice %6 {offsets = [6, 0, 0], sizes = [1, 16, 16], strides = [1, 1, 1]} : vector<16x16x16xbf16> to vector<1x16x16xbf16>
    %51 = vector.shape_cast %50 : vector<1x16x16xbf16> to vector<16x16xbf16>
    %cst_25 = arith.constant dense<0.000000e+00> : vector<16x16xf32>
    %52 = tpu.matmul %7, %51, %cst_25 {dimension_numbers = #tpu.dot_dimension_numbers<[1], [0], [0], [1], [0, 0, 1, 1], [], []>} : vector<16x16xbf16>, vector<16x16xbf16>, vector<16x16xf32> -> vector<16x16xf32>
    %53 = arith.truncf %52 : vector<16x16xf32> to vector<16x16xbf16>
    %c6 = arith.constant 6 : index
    %c0_26 = arith.constant 0 : index
    %c0_27 = arith.constant 0 : index
    %54 = vector.load %arg4[%c6, %c0_26, %c0_27] : memref<16x16x16xbf16, #tpu.memory_space<vmem>>, vector<1x16x16xbf16>
    %55 = vector.shape_cast %54 : vector<1x16x16xbf16> to vector<16x16xbf16>
    %56 = vector.shape_cast %53 : vector<16x16xbf16> to vector<1x16x16xbf16>
    tpu.vector_store %arg4[%c6, %c0_26, %c0_27], %56 {strides = array<i32>} : memref<16x16x16xbf16, #tpu.memory_space<vmem>>, vector<1x16x16xbf16>,
    %57 = vector.extract_strided_slice %6 {offsets = [7, 0, 0], sizes = [1, 16, 16], strides = [1, 1, 1]} : vector<16x16x16xbf16> to vector<1x16x16xbf16>
    %58 = vector.shape_cast %57 : vector<1x16x16xbf16> to vector<16x16xbf16>
    %cst_28 = arith.constant dense<0.000000e+00> : vector<16x16xf32>
    %59 = tpu.matmul %7, %58, %cst_28 {dimension_numbers = #tpu.dot_dimension_numbers<[1], [0], [0], [1], [0, 0, 1, 1], [], []>} : vector<16x16xbf16>, vector<16x16xbf16>, vector<16x16xf32> -> vector<16x16xf32>
    %60 = arith.truncf %59 : vector<16x16xf32> to vector<16x16xbf16>
    %c7 = arith.constant 7 : index
    %c0_29 = arith.constant 0 : index
    %c0_30 = arith.constant 0 : index
    %61 = vector.load %arg4[%c7, %c0_29, %c0_30] : memref<16x16x16xbf16, #tpu.memory_space<vmem>>, vector<1x16x16xbf16>
    %62 = vector.shape_cast %61 : vector<1x16x16xbf16> to vector<16x16xbf16>
    %63 = vector.shape_cast %60 : vector<16x16xbf16> to vector<1x16x16xbf16>
    tpu.vector_store %arg4[%c7, %c0_29, %c0_30], %63 {strides = array<i32>} : memref<16x16x16xbf16, #tpu.memory_space<vmem>>, vector<1x16x16xbf16>,
    %64 = vector.extract_strided_slice %6 {offsets = [8, 0, 0], sizes = [1, 16, 16], strides = [1, 1, 1]} : vector<16x16x16xbf16> to vector<1x16x16xbf16>
    %65 = vector.shape_cast %64 : vector<1x16x16xbf16> to vector<16x16xbf16>
    %cst_31 = arith.constant dense<0.000000e+00> : vector<16x16xf32>
    %66 = tpu.matmul %7, %65, %cst_31 {dimension_numbers = #tpu.dot_dimension_numbers<[1], [0], [0], [1], [0, 0, 1, 1], [], []>} : vector<16x16xbf16>, vector<16x16xbf16>, vector<16x16xf32> -> vector<16x16xf32>
    %67 = arith.truncf %66 : vector<16x16xf32> to vector<16x16xbf16>
    %c8 = arith.constant 8 : index
    %c0_32 = arith.constant 0 : index
    %c0_33 = arith.constant 0 : index
    %68 = vector.load %arg4[%c8, %c0_32, %c0_33] : memref<16x16x16xbf16, #tpu.memory_space<vmem>>, vector<1x16x16xbf16>
    %69 = vector.shape_cast %68 : vector<1x16x16xbf16> to vector<16x16xbf16>
    %70 = vector.shape_cast %67 : vector<16x16xbf16> to vector<1x16x16xbf16>
    tpu.vector_store %arg4[%c8, %c0_32, %c0_33], %70 {strides = array<i32>} : memref<16x16x16xbf16, #tpu.memory_space<vmem>>, vector<1x16x16xbf16>,
    %71 = vector.extract_strided_slice %6 {offsets = [9, 0, 0], sizes = [1, 16, 16], strides = [1, 1, 1]} : vector<16x16x16xbf16> to vector<1x16x16xbf16>
    %72 = vector.shape_cast %71 : vector<1x16x16xbf16> to vector<16x16xbf16>
    %cst_34 = arith.constant dense<0.000000e+00> : vector<16x16xf32>
    %73 = tpu.matmul %7, %72, %cst_34 {dimension_numbers = #tpu.dot_dimension_numbers<[1], [0], [0], [1], [0, 0, 1, 1], [], []>} : vector<16x16xbf16>, vector<16x16xbf16>, vector<16x16xf32> -> vector<16x16xf32>
    %74 = arith.truncf %73 : vector<16x16xf32> to vector<16x16xbf16>
    %c9 = arith.constant 9 : index
    %c0_35 = arith.constant 0 : index
    %c0_36 = arith.constant 0 : index
    %75 = vector.load %arg4[%c9, %c0_35, %c0_36] : memref<16x16x16xbf16, #tpu.memory_space<vmem>>, vector<1x16x16xbf16>
    %76 = vector.shape_cast %75 : vector<1x16x16xbf16> to vector<16x16xbf16>
    %77 = vector.shape_cast %74 : vector<16x16xbf16> to vector<1x16x16xbf16>
    tpu.vector_store %arg4[%c9, %c0_35, %c0_36], %77 {strides = array<i32>} : memref<16x16x16xbf16, #tpu.memory_space<vmem>>, vector<1x16x16xbf16>,
    %78 = vector.extract_strided_slice %6 {offsets = [10, 0, 0], sizes = [1, 16, 16], strides = [1, 1, 1]} : vector<16x16x16xbf16> to vector<1x16x16xbf16>
    %79 = vector.shape_cast %78 : vector<1x16x16xbf16> to vector<16x16xbf16>
    %cst_37 = arith.constant dense<0.000000e+00> : vector<16x16xf32>
    %80 = tpu.matmul %7, %79, %cst_37 {dimension_numbers = #tpu.dot_dimension_numbers<[1], [0], [0], [1], [0, 0, 1, 1], [], []>} : vector<16x16xbf16>, vector<16x16xbf16>, vector<16x16xf32> -> vector<16x16xf32>
    %81 = arith.truncf %80 : vector<16x16xf32> to vector<16x16xbf16>
    %c10 = arith.constant 10 : index
    %c0_38 = arith.constant 0 : index
    %c0_39 = arith.constant 0 : index
    %82 = vector.load %arg4[%c10, %c0_38, %c0_39] : memref<16x16x16xbf16, #tpu.memory_space<vmem>>, vector<1x16x16xbf16>
    %83 = vector.shape_cast %82 : vector<1x16x16xbf16> to vector<16x16xbf16>
    %84 = vector.shape_cast %81 : vector<16x16xbf16> to vector<1x16x16xbf16>
    tpu.vector_store %arg4[%c10, %c0_38, %c0_39], %84 {strides = array<i32>} : memref<16x16x16xbf16, #tpu.memory_space<vmem>>, vector<1x16x16xbf16>,
    %85 = vector.extract_strided_slice %6 {offsets = [11, 0, 0], sizes = [1, 16, 16], strides = [1, 1, 1]} : vector<16x16x16xbf16> to vector<1x16x16xbf16>
    %86 = vector.shape_cast %85 : vector<1x16x16xbf16> to vector<16x16xbf16>
    %cst_40 = arith.constant dense<0.000000e+00> : vector<16x16xf32>
    %87 = tpu.matmul %7, %86, %cst_40 {dimension_numbers = #tpu.dot_dimension_numbers<[1], [0], [0], [1], [0, 0, 1, 1], [], []>} : vector<16x16xbf16>, vector<16x16xbf16>, vector<16x16xf32> -> vector<16x16xf32>
    %88 = arith.truncf %87 : vector<16x16xf32> to vector<16x16xbf16>
    %c11 = arith.constant 11 : index
    %c0_41 = arith.constant 0 : index
    %c0_42 = arith.constant 0 : index
    %89 = vector.load %arg4[%c11, %c0_41, %c0_42] : memref<16x16x16xbf16, #tpu.memory_space<vmem>>, vector<1x16x16xbf16>
    %90 = vector.shape_cast %89 : vector<1x16x16xbf16> to vector<16x16xbf16>
    %91 = vector.shape_cast %88 : vector<16x16xbf16> to vector<1x16x16xbf16>
    tpu.vector_store %arg4[%c11, %c0_41, %c0_42], %91 {strides = array<i32>} : memref<16x16x16xbf16, #tpu.memory_space<vmem>>, vector<1x16x16xbf16>,
    %92 = vector.extract_strided_slice %6 {offsets = [12, 0, 0], sizes = [1, 16, 16], strides = [1, 1, 1]} : vector<16x16x16xbf16> to vector<1x16x16xbf16>
    %93 = vector.shape_cast %92 : vector<1x16x16xbf16> to vector<16x16xbf16>
    %cst_43 = arith.constant dense<0.000000e+00> : vector<16x16xf32>
    %94 = tpu.matmul %7, %93, %cst_43 {dimension_numbers = #tpu.dot_dimension_numbers<[1], [0], [0], [1], [0, 0, 1, 1], [], []>} : vector<16x16xbf16>, vector<16x16xbf16>, vector<16x16xf32> -> vector<16x16xf32>
    %95 = arith.truncf %94 : vector<16x16xf32> to vector<16x16xbf16>
    %c12 = arith.constant 12 : index
    %c0_44 = arith.constant 0 : index
    %c0_45 = arith.constant 0 : index
    %96 = vector.load %arg4[%c12, %c0_44, %c0_45] : memref<16x16x16xbf16, #tpu.memory_space<vmem>>, vector<1x16x16xbf16>
    %97 = vector.shape_cast %96 : vector<1x16x16xbf16> to vector<16x16xbf16>
    %98 = vector.shape_cast %95 : vector<16x16xbf16> to vector<1x16x16xbf16>
    tpu.vector_store %arg4[%c12, %c0_44, %c0_45], %98 {strides = array<i32>} : memref<16x16x16xbf16, #tpu.memory_space<vmem>>, vector<1x16x16xbf16>,
    %99 = vector.extract_strided_slice %6 {offsets = [13, 0, 0], sizes = [1, 16, 16], strides = [1, 1, 1]} : vector<16x16x16xbf16> to vector<1x16x16xbf16>
    %100 = vector.shape_cast %99 : vector<1x16x16xbf16> to vector<16x16xbf16>
    %cst_46 = arith.constant dense<0.000000e+00> : vector<16x16xf32>
    %101 = tpu.matmul %7, %100, %cst_46 {dimension_numbers = #tpu.dot_dimension_numbers<[1], [0], [0], [1], [0, 0, 1, 1], [], []>} : vector<16x16xbf16>, vector<16x16xbf16>, vector<16x16xf32> -> vector<16x16xf32>
    %102 = arith.truncf %101 : vector<16x16xf32> to vector<16x16xbf16>
    %c13 = arith.constant 13 : index
    %c0_47 = arith.constant 0 : index
    %c0_48 = arith.constant 0 : index
    %103 = vector.load %arg4[%c13, %c0_47, %c0_48] : memref<16x16x16xbf16, #tpu.memory_space<vmem>>, vector<1x16x16xbf16>
    %104 = vector.shape_cast %103 : vector<1x16x16xbf16> to vector<16x16xbf16>
    %105 = vector.shape_cast %102 : vector<16x16xbf16> to vector<1x16x16xbf16>
    tpu.vector_store %arg4[%c13, %c0_47, %c0_48], %105 {strides = array<i32>} : memref<16x16x16xbf16, #tpu.memory_space<vmem>>, vector<1x16x16xbf16>,
    %106 = vector.extract_strided_slice %6 {offsets = [14, 0, 0], sizes = [1, 16, 16], strides = [1, 1, 1]} : vector<16x16x16xbf16> to vector<1x16x16xbf16>
    %107 = vector.shape_cast %106 : vector<1x16x16xbf16> to vector<16x16xbf16>
    %cst_49 = arith.constant dense<0.000000e+00> : vector<16x16xf32>
    %108 = tpu.matmul %7, %107, %cst_49 {dimension_numbers = #tpu.dot_dimension_numbers<[1], [0], [0], [1], [0, 0, 1, 1], [], []>} : vector<16x16xbf16>, vector<16x16xbf16>, vector<16x16xf32> -> vector<16x16xf32>
    %109 = arith.truncf %108 : vector<16x16xf32> to vector<16x16xbf16>
    %c14 = arith.constant 14 : index
    %c0_50 = arith.constant 0 : index
    %c0_51 = arith.constant 0 : index
    %110 = vector.load %arg4[%c14, %c0_50, %c0_51] : memref<16x16x16xbf16, #tpu.memory_space<vmem>>, vector<1x16x16xbf16>
    %111 = vector.shape_cast %110 : vector<1x16x16xbf16> to vector<16x16xbf16>
    %112 = vector.shape_cast %109 : vector<16x16xbf16> to vector<1x16x16xbf16>
    tpu.vector_store %arg4[%c14, %c0_50, %c0_51], %112 {strides = array<i32>} : memref<16x16x16xbf16, #tpu.memory_space<vmem>>, vector<1x16x16xbf16>,
    %113 = vector.extract_strided_slice %6 {offsets = [15, 0, 0], sizes = [1, 16, 16], strides = [1, 1, 1]} : vector<16x16x16xbf16> to vector<1x16x16xbf16>
    %114 = vector.shape_cast %113 : vector<1x16x16xbf16> to vector<16x16xbf16>
    %cst_52 = arith.constant dense<0.000000e+00> : vector<16x16xf32>
    %115 = tpu.matmul %7, %114, %cst_52 {dimension_numbers = #tpu.dot_dimension_numbers<[1], [0], [0], [1], [0, 0, 1, 1], [], []>} : vector<16x16xbf16>, vector<16x16xbf16>, vector<16x16xf32> -> vector<16x16xf32>
    %116 = arith.truncf %115 : vector<16x16xf32> to vector<16x16xbf16>
    %c15 = arith.constant 15 : index
    %c0_53 = arith.constant 0 : index
    %c0_54 = arith.constant 0 : index
    %117 = vector.load %arg4[%c15, %c0_53, %c0_54] : memref<16x16x16xbf16, #tpu.memory_space<vmem>>, vector<1x16x16xbf16>
    %118 = vector.shape_cast %117 : vector<1x16x16xbf16> to vector<16x16xbf16>
    %119 = vector.shape_cast %116 : vector<16x16xbf16> to vector<1x16x16xbf16>
    tpu.vector_store %arg4[%c15, %c0_53, %c0_54], %119 {strides = array<i32>} : memref<16x16x16xbf16, #tpu.memory_space<vmem>>, vector<1x16x16xbf16>,
    return
  }
  func.func @transform_0(%arg0: i32) -> (i32, i32, i32) {
    %c0_i32 = arith.constant 0 : i32
    %c0_i32_0 = arith.constant 0 : i32
    %c0_i32_1 = arith.constant 0 : i32
    return %arg0, %c0_i32, %c0_i32_0 : i32, i32, i32
  }
  func.func @transform_1(%arg0: i32) -> (i32, i32) {
    %c0_i32 = arith.constant 0 : i32
    %c0_i32_0 = arith.constant 0 : i32
    %c0_i32_1 = arith.constant 0 : i32
    return %c0_i32, %c0_i32_0 : i32, i32
  }
  func.func @transform_2(%arg0: i32) -> (i32, i32) {
    %c0_i32 = arith.constant 0 : i32
    %c0_i32_0 = arith.constant 0 : i32
    %c0_i32_1 = arith.constant 0 : i32
    return %c0_i32, %c0_i32_0 : i32, i32
  }
  func.func @transform_3(%arg0: i32) -> (i32, i32, i32) {
    %c0_i32 = arith.constant 0 : i32
    %c0_i32_0 = arith.constant 0 : i32
    %c0_i32_1 = arith.constant 0 : i32
    return %arg0, %c0_i32, %c0_i32_0 : i32, i32, i32
  }
}

module attributes {stable_mosaic.version = 11 : i64} {
  func.func @_dwconv3x3_kernel(%arg0: i32, %arg1: i32, %arg2: memref<1x16x16x48xbf16, #tpu.memory_space<vmem>>, %arg3: memref<9x48xf32, #tpu.memory_space<vmem>>, %arg4: memref<1x16x16x48xbf16, #tpu.memory_space<vmem>>, %arg5: memref<18x18x48xf32, #tpu.memory_space<vmem>>) attributes {dimension_semantics = [#tpu.dimension_semantics<parallel>, #tpu.dimension_semantics<parallel>], iteration_bounds = array<i64: 2, 1>, scalar_prefetch = 0 : i64, scratch_operands = 1 : i64, tpu.core_type = #tpu.core_type<tc>, window_params = [{transform_indices = @transform_0, window_bounds = array<i64: 1, 16, 16, 48>}, {transform_indices = @transform_1, window_bounds = array<i64: 9, 48>}, {transform_indices = @transform_2, window_bounds = array<i64: 1, 16, 16, 48>}]} {
    %cst = arith.constant 0.000000e+00 : f32
    %0 = vector.broadcast %cst : f32 to vector<1x18x48xf32>
    %c0 = arith.constant 0 : index
    %c0_0 = arith.constant 0 : index
    %c0_1 = arith.constant 0 : index
    %1 = vector.load %arg5[%c0, %c0_0, %c0_1] : memref<18x18x48xf32, #tpu.memory_space<vmem>>, vector<1x18x48xf32>
    tpu.vector_store %arg5[%c0, %c0_0, %c0_1], %0 {strides = array<i32>} : memref<18x18x48xf32, #tpu.memory_space<vmem>>, vector<1x18x48xf32>,
    %cst_2 = arith.constant 0.000000e+00 : f32
    %2 = vector.broadcast %cst_2 : f32 to vector<1x18x48xf32>
    %c17 = arith.constant 17 : index
    %c0_3 = arith.constant 0 : index
    %c0_4 = arith.constant 0 : index
    %3 = vector.load %arg5[%c17, %c0_3, %c0_4] : memref<18x18x48xf32, #tpu.memory_space<vmem>>, vector<1x18x48xf32>
    tpu.vector_store %arg5[%c17, %c0_3, %c0_4], %2 {strides = array<i32>} : memref<18x18x48xf32, #tpu.memory_space<vmem>>, vector<1x18x48xf32>,
    %cst_5 = arith.constant 0.000000e+00 : f32
    %4 = vector.broadcast %cst_5 : f32 to vector<16x1x48xf32>
    %c1 = arith.constant 1 : index
    %c0_6 = arith.constant 0 : index
    %c0_7 = arith.constant 0 : index
    %5 = vector.load %arg5[%c1, %c0_6, %c0_7] : memref<18x18x48xf32, #tpu.memory_space<vmem>>, vector<16x1x48xf32>
    tpu.vector_store %arg5[%c1, %c0_6, %c0_7], %4 {strides = array<i32>} : memref<18x18x48xf32, #tpu.memory_space<vmem>>, vector<16x1x48xf32>,
    %cst_8 = arith.constant 0.000000e+00 : f32
    %6 = vector.broadcast %cst_8 : f32 to vector<16x1x48xf32>
    %c1_9 = arith.constant 1 : index
    %c17_10 = arith.constant 17 : index
    %c0_11 = arith.constant 0 : index
    %7 = vector.load %arg5[%c1_9, %c17_10, %c0_11] : memref<18x18x48xf32, #tpu.memory_space<vmem>>, vector<16x1x48xf32>
    tpu.vector_store %arg5[%c1_9, %c17_10, %c0_11], %6 {strides = array<i32>} : memref<18x18x48xf32, #tpu.memory_space<vmem>>, vector<16x1x48xf32>,
    %c0_12 = arith.constant 0 : index
    %c0_13 = arith.constant 0 : index
    %c0_14 = arith.constant 0 : index
    %c0_15 = arith.constant 0 : index
    %8 = vector.load %arg2[%c0_12, %c0_13, %c0_14, %c0_15] : memref<1x16x16x48xbf16, #tpu.memory_space<vmem>>, vector<1x16x16x48xbf16>
    %9 = vector.shape_cast %8 : vector<1x16x16x48xbf16> to vector<16x16x48xbf16>
    %10 = arith.extf %9 : vector<16x16x48xbf16> to vector<16x16x48xf32>
    %c1_16 = arith.constant 1 : index
    %c1_17 = arith.constant 1 : index
    %c0_18 = arith.constant 0 : index
    %11 = vector.load %arg5[%c1_16, %c1_17, %c0_18] : memref<18x18x48xf32, #tpu.memory_space<vmem>>, vector<16x16x48xf32>
    tpu.vector_store %arg5[%c1_16, %c1_17, %c0_18], %10 {strides = array<i32>} : memref<18x18x48xf32, #tpu.memory_space<vmem>>, vector<16x16x48xf32>,
    %cst_19 = arith.constant 0.000000e+00 : f32
    %12 = vector.broadcast %cst_19 : f32 to vector<16x16x48xf32>
    %c0_20 = arith.constant 0 : index
    %c0_21 = arith.constant 0 : index
    %13 = vector.load %arg3[%c0_20, %c0_21] : memref<9x48xf32, #tpu.memory_space<vmem>>, vector<1x48xf32>
    %14 = vector.shape_cast %13 : vector<1x48xf32> to vector<48xf32>
    %15 = vector.shape_cast %14 : vector<48xf32> to vector<1x1x48xf32>
    %c0_22 = arith.constant 0 : index
    %c0_23 = arith.constant 0 : index
    %c0_24 = arith.constant 0 : index
    %16 = vector.load %arg5[%c0_22, %c0_23, %c0_24] : memref<18x18x48xf32, #tpu.memory_space<vmem>>, vector<16x16x48xf32>
    %17 = vector.broadcast %15 : vector<1x1x48xf32> to vector<16x16x48xf32>
    %18 = arith.mulf %16, %17 : vector<16x16x48xf32>
    %19 = arith.addf %12, %18 : vector<16x16x48xf32>
    %c1_25 = arith.constant 1 : index
    %c0_26 = arith.constant 0 : index
    %20 = vector.load %arg3[%c1_25, %c0_26] : memref<9x48xf32, #tpu.memory_space<vmem>>, vector<1x48xf32>
    %21 = vector.shape_cast %20 : vector<1x48xf32> to vector<48xf32>
    %22 = vector.shape_cast %21 : vector<48xf32> to vector<1x1x48xf32>
    %c0_27 = arith.constant 0 : index
    %c1_28 = arith.constant 1 : index
    %c0_29 = arith.constant 0 : index
    %23 = vector.load %arg5[%c0_27, %c1_28, %c0_29] : memref<18x18x48xf32, #tpu.memory_space<vmem>>, vector<16x16x48xf32>
    %24 = vector.broadcast %22 : vector<1x1x48xf32> to vector<16x16x48xf32>
    %25 = arith.mulf %23, %24 : vector<16x16x48xf32>
    %26 = arith.addf %19, %25 : vector<16x16x48xf32>
    %c2 = arith.constant 2 : index
    %c0_30 = arith.constant 0 : index
    %27 = vector.load %arg3[%c2, %c0_30] : memref<9x48xf32, #tpu.memory_space<vmem>>, vector<1x48xf32>
    %28 = vector.shape_cast %27 : vector<1x48xf32> to vector<48xf32>
    %29 = vector.shape_cast %28 : vector<48xf32> to vector<1x1x48xf32>
    %c0_31 = arith.constant 0 : index
    %c2_32 = arith.constant 2 : index
    %c0_33 = arith.constant 0 : index
    %30 = vector.load %arg5[%c0_31, %c2_32, %c0_33] : memref<18x18x48xf32, #tpu.memory_space<vmem>>, vector<16x16x48xf32>
    %31 = vector.broadcast %29 : vector<1x1x48xf32> to vector<16x16x48xf32>
    %32 = arith.mulf %30, %31 : vector<16x16x48xf32>
    %33 = arith.addf %26, %32 : vector<16x16x48xf32>
    %c3 = arith.constant 3 : index
    %c0_34 = arith.constant 0 : index
    %34 = vector.load %arg3[%c3, %c0_34] : memref<9x48xf32, #tpu.memory_space<vmem>>, vector<1x48xf32>
    %35 = vector.shape_cast %34 : vector<1x48xf32> to vector<48xf32>
    %36 = vector.shape_cast %35 : vector<48xf32> to vector<1x1x48xf32>
    %c1_35 = arith.constant 1 : index
    %c0_36 = arith.constant 0 : index
    %c0_37 = arith.constant 0 : index
    %37 = vector.load %arg5[%c1_35, %c0_36, %c0_37] : memref<18x18x48xf32, #tpu.memory_space<vmem>>, vector<16x16x48xf32>
    %38 = vector.broadcast %36 : vector<1x1x48xf32> to vector<16x16x48xf32>
    %39 = arith.mulf %37, %38 : vector<16x16x48xf32>
    %40 = arith.addf %33, %39 : vector<16x16x48xf32>
    %c4 = arith.constant 4 : index
    %c0_38 = arith.constant 0 : index
    %41 = vector.load %arg3[%c4, %c0_38] : memref<9x48xf32, #tpu.memory_space<vmem>>, vector<1x48xf32>
    %42 = vector.shape_cast %41 : vector<1x48xf32> to vector<48xf32>
    %43 = vector.shape_cast %42 : vector<48xf32> to vector<1x1x48xf32>
    %c1_39 = arith.constant 1 : index
    %c1_40 = arith.constant 1 : index
    %c0_41 = arith.constant 0 : index
    %44 = vector.load %arg5[%c1_39, %c1_40, %c0_41] : memref<18x18x48xf32, #tpu.memory_space<vmem>>, vector<16x16x48xf32>
    %45 = vector.broadcast %43 : vector<1x1x48xf32> to vector<16x16x48xf32>
    %46 = arith.mulf %44, %45 : vector<16x16x48xf32>
    %47 = arith.addf %40, %46 : vector<16x16x48xf32>
    %c5 = arith.constant 5 : index
    %c0_42 = arith.constant 0 : index
    %48 = vector.load %arg3[%c5, %c0_42] : memref<9x48xf32, #tpu.memory_space<vmem>>, vector<1x48xf32>
    %49 = vector.shape_cast %48 : vector<1x48xf32> to vector<48xf32>
    %50 = vector.shape_cast %49 : vector<48xf32> to vector<1x1x48xf32>
    %c1_43 = arith.constant 1 : index
    %c2_44 = arith.constant 2 : index
    %c0_45 = arith.constant 0 : index
    %51 = vector.load %arg5[%c1_43, %c2_44, %c0_45] : memref<18x18x48xf32, #tpu.memory_space<vmem>>, vector<16x16x48xf32>
    %52 = vector.broadcast %50 : vector<1x1x48xf32> to vector<16x16x48xf32>
    %53 = arith.mulf %51, %52 : vector<16x16x48xf32>
    %54 = arith.addf %47, %53 : vector<16x16x48xf32>
    %c6 = arith.constant 6 : index
    %c0_46 = arith.constant 0 : index
    %55 = vector.load %arg3[%c6, %c0_46] : memref<9x48xf32, #tpu.memory_space<vmem>>, vector<1x48xf32>
    %56 = vector.shape_cast %55 : vector<1x48xf32> to vector<48xf32>
    %57 = vector.shape_cast %56 : vector<48xf32> to vector<1x1x48xf32>
    %c2_47 = arith.constant 2 : index
    %c0_48 = arith.constant 0 : index
    %c0_49 = arith.constant 0 : index
    %58 = vector.load %arg5[%c2_47, %c0_48, %c0_49] : memref<18x18x48xf32, #tpu.memory_space<vmem>>, vector<16x16x48xf32>
    %59 = vector.broadcast %57 : vector<1x1x48xf32> to vector<16x16x48xf32>
    %60 = arith.mulf %58, %59 : vector<16x16x48xf32>
    %61 = arith.addf %54, %60 : vector<16x16x48xf32>
    %c7 = arith.constant 7 : index
    %c0_50 = arith.constant 0 : index
    %62 = vector.load %arg3[%c7, %c0_50] : memref<9x48xf32, #tpu.memory_space<vmem>>, vector<1x48xf32>
    %63 = vector.shape_cast %62 : vector<1x48xf32> to vector<48xf32>
    %64 = vector.shape_cast %63 : vector<48xf32> to vector<1x1x48xf32>
    %c2_51 = arith.constant 2 : index
    %c1_52 = arith.constant 1 : index
    %c0_53 = arith.constant 0 : index
    %65 = vector.load %arg5[%c2_51, %c1_52, %c0_53] : memref<18x18x48xf32, #tpu.memory_space<vmem>>, vector<16x16x48xf32>
    %66 = vector.broadcast %64 : vector<1x1x48xf32> to vector<16x16x48xf32>
    %67 = arith.mulf %65, %66 : vector<16x16x48xf32>
    %68 = arith.addf %61, %67 : vector<16x16x48xf32>
    %c8 = arith.constant 8 : index
    %c0_54 = arith.constant 0 : index
    %69 = vector.load %arg3[%c8, %c0_54] : memref<9x48xf32, #tpu.memory_space<vmem>>, vector<1x48xf32>
    %70 = vector.shape_cast %69 : vector<1x48xf32> to vector<48xf32>
    %71 = vector.shape_cast %70 : vector<48xf32> to vector<1x1x48xf32>
    %c2_55 = arith.constant 2 : index
    %c2_56 = arith.constant 2 : index
    %c0_57 = arith.constant 0 : index
    %72 = vector.load %arg5[%c2_55, %c2_56, %c0_57] : memref<18x18x48xf32, #tpu.memory_space<vmem>>, vector<16x16x48xf32>
    %73 = vector.broadcast %71 : vector<1x1x48xf32> to vector<16x16x48xf32>
    %74 = arith.mulf %72, %73 : vector<16x16x48xf32>
    %75 = arith.addf %68, %74 : vector<16x16x48xf32>
    %76 = arith.truncf %75 : vector<16x16x48xf32> to vector<16x16x48xbf16>
    %c0_58 = arith.constant 0 : index
    %c0_59 = arith.constant 0 : index
    %c0_60 = arith.constant 0 : index
    %c0_61 = arith.constant 0 : index
    %77 = vector.load %arg4[%c0_58, %c0_59, %c0_60, %c0_61] : memref<1x16x16x48xbf16, #tpu.memory_space<vmem>>, vector<1x16x16x48xbf16>
    %78 = vector.shape_cast %77 : vector<1x16x16x48xbf16> to vector<16x16x48xbf16>
    %79 = vector.shape_cast %76 : vector<16x16x48xbf16> to vector<1x16x16x48xbf16>
    tpu.vector_store %arg4[%c0_58, %c0_59, %c0_60, %c0_61], %79 {strides = array<i32>} : memref<1x16x16x48xbf16, #tpu.memory_space<vmem>>, vector<1x16x16x48xbf16>,
    return
  }
  func.func @transform_0(%arg0: i32, %arg1: i32) -> (i32, i32, i32, i32) {
    %c0_i32 = arith.constant 0 : i32
    %c0_i32_0 = arith.constant 0 : i32
    %c0_i32_1 = arith.constant 0 : i32
    return %arg0, %c0_i32, %c0_i32_0, %arg1 : i32, i32, i32, i32
  }
  func.func @transform_1(%arg0: i32, %arg1: i32) -> (i32, i32) {
    %c0_i32 = arith.constant 0 : i32
    %c0_i32_0 = arith.constant 0 : i32
    return %c0_i32, %arg1 : i32, i32
  }
  func.func @transform_2(%arg0: i32, %arg1: i32) -> (i32, i32, i32, i32) {
    %c0_i32 = arith.constant 0 : i32
    %c0_i32_0 = arith.constant 0 : i32
    %c0_i32_1 = arith.constant 0 : i32
    return %arg0, %c0_i32, %c0_i32_0, %arg1 : i32, i32, i32, i32
  }
}

module attributes {stable_mosaic.version = 11 : i64} {
  func.func @_ln_qkv_kernel(%arg0: i32, %arg1: memref<256x16xbf16, #tpu.memory_space<vmem>>, %arg2: memref<1x16xf32, #tpu.memory_space<vmem>>, %arg3: memref<1x16xf32, #tpu.memory_space<vmem>>, %arg4: memref<16x48xbf16, #tpu.memory_space<vmem>>, %arg5: memref<256x48xbf16, #tpu.memory_space<vmem>>) attributes {dimension_semantics = [#tpu.dimension_semantics<parallel>], iteration_bounds = array<i64: 2>, scalar_prefetch = 0 : i64, scratch_operands = 0 : i64, tpu.core_type = #tpu.core_type<tc>, window_params = [{transform_indices = @transform_0, window_bounds = array<i64: 256, 16>}, {pipeline_mode = #tpu.pipeline_mode<synchronous>, transform_indices = @transform_1, window_bounds = array<i64: 1, 16>}, {pipeline_mode = #tpu.pipeline_mode<synchronous>, transform_indices = @transform_2, window_bounds = array<i64: 1, 16>}, {pipeline_mode = #tpu.pipeline_mode<synchronous>, transform_indices = @transform_3, window_bounds = array<i64: 16, 48>}, {transform_indices = @transform_4, window_bounds = array<i64: 256, 48>}]} {
    %c0 = arith.constant 0 : index
    %c0_0 = arith.constant 0 : index
    %0 = vector.load %arg1[%c0, %c0_0] : memref<256x16xbf16, #tpu.memory_space<vmem>>, vector<256x16xbf16>
    %1 = arith.extf %0 : vector<256x16xbf16> to vector<256x16xf32>
    %cst = arith.constant dense<0.000000e+00> : vector<256xf32>
    %2 = vector.multi_reduction <add>, %1, %cst [1] : vector<256x16xf32> to vector<256xf32>
    %3 = vector.shape_cast %2 : vector<256xf32> to vector<256x1xf32>
    %cst_1 = arith.constant 1.600000e+01 : f32
    %4 = vector.broadcast %cst_1 : f32 to vector<256x1xf32>
    %5 = arith.divf %3, %4 : vector<256x1xf32>
    %6 = vector.broadcast %5 : vector<256x1xf32> to vector<256x16xf32>
    %7 = arith.subf %1, %6 : vector<256x16xf32>
    %8 = arith.mulf %7, %7 : vector<256x16xf32>
    %cst_2 = arith.constant dense<0.000000e+00> : vector<256xf32>
    %9 = vector.multi_reduction <add>, %8, %cst_2 [1] : vector<256x16xf32> to vector<256xf32>
    %10 = vector.shape_cast %9 : vector<256xf32> to vector<256x1xf32>
    %cst_3 = arith.constant 1.600000e+01 : f32
    %11 = vector.broadcast %cst_3 : f32 to vector<256x1xf32>
    %12 = arith.divf %10, %11 : vector<256x1xf32>
    %13 = vector.broadcast %5 : vector<256x1xf32> to vector<256x16xf32>
    %14 = arith.subf %1, %13 : vector<256x16xf32>
    %cst_4 = arith.constant 9.99999974E-6 : f32
    %15 = vector.broadcast %cst_4 : f32 to vector<256x1xf32>
    %16 = arith.addf %12, %15 : vector<256x1xf32>
    %17 = math.rsqrt %16 : vector<256x1xf32>
    %18 = vector.broadcast %17 : vector<256x1xf32> to vector<256x16xf32>
    %19 = arith.mulf %14, %18 : vector<256x16xf32>
    %c0_5 = arith.constant 0 : index
    %c0_6 = arith.constant 0 : index
    %20 = vector.load %arg2[%c0_5, %c0_6] : memref<1x16xf32, #tpu.memory_space<vmem>>, vector<1x16xf32>
    %21 = vector.broadcast %20 : vector<1x16xf32> to vector<256x16xf32>
    %22 = arith.mulf %19, %21 : vector<256x16xf32>
    %c0_7 = arith.constant 0 : index
    %c0_8 = arith.constant 0 : index
    %23 = vector.load %arg3[%c0_7, %c0_8] : memref<1x16xf32, #tpu.memory_space<vmem>>, vector<1x16xf32>
    %24 = vector.broadcast %23 : vector<1x16xf32> to vector<256x16xf32>
    %25 = arith.addf %22, %24 : vector<256x16xf32>
    %26 = arith.truncf %25 : vector<256x16xf32> to vector<256x16xbf16>
    %c0_9 = arith.constant 0 : index
    %c0_10 = arith.constant 0 : index
    %27 = vector.load %arg4[%c0_9, %c0_10] : memref<16x48xbf16, #tpu.memory_space<vmem>>, vector<16x48xbf16>
    %cst_11 = arith.constant dense<0.000000e+00> : vector<256x48xf32>
    %28 = tpu.matmul %26, %27, %cst_11 {dimension_numbers = #tpu.dot_dimension_numbers<[1], [0], [0], [1], [0, 0, 1, 1], [], []>} : vector<256x16xbf16>, vector<16x48xbf16>, vector<256x48xf32> -> vector<256x48xf32>
    %29 = arith.truncf %28 : vector<256x48xf32> to vector<256x48xbf16>
    %c0_12 = arith.constant 0 : index
    %c0_13 = arith.constant 0 : index
    %30 = vector.load %arg5[%c0_12, %c0_13] : memref<256x48xbf16, #tpu.memory_space<vmem>>, vector<256x48xbf16>
    tpu.vector_store %arg5[%c0_12, %c0_13], %29 {strides = array<i32>} : memref<256x48xbf16, #tpu.memory_space<vmem>>, vector<256x48xbf16>,
    return
  }
  func.func @transform_0(%arg0: i32) -> (i32, i32) {
    %c0_i32 = arith.constant 0 : i32
    %c0_i32_0 = arith.constant 0 : i32
    return %arg0, %c0_i32 : i32, i32
  }
  func.func @transform_1(%arg0: i32) -> (i32, i32) {
    %c0_i32 = arith.constant 0 : i32
    %c0_i32_0 = arith.constant 0 : i32
    %c0_i32_1 = arith.constant 0 : i32
    return %c0_i32, %c0_i32_0 : i32, i32
  }
  func.func @transform_2(%arg0: i32) -> (i32, i32) {
    %c0_i32 = arith.constant 0 : i32
    %c0_i32_0 = arith.constant 0 : i32
    %c0_i32_1 = arith.constant 0 : i32
    return %c0_i32, %c0_i32_0 : i32, i32
  }
  func.func @transform_3(%arg0: i32) -> (i32, i32) {
    %c0_i32 = arith.constant 0 : i32
    %c0_i32_0 = arith.constant 0 : i32
    %c0_i32_1 = arith.constant 0 : i32
    return %c0_i32, %c0_i32_0 : i32, i32
  }
  func.func @transform_4(%arg0: i32) -> (i32, i32) {
    %c0_i32 = arith.constant 0 : i32
    %c0_i32_0 = arith.constant 0 : i32
    return %arg0, %c0_i32 : i32, i32
  }
}

module attributes {stable_mosaic.version = 11 : i64} {
  func.func @_window_attn_kernel(%arg0: i32, %arg1: i32, %arg2: memref<2xf32, #tpu.memory_space<smem>>, %arg3: memref<1x4x8x64xbf16, #tpu.memory_space<vmem>>, %arg4: memref<1x4x8x64xbf16, #tpu.memory_space<vmem>>, %arg5: memref<1x4x8x64xbf16, #tpu.memory_space<vmem>>, %arg6: memref<64x64xbf16, #tpu.memory_space<vmem>>, %arg7: memref<1x64xf32, #tpu.memory_space<vmem>>, %arg8: memref<1x4x8x64xbf16, #tpu.memory_space<vmem>>) attributes {dimension_semantics = [#tpu.dimension_semantics<parallel>, #tpu.dimension_semantics<parallel>], iteration_bounds = array<i64: 2, 2>, scalar_prefetch = 1 : i64, scratch_operands = 0 : i64, tpu.core_type = #tpu.core_type<tc>, window_params = [{transform_indices = @transform_0, window_bounds = array<i64: 1, 4, 8, 64>}, {transform_indices = @transform_1, window_bounds = array<i64: 1, 4, 8, 64>}, {transform_indices = @transform_2, window_bounds = array<i64: 1, 4, 8, 64>}, {pipeline_mode = #tpu.pipeline_mode<synchronous>, transform_indices = @transform_3, window_bounds = array<i64: 64, 64>}, {pipeline_mode = #tpu.pipeline_mode<synchronous>, transform_indices = @transform_4, window_bounds = array<i64: 1, 64>}, {transform_indices = @transform_5, window_bounds = array<i64: 1, 4, 8, 64>}]} {
    %c0 = arith.constant 0 : index
    %c0_0 = arith.constant 0 : index
    %c0_1 = arith.constant 0 : index
    %c0_2 = arith.constant 0 : index
    %0 = vector.load %arg3[%c0, %c0_0, %c0_1, %c0_2] : memref<1x4x8x64xbf16, #tpu.memory_space<vmem>>, vector<1x4x8x64xbf16>
    %1 = vector.shape_cast %0 : vector<1x4x8x64xbf16> to vector<4x8x64xbf16>
    %c0_3 = arith.constant 0 : index
    %c0_4 = arith.constant 0 : index
    %c0_5 = arith.constant 0 : index
    %c0_6 = arith.constant 0 : index
    %2 = vector.load %arg4[%c0_3, %c0_4, %c0_5, %c0_6] : memref<1x4x8x64xbf16, #tpu.memory_space<vmem>>, vector<1x4x8x64xbf16>
    %3 = vector.shape_cast %2 : vector<1x4x8x64xbf16> to vector<4x8x64xbf16>
    %c0_7 = arith.constant 0 : index
    %c0_8 = arith.constant 0 : index
    %c0_9 = arith.constant 0 : index
    %c0_10 = arith.constant 0 : index
    %4 = vector.load %arg5[%c0_7, %c0_8, %c0_9, %c0_10] : memref<1x4x8x64xbf16, #tpu.memory_space<vmem>>, vector<1x4x8x64xbf16>
    %5 = vector.shape_cast %4 : vector<1x4x8x64xbf16> to vector<4x8x64xbf16>
    %6 = vector.shape_cast %5 : vector<4x8x64xbf16> to vector<32x64xbf16>
    %c0_11 = arith.constant 0 : index
    %c0_12 = arith.constant 0 : index
    %7 = vector.load %arg6[%c0_11, %c0_12] : memref<64x64xbf16, #tpu.memory_space<vmem>>, vector<64x64xbf16>
    %cst = arith.constant dense<0.000000e+00> : vector<32x64xf32>
    %8 = tpu.matmul %6, %7, %cst {dimension_numbers = #tpu.dot_dimension_numbers<[1], [0], [0], [1], [0, 0, 1, 1], [], []>} : vector<32x64xbf16>, vector<64x64xbf16>, vector<32x64xf32> -> vector<32x64xf32>
    %c0_13 = arith.constant 0 : index
    %c0_14 = arith.constant 0 : index
    %9 = vector.load %arg7[%c0_13, %c0_14] : memref<1x64xf32, #tpu.memory_space<vmem>>, vector<1x64xf32>
    %10 = vector.broadcast %9 : vector<1x64xf32> to vector<32x64xf32>
    %11 = arith.addf %8, %10 : vector<32x64xf32>
    %cst_15 = arith.constant 5.000000e-01 : f32
    %12 = vector.broadcast %cst_15 : f32 to vector<32x64xf32>
    %13 = arith.mulf %12, %11 : vector<32x64xf32>
    %cst_16 = arith.constant 0.707106769 : f32
    %14 = vector.broadcast %cst_16 : f32 to vector<32x64xf32>
    %15 = arith.mulf %11, %14 : vector<32x64xf32>
    %16 = math.absf %15 : vector<32x64xf32>
    %cst_17 = arith.constant 0.327591091 : f32
    %17 = vector.broadcast %cst_17 : f32 to vector<32x64xf32>
    %18 = arith.mulf %17, %16 : vector<32x64xf32>
    %cst_18 = arith.constant 1.000000e+00 : f32
    %19 = vector.broadcast %cst_18 : f32 to vector<32x64xf32>
    %20 = arith.addf %19, %18 : vector<32x64xf32>
    %cst_19 = arith.constant 1.000000e+00 : f32
    %21 = vector.broadcast %cst_19 : f32 to vector<32x64xf32>
    %22 = arith.divf %21, %20 : vector<32x64xf32>
    %cst_20 = arith.constant 1.06140542 : f32
    %23 = vector.broadcast %cst_20 : f32 to vector<32x64xf32>
    %24 = arith.mulf %23, %22 : vector<32x64xf32>
    %cst_21 = arith.constant -1.45315206 : f32
    %25 = vector.broadcast %cst_21 : f32 to vector<32x64xf32>
    %26 = arith.addf %24, %25 : vector<32x64xf32>
    %27 = arith.mulf %26, %22 : vector<32x64xf32>
    %cst_22 = arith.constant 1.42141378 : f32
    %28 = vector.broadcast %cst_22 : f32 to vector<32x64xf32>
    %29 = arith.addf %27, %28 : vector<32x64xf32>
    %30 = arith.mulf %29, %22 : vector<32x64xf32>
    %cst_23 = arith.constant -0.284496725 : f32
    %31 = vector.broadcast %cst_23 : f32 to vector<32x64xf32>
    %32 = arith.addf %30, %31 : vector<32x64xf32>
    %33 = arith.mulf %32, %22 : vector<32x64xf32>
    %cst_24 = arith.constant 0.254829586 : f32
    %34 = vector.broadcast %cst_24 : f32 to vector<32x64xf32>
    %35 = arith.addf %33, %34 : vector<32x64xf32>
    %36 = arith.mulf %35, %22 : vector<32x64xf32>
    %cst_25 = arith.constant 0.000000e+00 : f32
    %37 = vector.broadcast %cst_25 : f32 to vector<32x64xf32>
    %38 = arith.subf %37, %16 : vector<32x64xf32>
    %39 = arith.mulf %38, %16 : vector<32x64xf32>
    %40 = math.exp %39 : vector<32x64xf32>
    %41 = arith.mulf %36, %40 : vector<32x64xf32>
    %cst_26 = arith.constant 1.000000e+00 : f32
    %42 = vector.broadcast %cst_26 : f32 to vector<32x64xf32>
    %43 = arith.subf %42, %41 : vector<32x64xf32>
    %cst_27 = arith.constant 0.000000e+00 : f32
    %44 = vector.broadcast %cst_27 : f32 to vector<32x64xf32>
    %45 = arith.cmpf oge, %15, %44 : vector<32x64xf32>
    %cst_28 = arith.constant 0.000000e+00 : f32
    %46 = vector.broadcast %cst_28 : f32 to vector<32x64xf32>
    %47 = arith.subf %46, %43 : vector<32x64xf32>
    %48 = arith.select %45, %43, %47 : vector<32x64xi1>, vector<32x64xf32>
    %cst_29 = arith.constant 1.000000e+00 : f32
    %49 = vector.broadcast %cst_29 : f32 to vector<32x64xf32>
    %50 = arith.addf %49, %48 : vector<32x64xf32>
    %51 = arith.mulf %13, %50 : vector<32x64xf32>
    %52 = vector.shape_cast %51 : vector<32x64xf32> to vector<4x8x64xf32>
    %53 = arith.index_cast %arg1 : i32 to index
    %54 = memref.load %arg2[%53] : memref<2xf32, #tpu.memory_space<smem>>
    "tpu.trace_start"() <{level = 10 : i32, message = "gcs,gds->gcd"}> : () -> ()
    %cst_30 = arith.constant dense<0.000000e+00> : vector<4x8x8xf32>
    %55 = tpu.matmul %1, %3, %cst_30 {dimension_numbers = #tpu.dot_dimension_numbers<[2], [2], [1], [1], [0, 0, 0, 1, 1, 1], [0], [0]>} : vector<4x8x64xbf16>, vector<4x8x64xbf16>, vector<4x8x8xf32> -> vector<4x8x8xf32>
    "tpu.trace_stop"() : () -> ()
    %56 = vector.broadcast %54 : f32 to vector<4x8x8xf32>
    %57 = arith.mulf %55, %56 : vector<4x8x8xf32>
    %cst_31 = arith.constant dense<0xFF800000> : vector<4x8xf32>
    %58 = vector.multi_reduction <maximumf>, %57, %cst_31 [2] : vector<4x8x8xf32> to vector<4x8xf32>
    %59 = vector.shape_cast %58 : vector<4x8xf32> to vector<4x8x1xf32>
    %60 = vector.broadcast %59 : vector<4x8x1xf32> to vector<4x8x8xf32>
    %61 = arith.subf %57, %60 : vector<4x8x8xf32>
    %62 = math.exp %61 : vector<4x8x8xf32>
    %cst_32 = arith.constant dense<0.000000e+00> : vector<4x8xf32>
    %63 = vector.multi_reduction <add>, %62, %cst_32 [2] : vector<4x8x8xf32> to vector<4x8xf32>
    %64 = vector.shape_cast %63 : vector<4x8xf32> to vector<4x8x1xf32>
    %65 = tpu.reciprocal %64 {approx = true} : vector<4x8x1xf32> -> vector<4x8x1xf32>
    %66 = vector.broadcast %65 : vector<4x8x1xf32> to vector<4x8x8xf32>
    %67 = arith.mulf %62, %66 : vector<4x8x8xf32>
    %68 = arith.truncf %67 : vector<4x8x8xf32> to vector<4x8x8xbf16>
    "tpu.trace_start"() <{level = 10 : i32, message = "gcd,gds->gcs"}> : () -> ()
    %cst_33 = arith.constant dense<0.000000e+00> : vector<4x8x64xf32>
    %69 = tpu.matmul %68, %5, %cst_33 {dimension_numbers = #tpu.dot_dimension_numbers<[2], [1], [1], [2], [0, 0, 0, 1, 1, 2], [0], [0]>} : vector<4x8x8xbf16>, vector<4x8x64xbf16>, vector<4x8x64xf32> -> vector<4x8x64xf32>
    "tpu.trace_stop"() : () -> ()
    %70 = arith.mulf %69, %52 : vector<4x8x64xf32>
    %71 = arith.truncf %70 : vector<4x8x64xf32> to vector<4x8x64xbf16>
    %c0_34 = arith.constant 0 : index
    %c0_35 = arith.constant 0 : index
    %c0_36 = arith.constant 0 : index
    %c0_37 = arith.constant 0 : index
    %72 = vector.load %arg8[%c0_34, %c0_35, %c0_36, %c0_37] : memref<1x4x8x64xbf16, #tpu.memory_space<vmem>>, vector<1x4x8x64xbf16>
    %73 = vector.shape_cast %72 : vector<1x4x8x64xbf16> to vector<4x8x64xbf16>
    %74 = vector.shape_cast %71 : vector<4x8x64xbf16> to vector<1x4x8x64xbf16>
    tpu.vector_store %arg8[%c0_34, %c0_35, %c0_36, %c0_37], %74 {strides = array<i32>} : memref<1x4x8x64xbf16, #tpu.memory_space<vmem>>, vector<1x4x8x64xbf16>,
    return
  }
  func.func @transform_0(%arg0: i32, %arg1: i32, %arg2: memref<2xf32, #tpu.memory_space<smem>>) -> (i32, i32, i32, i32) {
    %c0_i32 = arith.constant 0 : i32
    %c0_i32_0 = arith.constant 0 : i32
    %c0_i32_1 = arith.constant 0 : i32
    return %arg1, %arg0, %c0_i32, %c0_i32_0 : i32, i32, i32, i32
  }
  func.func @transform_1(%arg0: i32, %arg1: i32, %arg2: memref<2xf32, #tpu.memory_space<smem>>) -> (i32, i32, i32, i32) {
    %c0_i32 = arith.constant 0 : i32
    %c0_i32_0 = arith.constant 0 : i32
    %c0_i32_1 = arith.constant 0 : i32
    return %arg1, %arg0, %c0_i32, %c0_i32_0 : i32, i32, i32, i32
  }
  func.func @transform_2(%arg0: i32, %arg1: i32, %arg2: memref<2xf32, #tpu.memory_space<smem>>) -> (i32, i32, i32, i32) {
    %c0_i32 = arith.constant 0 : i32
    %c0_i32_0 = arith.constant 0 : i32
    %c0_i32_1 = arith.constant 0 : i32
    return %arg1, %arg0, %c0_i32, %c0_i32_0 : i32, i32, i32, i32
  }
  func.func @transform_3(%arg0: i32, %arg1: i32, %arg2: memref<2xf32, #tpu.memory_space<smem>>) -> (i32, i32) {
    %c0_i32 = arith.constant 0 : i32
    %c0_i32_0 = arith.constant 0 : i32
    %c0_i32_1 = arith.constant 0 : i32
    return %c0_i32, %c0_i32_0 : i32, i32
  }
  func.func @transform_4(%arg0: i32, %arg1: i32, %arg2: memref<2xf32, #tpu.memory_space<smem>>) -> (i32, i32) {
    %c0_i32 = arith.constant 0 : i32
    %c0_i32_0 = arith.constant 0 : i32
    %c0_i32_1 = arith.constant 0 : i32
    return %c0_i32, %c0_i32_0 : i32, i32
  }
  func.func @transform_5(%arg0: i32, %arg1: i32, %arg2: memref<2xf32, #tpu.memory_space<smem>>) -> (i32, i32, i32, i32) {
    %c0_i32 = arith.constant 0 : i32
    %c0_i32_0 = arith.constant 0 : i32
    %c0_i32_1 = arith.constant 0 : i32
    return %arg1, %arg0, %c0_i32, %c0_i32_0 : i32, i32, i32, i32
  }
}

module attributes {stable_mosaic.version = 11 : i64} {
  func.func @_matmul_bias_kernel(%arg0: i32, %arg1: memref<256x16xbf16, #tpu.memory_space<vmem>>, %arg2: memref<16x16xbf16, #tpu.memory_space<vmem>>, %arg3: memref<1x16xf32, #tpu.memory_space<vmem>>, %arg4: memref<256x16xbf16, #tpu.memory_space<vmem>>) attributes {dimension_semantics = [#tpu.dimension_semantics<parallel>], iteration_bounds = array<i64: 2>, scalar_prefetch = 0 : i64, scratch_operands = 0 : i64, tpu.core_type = #tpu.core_type<tc>, window_params = [{transform_indices = @transform_0, window_bounds = array<i64: 256, 16>}, {pipeline_mode = #tpu.pipeline_mode<synchronous>, transform_indices = @transform_1, window_bounds = array<i64: 16, 16>}, {pipeline_mode = #tpu.pipeline_mode<synchronous>, transform_indices = @transform_2, window_bounds = array<i64: 1, 16>}, {transform_indices = @transform_3, window_bounds = array<i64: 256, 16>}]} {
    %c0 = arith.constant 0 : index
    %c0_0 = arith.constant 0 : index
    %0 = vector.load %arg1[%c0, %c0_0] : memref<256x16xbf16, #tpu.memory_space<vmem>>, vector<256x16xbf16>
    %c0_1 = arith.constant 0 : index
    %c0_2 = arith.constant 0 : index
    %1 = vector.load %arg2[%c0_1, %c0_2] : memref<16x16xbf16, #tpu.memory_space<vmem>>, vector<16x16xbf16>
    %cst = arith.constant dense<0.000000e+00> : vector<256x16xf32>
    %2 = tpu.matmul %0, %1, %cst {dimension_numbers = #tpu.dot_dimension_numbers<[1], [0], [0], [1], [0, 0, 1, 1], [], []>} : vector<256x16xbf16>, vector<16x16xbf16>, vector<256x16xf32> -> vector<256x16xf32>
    %c0_3 = arith.constant 0 : index
    %c0_4 = arith.constant 0 : index
    %3 = vector.load %arg3[%c0_3, %c0_4] : memref<1x16xf32, #tpu.memory_space<vmem>>, vector<1x16xf32>
    %4 = vector.broadcast %3 : vector<1x16xf32> to vector<256x16xf32>
    %5 = arith.addf %2, %4 : vector<256x16xf32>
    %6 = arith.truncf %5 : vector<256x16xf32> to vector<256x16xbf16>
    %c0_5 = arith.constant 0 : index
    %c0_6 = arith.constant 0 : index
    %7 = vector.load %arg4[%c0_5, %c0_6] : memref<256x16xbf16, #tpu.memory_space<vmem>>, vector<256x16xbf16>
    tpu.vector_store %arg4[%c0_5, %c0_6], %6 {strides = array<i32>} : memref<256x16xbf16, #tpu.memory_space<vmem>>, vector<256x16xbf16>,
    return
  }
  func.func @transform_0(%arg0: i32) -> (i32, i32) {
    %c0_i32 = arith.constant 0 : i32
    %c0_i32_0 = arith.constant 0 : i32
    return %arg0, %c0_i32 : i32, i32
  }
  func.func @transform_1(%arg0: i32) -> (i32, i32) {
    %c0_i32 = arith.constant 0 : i32
    %c0_i32_0 = arith.constant 0 : i32
    %c0_i32_1 = arith.constant 0 : i32
    return %c0_i32, %c0_i32_0 : i32, i32
  }
  func.func @transform_2(%arg0: i32) -> (i32, i32) {
    %c0_i32 = arith.constant 0 : i32
    %c0_i32_0 = arith.constant 0 : i32
    %c0_i32_1 = arith.constant 0 : i32
    return %c0_i32, %c0_i32_0 : i32, i32
  }
  func.func @transform_3(%arg0: i32) -> (i32, i32) {
    %c0_i32 = arith.constant 0 : i32
    %c0_i32_0 = arith.constant 0 : i32
    return %arg0, %c0_i32 : i32, i32
  }
}

module attributes {stable_mosaic.version = 11 : i64} {
  func.func @_sep2d_add_kernel(%arg0: i32, %arg1: memref<16x16x16xbf16, #tpu.memory_space<vmem>>, %arg2: memref<16x16x16xbf16, #tpu.memory_space<vmem>>, %arg3: memref<16x16xbf16, #tpu.memory_space<vmem>>, %arg4: memref<16x16xbf16, #tpu.memory_space<vmem>>, %arg5: memref<16x16x16xf32, #tpu.memory_space<vmem>>) attributes {dimension_semantics = [#tpu.dimension_semantics<parallel>], iteration_bounds = array<i64: 2>, scalar_prefetch = 0 : i64, scratch_operands = 0 : i64, tpu.core_type = #tpu.core_type<tc>, window_params = [{transform_indices = @transform_0, window_bounds = array<i64: 16, 16, 16>}, {transform_indices = @transform_1, window_bounds = array<i64: 16, 16, 16>}, {pipeline_mode = #tpu.pipeline_mode<synchronous>, transform_indices = @transform_2, window_bounds = array<i64: 16, 16>}, {pipeline_mode = #tpu.pipeline_mode<synchronous>, transform_indices = @transform_3, window_bounds = array<i64: 16, 16>}, {transform_indices = @transform_4, window_bounds = array<i64: 16, 16, 16>}]} {
    %c0 = arith.constant 0 : index
    %c0_0 = arith.constant 0 : index
    %c0_1 = arith.constant 0 : index
    %0 = vector.load %arg1[%c0, %c0_0, %c0_1] : memref<16x16x16xbf16, #tpu.memory_space<vmem>>, vector<16x16x16xbf16>
    %1 = arith.extf %0 : vector<16x16x16xbf16> to vector<16x16x16xf32>
    %c0_2 = arith.constant 0 : index
    %c0_3 = arith.constant 0 : index
    %c0_4 = arith.constant 0 : index
    %2 = vector.load %arg2[%c0_2, %c0_3, %c0_4] : memref<16x16x16xbf16, #tpu.memory_space<vmem>>, vector<16x16x16xbf16>
    %3 = arith.extf %2 : vector<16x16x16xbf16> to vector<16x16x16xf32>
    %4 = arith.addf %1, %3 : vector<16x16x16xf32>
    %5 = arith.truncf %4 : vector<16x16x16xf32> to vector<16x16x16xbf16>
    %6 = vector.shape_cast %5 : vector<16x16x16xbf16> to vector<256x16xbf16>
    %c0_5 = arith.constant 0 : index
    %c0_6 = arith.constant 0 : index
    %7 = vector.load %arg3[%c0_5, %c0_6] : memref<16x16xbf16, #tpu.memory_space<vmem>>, vector<16x16xbf16>
    %cst = arith.constant dense<0.000000e+00> : vector<256x16xf32>
    %8 = tpu.matmul %6, %7, %cst {dimension_numbers = #tpu.dot_dimension_numbers<[1], [0], [0], [1], [0, 0, 1, 1], [], []>} : vector<256x16xbf16>, vector<16x16xbf16>, vector<256x16xf32> -> vector<256x16xf32>
    %9 = vector.shape_cast %8 : vector<256x16xf32> to vector<16x16x16xf32>
    %10 = arith.truncf %9 : vector<16x16x16xf32> to vector<16x16x16xbf16>
    %c0_7 = arith.constant 0 : index
    %c0_8 = arith.constant 0 : index
    %11 = vector.load %arg4[%c0_7, %c0_8] : memref<16x16xbf16, #tpu.memory_space<vmem>>, vector<16x16xbf16>
    %12 = vector.extract_strided_slice %10 {offsets = [0, 0, 0], sizes = [1, 16, 16], strides = [1, 1, 1]} : vector<16x16x16xbf16> to vector<1x16x16xbf16>
    %13 = vector.shape_cast %12 : vector<1x16x16xbf16> to vector<16x16xbf16>
    %cst_9 = arith.constant dense<0.000000e+00> : vector<16x16xf32>
    %14 = tpu.matmul %11, %13, %cst_9 {dimension_numbers = #tpu.dot_dimension_numbers<[1], [0], [0], [1], [0, 0, 1, 1], [], []>} : vector<16x16xbf16>, vector<16x16xbf16>, vector<16x16xf32> -> vector<16x16xf32>
    %c0_10 = arith.constant 0 : index
    %c0_11 = arith.constant 0 : index
    %c0_12 = arith.constant 0 : index
    %15 = vector.load %arg5[%c0_10, %c0_11, %c0_12] : memref<16x16x16xf32, #tpu.memory_space<vmem>>, vector<1x16x16xf32>
    %16 = vector.shape_cast %15 : vector<1x16x16xf32> to vector<16x16xf32>
    %17 = vector.shape_cast %14 : vector<16x16xf32> to vector<1x16x16xf32>
    tpu.vector_store %arg5[%c0_10, %c0_11, %c0_12], %17 {strides = array<i32>} : memref<16x16x16xf32, #tpu.memory_space<vmem>>, vector<1x16x16xf32>,
    %18 = vector.extract_strided_slice %10 {offsets = [1, 0, 0], sizes = [1, 16, 16], strides = [1, 1, 1]} : vector<16x16x16xbf16> to vector<1x16x16xbf16>
    %19 = vector.shape_cast %18 : vector<1x16x16xbf16> to vector<16x16xbf16>
    %cst_13 = arith.constant dense<0.000000e+00> : vector<16x16xf32>
    %20 = tpu.matmul %11, %19, %cst_13 {dimension_numbers = #tpu.dot_dimension_numbers<[1], [0], [0], [1], [0, 0, 1, 1], [], []>} : vector<16x16xbf16>, vector<16x16xbf16>, vector<16x16xf32> -> vector<16x16xf32>
    %c1 = arith.constant 1 : index
    %c0_14 = arith.constant 0 : index
    %c0_15 = arith.constant 0 : index
    %21 = vector.load %arg5[%c1, %c0_14, %c0_15] : memref<16x16x16xf32, #tpu.memory_space<vmem>>, vector<1x16x16xf32>
    %22 = vector.shape_cast %21 : vector<1x16x16xf32> to vector<16x16xf32>
    %23 = vector.shape_cast %20 : vector<16x16xf32> to vector<1x16x16xf32>
    tpu.vector_store %arg5[%c1, %c0_14, %c0_15], %23 {strides = array<i32>} : memref<16x16x16xf32, #tpu.memory_space<vmem>>, vector<1x16x16xf32>,
    %24 = vector.extract_strided_slice %10 {offsets = [2, 0, 0], sizes = [1, 16, 16], strides = [1, 1, 1]} : vector<16x16x16xbf16> to vector<1x16x16xbf16>
    %25 = vector.shape_cast %24 : vector<1x16x16xbf16> to vector<16x16xbf16>
    %cst_16 = arith.constant dense<0.000000e+00> : vector<16x16xf32>
    %26 = tpu.matmul %11, %25, %cst_16 {dimension_numbers = #tpu.dot_dimension_numbers<[1], [0], [0], [1], [0, 0, 1, 1], [], []>} : vector<16x16xbf16>, vector<16x16xbf16>, vector<16x16xf32> -> vector<16x16xf32>
    %c2 = arith.constant 2 : index
    %c0_17 = arith.constant 0 : index
    %c0_18 = arith.constant 0 : index
    %27 = vector.load %arg5[%c2, %c0_17, %c0_18] : memref<16x16x16xf32, #tpu.memory_space<vmem>>, vector<1x16x16xf32>
    %28 = vector.shape_cast %27 : vector<1x16x16xf32> to vector<16x16xf32>
    %29 = vector.shape_cast %26 : vector<16x16xf32> to vector<1x16x16xf32>
    tpu.vector_store %arg5[%c2, %c0_17, %c0_18], %29 {strides = array<i32>} : memref<16x16x16xf32, #tpu.memory_space<vmem>>, vector<1x16x16xf32>,
    %30 = vector.extract_strided_slice %10 {offsets = [3, 0, 0], sizes = [1, 16, 16], strides = [1, 1, 1]} : vector<16x16x16xbf16> to vector<1x16x16xbf16>
    %31 = vector.shape_cast %30 : vector<1x16x16xbf16> to vector<16x16xbf16>
    %cst_19 = arith.constant dense<0.000000e+00> : vector<16x16xf32>
    %32 = tpu.matmul %11, %31, %cst_19 {dimension_numbers = #tpu.dot_dimension_numbers<[1], [0], [0], [1], [0, 0, 1, 1], [], []>} : vector<16x16xbf16>, vector<16x16xbf16>, vector<16x16xf32> -> vector<16x16xf32>
    %c3 = arith.constant 3 : index
    %c0_20 = arith.constant 0 : index
    %c0_21 = arith.constant 0 : index
    %33 = vector.load %arg5[%c3, %c0_20, %c0_21] : memref<16x16x16xf32, #tpu.memory_space<vmem>>, vector<1x16x16xf32>
    %34 = vector.shape_cast %33 : vector<1x16x16xf32> to vector<16x16xf32>
    %35 = vector.shape_cast %32 : vector<16x16xf32> to vector<1x16x16xf32>
    tpu.vector_store %arg5[%c3, %c0_20, %c0_21], %35 {strides = array<i32>} : memref<16x16x16xf32, #tpu.memory_space<vmem>>, vector<1x16x16xf32>,
    %36 = vector.extract_strided_slice %10 {offsets = [4, 0, 0], sizes = [1, 16, 16], strides = [1, 1, 1]} : vector<16x16x16xbf16> to vector<1x16x16xbf16>
    %37 = vector.shape_cast %36 : vector<1x16x16xbf16> to vector<16x16xbf16>
    %cst_22 = arith.constant dense<0.000000e+00> : vector<16x16xf32>
    %38 = tpu.matmul %11, %37, %cst_22 {dimension_numbers = #tpu.dot_dimension_numbers<[1], [0], [0], [1], [0, 0, 1, 1], [], []>} : vector<16x16xbf16>, vector<16x16xbf16>, vector<16x16xf32> -> vector<16x16xf32>
    %c4 = arith.constant 4 : index
    %c0_23 = arith.constant 0 : index
    %c0_24 = arith.constant 0 : index
    %39 = vector.load %arg5[%c4, %c0_23, %c0_24] : memref<16x16x16xf32, #tpu.memory_space<vmem>>, vector<1x16x16xf32>
    %40 = vector.shape_cast %39 : vector<1x16x16xf32> to vector<16x16xf32>
    %41 = vector.shape_cast %38 : vector<16x16xf32> to vector<1x16x16xf32>
    tpu.vector_store %arg5[%c4, %c0_23, %c0_24], %41 {strides = array<i32>} : memref<16x16x16xf32, #tpu.memory_space<vmem>>, vector<1x16x16xf32>,
    %42 = vector.extract_strided_slice %10 {offsets = [5, 0, 0], sizes = [1, 16, 16], strides = [1, 1, 1]} : vector<16x16x16xbf16> to vector<1x16x16xbf16>
    %43 = vector.shape_cast %42 : vector<1x16x16xbf16> to vector<16x16xbf16>
    %cst_25 = arith.constant dense<0.000000e+00> : vector<16x16xf32>
    %44 = tpu.matmul %11, %43, %cst_25 {dimension_numbers = #tpu.dot_dimension_numbers<[1], [0], [0], [1], [0, 0, 1, 1], [], []>} : vector<16x16xbf16>, vector<16x16xbf16>, vector<16x16xf32> -> vector<16x16xf32>
    %c5 = arith.constant 5 : index
    %c0_26 = arith.constant 0 : index
    %c0_27 = arith.constant 0 : index
    %45 = vector.load %arg5[%c5, %c0_26, %c0_27] : memref<16x16x16xf32, #tpu.memory_space<vmem>>, vector<1x16x16xf32>
    %46 = vector.shape_cast %45 : vector<1x16x16xf32> to vector<16x16xf32>
    %47 = vector.shape_cast %44 : vector<16x16xf32> to vector<1x16x16xf32>
    tpu.vector_store %arg5[%c5, %c0_26, %c0_27], %47 {strides = array<i32>} : memref<16x16x16xf32, #tpu.memory_space<vmem>>, vector<1x16x16xf32>,
    %48 = vector.extract_strided_slice %10 {offsets = [6, 0, 0], sizes = [1, 16, 16], strides = [1, 1, 1]} : vector<16x16x16xbf16> to vector<1x16x16xbf16>
    %49 = vector.shape_cast %48 : vector<1x16x16xbf16> to vector<16x16xbf16>
    %cst_28 = arith.constant dense<0.000000e+00> : vector<16x16xf32>
    %50 = tpu.matmul %11, %49, %cst_28 {dimension_numbers = #tpu.dot_dimension_numbers<[1], [0], [0], [1], [0, 0, 1, 1], [], []>} : vector<16x16xbf16>, vector<16x16xbf16>, vector<16x16xf32> -> vector<16x16xf32>
    %c6 = arith.constant 6 : index
    %c0_29 = arith.constant 0 : index
    %c0_30 = arith.constant 0 : index
    %51 = vector.load %arg5[%c6, %c0_29, %c0_30] : memref<16x16x16xf32, #tpu.memory_space<vmem>>, vector<1x16x16xf32>
    %52 = vector.shape_cast %51 : vector<1x16x16xf32> to vector<16x16xf32>
    %53 = vector.shape_cast %50 : vector<16x16xf32> to vector<1x16x16xf32>
    tpu.vector_store %arg5[%c6, %c0_29, %c0_30], %53 {strides = array<i32>} : memref<16x16x16xf32, #tpu.memory_space<vmem>>, vector<1x16x16xf32>,
    %54 = vector.extract_strided_slice %10 {offsets = [7, 0, 0], sizes = [1, 16, 16], strides = [1, 1, 1]} : vector<16x16x16xbf16> to vector<1x16x16xbf16>
    %55 = vector.shape_cast %54 : vector<1x16x16xbf16> to vector<16x16xbf16>
    %cst_31 = arith.constant dense<0.000000e+00> : vector<16x16xf32>
    %56 = tpu.matmul %11, %55, %cst_31 {dimension_numbers = #tpu.dot_dimension_numbers<[1], [0], [0], [1], [0, 0, 1, 1], [], []>} : vector<16x16xbf16>, vector<16x16xbf16>, vector<16x16xf32> -> vector<16x16xf32>
    %c7 = arith.constant 7 : index
    %c0_32 = arith.constant 0 : index
    %c0_33 = arith.constant 0 : index
    %57 = vector.load %arg5[%c7, %c0_32, %c0_33] : memref<16x16x16xf32, #tpu.memory_space<vmem>>, vector<1x16x16xf32>
    %58 = vector.shape_cast %57 : vector<1x16x16xf32> to vector<16x16xf32>
    %59 = vector.shape_cast %56 : vector<16x16xf32> to vector<1x16x16xf32>
    tpu.vector_store %arg5[%c7, %c0_32, %c0_33], %59 {strides = array<i32>} : memref<16x16x16xf32, #tpu.memory_space<vmem>>, vector<1x16x16xf32>,
    %60 = vector.extract_strided_slice %10 {offsets = [8, 0, 0], sizes = [1, 16, 16], strides = [1, 1, 1]} : vector<16x16x16xbf16> to vector<1x16x16xbf16>
    %61 = vector.shape_cast %60 : vector<1x16x16xbf16> to vector<16x16xbf16>
    %cst_34 = arith.constant dense<0.000000e+00> : vector<16x16xf32>
    %62 = tpu.matmul %11, %61, %cst_34 {dimension_numbers = #tpu.dot_dimension_numbers<[1], [0], [0], [1], [0, 0, 1, 1], [], []>} : vector<16x16xbf16>, vector<16x16xbf16>, vector<16x16xf32> -> vector<16x16xf32>
    %c8 = arith.constant 8 : index
    %c0_35 = arith.constant 0 : index
    %c0_36 = arith.constant 0 : index
    %63 = vector.load %arg5[%c8, %c0_35, %c0_36] : memref<16x16x16xf32, #tpu.memory_space<vmem>>, vector<1x16x16xf32>
    %64 = vector.shape_cast %63 : vector<1x16x16xf32> to vector<16x16xf32>
    %65 = vector.shape_cast %62 : vector<16x16xf32> to vector<1x16x16xf32>
    tpu.vector_store %arg5[%c8, %c0_35, %c0_36], %65 {strides = array<i32>} : memref<16x16x16xf32, #tpu.memory_space<vmem>>, vector<1x16x16xf32>,
    %66 = vector.extract_strided_slice %10 {offsets = [9, 0, 0], sizes = [1, 16, 16], strides = [1, 1, 1]} : vector<16x16x16xbf16> to vector<1x16x16xbf16>
    %67 = vector.shape_cast %66 : vector<1x16x16xbf16> to vector<16x16xbf16>
    %cst_37 = arith.constant dense<0.000000e+00> : vector<16x16xf32>
    %68 = tpu.matmul %11, %67, %cst_37 {dimension_numbers = #tpu.dot_dimension_numbers<[1], [0], [0], [1], [0, 0, 1, 1], [], []>} : vector<16x16xbf16>, vector<16x16xbf16>, vector<16x16xf32> -> vector<16x16xf32>
    %c9 = arith.constant 9 : index
    %c0_38 = arith.constant 0 : index
    %c0_39 = arith.constant 0 : index
    %69 = vector.load %arg5[%c9, %c0_38, %c0_39] : memref<16x16x16xf32, #tpu.memory_space<vmem>>, vector<1x16x16xf32>
    %70 = vector.shape_cast %69 : vector<1x16x16xf32> to vector<16x16xf32>
    %71 = vector.shape_cast %68 : vector<16x16xf32> to vector<1x16x16xf32>
    tpu.vector_store %arg5[%c9, %c0_38, %c0_39], %71 {strides = array<i32>} : memref<16x16x16xf32, #tpu.memory_space<vmem>>, vector<1x16x16xf32>,
    %72 = vector.extract_strided_slice %10 {offsets = [10, 0, 0], sizes = [1, 16, 16], strides = [1, 1, 1]} : vector<16x16x16xbf16> to vector<1x16x16xbf16>
    %73 = vector.shape_cast %72 : vector<1x16x16xbf16> to vector<16x16xbf16>
    %cst_40 = arith.constant dense<0.000000e+00> : vector<16x16xf32>
    %74 = tpu.matmul %11, %73, %cst_40 {dimension_numbers = #tpu.dot_dimension_numbers<[1], [0], [0], [1], [0, 0, 1, 1], [], []>} : vector<16x16xbf16>, vector<16x16xbf16>, vector<16x16xf32> -> vector<16x16xf32>
    %c10 = arith.constant 10 : index
    %c0_41 = arith.constant 0 : index
    %c0_42 = arith.constant 0 : index
    %75 = vector.load %arg5[%c10, %c0_41, %c0_42] : memref<16x16x16xf32, #tpu.memory_space<vmem>>, vector<1x16x16xf32>
    %76 = vector.shape_cast %75 : vector<1x16x16xf32> to vector<16x16xf32>
    %77 = vector.shape_cast %74 : vector<16x16xf32> to vector<1x16x16xf32>
    tpu.vector_store %arg5[%c10, %c0_41, %c0_42], %77 {strides = array<i32>} : memref<16x16x16xf32, #tpu.memory_space<vmem>>, vector<1x16x16xf32>,
    %78 = vector.extract_strided_slice %10 {offsets = [11, 0, 0], sizes = [1, 16, 16], strides = [1, 1, 1]} : vector<16x16x16xbf16> to vector<1x16x16xbf16>
    %79 = vector.shape_cast %78 : vector<1x16x16xbf16> to vector<16x16xbf16>
    %cst_43 = arith.constant dense<0.000000e+00> : vector<16x16xf32>
    %80 = tpu.matmul %11, %79, %cst_43 {dimension_numbers = #tpu.dot_dimension_numbers<[1], [0], [0], [1], [0, 0, 1, 1], [], []>} : vector<16x16xbf16>, vector<16x16xbf16>, vector<16x16xf32> -> vector<16x16xf32>
    %c11 = arith.constant 11 : index
    %c0_44 = arith.constant 0 : index
    %c0_45 = arith.constant 0 : index
    %81 = vector.load %arg5[%c11, %c0_44, %c0_45] : memref<16x16x16xf32, #tpu.memory_space<vmem>>, vector<1x16x16xf32>
    %82 = vector.shape_cast %81 : vector<1x16x16xf32> to vector<16x16xf32>
    %83 = vector.shape_cast %80 : vector<16x16xf32> to vector<1x16x16xf32>
    tpu.vector_store %arg5[%c11, %c0_44, %c0_45], %83 {strides = array<i32>} : memref<16x16x16xf32, #tpu.memory_space<vmem>>, vector<1x16x16xf32>,
    %84 = vector.extract_strided_slice %10 {offsets = [12, 0, 0], sizes = [1, 16, 16], strides = [1, 1, 1]} : vector<16x16x16xbf16> to vector<1x16x16xbf16>
    %85 = vector.shape_cast %84 : vector<1x16x16xbf16> to vector<16x16xbf16>
    %cst_46 = arith.constant dense<0.000000e+00> : vector<16x16xf32>
    %86 = tpu.matmul %11, %85, %cst_46 {dimension_numbers = #tpu.dot_dimension_numbers<[1], [0], [0], [1], [0, 0, 1, 1], [], []>} : vector<16x16xbf16>, vector<16x16xbf16>, vector<16x16xf32> -> vector<16x16xf32>
    %c12 = arith.constant 12 : index
    %c0_47 = arith.constant 0 : index
    %c0_48 = arith.constant 0 : index
    %87 = vector.load %arg5[%c12, %c0_47, %c0_48] : memref<16x16x16xf32, #tpu.memory_space<vmem>>, vector<1x16x16xf32>
    %88 = vector.shape_cast %87 : vector<1x16x16xf32> to vector<16x16xf32>
    %89 = vector.shape_cast %86 : vector<16x16xf32> to vector<1x16x16xf32>
    tpu.vector_store %arg5[%c12, %c0_47, %c0_48], %89 {strides = array<i32>} : memref<16x16x16xf32, #tpu.memory_space<vmem>>, vector<1x16x16xf32>,
    %90 = vector.extract_strided_slice %10 {offsets = [13, 0, 0], sizes = [1, 16, 16], strides = [1, 1, 1]} : vector<16x16x16xbf16> to vector<1x16x16xbf16>
    %91 = vector.shape_cast %90 : vector<1x16x16xbf16> to vector<16x16xbf16>
    %cst_49 = arith.constant dense<0.000000e+00> : vector<16x16xf32>
    %92 = tpu.matmul %11, %91, %cst_49 {dimension_numbers = #tpu.dot_dimension_numbers<[1], [0], [0], [1], [0, 0, 1, 1], [], []>} : vector<16x16xbf16>, vector<16x16xbf16>, vector<16x16xf32> -> vector<16x16xf32>
    %c13 = arith.constant 13 : index
    %c0_50 = arith.constant 0 : index
    %c0_51 = arith.constant 0 : index
    %93 = vector.load %arg5[%c13, %c0_50, %c0_51] : memref<16x16x16xf32, #tpu.memory_space<vmem>>, vector<1x16x16xf32>
    %94 = vector.shape_cast %93 : vector<1x16x16xf32> to vector<16x16xf32>
    %95 = vector.shape_cast %92 : vector<16x16xf32> to vector<1x16x16xf32>
    tpu.vector_store %arg5[%c13, %c0_50, %c0_51], %95 {strides = array<i32>} : memref<16x16x16xf32, #tpu.memory_space<vmem>>, vector<1x16x16xf32>,
    %96 = vector.extract_strided_slice %10 {offsets = [14, 0, 0], sizes = [1, 16, 16], strides = [1, 1, 1]} : vector<16x16x16xbf16> to vector<1x16x16xbf16>
    %97 = vector.shape_cast %96 : vector<1x16x16xbf16> to vector<16x16xbf16>
    %cst_52 = arith.constant dense<0.000000e+00> : vector<16x16xf32>
    %98 = tpu.matmul %11, %97, %cst_52 {dimension_numbers = #tpu.dot_dimension_numbers<[1], [0], [0], [1], [0, 0, 1, 1], [], []>} : vector<16x16xbf16>, vector<16x16xbf16>, vector<16x16xf32> -> vector<16x16xf32>
    %c14 = arith.constant 14 : index
    %c0_53 = arith.constant 0 : index
    %c0_54 = arith.constant 0 : index
    %99 = vector.load %arg5[%c14, %c0_53, %c0_54] : memref<16x16x16xf32, #tpu.memory_space<vmem>>, vector<1x16x16xf32>
    %100 = vector.shape_cast %99 : vector<1x16x16xf32> to vector<16x16xf32>
    %101 = vector.shape_cast %98 : vector<16x16xf32> to vector<1x16x16xf32>
    tpu.vector_store %arg5[%c14, %c0_53, %c0_54], %101 {strides = array<i32>} : memref<16x16x16xf32, #tpu.memory_space<vmem>>, vector<1x16x16xf32>,
    %102 = vector.extract_strided_slice %10 {offsets = [15, 0, 0], sizes = [1, 16, 16], strides = [1, 1, 1]} : vector<16x16x16xbf16> to vector<1x16x16xbf16>
    %103 = vector.shape_cast %102 : vector<1x16x16xbf16> to vector<16x16xbf16>
    %cst_55 = arith.constant dense<0.000000e+00> : vector<16x16xf32>
    %104 = tpu.matmul %11, %103, %cst_55 {dimension_numbers = #tpu.dot_dimension_numbers<[1], [0], [0], [1], [0, 0, 1, 1], [], []>} : vector<16x16xbf16>, vector<16x16xbf16>, vector<16x16xf32> -> vector<16x16xf32>
    %c15 = arith.constant 15 : index
    %c0_56 = arith.constant 0 : index
    %c0_57 = arith.constant 0 : index
    %105 = vector.load %arg5[%c15, %c0_56, %c0_57] : memref<16x16x16xf32, #tpu.memory_space<vmem>>, vector<1x16x16xf32>
    %106 = vector.shape_cast %105 : vector<1x16x16xf32> to vector<16x16xf32>
    %107 = vector.shape_cast %104 : vector<16x16xf32> to vector<1x16x16xf32>
    tpu.vector_store %arg5[%c15, %c0_56, %c0_57], %107 {strides = array<i32>} : memref<16x16x16xf32, #tpu.memory_space<vmem>>, vector<1x16x16xf32>,
    return
  }
  func.func @transform_0(%arg0: i32) -> (i32, i32, i32) {
    %c0_i32 = arith.constant 0 : i32
    %c0_i32_0 = arith.constant 0 : i32
    %c0_i32_1 = arith.constant 0 : i32
    return %arg0, %c0_i32, %c0_i32_0 : i32, i32, i32
  }
  func.func @transform_1(%arg0: i32) -> (i32, i32, i32) {
    %c0_i32 = arith.constant 0 : i32
    %c0_i32_0 = arith.constant 0 : i32
    %c0_i32_1 = arith.constant 0 : i32
    return %arg0, %c0_i32, %c0_i32_0 : i32, i32, i32
  }
  func.func @transform_2(%arg0: i32) -> (i32, i32) {
    %c0_i32 = arith.constant 0 : i32
    %c0_i32_0 = arith.constant 0 : i32
    %c0_i32_1 = arith.constant 0 : i32
    return %c0_i32, %c0_i32_0 : i32, i32
  }
  func.func @transform_3(%arg0: i32) -> (i32, i32) {
    %c0_i32 = arith.constant 0 : i32
    %c0_i32_0 = arith.constant 0 : i32
    %c0_i32_1 = arith.constant 0 : i32
    return %c0_i32, %c0_i32_0 : i32, i32
  }
  func.func @transform_4(%arg0: i32) -> (i32, i32, i32) {
    %c0_i32 = arith.constant 0 : i32
    %c0_i32_0 = arith.constant 0 : i32
    %c0_i32_1 = arith.constant 0 : i32
    return %arg0, %c0_i32, %c0_i32_0 : i32, i32, i32
  }
}

</mosaic_0001>

<bundles_post_ra>
// kernel: freqlc_block_forward.6
= control target key start
LH: loop header
LB: loop body
LE: loop exit
PB: predicated region body
PF: predicated region fallthrough
CT: control target
= control target key end

     0   :  { %8 = vsyncpa [#allocation3], 0  ;;  %s1485_s0 = inlined_call_operand.hbm [shape: f32[32,16,16], index: 0, kind: input, shape index: {}]   ;;  %s1486_s1 = inlined_call_operand.vmem [shape: bf16[16,16], index: 1, kind: input, shape index: {}]   ;;  %s1487_s2 = inlined_call_operand.vmem [shape: bf16[16,16], index: 2, kind: input, shape index: {}]   ;;  %s1488_s3 = inlined_call_operand.vmem [shape: bf16[32,16,16], index: 3, kind: output, shape index: {}]  }
   0x1   :  { %10 = vsyncpa [#allocation3 + $0x1], 0  ;;  %s1222_s12 = smov 0   ;;  %s1224_s13 = smov 0  }
   0x2   :  { %s1226_s14 = smov 0   ;;  %s1228_s15 = smov 0  }
   0x3 LB: > { %s1000_s16 = sadd.s32 4294967295, %s1198_s15   ;;  %s1242_s17 = sadd.s32 1, %s1198_s15   ;;  %s1198_s15 = sphi %s1228_s15, %s1495_s15   ;;  %s1194_s14 = sphi %s1226_s14, %s1494_s14   ;;  %s1190_s13 = sphi %s1224_s13, %s1493_s13   ;;  %s1186_s12 = sphi %s1222_s12, %s1492_s12  }
   0x4   : > { %s20_s18 = ssub.s32 %s1198_s15, %s1242_s17  ;;  %s23_s19 = sadd.s32 1, %s1194_s14 }
   0x5   : > { %p21_p0 = scmp.eq.s32.totalorder %s20_s18, 0  ;;  %p30_p1 = scmp.ne.s32.totalorder %s1194_s14, %s1190_s13 }
   0x6   : > { %p31_p2 = scmp.eq.s32.totalorder %s1198_s15, 0  ;;  %p36_p3 = scmp.ne.s32.totalorder %s1190_s13, %s1186_s12 }
   0x7   : > { %s1252_s20 = scalar_select %p21_p0, %s1194_s14, %s23_s19  }
   0x8   : > { %p1254_p4 = por %p31_p2, %p30_p1  ;;  %p37_p5 = scmp.eq.s32.totalorder %s1000_s16, 0 }
   0x9   : > { %p1099_p6 = scmp.lt.s32.totalorder %s1198_s15, 2  ;;  %s134_s23 = sand.u32 1, %s1194_s14  }
   0xa   : > { %p1261_p7 = por %p37_p5, %p36_p3  ;;  %s1004_s24 = sshll.u32 %s134_s23, 8 }
   0xb   : > { %s1086_s25 = sshll.u32 %s1198_s15, 8  ;;  %s138_s29 = scalar_lea.vmem [#allocation2], %s1004_s24 }
   0xc   : > { %s144_s28 = scalar_lea.hbm %s1485_s0, %s1086_s25  ;;  %s147_s30 = sshll.u32 %s138_s29, 4  ;;  %s148_s30 = int_to_ptr.vmem [resolvable:$true] %s147_s30 }
   0xd   : > { %s145_s4 = sshll.u32 %s144_s28, 4  ;;  %p1272_p8 = pnand %p1099_p6, %p1254_p4  ;;  %s146_s4 = int_to_ptr.hbm [resolvable:$true] %s145_s4 }
   0xe   : > { %p1008_p9 = scmp.ge.s32.totalorder %s1198_s15, 1  ;;  %s135_s6 = scalar_lea.sflag [#allocation3], %s134_s23 }
   0xf   : > { %s1134_s7 = sshra.s32 %s146_s4, 4  ;;  %p1138_p11 = pneg %p1272_p8  ;;  %s1135_s7 = int_to_ptr.hbm [resolvable:$true] %s1134_s7 }
  0x10   : > { %s1136_s8 = scalar_lea.hbm %s1135_s7, 256  ;;  %s1141_s11 = scalar_lea.hbm %s1485_s0, 512 }
  0x11   : > { %p1137_p10 = scmp.ne.s32.totalorder %s1135_s7, %s1136_s8  ;;  %p1142_p0 = scmp.lt.s32.totalorder %s1135_s7, %s1485_s0 }
  0x12   : > { %p1143_p1 = scmp.lt.s32.totalorder %s1141_s11, %s1136_s8 }
  0x13   : > { %p1139_p12 = pnand %p1138_p11, %p1137_p10 }
  0x14   : > { %p1144_p2 = por %p1143_p1, %p1142_p0 }
  0x15   : > { %p1140_p13 = pneg %p1139_p12 }
  0x17   : > { %p1145_p3 = pnand %p1144_p2, %p1140_p13 }
  0x19   : > { %1148 = shalt.err (!%p1145_p3)
}
  0x1a   : > { %s1200_s19 = smov 128   ;;  %s1201_s21 = smov 8  }
  0x1b   : > { %1098 = dma.hbm_to_vmem [thread:$0]  (!%p1272_p8), %s146_s4, 4096, %s148_s30, %s135_s6, %s1200_s19, %s1200_s19, %s1201_s21  }
  0x1c   : > { %p155_p4 = scmp.lt.s32.totalorder %s1198_s15, 3 }
  0x1e   : > { %p156_p5 = pnand %p1008_p9, %p155_p4 }
  0x1f   : > { %s161_s23 = sand.u32 (!%p156_p5), 1, %s1190_s13  }
  0x20   : > { %159 = sbr.rel (%p156_p5) target bundleno = 476 (0x1dc), region = 32  ;;  %s1009_s24 = sshll.u32 (!%p156_p5), %s161_s23, 8 }
  0x21   : > { %s162_s25 = scalar_lea.sflag (!%p156_p5), [#allocation3], %s161_s23  ;;  %s1291_s26 = scalar_lea.vmem (!%p156_p5), [#allocation2], %s1009_s24 }
  0x25   : > { %1181 = dma.done.wait (%p1261_p7), %s162_s25, 4096  }
  0x26   : > { %1183 = vsyncadd (%p1261_p7), %s162_s25, 4294963200  ;;  %v1088_v0 = vld [vmem:[%s1486_s1] sm:$0xff]  ;;  %v200_v2 = vld [vmem:[%s1291_s26 + $0x8] sm:$0xff]  ;;  %vm351_vm0 = vcmask 130048   ;;  %s1010_s30 = sshll.u32 %s1000_s16, 4  ;;  %vm553_vm1 = vcmask 125952  }
  0x27   : > { %v199_v1 = vld [vmem:[%s1291_s26] sm:$0xff]  ;;  %v232_v4 = vpack.c.bf16 %v200_v2, %v200_v2  ;;  %407 = vmatpush.bf16.msra.mxu0 %v1088_v0  ;;  %1091 = vmatpush.bf16.msra.mxu2 %v1088_v0  ;;  %v201_v8 = vld [vmem:[%s1291_s26 + $0x10] sm:$0xff]  ;;  %v202_v9 = vld [vmem:[%s1291_s26 + $0x18] sm:$0xff]  ;;  %p192_p6 = scmp.lt.s32.totalorder %s1010_s30, 31 }
  0x28   : > { %v231_v3 = vpack.c.bf16 %v199_v1, %v199_v1  ;;  %1090 = vmatpush.bf16.msra.mxu1 %v1088_v0  ;;  %1092 = vmatpush.bf16.msra.mxu3 %v1088_v0  ;;  %v233_v10 = vpack.c.bf16 %v201_v8, %v201_v8  ;;  %v234_v11 = vpack.c.bf16 %v202_v9, %v202_v9  ;;  %v203_v15 = vld [vmem:[%s1291_s26 + $0x20] sm:$0xff]  ;;  %v204_v16 = vld [vmem:[%s1291_s26 + $0x28] sm:$0xff]  ;;  %v205_v22 = vld [vmem:[%s1291_s26 + $0x30] sm:$0xff] }
  0x29   : > { %v298_v6 = vunpack.c.l.b16 %v232_v4  ;;  %v235_v17 = vpack.c.bf16 %v203_v15, %v203_v15  ;;  %v236_v18 = vpack.c.bf16 %v204_v16, %v204_v16  ;;  %v206_v23 = vld [vmem:[%s1291_s26 + $0x38] sm:$0xff]  ;;  %v237_v24 = vpack.c.bf16 %v205_v22, %v205_v22  ;;  %v219_v29 = vld [vmem:[%s1291_s26 + $0xa0] sm:$0xff]  ;;  %v220_v30 = vld [vmem:[%s1291_s26 + $0xa8] sm:$0xff]  ;;  %s1497_s30 = smov (!%p192_p6, %s1010_s30), 31 }
  0x2a   : > { %v297_v5 = vunpack.c.l.b16 %v231_v3  ;;  %v299_v12 = vunpack.c.l.b16 %v233_v10  ;;  %v300_v13 = vunpack.c.l.b16 %v234_v11  ;;  %v238_v25 = vpack.c.bf16 %v206_v23, %v206_v23  ;;  %v215_v31 = vld [vmem:[%s1291_s26 + $0x80] sm:$0xff]  ;;  %v208_v33 = vld [vmem:[%s1291_s26 + $0x48] sm:$0xff]  ;;  %v209_v50 = vld [vmem:[%s1291_s26 + $0x50] sm:$0xff]  ;;  %s1087_s4 = sshll.u32 %s1497_s30, 3 }
  0x2b   : > { %v301_v19 = vunpack.c.l.b16 %v235_v17  ;;  %v302_v20 = vunpack.c.l.b16 %v236_v18  ;;  %v303_v26 = vunpack.c.l.b16 %v237_v24  ;;  %v207_v32 = vld [vmem:[%s1291_s26 + $0x40] sm:$0xff]  ;;  %v251_v34 = vpack.c.bf16 %v219_v29, %v219_v29  ;;  %v216_v36 = vld [vmem:[%s1291_s26 + $0x88] sm:$0xff]  ;;  %v210_v51 = vld [vmem:[%s1291_s26 + $0x58] sm:$0xff]  ;;  %s1406_s7 = scalar_lea.vmem %s1488_s3, %s1087_s4 }
  0x2c   : > { %v329_v7 = vpack.c.b16 %v298_v6, %v297_v5  ;;  %v330_v14 = vpack.c.b16 %v300_v13, %v299_v12  ;;  %v304_v27 = vunpack.c.l.b16 %v238_v25  ;;  %v252_v35 = vpack.c.bf16 %v220_v30, %v220_v30  ;;  %v221_v52 = vld [vmem:[%s1291_s26 + $0xb0] sm:$0xff]  ;;  %v222_v53 = vld [vmem:[%s1291_s26 + $0xb8] sm:$0xff]  ;;  %v224_v15 = vld [vmem:[%s1291_s26 + $0xc8] sm:$0xff] }
  0x2d   : > { %v331_v21 = vpack.c.b16 %v302_v20, %v301_v19  ;;  %v247_v37 = vpack.c.bf16 %v215_v31, %v215_v31  ;;  %v248_v38 = vpack.c.bf16 %v216_v36, %v216_v36  ;;  %v317_v39 = vunpack.c.l.b16 %v251_v34  ;;  %v225_v54 = vld [vmem:[%s1291_s26 + $0xd0] sm:$0xff]  ;;  %v226_v57 = vld [vmem:[%s1291_s26 + $0xd8] sm:$0xff]  ;;  %v227_v16 = vld [vmem:[%s1291_s26 + $0xe0] sm:$0xff] }
  0x2e   : > { %1017 = vmatmul.msk.bf16.vlgmr.msra.gmra.mxu0 %vm351_vm0, %v329_v7  ;;  %v332_v28 = vpack.c.b16 %v304_v27, %v303_v26  ;;  %v318_v40 = vunpack.c.l.b16 %v252_v35  ;;  %v239_v42 = vpack.c.bf16 %v207_v32, %v207_v32  ;;  %v240_v43 = vpack.c.bf16 %v208_v33, %v208_v33  ;;  %v217_v59 = vld [vmem:[%s1291_s26 + $0x90] sm:$0xff]  ;;  %v218_v60 = vld [vmem:[%s1291_s26 + $0x98] sm:$0xff]  ;;  %v211_v17 = vld [vmem:[%s1291_s26 + $0x60] sm:$0xff] }
  0x2f   : > { %v313_v41 = vunpack.c.l.b16 %v247_v37  ;;  %v314_v44 = vunpack.c.l.b16 %v248_v38  ;;  %v253_v55 = vpack.c.bf16 %v221_v52, %v221_v52  ;;  %v254_v56 = vpack.c.bf16 %v222_v53, %v222_v53  ;;  %v212_v18 = vld [vmem:[%s1291_s26 + $0x68] sm:$0xff]  ;;  %v213_v35 = vld [vmem:[%s1291_s26 + $0x70] sm:$0xff]  ;;  %v214_v36 = vld [vmem:[%s1291_s26 + $0x78] sm:$0xff] }
  0x30   : > { %v339_v45 = vpack.c.b16 %v318_v40, %v317_v39  ;;  %v305_v47 = vunpack.c.l.b16 %v239_v42  ;;  %v306_v48 = vunpack.c.l.b16 %v240_v43  ;;  %v257_v58 = vpack.c.bf16 %v225_v54, %v225_v54  ;;  %v229_v37 = vld [vmem:[%s1291_s26 + $0xf0] sm:$0xff]  ;;  %v230_v38 = vld [vmem:[%s1291_s26 + $0xf8] sm:$0xff] }
  0x31   : > { %v337_v46 = vpack.c.b16 %v314_v44, %v313_v41  ;;  %v258_v61 = vpack.c.bf16 %v226_v57, %v226_v57  ;;  %v249_v62 = vpack.c.bf16 %v217_v59, %v217_v59  ;;  %v250_v63 = vpack.c.bf16 %v218_v60, %v218_v60 }
  0x32   : > { %1027 = vmatmul.msk.bf16.vlgmr.msra.gmra.mxu2 %vm351_vm0, %v339_v45  ;;  %v333_v49 = vpack.c.b16 %v306_v48, %v305_v47  ;;  %v241_v0 = vpack.c.bf16 %v209_v50, %v209_v50  ;;  %v319_v1 = vunpack.c.l.b16 %v253_v55  ;;  %v320_v2 = vunpack.c.l.b16 %v254_v56 }
  0x33   : > { %1025 = vmatmul.msk.bf16.vlgmr.msra.gmra.mxu1 %vm351_vm0, %v337_v46  ;;  %v323_v3 = vunpack.c.l.b16 %v257_v58  ;;  %v242_v4 = vpack.c.bf16 %v210_v51, %v210_v51  ;;  %v324_v5 = vunpack.c.l.b16 %v258_v61  ;;  %v315_v6 = vunpack.c.l.b16 %v249_v62 }
  0x34   : > { %v316_v7 = vunpack.c.l.b16 %v250_v63  ;;  %v340_v8 = vpack.c.b16 %v320_v2, %v319_v1  ;;  %v307_v11 = vunpack.c.l.b16 %v241_v0  ;;  %v256_v20 = vpack.c.bf16 %v224_v15, %v224_v15 }
  0x35   : > { %v342_v9 = vpack.c.b16 %v324_v5, %v323_v3  ;;  %v308_v12 = vunpack.c.l.b16 %v242_v4  ;;  %v259_v22 = vpack.c.bf16 %v227_v16, %v227_v16  ;;  %v243_v27 = vpack.c.bf16 %v211_v17, %v211_v17 }
  0x36   : > { %v338_v10 = vpack.c.b16 %v316_v7, %v315_v6  ;;  %v322_v25 = vunpack.c.l.b16 %v256_v20  ;;  %v261_v39 = vpack.c.bf16 %v229_v37, %v229_v37  ;;  %v262_v40 = vpack.c.bf16 %v230_v38, %v230_v38  ;;  %v1351_v6 = vld [vmem:[%s1487_s2] sm:$0xff] }
  0x37   : > { %1030 = vmatmul.msk.bf16.vlgmr.msra.gmra.mxu3 %vm351_vm0, %v342_v9  ;;  %v334_v13 = vpack.c.b16 %v308_v12, %v307_v11  ;;  %v325_v26 = vunpack.c.l.b16 %v259_v22  ;;  %v309_v32 = vunpack.c.l.b16 %v243_v27  ;;  %v245_v41 = vpack.c.bf16 %v213_v35, %v213_v35 }
  0x38   : > { %v246_v42 = vpack.c.bf16 %v214_v36, %v214_v36  ;;  %v327_v43 = vunpack.c.l.b16 %v261_v39  ;;  %v328_v44 = vunpack.c.l.b16 %v262_v40 }
  0x39   : > { %v311_v46 = vunpack.c.l.b16 %v245_v41 }
  0x3a   : > { %v344_v45 = vpack.c.b16 %v328_v44, %v327_v43  ;;  %v312_v47 = vunpack.c.l.b16 %v246_v42 }
  0x3c   : > { %v336_v48 = vpack.c.b16 %v312_v47, %v311_v46 }
  0x3e   : > { %1018 = vmatmul.msk.bf16.gmra.mxu0 %vm351_vm0, %v330_v14  ;;  %v223_v14 = vld [vmem:[%s1291_s26 + $0xc0] sm:$0xff] }
  0x3f   : > { %v255_v19 = vpack.c.bf16 %v223_v14, %v223_v14 }
  0x41   : > { %v321_v24 = vunpack.c.l.b16 %v255_v19 }
  0x42   : > { %1028 = vmatmul.msk.bf16.gmra.mxu2 %vm351_vm0, %v340_v8 }
  0x43   : > { %1026 = vmatmul.msk.bf16.gmra.mxu1 %vm351_vm0, %v338_v10  ;;  %v341_v30 = vpack.c.b16 %v322_v25, %v321_v24 }
  0x4e   : > { %1019 = vmatmul.msk.bf16.gmra.mxu0 %vm351_vm0, %v331_v21  ;;  %v228_v21 = vld [vmem:[%s1291_s26 + $0xe8] sm:$0xff] }
  0x4f   : > { %v260_v23 = vpack.c.bf16 %v228_v21, %v228_v21 }
  0x51   : > { %v326_v29 = vunpack.c.l.b16 %v260_v23 }
  0x52   : > { %1029 = vmatmul.msk.bf16.gmra.mxu2 %vm351_vm0, %v341_v30 }
  0x53   : > { %v343_v31 = vpack.c.b16 %v326_v29, %v325_v26 }
  0x55   : > { %1031 = vmatmul.msk.bf16.gmra.mxu3 %vm351_vm0, %v343_v31 }
  0x5e   : > { %1020 = vmatmul.msk.bf16.gmra.mxu0 %vm351_vm0, %v332_v28  ;;  %v244_v28 = vpack.c.bf16 %v212_v18, %v212_v18 }
  0x60   : > { %v310_v33 = vunpack.c.l.b16 %v244_v28 }
  0x62   : > { %v335_v34 = vpack.c.b16 %v310_v33, %v309_v32 }
  0x65   : > { %1032 = vmatmul.msk.bf16.gmra.mxu3 %vm351_vm0, %v344_v45 }
  0x6e   : > { %1021 = vmatmul.msk.bf16.gmra.mxu0 %vm351_vm0, %v333_v49 }
  0x7e   : > { %1022 = vmatmul.msk.bf16.gmra.mxu0 %vm351_vm0, %v334_v13 }
  0x8e   : > { %1023 = vmatmul.msk.bf16.gmra.mxu0 %vm351_vm0, %v335_v34 }
  0x9e   : > { %1024 = vmatmul.msk.bf16.gmra.mxu0 %vm351_vm0, %v336_v48 }
  0xab   : > { %v409_v49 = vpop.f32.mrf.mxu0 }
  0xac   : > { %v489_v50 = vpack.c.bf16 %v409_v49, %v409_v49 }
  0xae   : > { %v530_v53 = vunpack.c.l.b16 %v489_v50 }
  0xb0   : > { %v449_v16 = vpop.f32.mrf.mxu1 }
  0xb1   : > { %v505_v28 = vpack.c.bf16 %v449_v16, %v449_v16 }
  0xb3   : > { %v411_v51 = vpop.f32.mrf.mxu0  ;;  %v733_v37 = vunpack.c.l.b16 %v505_v28 }
  0xb4   : > { %v490_v52 = vpack.c.bf16 %v411_v51, %v411_v51 }
  0xb5   : > { %v1359_v14 = vpop.f32.mrf.mxu2 }
  0xb6   : > { %v531_v54 = vunpack.c.l.b16 %v490_v52 }
  0xb8   : > { %v532_v55 = vpack.c.b16 %v531_v54, %v530_v53  ;;  %v451_v24 = vpop.f32.mrf.mxu1 }
  0xb9   : > { %v506_v29 = vpack.c.bf16 %v451_v24, %v451_v24 }
  0xba   : > { %544 = vmatpush.bf16.msrb.mxu1 %v532_v55  ;;  %v1365_v26 = vpop.f32.mrf.mxu3 }
  0xbb   : > { %v414_v56 = vpop.f32.mrf.mxu0  ;;  %v734_v38 = vunpack.c.l.b16 %v506_v29 }
  0xbc   : > { %v491_v57 = vpack.c.bf16 %v414_v56, %v414_v56 }
  0xbd   : > { %1037 = vmatmul.msk.bf16.vlgmr.msrb.gmra.mxu1 %vm351_vm0, %v1351_v6  ;;  %v1363_v17 = vpop.f32.mrf.mxu2  ;;  %v735_v44 = vpack.c.b16 %v734_v38, %v733_v37 }
  0xbe   : > { %v558_v60 = vunpack.c.l.b16 %v491_v57 }
  0xc0   : > { %v454_v33 = vpop.f32.mrf.mxu1 }
  0xc1   : > { %v507_v51 = vpack.c.bf16 %v454_v33, %v454_v33 }
  0xc2   : > { %v1369_v31 = vpop.f32.mrf.mxu3 }
  0xc3   : > { %v416_v58 = vpop.f32.mrf.mxu0 }
  0xc4   : > { %v492_v59 = vpack.c.bf16 %v416_v58, %v416_v58 }
  0xc5   : > { %v464_v25 = vpop.f32.mrf.mxu2 }
  0xc6   : > { %v559_v61 = vunpack.c.l.b16 %v492_v59  ;;  %v511_v34 = vpack.c.bf16 %v464_v25, %v464_v25 }
  0xc8   : > { %v560_v62 = vpack.c.b16 %v559_v61, %v558_v60  ;;  %v808_v42 = vunpack.c.l.b16 %v511_v34  ;;  %v456_v50 = vpop.f32.mrf.mxu1  ;;  %v758_v61 = vunpack.c.l.b16 %v507_v51 }
  0xc9   : > { %v508_v52 = vpack.c.bf16 %v456_v50, %v456_v50 }
  0xca   : > { %569 = vmatpush.bf16.msrb.mxu2 %v560_v62 }
  0xcb   : > { %v419_v63 = vpop.f32.mrf.mxu0  ;;  %v759_v62 = vunpack.c.l.b16 %v508_v52 }
  0xcc   : > { %v493_v0 = vpack.c.bf16 %v419_v63, %v419_v63 }
  0xcd   : > { %1038 = vmatmul.msk.bf16.vlgmr.msrb.gmra.mxu2 %vm351_vm0, %v1351_v6  ;;  %v466_v30 = vpop.f32.mrf.mxu2 }
  0xce   : > { %v583_v3 = vunpack.c.l.b16 %v493_v0  ;;  %v512_v35 = vpack.c.bf16 %v466_v30, %v466_v30 }
  0xd0   : > { %v809_v43 = vunpack.c.l.b16 %v512_v35 }
  0xd2   : > { %v810_v48 = vpack.c.b16 %v809_v43, %v808_v42 }
  0xd3   : > { %v421_v1 = vpop.f32.mrf.mxu0 }
  0xd4   : > { %v494_v2 = vpack.c.bf16 %v421_v1, %v421_v1 }
  0xd5   : > { %v469_v46 = vpop.f32.mrf.mxu2 }
  0xd6   : > { %v584_v4 = vunpack.c.l.b16 %v494_v2  ;;  %v513_v54 = vpack.c.bf16 %v469_v46, %v469_v46 }
  0xd8   : > { %v585_v5 = vpack.c.b16 %v584_v4, %v583_v3  ;;  %v479_v47 = vpop.f32.mrf.mxu3  ;;  %v833_v0 = vunpack.c.l.b16 %v513_v54 }
  0xd9   : > { %v517_v55 = vpack.c.bf16 %v479_v47, %v479_v47 }
  0xda   : > { %594 = vmatpush.bf16.msrb.mxu3 %v585_v5 }
  0xdb   : > { %v424_v7 = vpop.f32.mrf.mxu0  ;;  %v883_v1 = vunpack.c.l.b16 %v517_v55 }
  0xdc   : > { %v495_v8 = vpack.c.bf16 %v424_v7, %v424_v7  ;;  %v760_v7 = vpack.c.b16 %v759_v62, %v758_v61 }
  0xdd   : > { %1041 = vmatmul.msk.bf16.vlgmr.msrb.gmra.mxu3 %vm351_vm0, %v1351_v6  ;;  %v471_v53 = vpop.f32.mrf.mxu2 }
  0xde   : > { %v608_v11 = vunpack.c.l.b16 %v495_v8  ;;  %v514_v58 = vpack.c.bf16 %v471_v53, %v471_v53 }
  0xe0   : > { %v481_v56 = vpop.f32.mrf.mxu3  ;;  %v834_v4 = vunpack.c.l.b16 %v514_v58 }
  0xe1   : > { %v518_v59 = vpack.c.bf16 %v481_v56, %v481_v56 }
  0xe3   : > { %v426_v9 = vpop.f32.mrf.mxu0  ;;  %v884_v5 = vunpack.c.l.b16 %v518_v59 }
  0xe4   : > { %v496_v10 = vpack.c.bf16 %v426_v9, %v426_v9 }
  0xe6   : > { %v609_v12 = vunpack.c.l.b16 %v496_v10  ;;  %v835_v10 = vpack.c.b16 %v834_v4, %v833_v0 }
  0xe8   : > { %v610_v13 = vpack.c.b16 %v609_v12, %v608_v11  ;;  %v484_v9 = vpop.f32.mrf.mxu3  ;;  %v885_v11 = vpack.c.b16 %v884_v5, %v883_v1 }
  0xea   : > { %619 = vmatpush.bf16.msra.mxu1 %v610_v13  ;;  %v509_v13 = vpack.c.bf16 %v1359_v14, %v1359_v14 }
  0xeb   : > { %v429_v15 = vpop.f32.mrf.mxu0 }
  0xec   : > { %v497_v18 = vpack.c.bf16 %v429_v15, %v429_v15  ;;  %v510_v15 = vpack.c.bf16 %v1363_v17, %v1363_v17  ;;  %v783_v25 = vunpack.c.l.b16 %v509_v13 }
  0xed   : > { %1044 = vmatmul.msk.bf16.vlgmr.msra.gmra.mxu1 %vm351_vm0, %v1351_v6 }
  0xee   : > { %v633_v21 = vunpack.c.l.b16 %v497_v18 }
  0xf0   : > { %v486_v16 = vpop.f32.mrf.mxu3 }
  0xf3   : > { %v431_v19 = vpop.f32.mrf.mxu0 }
  0xf4   : > { %v498_v20 = vpack.c.bf16 %v431_v19, %v431_v19 }
  0xf6   : > { %v634_v22 = vunpack.c.l.b16 %v498_v20  ;;  %v519_v20 = vpack.c.bf16 %v484_v9, %v484_v9 }
  0xf8   : > { %v635_v23 = vpack.c.b16 %v634_v22, %v633_v21  ;;  %v520_v21 = vpack.c.bf16 %v486_v16, %v486_v16  ;;  %v515_v22 = vpack.c.bf16 %v1365_v26, %v1365_v26  ;;  %v908_v14 = vunpack.c.l.b16 %v519_v20 }
  0xfa   : > { %644 = vmatpush.bf16.msra.mxu2 %v635_v23  ;;  %v516_v23 = vpack.c.bf16 %v1369_v31, %v1369_v31  ;;  %v909_v30 = vunpack.c.l.b16 %v520_v21 }
  0xfb   : > { %v434_v27 = vpop.f32.mrf.mxu0 }
  0xfc   : > { %v499_v32 = vpack.c.bf16 %v434_v27, %v434_v27  ;;  %v784_v27 = vunpack.c.l.b16 %v510_v15  ;;  %v859_v17 = vunpack.c.l.b16 %v516_v23  ;;  %v910_v35 = vpack.c.b16 %v909_v30, %v908_v14 }
  0xfd   : > { %1047 = vmatmul.msk.bf16.vlgmr.msra.gmra.mxu2 %vm351_vm0, %v1351_v6 }
  0xfe   : > { %v658_v40 = vunpack.c.l.b16 %v499_v32  ;;  %v858_v32 = vunpack.c.l.b16 %v515_v22  ;;  %v785_v34 = vpack.c.b16 %v784_v27, %v783_v25 }
 0x103   : > { %v436_v36 = vpop.f32.mrf.mxu0 }
 0x104   : > { %v500_v39 = vpack.c.bf16 %v436_v36, %v436_v36  ;;  %v860_v36 = vpack.c.b16 %v859_v17, %v858_v32 }
 0x106   : > { %v659_v41 = vunpack.c.l.b16 %v500_v39 }
 0x108   : > { %v660_v45 = vpack.c.b16 %v659_v41, %v658_v40 }
 0x10a   : > { %669 = vmatpush.bf16.msra.mxu3 %v660_v45 }
 0x10b   : > { %v439_v49 = vpop.f32.mrf.mxu0 }
 0x10c   : > { %v501_v57 = vpack.c.bf16 %v439_v49, %v439_v49 }
 0x10d   : > { %1050 = vmatmul.msk.bf16.vlgmr.msra.gmra.mxu3 %vm351_vm0, %v1351_v6 }
 0x10e   : > { %744 = vmatpush.bf16.msrb.mxu3 %v735_v44  ;;  %v683_v2 = vunpack.c.l.b16 %v501_v57 }
 0x112   : > { %819 = vmatpush.bf16.msra.mxu3 %v810_v48 }
 0x113   : > { %v441_v60 = vpop.f32.mrf.mxu0 }
 0x114   : > { %v502_v63 = vpack.c.bf16 %v441_v60, %v441_v60 }
 0x116   : > { %v684_v3 = vunpack.c.l.b16 %v502_v63 }
 0x118   : > { %v685_v8 = vpack.c.b16 %v684_v3, %v683_v2 }
 0x11a   : > { %694 = vmatpush.bf16.msrb.mxu1 %v685_v8 }
 0x11b   : > { %v444_v12 = vpop.f32.mrf.mxu0 }
 0x11c   : > { %v503_v18 = vpack.c.bf16 %v444_v12, %v444_v12 }
 0x11d   : > { %1053 = vmatmul.msk.bf16.vlgmr.msrb.gmra.mxu1 %vm351_vm0, %v1351_v6  ;;  %1059 = vmatmul.msk.bf16.vlgmr.msrb.gmra.mxu3 %vm351_vm0, %v1351_v6 }
 0x11e   : > { %769 = vmatpush.bf16.msra.mxu1 %v760_v7  ;;  %894 = vmatpush.bf16.msrb.mxu3 %v885_v11  ;;  %v708_v28 = vunpack.c.l.b16 %v503_v18 }
 0x122   : > { %844 = vmatpush.bf16.msrb.mxu1 %v835_v10 }
 0x123   : > { %v446_v19 = vpop.f32.mrf.mxu0 }
 0x124   : > { %v504_v24 = vpack.c.bf16 %v446_v19, %v446_v19 }
 0x126   : > { %v709_v29 = vunpack.c.l.b16 %v504_v24 }
 0x128   : > { %v710_v33 = vpack.c.b16 %v709_v29, %v708_v28 }
 0x12a   : > { %719 = vmatpush.bf16.msrb.mxu2 %v710_v33 }
 0x12d   : > { %1056 = vmatmul.msk.bf16.vlgmr.msrb.gmra.mxu2 %vm351_vm0, %v1351_v6  ;;  %1062 = vmatmul.msk.bf16.vlgmr.msra.gmra.mxu1 %vm351_vm0, %v1351_v6 }
 0x12e   : > { %794 = vmatpush.bf16.msra.mxu2 %v785_v34  ;;  %1068 = vmatmul.msk.bf16.vlgmr.msra.gmra.mxu3 %vm351_vm0, %v1351_v6 }
 0x12f   : > { %919 = vmatpush.bf16.msra.mxu1 %v910_v35 }
 0x132   : > { %869 = vmatpush.bf16.msrb.mxu2 %v860_v36 }
 0x13a   : > { %v546_v26 = vpop.f32.mrf.mxu1 }
 0x13b   : > { %v551_v31 = vpack.c.bf16 %v546_v26, %v546_v26 }
 0x13d   : > { %1065 = vmatmul.msk.bf16.vlgmr.msra.gmra.mxu2 %vm351_vm0, %v1351_v6  ;;  %1071 = vmatmul.msk.bf16.vlgmr.msrb.gmra.mxu1 %vm351_vm0, %v1351_v6  ;;  %554 = vst.msk [vmem:[%s1406_s7] sm:$0xf] %vm553_vm1, %v551_v31 }
 0x13e   : > { %1077 = vmatmul.msk.bf16.vlgmr.msrb.gmra.mxu3 %vm351_vm0, %v1351_v6 }
 0x142   : > { %v548_v38 = vpop.f32.mrf.mxu1 }
 0x143   : > { %v552_v40 = vpack.c.bf16 %v548_v38, %v548_v38 }
 0x145   : > { %555 = vst.msk [vmem:[%s1406_s7 + $0x4] sm:$0xf] %vm553_vm1, %v552_v40 }
 0x14d   : > { %1074 = vmatmul.msk.bf16.vlgmr.msrb.gmra.mxu2 %vm351_vm0, %v1351_v6  ;;  %1080 = vmatmul.msk.bf16.vlgmr.msra.gmra.mxu1 %vm351_vm0, %v1351_v6 }
 0x150   : > { %v571_v37 = vpop.f32.mrf.mxu2 }
 0x151   : > { %v576_v6 = vpack.c.bf16 %v571_v37, %v571_v37 }
 0x153   : > { %1039 = vst.msk [vmem:[%s1406_s7 + $0x8] sm:$0xf] %vm553_vm1, %v576_v6 }
 0x158   : > { %v573_v42 = vpop.f32.mrf.mxu2 }
 0x159   : > { %v577_v43 = vpack.c.bf16 %v573_v42, %v573_v42 }
 0x15b   : > { %1040 = vst.msk [vmem:[%s1406_s7 + $0xc] sm:$0xf] %vm553_vm1, %v577_v43 }
 0x160   : > { %v596_v39 = vpop.f32.mrf.mxu3 }
 0x161   : > { %v601_v41 = vpack.c.bf16 %v596_v39, %v596_v39 }
 0x163   : > { %1042 = vst.msk [vmem:[%s1406_s7 + $0x10] sm:$0xf] %vm553_vm1, %v601_v41 }
 0x168   : > { %v598_v44 = vpop.f32.mrf.mxu3 }
 0x169   : > { %v602_v45 = vpack.c.bf16 %v598_v44, %v598_v44 }
 0x16a   : > { %v621_v46 = vpop.f32.mrf.mxu1 }
 0x16b   : > { %v626_v47 = vpack.c.bf16 %v621_v46, %v621_v46  ;;  %1043 = vst.msk [vmem:[%s1406_s7 + $0x14] sm:$0xf] %vm553_vm1, %v602_v45 }
 0x16d   : > { %1045 = vst.msk [vmem:[%s1406_s7 + $0x18] sm:$0xf] %vm553_vm1, %v626_v47 }
 0x172   : > { %v623_v48 = vpop.f32.mrf.mxu1 }
 0x173   : > { %v627_v49 = vpack.c.bf16 %v623_v48, %v623_v48 }
 0x175   : > { %1046 = vst.msk [vmem:[%s1406_s7 + $0x1c] sm:$0xf] %vm553_vm1, %v627_v49 }
 0x180   : > { %v646_v50 = vpop.f32.mrf.mxu2 }
 0x181   : > { %v651_v51 = vpack.c.bf16 %v646_v50, %v646_v50 }
 0x183   : > { %1048 = vst.msk [vmem:[%s1406_s7 + $0x20] sm:$0xf] %vm553_vm1, %v651_v51 }
 0x188   : > { %v648_v52 = vpop.f32.mrf.mxu2 }
 0x189   : > { %v652_v53 = vpack.c.bf16 %v648_v52, %v648_v52 }
 0x18b   : > { %1049 = vst.msk [vmem:[%s1406_s7 + $0x24] sm:$0xf] %vm553_vm1, %v652_v53 }
 0x190   : > { %v671_v54 = vpop.f32.mrf.mxu3 }
 0x191   : > { %v676_v55 = vpack.c.bf16 %v671_v54, %v671_v54 }
 0x193   : > { %1051 = vst.msk [vmem:[%s1406_s7 + $0x28] sm:$0xf] %vm553_vm1, %v676_v55 }
 0x198   : > { %v673_v56 = vpop.f32.mrf.mxu3 }
 0x199   : > { %v677_v57 = vpack.c.bf16 %v673_v56, %v673_v56 }
 0x19a   : > { %v696_v58 = vpop.f32.mrf.mxu1 }
 0x19b   : > { %v701_v59 = vpack.c.bf16 %v696_v58, %v696_v58  ;;  %1052 = vst.msk [vmem:[%s1406_s7 + $0x2c] sm:$0xf] %vm553_vm1, %v677_v57 }
 0x19d   : > { %1054 = vst.msk [vmem:[%s1406_s7 + $0x30] sm:$0xf] %vm553_vm1, %v701_v59 }
 0x1a0   : > { %v746_v60 = vpop.f32.mrf.mxu3 }
 0x1a1   : > { %v751_v61 = vpack.c.bf16 %v746_v60, %v746_v60 }
 0x1a2   : > { %v698_v62 = vpop.f32.mrf.mxu1 }
 0x1a3   : > { %v702_v63 = vpack.c.bf16 %v698_v62, %v698_v62  ;;  %1060 = vst.msk [vmem:[%s1406_s7 + $0x40] sm:$0xf] %vm553_vm1, %v751_v61 }
 0x1a5   : > { %1055 = vst.msk [vmem:[%s1406_s7 + $0x34] sm:$0xf] %vm553_vm1, %v702_v63 }
 0x1a8   : > { %v748_v0 = vpop.f32.mrf.mxu3 }
 0x1a9   : > { %v752_v1 = vpack.c.bf16 %v748_v0, %v748_v0 }
 0x1aa   : > { %v771_v2 = vpop.f32.mrf.mxu1 }
 0x1ab   : > { %v776_v3 = vpack.c.bf16 %v771_v2, %v771_v2  ;;  %1061 = vst.msk [vmem:[%s1406_s7 + $0x44] sm:$0xf] %vm553_vm1, %v752_v1 }
 0x1ad   : > { %1063 = vst.msk [vmem:[%s1406_s7 + $0x48] sm:$0xf] %vm553_vm1, %v776_v3 }
 0x1b0   : > { %v721_v4 = vpop.f32.mrf.mxu2 }
 0x1b1   : > { %v726_v5 = vpack.c.bf16 %v721_v4, %v721_v4  ;;  %v821_v7 = vpop.f32.mrf.mxu3 }
 0x1b2   : > { %v773_v8 = vpop.f32.mrf.mxu1  ;;  %v826_v9 = vpack.c.bf16 %v821_v7, %v821_v7 }
 0x1b3   : > { %1057 = vst.msk [vmem:[%s1406_s7 + $0x38] sm:$0xf] %vm553_vm1, %v726_v5  ;;  %v777_v10 = vpack.c.bf16 %v773_v8, %v773_v8 }
 0x1b4   : > { %1069 = vst.msk [vmem:[%s1406_s7 + $0x58] sm:$0xf] %vm553_vm1, %v826_v9 }
 0x1b5   : > { %1064 = vst.msk [vmem:[%s1406_s7 + $0x4c] sm:$0xf] %vm553_vm1, %v777_v10 }
 0x1b8   : > { %v723_v11 = vpop.f32.mrf.mxu2 }
 0x1b9   : > { %v727_v12 = vpack.c.bf16 %v723_v11, %v723_v11  ;;  %v823_v13 = vpop.f32.mrf.mxu3 }
 0x1ba   : > { %v846_v15 = vpop.f32.mrf.mxu1  ;;  %v827_v16 = vpack.c.bf16 %v823_v13, %v823_v13 }
 0x1bb   : > { %1058 = vst.msk [vmem:[%s1406_s7 + $0x3c] sm:$0xf] %vm553_vm1, %v727_v12  ;;  %v851_v18 = vpack.c.bf16 %v846_v15, %v846_v15 }
 0x1bc   : > { %1070 = vst.msk [vmem:[%s1406_s7 + $0x5c] sm:$0xf] %vm553_vm1, %v827_v16 }
 0x1bd   : > { %1072 = vst.msk [vmem:[%s1406_s7 + $0x60] sm:$0xf] %vm553_vm1, %v851_v18 }
 0x1c0   : > { %v796_v19 = vpop.f32.mrf.mxu2 }
 0x1c1   : > { %v801_v20 = vpack.c.bf16 %v796_v19, %v796_v19  ;;  %v896_v21 = vpop.f32.mrf.mxu3 }
 0x1c2   : > { %v848_v22 = vpop.f32.mrf.mxu1  ;;  %v901_v23 = vpack.c.bf16 %v896_v21, %v896_v21 }
 0x1c3   : > { %1066 = vst.msk [vmem:[%s1406_s7 + $0x50] sm:$0xf] %vm553_vm1, %v801_v20  ;;  %v852_v24 = vpack.c.bf16 %v848_v22, %v848_v22 }
 0x1c4   : > { %1078 = vst.msk [vmem:[%s1406_s7 + $0x70] sm:$0xf] %vm553_vm1, %v901_v23 }
 0x1c5   : > { %1073 = vst.msk [vmem:[%s1406_s7 + $0x64] sm:$0xf] %vm553_vm1, %v852_v24 }
 0x1c8   : > { %v798_v25 = vpop.f32.mrf.mxu2 }
 0x1c9   : > { %v802_v27 = vpack.c.bf16 %v798_v25, %v798_v25  ;;  %v898_v28 = vpop.f32.mrf.mxu3 }
 0x1ca   : > { %v921_v29 = vpop.f32.mrf.mxu1  ;;  %v902_v14 = vpack.c.bf16 %v898_v28, %v898_v28 }
 0x1cb   : > { %1067 = vst.msk [vmem:[%s1406_s7 + $0x54] sm:$0xf] %vm553_vm1, %v802_v27  ;;  %v926_v30 = vpack.c.bf16 %v921_v29, %v921_v29 }
 0x1cc   : > { %1079 = vst.msk [vmem:[%s1406_s7 + $0x74] sm:$0xf] %vm553_vm1, %v902_v14 }
 0x1cd   : > { %1081 = vst.msk [vmem:[%s1406_s7 + $0x78] sm:$0xf] %vm553_vm1, %v926_v30 }
 0x1d0   : > { %v871_v32 = vpop.f32.mrf.mxu2 }
 0x1d1   : > { %v876_v17 = vpack.c.bf16 %v871_v32, %v871_v32 }
 0x1d2   : > { %v923_v33 = vpop.f32.mrf.mxu1 }
 0x1d3   : > { %1075 = vst.msk [vmem:[%s1406_s7 + $0x68] sm:$0xf] %vm553_vm1, %v876_v17  ;;  %v927_v34 = vpack.c.bf16 %v923_v33, %v923_v33 }
 0x1d5   : > { %1082 = vst.msk [vmem:[%s1406_s7 + $0x7c] sm:$0xf] %vm553_vm1, %v927_v34 }
 0x1d8   : > { %v873_v35 = vpop.f32.mrf.mxu2 }
 0x1d9   : > { %v877_v36 = vpack.c.bf16 %v873_v35, %v873_v35 }
 0x1db   : > { %1076 = vst.msk [vmem:[%s1406_s7 + $0x6c] sm:$0xf] %vm553_vm1, %v877_v36 }
 0x1dc PF: > { %p13_p7 = scmp.ge.s32.totalorder %s1242_s17, 4   ;;  %s1492_s12 = smov %s1190_s13 }
 0x1dd   : > { %s1493_s13 = smov %s1194_s14  ;;  %s1494_s14 = smov %s1252_s20 }
 0x1de   : > { %s1495_s15 = smov %s1242_s17  ;;  %15 = sbr.rel (!%p13_p7) target bundleno = 3 (0x3), region = 87 }
 0x1e3   :  { %955 = vsyncpa [#allocation3], 1 }
 0x1e4   :  { %957 = vsyncpa [#allocation3 + $0x1], 1 }

// kernel: freqlc_block_forward.8
= control target key start
LH: loop header
LB: loop body
LE: loop exit
PB: predicated region body
PF: predicated region fallthrough
CT: control target
= control target key end

     0   :  { %s1554_s9 = smov 0   ;;  %s1556_s10 = smov 0   ;;  %s2296_s0 = inlined_call_operand.vmem [shape: bf16[2,16,16,48], index: 0, kind: input, shape index: {}]   ;;  %s2297_s1 = inlined_call_operand.vmem [shape: f32[9,48], index: 1, kind: input, shape index: {}]   ;;  %s2298_s2 = inlined_call_operand.vmem [shape: bf16[2,16,16,48], index: 2, kind: output, shape index: {}]  }
   0x1   :  { %s1558_s11 = smov 0  }
   0x2 LB: > { %s24_s12 = sadd.s32 1, %s1532_s10  ;;  %p1383_p0 = scmp.ge.s32.totalorder %s1536_s11, 1  ;;  %s1536_s11 = sphi %s1558_s11, %s12_s11   ;;  %s1532_s10 = sphi %s1556_s10, %s2300_s10   ;;  %s1528_s9 = sphi %s1554_s9, %s2299_s9  }
   0x3   : > { %p26_p1 = scmp.ge.s32.totalorder %s24_s12, 2  ;;  %p140_p2 = scmp.lt.s32.totalorder %s1536_s11, 3 }
   0x5   : > { %s2302_s12 = smov (%p26_p1, %s24_s12), 0  ;;  %p141_p3 = pnand %p1383_p0, %p140_p2 }
   0x6   : > { %p172_p4 = scmp.lt.s32.totalorder (!%p141_p3), %s1528_s9, 1 }
   0x7   : > { %144 = sbr.rel (%p141_p3) target bundleno = 212 (0xd4), region = 28 }
   0xc   : > { %vm192_vm0 = vcmask 392192   ;;  %v1538_v0 = vmov 0.0   ;;  %vm195_vm1 = vcmask 386048   ;;  %vm202_vm2 = vcmask 385024   ;;  %s2304_s9 = smov (!%p172_p4, %s1528_s9), 1 }
   0xd   : > { %193 = vst.msk [vmem:[#allocation2] sm:$0xff] %vm192_vm0, %v1538_v0  ;;  %s1390_s13 = sshll.u32 %s2304_s9, 7  ;;  %v1638_v13 = vld [vmem:[%s2297_s1] ss:$0 sm:$0xff]  ;;  %v1644_v16 = vld [vmem:[%s2297_s1 + $0x1] ss:$0 sm:$0xff] }
   0xe   : > { %194 = vst.msk [vmem:[#allocation2 + $0x8] sm:$0xff] %vm192_vm0, %v1538_v0  ;;  %s1611_s16 = scalar_lea.vmem %s2296_s0, %s1390_s13  ;;  %v1649_v18 = vld [vmem:[%s2297_s1 + $0x2] ss:$0 sm:$0xff]  ;;  %v1684_v41 = vld [vmem:[%s2297_s1 + $0x3] ss:$0 sm:$0xff]  ;;  %vm1246_vm3 = vcmask 388096   ;;  %s1892_s14 = scalar_lea.vmem %s2298_s2, %s1390_s13 }
   0xf   : > { %198 = vst.msk [vmem:[#allocation2 + $0x198] sm:$0xff] %vm192_vm0, %v1538_v0  ;;  %v1393_v1 = vld [vmem:[%s1611_s16] sm:$0xff]   ;;  %v1456_v2 = vld [vmem:[%s1611_s16 + $0x8] sm:$0xff]   ;;  %v1457_v5 = vld [vmem:[%s1611_s16 + $0x10] sm:$0xff]  }
  0x10   : > { %199 = vst.msk [vmem:[#allocation2 + $0x1a0] sm:$0xff] %vm192_vm0, %v1538_v0  ;;  %v1394_v3 = vunpack.c.l.bf16 %v1393_v1  ;;  %v1395_v4 = vunpack.c.h.bf16 %v1393_v1  ;;  %v1458_v6 = vld [vmem:[%s1611_s16 + $0x18] sm:$0xff]   ;;  %v1398_v7 = vunpack.c.l.bf16 %v1456_v2  ;;  %v1626_v8 = vld [vmem:[%s1611_s16 + $0x20] sm:$0xff]   ;;  %v1629_v9 = vld [vmem:[%s1611_s16 + $0x28] sm:$0xff]   ;;  %v1399_v11 = vunpack.c.h.bf16 %v1456_v2 }
  0x11   : > { %196 = vst.msk [vmem:[#allocation2 + $0x10] sm:$0x3] %vm195_vm1, %v1538_v0  ;;  %v1632_v10 = vld [vmem:[%s1611_s16 + $0x30] sm:$0xff]   ;;  %v1402_v15 = vunpack.c.l.bf16 %v1457_v5  ;;  %v1403_v19 = vunpack.c.h.bf16 %v1457_v5  ;;  %v1406_v20 = vunpack.c.l.bf16 %v1458_v6  ;;  %v1407_v21 = vunpack.c.h.bf16 %v1458_v6  ;;  %v1653_v22 = vld [vmem:[%s1611_s16 + $0x38] sm:$0xff]   ;;  %v1660_v26 = vld [vmem:[%s1611_s16 + $0x40] sm:$0xff]  }
  0x12   : > { %200 = vst.msk [vmem:[#allocation2 + $0x1a8] sm:$0x3] %vm195_vm1, %v1538_v0  ;;  %v1410_v24 = vunpack.c.l.bf16 %v1626_v8  ;;  %v1411_v25 = vunpack.c.h.bf16 %v1626_v8  ;;  %v1414_v30 = vunpack.c.l.bf16 %v1629_v9  ;;  %v1415_v31 = vunpack.c.h.bf16 %v1629_v9  ;;  %v1669_v33 = vld [vmem:[%s1611_s16 + $0x48] sm:$0xff]   ;;  %v1672_v34 = vld [vmem:[%s1611_s16 + $0x50] sm:$0xff]   ;;  %v1679_v39 = vld [vmem:[%s1611_s16 + $0x58] sm:$0xff]  }
  0x13   : > { %203 = vst.msk [vmem:[#allocation2 + $0x18] sm:$0x1] %vm202_vm2, %v1538_v0  ;;  %v1418_v32 = vunpack.c.l.bf16 %v1632_v10  ;;  %v1419_v37 = vunpack.c.h.bf16 %v1632_v10  ;;  %v1422_v38 = vunpack.c.l.bf16 %v1653_v22  ;;  %v1423_v44 = vunpack.c.h.bf16 %v1653_v22  ;;  %v1692_v47 = vld [vmem:[%s1611_s16 + $0x60] sm:$0xff]   ;;  %v1699_v51 = vld [vmem:[%s1611_s16 + $0x68] sm:$0xff]   ;;  %v1702_v52 = vld [vmem:[%s1611_s16 + $0x70] sm:$0xff]  }
  0x14   : > { %204 = vst.msk [vmem:[#allocation2 + $0x30] sm:$0x1] %vm202_vm2, %v1538_v0  ;;  %v332_v12 = vld [vmem:[#allocation2] sm:$0xff]  ;;  %v1426_v45 = vunpack.c.l.bf16 %v1660_v26  ;;  %v1427_v46 = vunpack.c.h.bf16 %v1660_v26  ;;  %v1430_v49 = vunpack.c.l.bf16 %v1669_v33  ;;  %v1431_v50 = vunpack.c.h.bf16 %v1669_v33  ;;  %v1715_v60 = vld [vmem:[%s1611_s16 + $0x78] sm:$0xff]  }
  0x15   : > { %205 = vst.msk [vmem:[#allocation2 + $0x48] sm:$0x1] %vm202_vm2, %v1538_v0  ;;  %v430_v14 = vld [vmem:[#allocation2 + $0x1] sm:$0xff]  ;;  %v365_v23 = vmul.f32 %v1638_v13, %v332_v12  ;;  %v1434_v56 = vunpack.c.l.bf16 %v1672_v34  ;;  %v1435_v57 = vunpack.c.h.bf16 %v1672_v34  ;;  %v1438_v58 = vunpack.c.l.bf16 %v1679_v39 }
  0x16   : > { %206 = vst.msk [vmem:[#allocation2 + $0x60] sm:$0x1] %vm202_vm2, %v1538_v0  ;;  %v528_v17 = vld [vmem:[#allocation2 + $0x2] sm:$0xff]  ;;  %v463_v27 = vmul.f32 %v1644_v16, %v430_v14  ;;  %v1439_v59 = vunpack.c.h.bf16 %v1679_v39  ;;  %v1442_v63 = vunpack.c.l.bf16 %v1692_v47  ;;  %v1443_v6 = vunpack.c.h.bf16 %v1692_v47 }
  0x17   : > { %207 = vst.msk [vmem:[#allocation2 + $0x78] sm:$0x1] %vm202_vm2, %v1538_v0  ;;  %v561_v28 = vmul.f32 %v1649_v18, %v528_v17  ;;  %v333_v29 = vld [vmem:[#allocation2 + $0x8] sm:$0xff]  ;;  %v1707_v54 = vld [vmem:[%s2297_s1 + $0x4] ss:$0 sm:$0xff]  ;;  %v1447_v14 = vunpack.c.h.bf16 %v1699_v51 }
  0x18   : > { %208 = vst.msk [vmem:[#allocation2 + $0x90] sm:$0x1] %vm202_vm2, %v1538_v0  ;;  %v366_v35 = vmul.f32 %v1638_v13, %v333_v29  ;;  %v431_v36 = vld [vmem:[#allocation2 + $0x9] sm:$0xff]  ;;  %v495_v40 = vadd.f32 %v463_v27, %v365_v23  ;;  %v1723_v1 = vld [vmem:[%s2297_s1 + $0x5] ss:$0 sm:$0xff] }
  0x19   : > { %209 = vst.msk [vmem:[#allocation2 + $0xa8] sm:$0x1] %vm202_vm2, %v1538_v0  ;;  %v464_v42 = vmul.f32 %v1644_v16, %v431_v36  ;;  %v529_v43 = vld [vmem:[#allocation2 + $0xa] sm:$0xff]  ;;  %v1732_v9 = vld [vmem:[%s2297_s1 + $0x6] ss:$0 sm:$0xff] }
  0x1a   : > { %210 = vst.msk [vmem:[#allocation2 + $0xc0] sm:$0x1] %vm202_vm2, %v1538_v0  ;;  %v562_v48 = vmul.f32 %v1649_v18, %v529_v43  ;;  %v593_v53 = vadd.f32 %v561_v28, %v495_v40  ;;  %v1756_v36 = vld [vmem:[%s2297_s1 + $0x8] ss:$0 sm:$0xff]  ;;  %v1455_v43 = vunpack.c.h.bf16 %v1715_v60 }
  0x1b   : > { %211 = vst.msk [vmem:[#allocation2 + $0xd8] sm:$0x1] %vm202_vm2, %v1538_v0  ;;  %v496_v55 = vadd.f32 %v464_v42, %v366_v35 }
  0x1c   : > { %212 = vst.msk [vmem:[#allocation2 + $0xf0] sm:$0x1] %vm202_vm2, %v1538_v0 }
  0x1d   : > { %213 = vst.msk [vmem:[#allocation2 + $0x108] sm:$0x1] %vm202_vm2, %v1538_v0  ;;  %v594_v2 = vadd.f32 %v562_v48, %v496_v55 }
  0x1e   : > { %214 = vst.msk [vmem:[#allocation2 + $0x120] sm:$0x1] %vm202_vm2, %v1538_v0 }
  0x1f   : > { %215 = vst.msk [vmem:[#allocation2 + $0x138] sm:$0x1] %vm202_vm2, %v1538_v0 }
  0x20   : > { %216 = vst.msk [vmem:[#allocation2 + $0x150] sm:$0x1] %vm202_vm2, %v1538_v0 }
  0x21   : > { %217 = vst.msk [vmem:[#allocation2 + $0x168] sm:$0x1] %vm202_vm2, %v1538_v0 }
  0x22   : > { %218 = vst.msk [vmem:[#allocation2 + $0x180] sm:$0x1] %vm202_vm2, %v1538_v0 }
  0x23   : > { %219 = vst.msk [vmem:[#allocation2 + $0x29] sm:$0x1] %vm202_vm2, %v1538_v0 }
  0x24   : > { %220 = vst.msk [vmem:[#allocation2 + $0x41] sm:$0x1] %vm202_vm2, %v1538_v0 }
  0x25   : > { %221 = vst.msk [vmem:[#allocation2 + $0x59] sm:$0x1] %vm202_vm2, %v1538_v0 }
  0x26   : > { %222 = vst.msk [vmem:[#allocation2 + $0x71] sm:$0x1] %vm202_vm2, %v1538_v0 }
  0x27   : > { %223 = vst.msk [vmem:[#allocation2 + $0x89] sm:$0x1] %vm202_vm2, %v1538_v0 }
  0x28   : > { %224 = vst.msk [vmem:[#allocation2 + $0xa1] sm:$0x1] %vm202_vm2, %v1538_v0 }
  0x29   : > { %225 = vst.msk [vmem:[#allocation2 + $0xb9] sm:$0x1] %vm202_vm2, %v1538_v0 }
  0x2a   : > { %226 = vst.msk [vmem:[#allocation2 + $0xd1] sm:$0x1] %vm202_vm2, %v1538_v0 }
  0x2b   : > { %227 = vst.msk [vmem:[#allocation2 + $0xe9] sm:$0x1] %vm202_vm2, %v1538_v0 }
  0x2c   : > { %228 = vst.msk [vmem:[#allocation2 + $0x101] sm:$0x1] %vm202_vm2, %v1538_v0 }
  0x2d   : > { %229 = vst.msk [vmem:[#allocation2 + $0x119] sm:$0x1] %vm202_vm2, %v1538_v0 }
  0x2e   : > { %230 = vst.msk [vmem:[#allocation2 + $0x131] sm:$0x1] %vm202_vm2, %v1538_v0 }
  0x2f   : > { %231 = vst.msk [vmem:[#allocation2 + $0x149] sm:$0x1] %vm202_vm2, %v1538_v0 }
  0x30   : > { %232 = vst.msk [vmem:[#allocation2 + $0x161] sm:$0x1] %vm202_vm2, %v1538_v0 }
  0x31   : > { %233 = vst.msk [vmem:[#allocation2 + $0x179] sm:$0x1] %vm202_vm2, %v1538_v0 }
  0x32   : > { %234 = vst.msk [vmem:[#allocation2 + $0x191] sm:$0x1] %vm202_vm2, %v1538_v0 }
  0x33   : > { %299 = vst.msk [vmem:[#allocation2 + $0x19] sm:$0xff] %vm192_vm0, %v1394_v3 }
  0x34   : > { %300 = vst.msk [vmem:[#allocation2 + $0x21] sm:$0xff] %vm192_vm0, %v1395_v4 }
  0x35   : > { %301 = vst.msk [vmem:[#allocation2 + $0x31] sm:$0xff] %vm192_vm0, %v1398_v7  ;;  %v1446_v7 = vunpack.c.l.bf16 %v1699_v51 }
  0x36   : > { %302 = vst.msk [vmem:[#allocation2 + $0x39] sm:$0xff] %vm192_vm0, %v1399_v11 }
  0x37   : > { %303 = vst.msk [vmem:[#allocation2 + $0x49] sm:$0xff] %vm192_vm0, %v1402_v15  ;;  %v1450_v15 = vunpack.c.l.bf16 %v1702_v52 }
  0x38   : > { %304 = vst.msk [vmem:[#allocation2 + $0x51] sm:$0xff] %vm192_vm0, %v1403_v19 }
  0x39   : > { %305 = vst.msk [vmem:[#allocation2 + $0x61] sm:$0xff] %vm192_vm0, %v1406_v20 }
  0x3a   : > { %306 = vst.msk [vmem:[#allocation2 + $0x69] sm:$0xff] %vm192_vm0, %v1407_v21  ;;  %v626_v61 = vld [vmem:[#allocation2 + $0x18] sm:$0xff]  ;;  %v1743_v21 = vld [vmem:[%s2297_s1 + $0x7] ss:$0 sm:$0xff] }
  0x3b   : > { %v724_v62 = vld [vmem:[#allocation2 + $0x19] sm:$0xff]  ;;  %307 = vst.msk [vmem:[#allocation2 + $0x79] sm:$0xff] %vm192_vm0, %v1410_v24  ;;  %v659_v0 = vmul.f32 %v1684_v41, %v626_v61  ;;  %v725_v4 = vld [vmem:[#allocation2 + $0x21] sm:$0xff]  ;;  %v367_v5 = vmul.f32 %v1638_v13, %v626_v61  ;;  %v1451_v24 = vunpack.c.h.bf16 %v1702_v52 }
  0x3c   : > { %v627_v3 = vld [vmem:[#allocation2 + $0x20] sm:$0xff]  ;;  %308 = vst.msk [vmem:[#allocation2 + $0x81] sm:$0xff] %vm192_vm0, %v1411_v25  ;;  %v465_v12 = vmul.f32 %v1644_v16, %v724_v62  ;;  %v757_v19 = vmul.f32 %v1707_v54, %v724_v62  ;;  %v921_v20 = vld [vmem:[#allocation2 + $0x30] sm:$0xff]  ;;  %v1454_v25 = vunpack.c.l.bf16 %v1715_v60  ;;  %v758_v29 = vmul.f32 %v1707_v54, %v725_v4 }
  0x3d   : > { %v822_v8 = vld [vmem:[#allocation2 + $0x1a] sm:$0xff]  ;;  %v660_v11 = vmul.f32 %v1684_v41, %v627_v3  ;;  %309 = vst.msk [vmem:[#allocation2 + $0x91] sm:$0xff] %vm192_vm0, %v1414_v30  ;;  %v691_v17 = vadd.f32 %v659_v0, %v593_v53  ;;  %v823_v23 = vld [vmem:[#allocation2 + $0x22] sm:$0xff]  ;;  %v1019_v27 = vld [vmem:[#allocation2 + $0x31] sm:$0xff] }
  0x3e   : > { %310 = vst.msk [vmem:[#allocation2 + $0x99] sm:$0xff] %vm192_vm0, %v1415_v31  ;;  %v855_v35 = vmul.f32 %v1723_v1, %v822_v8  ;;  %v1758_v31 = vld [vmem:[#allocation2 + $0x38] sm:$0xff]  ;;  %v497_v40 = vadd.f32 %v465_v12, %v367_v5  ;;  %v563_v42 = vmul.f32 %v1649_v18, %v822_v8  ;;  %v856_v55 = vmul.f32 %v1723_v1, %v823_v23 }
  0x3f   : > { %v692_v28 = vadd.f32 %v660_v11, %v594_v2  ;;  %311 = vst.msk [vmem:[#allocation2 + $0xa9] sm:$0xff] %vm192_vm0, %v1418_v32  ;;  %v789_v30 = vadd.f32 %v757_v19, %v691_v17  ;;  %v954_v32 = vmul.f32 %v1732_v9, %v921_v20  ;;  %v1117_v48 = vld [vmem:[#allocation2 + $0x32] sm:$0xff]  ;;  %v1052_v62 = vmul.f32 %v1743_v21, %v1019_v27  ;;  %v1779_v8 = vld [vmem:[#allocation2 + $0x3a] sm:$0xff] }
  0x40   : > { %312 = vst.msk [vmem:[#allocation2 + $0xb1] sm:$0xff] %vm192_vm0, %v1419_v37  ;;  %v1771_v0 = vld [vmem:[#allocation2 + $0x39] sm:$0xff]  ;;  %v595_v10 = vadd.f32 %v563_v42, %v497_v40  ;;  %v661_v37 = vmul.f32 %v1684_v41, %v921_v20  ;;  %v955_v5 = vmul.f32 %v1732_v9, %v1758_v31  ;;  %v466_v11 = vmul.f32 %v1644_v16, %v725_v4  ;;  %v1795_v4 = vld [vmem:[#allocation2 + $0x49] sm:$0xff] }
  0x41   : > { %v790_v53 = vadd.f32 %v758_v29, %v692_v28  ;;  %313 = vst.msk [vmem:[#allocation2 + $0xc1] sm:$0xff] %vm192_vm0, %v1422_v38  ;;  %v887_v61 = vadd.f32 %v855_v35, %v789_v30  ;;  %v368_v38 = vmul.f32 %v1638_v13, %v627_v3  ;;  %v1150_v17 = vmul.f32 %v1756_v36, %v1117_v48  ;;  %v1793_v28 = vld [vmem:[#allocation2 + $0x48] sm:$0xff]  ;;  %v1836_v34 = vld [vmem:[#allocation2 + $0x52] sm:$0xff] }
  0x42   : > { %314 = vst.msk [vmem:[#allocation2 + $0xc9] sm:$0xff] %vm192_vm0, %v1423_v44  ;;  %v693_v22 = vadd.f32 %v661_v37, %v595_v10  ;;  %v759_v44 = vmul.f32 %v1707_v54, %v1019_v27  ;;  %v1053_v3 = vmul.f32 %v1743_v21, %v1771_v0  ;;  %v1151_v26 = vmul.f32 %v1756_v36, %v1779_v8  ;;  %v1804_v40 = vld [vmem:[#allocation2 + $0x4a] sm:$0xff] }
  0x43   : > { %v888_v2 = vadd.f32 %v856_v55, %v790_v53  ;;  %315 = vst.msk [vmem:[#allocation2 + $0xd9] sm:$0xff] %vm192_vm0, %v1426_v45  ;;  %v986_v12 = vadd.f32 %v954_v32, %v887_v61  ;;  %v498_v29 = vadd.f32 %v466_v11, %v368_v38  ;;  %v564_v45 = vmul.f32 %v1649_v18, %v823_v23  ;;  %v1819_v61 = vld [vmem:[#allocation2 + $0x50] sm:$0xff] }
  0x44   : > { %316 = vst.msk [vmem:[#allocation2 + $0xe1] sm:$0xff] %vm192_vm0, %v1427_v46  ;;  %v791_v46 = vadd.f32 %v759_v44, %v693_v22  ;;  %v857_v35 = vmul.f32 %v1723_v1, %v1117_v48  ;;  %v662_v23 = vmul.f32 %v1684_v41, %v1758_v31  ;;  %v956_v55 = vmul.f32 %v1732_v9, %v1793_v28 }
  0x45   : > { %v987_v19 = vadd.f32 %v955_v5, %v888_v2  ;;  %317 = vst.msk [vmem:[#allocation2 + $0xf1] sm:$0xff] %vm192_vm0, %v1430_v49  ;;  %v1084_v30 = vadd.f32 %v1052_v62, %v986_v12  ;;  %v596_v32 = vadd.f32 %v564_v45, %v498_v29  ;;  %v369_v49 = vmul.f32 %v1638_v13, %v921_v20 }
  0x46   : > { %318 = vst.msk [vmem:[#allocation2 + $0xf9] sm:$0xff] %vm192_vm0, %v1431_v50  ;;  %v889_v53 = vadd.f32 %v857_v35, %v791_v46  ;;  %v1054_v33 = vmul.f32 %v1743_v21, %v1795_v4  ;;  %v1821_v50 = vld [vmem:[#allocation2 + $0x51] sm:$0xff]  ;;  %v467_v62 = vmul.f32 %v1644_v16, %v1019_v27  ;;  %v760_v10 = vmul.f32 %v1707_v54, %v1771_v0  ;;  %v1874_v46 = vld [vmem:[#allocation2 + $0x62] sm:$0xff] }
  0x47   : > { %v1085_v42 = vadd.f32 %v1053_v3, %v987_v19  ;;  %319 = vst.msk [vmem:[#allocation2 + $0x109] sm:$0xff] %vm192_vm0, %v1434_v56  ;;  %v1152_v56 = vmul.f32 %v1756_v36, %v1804_v40  ;;  %v694_v20 = vadd.f32 %v662_v23, %v596_v32  ;;  %v858_v37 = vmul.f32 %v1723_v1, %v1779_v8  ;;  %v1862_v3 = vld [vmem:[#allocation2 + $0x61] sm:$0xff] }
  0x48   : > { %320 = vst.msk [vmem:[#allocation2 + $0x111] sm:$0xff] %vm192_vm0, %v1435_v57  ;;  %v1182_v27 = vadd.f32 %v1150_v17, %v1084_v30  ;;  %v988_v2 = vadd.f32 %v956_v55, %v889_v53  ;;  %v499_v57 = vadd.f32 %v467_v62, %v369_v49  ;;  %v565_v5 = vmul.f32 %v1649_v18, %v1117_v48 }
  0x49   : > { %321 = vst.msk [vmem:[#allocation2 + $0x121] sm:$0xff] %vm192_vm0, %v1438_v58  ;;  %v1183_v38 = vadd.f32 %v1151_v26, %v1085_v42  ;;  %v792_v11 = vadd.f32 %v760_v10, %v694_v20  ;;  %v957_v12 = vmul.f32 %v1732_v9, %v1819_v61  ;;  %v1055_v22 = vmul.f32 %v1743_v21, %v1821_v50 }
  0x4a   : > { %322 = vst.msk [vmem:[#allocation2 + $0x129] sm:$0xff] %vm192_vm0, %v1439_v59  ;;  %v1086_v58 = vadd.f32 %v1054_v33, %v988_v2  ;;  %v597_v17 = vadd.f32 %v565_v5, %v499_v57  ;;  %v663_v48 = vmul.f32 %v1684_v41, %v1793_v28  ;;  %v370_v39 = vmul.f32 %v1638_v13, %v1758_v31  ;;  %v1024_v33 = vld [vmem:[#allocation2 + $0x69] sm:$0xff] }
  0x4b   : > { %323 = vst.msk [vmem:[#allocation2 + $0x139] sm:$0xff] %vm192_vm0, %v1442_v63  ;;  %v890_v59 = vadd.f32 %v858_v37, %v792_v11  ;;  %v1153_v44 = vmul.f32 %v1756_v36, %v1836_v34  ;;  %v761_v19 = vmul.f32 %v1707_v54, %v1795_v4  ;;  %v1860_v63 = vld [vmem:[#allocation2 + $0x60] sm:$0xff]  ;;  %v468_v29 = vmul.f32 %v1644_v16, %v1771_v0 }
  0x4c   : > { %324 = vst.msk [vmem:[#allocation2 + $0x141] sm:$0xff] %vm192_vm0, %v1443_v6  ;;  %v1214_v47 = vpack.c.bf16 %v1182_v27, %v1182_v27  ;;  %v1184_v6 = vadd.f32 %v1152_v56, %v1086_v58  ;;  %v695_v31 = vadd.f32 %v663_v48, %v597_v17  ;;  %v859_v45 = vmul.f32 %v1723_v1, %v1804_v40  ;;  %v1122_v27 = vld [vmem:[#allocation2 + $0x6a] sm:$0xff]  ;;  %v1025_v58 = vld [vmem:[#allocation2 + $0x79] sm:$0xff] }
  0x4d   : > { %325 = vst.msk [vmem:[#allocation2 + $0x151] sm:$0xff] %vm192_vm0, %v1446_v7  ;;  %v1215_v30 = vpack.c.bf16 %v1183_v38, %v1183_v38  ;;  %v989_v26 = vadd.f32 %v957_v12, %v890_v59  ;;  %v500_v0 = vadd.f32 %v468_v29, %v370_v39  ;;  %v566_v35 = vmul.f32 %v1649_v18, %v1779_v8 }
  0x4e   : > { %326 = vst.msk [vmem:[#allocation2 + $0x159] sm:$0xff] %vm192_vm0, %v1447_v14  ;;  %v793_v7 = vadd.f32 %v761_v19, %v695_v31  ;;  %v958_v42 = vmul.f32 %v1732_v9, %v1860_v63  ;;  %v1056_v51 = vmul.f32 %v1743_v21, %v1862_v3  ;;  %v371_v14 = vmul.f32 %v1638_v13, %v1793_v28 }
  0x4f   : > { %327 = vst.msk [vmem:[#allocation2 + $0x169] sm:$0xff] %vm192_vm0, %v1450_v15  ;;  %v1087_v15 = vadd.f32 %v1055_v22, %v989_v26  ;;  %v598_v8 = vadd.f32 %v566_v35, %v500_v0  ;;  %v664_v32 = vmul.f32 %v1684_v41, %v1819_v61  ;;  %v469_v23 = vmul.f32 %v1644_v16, %v1795_v4  ;;  %v926_v4 = vld [vmem:[#allocation2 + $0x68] sm:$0xff]  ;;  %v927_v22 = vld [vmem:[#allocation2 + $0x78] sm:$0xff]  ;;  %v1943_v26 = vld [vmem:[#allocation2 + $0x80] sm:$0xff] }
  0x50   : > { %328 = vst.msk [vmem:[#allocation2 + $0x171] sm:$0xff] %vm192_vm0, %v1451_v24  ;;  %v1216_v28 = vpack.c.bf16 %v1184_v6, %v1184_v6  ;;  %v891_v49 = vadd.f32 %v859_v45, %v793_v7  ;;  %v1154_v52 = vmul.f32 %v1756_v36, %v1874_v46  ;;  %v762_v24 = vmul.f32 %v1707_v54, %v1821_v50 }
  0x51   : > { %329 = vst.msk [vmem:[#allocation2 + $0x181] sm:$0xff] %vm192_vm0, %v1454_v25  ;;  %v1185_v53 = vadd.f32 %v1153_v44, %v1087_v15  ;;  %v696_v55 = vadd.f32 %v664_v32, %v598_v8  ;;  %v501_v62 = vadd.f32 %v469_v23, %v371_v14  ;;  %v567_v25 = vmul.f32 %v1649_v18, %v1804_v40  ;;  %v1026_v15 = vld [vmem:[#allocation2 + $0x81] sm:$0xff] }
  0x52   : > { %330 = vst.msk [vmem:[#allocation2 + $0x189] sm:$0xff] %vm192_vm0, %v1455_v43  ;;  %v990_v56 = vadd.f32 %v958_v42, %v891_v49  ;;  %v860_v20 = vmul.f32 %v1723_v1, %v1836_v34  ;;  %v665_v60 = vmul.f32 %v1684_v41, %v1860_v63  ;;  %v372_v43 = vmul.f32 %v1638_v13, %v1819_v61 }
  0x53   : > { %1247 = vst.msk [vmem:[%s1892_s14] sm:$0xf] %vm1246_vm3, %v1214_v47  ;;  %v1217_v10 = vpack.c.bf16 %v1185_v53, %v1185_v53  ;;  %v794_v37 = vadd.f32 %v762_v24, %v696_v55  ;;  %v599_v2 = vadd.f32 %v567_v25, %v501_v62  ;;  %v470_v40 = vmul.f32 %v1644_v16, %v1821_v50  ;;  %v1123_v47 = vld [vmem:[#allocation2 + $0x7a] sm:$0xff] }
  0x54   : > { %1248 = vst.msk [vmem:[%s1892_s14 + $0x4] sm:$0xf] %vm1246_vm3, %v1215_v30  ;;  %v1088_v57 = vadd.f32 %v1056_v51, %v990_v56  ;;  %v959_v5 = vmul.f32 %v1732_v9, %v926_v4  ;;  %v1057_v38 = vmul.f32 %v1743_v21, %v1024_v33  ;;  %v763_v11 = vmul.f32 %v1707_v54, %v1862_v3 }
  0x55   : > { %1249 = vst.msk [vmem:[%s1892_s14 + $0x8] sm:$0xf] %vm1246_vm3, %v1216_v28  ;;  %v892_v61 = vadd.f32 %v860_v20, %v794_v37  ;;  %v697_v12 = vadd.f32 %v665_v60, %v599_v2  ;;  %v502_v17 = vadd.f32 %v470_v40, %v372_v43  ;;  %v568_v50 = vmul.f32 %v1649_v18, %v1836_v34 }
  0x56   : > { %1250 = vst.msk [vmem:[%s1892_s14 + $0xc] sm:$0xf] %vm1246_vm3, %v1217_v10  ;;  %v1186_v48 = vadd.f32 %v1154_v52, %v1088_v57  ;;  %v1155_v39 = vmul.f32 %v1756_v36, %v1122_v27  ;;  %v861_v59 = vmul.f32 %v1723_v1, %v1874_v46  ;;  %v666_v44 = vmul.f32 %v1684_v41, %v926_v4  ;;  %v1124_v52 = vld [vmem:[#allocation2 + $0x82] sm:$0xff]  ;;  %v929_v10 = vld [vmem:[#allocation2 + $0x90] sm:$0xff] }
  0x57   : > { %v991_v19 = vadd.f32 %v959_v5, %v892_v61  ;;  %v795_v29 = vadd.f32 %v763_v11, %v697_v12  ;;  %v600_v6 = vadd.f32 %v568_v50, %v502_v17  ;;  %v373_v31 = vmul.f32 %v1638_v13, %v1860_v63  ;;  %v1027_v5 = vld [vmem:[#allocation2 + $0x91] sm:$0xff] }
  0x58   : > { %v1218_v45 = vpack.c.bf16 %v1186_v48, %v1186_v48  ;;  %v960_v30 = vmul.f32 %v1732_v9, %v927_v22  ;;  %v1058_v34 = vmul.f32 %v1743_v21, %v1025_v58  ;;  %v471_v0 = vmul.f32 %v1644_v16, %v1862_v3  ;;  %v1125_v11 = vld [vmem:[#allocation2 + $0x92] sm:$0xff] }
  0x59   : > { %v1089_v35 = vadd.f32 %v1057_v38, %v991_v19  ;;  %v893_v7 = vadd.f32 %v861_v59, %v795_v29  ;;  %v698_v42 = vadd.f32 %v666_v44, %v600_v6  ;;  %v764_v51 = vmul.f32 %v1707_v54, %v1024_v33 }
  0x5a   : > { %1251 = vst.msk [vmem:[%s1892_s14 + $0x10] sm:$0xf] %vm1246_vm3, %v1218_v45  ;;  %v1156_v14 = vmul.f32 %v1756_v36, %v1123_v47  ;;  %v862_v63 = vmul.f32 %v1723_v1, %v1122_v27  ;;  %v503_v8 = vadd.f32 %v471_v0, %v373_v31  ;;  %v569_v32 = vmul.f32 %v1649_v18, %v1874_v46  ;;  %v930_v45 = vld [vmem:[#allocation2 + $0x98] sm:$0xff] }
  0x5b   : > { %v1187_v23 = vadd.f32 %v1155_v39, %v1089_v35  ;;  %v992_v28 = vadd.f32 %v960_v30, %v893_v7  ;;  %v796_v49 = vadd.f32 %v764_v51, %v698_v42  ;;  %v961_v3 = vmul.f32 %v1732_v9, %v1943_v26  ;;  %v1028_v30 = vld [vmem:[#allocation2 + $0x99] sm:$0xff] }
  0x5c   : > { %v601_v24 = vadd.f32 %v569_v32, %v503_v8  ;;  %v667_v53 = vmul.f32 %v1684_v41, %v927_v22  ;;  %v374_v55 = vmul.f32 %v1638_v13, %v926_v4  ;;  %v472_v62 = vmul.f32 %v1644_v16, %v1024_v33  ;;  %v1126_v51 = vld [vmem:[#allocation2 + $0x9a] sm:$0xff] }
  0x5d   : > { %v1219_v25 = vpack.c.bf16 %v1187_v23, %v1187_v23  ;;  %v1090_v56 = vadd.f32 %v1058_v34, %v992_v28  ;;  %v894_v20 = vadd.f32 %v862_v63, %v796_v49  ;;  %v1059_v46 = vmul.f32 %v1743_v21, %v1026_v15 }
  0x5e   : > { %v699_v60 = vadd.f32 %v667_v53, %v601_v24  ;;  %v765_v43 = vmul.f32 %v1707_v54, %v1025_v58  ;;  %v504_v37 = vadd.f32 %v472_v62, %v374_v55  ;;  %v570_v2 = vmul.f32 %v1649_v18, %v1122_v27  ;;  %v931_v24 = vld [vmem:[#allocation2 + $0xa8] sm:$0xff] }
  0x5f   : > { %1252 = vst.msk [vmem:[%s1892_s14 + $0x14] sm:$0xf] %vm1246_vm3, %v1219_v25  ;;  %v1188_v40 = vadd.f32 %v1156_v14, %v1090_v56  ;;  %v993_v57 = vadd.f32 %v961_v3, %v894_v20  ;;  %v1157_v4 = vmul.f32 %v1756_v36, %v1124_v52  ;;  %v863_v33 = vmul.f32 %v1723_v1, %v1123_v47  ;;  %v1029_v56 = vld [vmem:[#allocation2 + $0xa9] sm:$0xff] }
  0x60   : > { %v797_v38 = vadd.f32 %v765_v43, %v699_v60  ;;  %v602_v61 = vadd.f32 %v570_v2, %v504_v37  ;;  %v668_v12 = vmul.f32 %v1684_v41, %v1943_v26  ;;  %v375_v17 = vmul.f32 %v1638_v13, %v927_v22 }
  0x61   : > { %v1220_v50 = vpack.c.bf16 %v1188_v40, %v1188_v40  ;;  %v1091_v27 = vadd.f32 %v1059_v46, %v993_v57  ;;  %v962_v48 = vmul.f32 %v1732_v9, %v929_v10  ;;  %v473_v39 = vmul.f32 %v1644_v16, %v1025_v58  ;;  %v1127_v46 = vld [vmem:[#allocation2 + $0xaa] sm:$0xff] }
  0x62   : > { %v895_v59 = vadd.f32 %v863_v33, %v797_v38  ;;  %v1060_v44 = vmul.f32 %v1743_v21, %v1027_v5  ;;  %v700_v19 = vadd.f32 %v668_v12, %v602_v61  ;;  %v766_v29 = vmul.f32 %v1707_v54, %v1026_v15 }
  0x63   : > { %1253 = vst.msk [vmem:[%s1892_s14 + $0x18] sm:$0xf] %vm1246_vm3, %v1220_v50  ;;  %v1189_v6 = vadd.f32 %v1157_v4, %v1091_v27  ;;  %v1158_v31 = vmul.f32 %v1756_v36, %v1125_v11  ;;  %v505_v22 = vadd.f32 %v473_v39, %v375_v17  ;;  %v571_v34 = vmul.f32 %v1649_v18, %v1123_v47  ;;  %v932_v50 = vld [vmem:[#allocation2 + $0xb0] sm:$0xff] }
  0x64   : > { %v994_v0 = vadd.f32 %v962_v48, %v895_v59  ;;  %v798_v35 = vadd.f32 %v766_v29, %v700_v19  ;;  %v864_v58 = vmul.f32 %v1723_v1, %v1124_v52  ;;  %v669_v7 = vmul.f32 %v1684_v41, %v929_v10  ;;  %v1030_v27 = vld [vmem:[#allocation2 + $0xb1] sm:$0xff] }
  0x65   : > { %v1221_v42 = vpack.c.bf16 %v1189_v6, %v1189_v6  ;;  %v603_v14 = vadd.f32 %v571_v34, %v505_v22  ;;  %v376_v63 = vmul.f32 %v1638_v13, %v1943_v26  ;;  %v474_v8 = vmul.f32 %v1644_v16, %v1026_v15  ;;  %v1128_v29 = vld [vmem:[#allocation2 + $0xb2] sm:$0xff] }
  0x66   : > { %v1092_v32 = vadd.f32 %v1060_v44, %v994_v0  ;;  %v896_v23 = vadd.f32 %v864_v58, %v798_v35  ;;  %v963_v28 = vmul.f32 %v1732_v9, %v930_v45  ;;  %v1061_v47 = vmul.f32 %v1743_v21, %v1028_v30 }
  0x67   : > { %1254 = vst.msk [vmem:[%s1892_s14 + $0x1c] sm:$0xf] %vm1246_vm3, %v1221_v42  ;;  %v701_v49 = vadd.f32 %v669_v7, %v603_v14  ;;  %v767_v3 = vmul.f32 %v1707_v54, %v1027_v5  ;;  %v506_v53 = vadd.f32 %v474_v8, %v376_v63  ;;  %v572_v55 = vmul.f32 %v1649_v18, %v1124_v52  ;;  %v933_v42 = vld [vmem:[#allocation2 + $0xc0] sm:$0xff] }
  0x68   : > { %v1190_v62 = vadd.f32 %v1158_v31, %v1092_v32  ;;  %v995_v25 = vadd.f32 %v963_v28, %v896_v23  ;;  %v1159_v26 = vmul.f32 %v1756_v36, %v1126_v51  ;;  %v865_v15 = vmul.f32 %v1723_v1, %v1125_v11  ;;  %v1031_v23 = vld [vmem:[#allocation2 + $0xc1] sm:$0xff] }
  0x69   : > { %v799_v20 = vadd.f32 %v767_v3, %v701_v49  ;;  %v604_v60 = vadd.f32 %v572_v55, %v506_v53  ;;  %v670_v43 = vmul.f32 %v1684_v41, %v930_v45  ;;  %v377_v37 = vmul.f32 %v1638_v13, %v929_v10 }
  0x6a   : > { %v1222_v2 = vpack.c.bf16 %v1190_v62, %v1190_v62  ;;  %v1093_v40 = vadd.f32 %v1061_v47, %v995_v25  ;;  %v964_v57 = vmul.f32 %v1732_v9, %v931_v24  ;;  %v475_v52 = vmul.f32 %v1644_v16, %v1027_v5  ;;  %v1129_v47 = vld [vmem:[#allocation2 + $0xc2] sm:$0xff] }
  0x6b   : > { %v897_v4 = vadd.f32 %v865_v15, %v799_v20  ;;  %v1062_v33 = vmul.f32 %v1743_v21, %v1029_v56  ;;  %v702_v38 = vadd.f32 %v670_v43, %v604_v60  ;;  %v768_v61 = vmul.f32 %v1707_v54, %v1028_v30 }
  0x6c   : > { %1255 = vst.msk [vmem:[%s1892_s14 + $0x20] sm:$0xf] %vm1246_vm3, %v1222_v2  ;;  %v1191_v12 = vadd.f32 %v1159_v26, %v1093_v40  ;;  %v1160_v17 = vmul.f32 %v1756_v36, %v1127_v46  ;;  %v507_v10 = vadd.f32 %v475_v52, %v377_v37  ;;  %v573_v48 = vmul.f32 %v1649_v18, %v1125_v11  ;;  %v934_v2 = vld [vmem:[#allocation2 + $0xc8] sm:$0xff] }
  0x6d   : > { %v996_v39 = vadd.f32 %v964_v57, %v897_v4  ;;  %v800_v59 = vadd.f32 %v768_v61, %v702_v38  ;;  %v866_v5 = vmul.f32 %v1723_v1, %v1126_v51  ;;  %v671_v44 = vmul.f32 %v1684_v41, %v931_v24  ;;  %v1032_v40 = vld [vmem:[#allocation2 + $0xc9] sm:$0xff] }
  0x6e   : > { %v1223_v19 = vpack.c.bf16 %v1191_v12, %v1191_v12  ;;  %v605_v6 = vadd.f32 %v573_v48, %v507_v10  ;;  %v378_v31 = vmul.f32 %v1638_v13, %v930_v45  ;;  %v476_v22 = vmul.f32 %v1644_v16, %v1028_v30  ;;  %v1130_v61 = vld [vmem:[#allocation2 + $0xca] sm:$0xff] }
  0x6f   : > { %v1094_v34 = vadd.f32 %v1062_v33, %v996_v39  ;;  %v898_v0 = vadd.f32 %v866_v5, %v800_v59  ;;  %v965_v35 = vmul.f32 %v1732_v9, %v932_v50  ;;  %v1063_v58 = vmul.f32 %v1743_v21, %v1030_v27 }
  0x70   : > { %1256 = vst.msk [vmem:[%s1892_s14 + $0x24] sm:$0xf] %vm1246_vm3, %v1223_v19  ;;  %v703_v11 = vadd.f32 %v671_v44, %v605_v6  ;;  %v769_v7 = vmul.f32 %v1707_v54, %v1029_v56  ;;  %v508_v14 = vadd.f32 %v476_v22, %v378_v31  ;;  %v574_v63 = vmul.f32 %v1649_v18, %v1126_v51  ;;  %v935_v19 = vld [vmem:[#allocation2 + $0xd8] sm:$0xff] }
  0x71   : > { %v1192_v8 = vadd.f32 %v1160_v17, %v1094_v34  ;;  %v997_v32 = vadd.f32 %v965_v35, %v898_v0  ;;  %v1161_v45 = vmul.f32 %v1756_v36, %v1128_v29  ;;  %v867_v30 = vmul.f32 %v1723_v1, %v1127_v46  ;;  %v1033_v0 = vld [vmem:[#allocation2 + $0xd9] sm:$0xff] }
  0x72   : > { %v801_v28 = vadd.f32 %v769_v7, %v703_v11  ;;  %v606_v49 = vadd.f32 %v574_v63, %v508_v14  ;;  %v672_v3 = vmul.f32 %v1684_v41, %v932_v50  ;;  %v379_v53 = vmul.f32 %v1638_v13, %v931_v24 }
  0x73   : > { %v1224_v55 = vpack.c.bf16 %v1192_v8, %v1192_v8  ;;  %v1095_v62 = vadd.f32 %v1063_v58, %v997_v32  ;;  %v966_v25 = vmul.f32 %v1732_v9, %v933_v42  ;;  %v477_v51 = vmul.f32 %v1644_v16, %v1029_v56  ;;  %v1131_v58 = vld [vmem:[#allocation2 + $0xda] sm:$0xff] }
  0x74   : > { %v899_v26 = vadd.f32 %v867_v30, %v801_v28  ;;  %v1064_v15 = vmul.f32 %v1743_v21, %v1031_v23  ;;  %v704_v20 = vadd.f32 %v672_v3, %v606_v49  ;;  %v770_v60 = vmul.f32 %v1707_v54, %v1030_v27 }
  0x75   : > { %1257 = vst.msk [vmem:[%s1892_s14 + $0x28] sm:$0xf] %vm1246_vm3, %v1224_v55  ;;  %v1193_v43 = vadd.f32 %v1161_v45, %v1095_v62  ;;  %v1162_v37 = vmul.f32 %v1756_v36, %v1129_v47  ;;  %v509_v24 = vadd.f32 %v477_v51, %v379_v53  ;;  %v575_v57 = vmul.f32 %v1649_v18, %v1127_v46  ;;  %v936_v55 = vld [vmem:[#allocation2 + $0xe0] sm:$0xff] }
  0x76   : > { %v998_v52 = vadd.f32 %v966_v25, %v899_v26  ;;  %v802_v4 = vadd.f32 %v770_v60, %v704_v20  ;;  %v868_v56 = vmul.f32 %v1723_v1, %v1128_v29  ;;  %v673_v33 = vmul.f32 %v1684_v41, %v933_v42  ;;  %v1034_v62 = vld [vmem:[#allocation2 + $0xe1] sm:$0xff] }
  0x77   : > { %v1225_v38 = vpack.c.bf16 %v1193_v43, %v1193_v43  ;;  %v607_v12 = vadd.f32 %v575_v57, %v509_v24  ;;  %v380_v17 = vmul.f32 %v1638_v13, %v932_v50  ;;  %v478_v10 = vmul.f32 %v1644_v16, %v1030_v27  ;;  %v1132_v60 = vld [vmem:[#allocation2 + $0xe2] sm:$0xff] }
  0x78   : > { %v1096_v48 = vadd.f32 %v1064_v15, %v998_v52  ;;  %v900_v39 = vadd.f32 %v868_v56, %v802_v4  ;;  %v967_v59 = vmul.f32 %v1732_v9, %v934_v2  ;;  %v1065_v5 = vmul.f32 %v1743_v21, %v1032_v40 }
  0x79   : > { %1258 = vst.msk [vmem:[%s1892_s14 + $0x2c] sm:$0xf] %vm1246_vm3, %v1225_v38  ;;  %v705_v46 = vadd.f32 %v673_v33, %v607_v12  ;;  %v771_v44 = vmul.f32 %v1707_v54, %v1031_v23  ;;  %v510_v6 = vadd.f32 %v478_v10, %v380_v17  ;;  %v576_v31 = vmul.f32 %v1649_v18, %v1128_v29  ;;  %v937_v38 = vld [vmem:[#allocation2 + $0xf0] sm:$0xff] }
  0x7a   : > { %v1194_v22 = vadd.f32 %v1162_v37, %v1096_v48  ;;  %v999_v34 = vadd.f32 %v967_v59, %v900_v39  ;;  %v1163_v50 = vmul.f32 %v1756_v36, %v1130_v61  ;;  %v869_v27 = vmul.f32 %v1723_v1, %v1129_v47  ;;  %v1035_v39 = vld [vmem:[#allocation2 + $0xf1] sm:$0xff] }
  0x7b   : > { %v803_v35 = vadd.f32 %v771_v44, %v705_v46  ;;  %v608_v11 = vadd.f32 %v576_v31, %v510_v6  ;;  %v674_v7 = vmul.f32 %v1684_v41, %v934_v2  ;;  %v381_v14 = vmul.f32 %v1638_v13, %v933_v42 }
  0x7c   : > { %v1226_v63 = vpack.c.bf16 %v1194_v22, %v1194_v22  ;;  %v1097_v8 = vadd.f32 %v1065_v5, %v999_v34  ;;  %v968_v32 = vmul.f32 %v1732_v9, %v935_v19  ;;  %v479_v29 = vmul.f32 %v1644_v16, %v1031_v23  ;;  %v1133_v5 = vld [vmem:[#allocation2 + $0xf2] sm:$0xff] }
  0x7d   : > { %v901_v45 = vadd.f32 %v869_v27, %v803_v35  ;;  %v1066_v30 = vmul.f32 %v1743_v21, %v1033_v0  ;;  %v706_v28 = vadd.f32 %v674_v7, %v608_v11  ;;  %v772_v49 = vmul.f32 %v1707_v54, %v1032_v40 }
  0x7e   : > { %1259 = vst.msk [vmem:[%s1892_s14 + $0x30] sm:$0xf] %vm1246_vm3, %v1226_v63  ;;  %v1195_v3 = vadd.f32 %v1163_v50, %v1097_v8  ;;  %v1164_v53 = vmul.f32 %v1756_v36, %v1131_v58  ;;  %v511_v42 = vadd.f32 %v479_v29, %v381_v14  ;;  %v577_v25 = vmul.f32 %v1649_v18, %v1129_v47  ;;  %v938_v63 = vld [vmem:[#allocation2 + $0xf8] sm:$0xff] }
  0x7f   : > { %v1000_v51 = vadd.f32 %v968_v32, %v901_v45  ;;  %v804_v26 = vadd.f32 %v772_v49, %v706_v28  ;;  %v870_v23 = vmul.f32 %v1723_v1, %v1130_v61  ;;  %v675_v15 = vmul.f32 %v1684_v41, %v935_v19  ;;  %v1036_v8 = vld [vmem:[#allocation2 + $0xf9] sm:$0xff] }
  0x80   : > { %v1227_v20 = vpack.c.bf16 %v1195_v3, %v1195_v3  ;;  %v609_v43 = vadd.f32 %v577_v25, %v511_v42  ;;  %v382_v37 = vmul.f32 %v1638_v13, %v934_v2  ;;  %v480_v24 = vmul.f32 %v1644_v16, %v1032_v40  ;;  %v1134_v49 = vld [vmem:[#allocation2 + $0xfa] sm:$0xff] }
  0x81   : > { %v1098_v57 = vadd.f32 %v1066_v30, %v1000_v51  ;;  %v902_v52 = vadd.f32 %v870_v23, %v804_v26  ;;  %v969_v4 = vmul.f32 %v1732_v9, %v936_v55  ;;  %v1067_v56 = vmul.f32 %v1743_v21, %v1034_v62 }
  0x82   : > { %1260 = vst.msk [vmem:[%s1892_s14 + $0x34] sm:$0xf] %vm1246_vm3, %v1227_v20  ;;  %v707_v47 = vadd.f32 %v675_v15, %v609_v43  ;;  %v773_v33 = vmul.f32 %v1707_v54, %v1033_v0  ;;  %v512_v12 = vadd.f32 %v480_v24, %v382_v37  ;;  %v578_v17 = vmul.f32 %v1649_v18, %v1130_v61  ;;  %v939_v20 = vld [vmem:[#allocation2 + $0x108] sm:$0xff] }
  0x83   : > { %v1196_v10 = vadd.f32 %v1164_v53, %v1098_v57  ;;  %v1001_v48 = vadd.f32 %v969_v4, %v902_v52  ;;  %v1165_v2 = vmul.f32 %v1756_v36, %v1132_v60  ;;  %v871_v40 = vmul.f32 %v1723_v1, %v1131_v58  ;;  %v1037_v52 = vld [vmem:[#allocation2 + $0x109] sm:$0xff] }
  0x84   : > { %v805_v59 = vadd.f32 %v773_v33, %v707_v47  ;;  %v610_v46 = vadd.f32 %v578_v17, %v512_v12  ;;  %v676_v44 = vmul.f32 %v1684_v41, %v936_v55  ;;  %v383_v6 = vmul.f32 %v1638_v13, %v935_v19 }
  0x85   : > { %v1228_v31 = vpack.c.bf16 %v1196_v10, %v1196_v10  ;;  %v1099_v22 = vadd.f32 %v1067_v56, %v1001_v48  ;;  %v970_v34 = vmul.f32 %v1732_v9, %v937_v38  ;;  %v481_v61 = vmul.f32 %v1644_v16, %v1033_v0  ;;  %v2078_v56 = vld [vmem:[#allocation2 + $0x10a] sm:$0xff] }
  0x86   : > { %v903_v50 = vadd.f32 %v871_v40, %v805_v59  ;;  %v1068_v27 = vmul.f32 %v1743_v21, %v1035_v39  ;;  %v708_v35 = vadd.f32 %v676_v44, %v610_v46  ;;  %v774_v11 = vmul.f32 %v1707_v54, %v1034_v62 }
  0x87   : > { %1261 = vst.msk [vmem:[%s1892_s14 + $0x38] sm:$0xf] %vm1246_vm3, %v1228_v31  ;;  %v1197_v7 = vadd.f32 %v1165_v2, %v1099_v22  ;;  %v1166_v14 = vmul.f32 %v1756_v36, %v1133_v5  ;;  %v513_v19 = vadd.f32 %v481_v61, %v383_v6  ;;  %v579_v32 = vmul.f32 %v1649_v18, %v1131_v58  ;;  %v940_v31 = vld [vmem:[#allocation2 + $0x110] sm:$0xff] }
  0x88   : > { %v1002_v29 = vadd.f32 %v970_v34, %v903_v50  ;;  %v806_v45 = vadd.f32 %v774_v11, %v708_v35  ;;  %v872_v0 = vmul.f32 %v1723_v1, %v1132_v60  ;;  %v677_v30 = vmul.f32 %v1684_v41, %v937_v38  ;;  %v2096_v11 = vld [vmem:[%s2297_s1] ss:$0 sm:$0xff] }
  0x89   : > { %v1229_v28 = vpack.c.bf16 %v1197_v7, %v1197_v7  ;;  %v611_v3 = vadd.f32 %v579_v32, %v513_v19  ;;  %v384_v53 = vmul.f32 %v1638_v13, %v936_v55  ;;  %v482_v42 = vmul.f32 %v1644_v16, %v1034_v62 }
  0x8a   : > { %v1100_v25 = vadd.f32 %v1068_v27, %v1002_v29  ;;  %v904_v51 = vadd.f32 %v872_v0, %v806_v45  ;;  %v971_v26 = vmul.f32 %v1732_v9, %v938_v63  ;;  %v1069_v23 = vmul.f32 %v1743_v21, %v1036_v8  ;;  %v1136_v27 = vld [vmem:[#allocation2 + $0x112] sm:$0xff] }
  0x8b   : > { %1262 = vst.msk [vmem:[%s1892_s14 + $0x3c] sm:$0xf] %vm1246_vm3, %v1229_v28  ;;  %v709_v58 = vadd.f32 %v677_v30, %v611_v3  ;;  %v775_v15 = vmul.f32 %v1707_v54, %v1035_v39  ;;  %v514_v43 = vadd.f32 %v482_v42, %v384_v53  ;;  %v580_v37 = vmul.f32 %v1649_v18, %v1132_v60  ;;  %v941_v30 = vld [vmem:[#allocation2 + $0x120] sm:$0xff] }
  0x8c   : > { %v1198_v24 = vadd.f32 %v1166_v14, %v1100_v25  ;;  %v1003_v57 = vadd.f32 %v971_v26, %v904_v51  ;;  %v1167_v55 = vmul.f32 %v1756_v36, %v1134_v49  ;;  %v873_v62 = vmul.f32 %v1723_v1, %v1133_v5  ;;  %v2113_v28 = vld [vmem:[%s2297_s1 + $0x2] ss:$0 sm:$0xff] }
  0x8d   : > { %v807_v4 = vadd.f32 %v775_v15, %v709_v58  ;;  %v612_v47 = vadd.f32 %v580_v37, %v514_v43  ;;  %v678_v33 = vmul.f32 %v1684_v41, %v938_v63  ;;  %v385_v12 = vmul.f32 %v1638_v13, %v937_v38  ;;  %v1038_v13 = vld [vmem:[#allocation2 + $0x111] sm:$0xff]  ;;  %v1039_v51 = vld [vmem:[#allocation2 + $0x121] sm:$0xff] }
  0x8e   : > { %v1230_v17 = vpack.c.bf16 %v1198_v24, %v1198_v24  ;;  %v1101_v10 = vadd.f32 %v1069_v23, %v1003_v57  ;;  %v972_v60 = vmul.f32 %v1732_v9, %v939_v20  ;;  %v483_v48 = vmul.f32 %v1644_v16, %v1035_v39  ;;  %v2119_v23 = vld [vmem:[#allocation2 + $0x122] sm:$0xff] }
  0x8f   : > { %v905_v2 = vadd.f32 %v873_v62, %v807_v4  ;;  %v1070_v40 = vmul.f32 %v1743_v21, %v1037_v52  ;;  %v710_v59 = vadd.f32 %v678_v33, %v612_v47  ;;  %v776_v46 = vmul.f32 %v1707_v54, %v1036_v8 }
  0x90   : > { %1263 = vst.msk [vmem:[%s1892_s14 + $0x40] sm:$0xf] %vm1246_vm3, %v1230_v17  ;;  %v1199_v44 = vadd.f32 %v1167_v55, %v1101_v10  ;;  %v1168_v6 = vmul.f32 %v1756_v36, %v2078_v56  ;;  %v515_v38 = vadd.f32 %v483_v48, %v385_v12  ;;  %v581_v22 = vmul.f32 %v1649_v18, %v1133_v5  ;;  %v2102_v18 = vld [vmem:[%s2297_s1 + $0x1] ss:$0 sm:$0xff]  ;;  %v942_v12 = vld [vmem:[#allocation2 + $0x128] sm:$0xff] }
  0x91   : > { %v1004_v34 = vadd.f32 %v972_v60, %v905_v2  ;;  %v808_v16 = vadd.f32 %v776_v46, %v710_v59  ;;  %v874_v39 = vmul.f32 %v1723_v1, %v1134_v49  ;;  %v679_v61 = vmul.f32 %v1684_v41, %v939_v20  ;;  %v1138_v59 = vld [vmem:[#allocation2 + $0x12a] sm:$0xff] }
  0x92   : > { %v1231_v50 = vpack.c.bf16 %v1199_v44, %v1199_v44  ;;  %v613_v35 = vadd.f32 %v581_v22, %v515_v38  ;;  %v386_v7 = vmul.f32 %v2096_v11, %v938_v63  ;;  %v484_v5 = vmul.f32 %v2102_v18, %v1036_v8 }
  0x93   : > { %v1102_v14 = vadd.f32 %v1070_v40, %v1004_v34  ;;  %v906_v19 = vadd.f32 %v874_v39, %v808_v16  ;;  %v973_v32 = vmul.f32 %v1732_v9, %v940_v31  ;;  %v1071_v29 = vmul.f32 %v1743_v21, %v1038_v13  ;;  %v2149_v16 = vld [vmem:[%s2297_s1 + $0x4] ss:$0 sm:$0xff] }
  0x94   : > { %1264 = vst.msk [vmem:[%s1892_s14 + $0x44] sm:$0xf] %vm1246_vm3, %v1231_v50  ;;  %v711_v45 = vadd.f32 %v679_v61, %v613_v35  ;;  %v777_v0 = vmul.f32 %v1707_v54, %v1037_v52  ;;  %v516_v63 = vadd.f32 %v484_v5, %v386_v7  ;;  %v582_v8 = vmul.f32 %v2113_v28, %v1134_v49  ;;  %v943_v61 = vld [vmem:[#allocation2 + $0x138] sm:$0xff] }
  0x95   : > { %v1200_v3 = vadd.f32 %v1168_v6, %v1102_v14  ;;  %v1005_v53 = vadd.f32 %v973_v32, %v906_v19  ;;  %v1169_v42 = vmul.f32 %v1756_v36, %v1136_v27  ;;  %v875_v25 = vmul.f32 %v1723_v1, %v2078_v56  ;;  %v1041_v5 = vld [vmem:[#allocation2 + $0x139] sm:$0xff] }
  0x96   : > { %v809_v26 = vadd.f32 %v777_v0, %v711_v45  ;;  %v614_v58 = vadd.f32 %v582_v8, %v516_v63  ;;  %v680_v15 = vmul.f32 %v1684_v41, %v940_v31  ;;  %v387_v43 = vmul.f32 %v2096_v11, %v939_v20  ;;  %v1040_v20 = vld [vmem:[#allocation2 + $0x129] sm:$0xff]  ;;  %v2161_v19 = vld [vmem:[#allocation2 + $0x13a] sm:$0xff]  ;;  %v2168_v63 = vld [vmem:[%s2297_s1 + $0x6] ss:$0 sm:$0xff] }
  0x97   : > { %v1232_v37 = vpack.c.bf16 %v1200_v3, %v1200_v3  ;;  %v1103_v24 = vadd.f32 %v1071_v29, %v1005_v53  ;;  %v974_v49 = vmul.f32 %v1732_v9, %v941_v30  ;;  %v485_v57 = vmul.f32 %v2102_v18, %v1037_v52 }
  0x98   : > { %v907_v55 = vadd.f32 %v875_v25, %v809_v26  ;;  %v1072_v62 = vmul.f32 %v1743_v21, %v1039_v51  ;;  %v712_v4 = vadd.f32 %v680_v15, %v614_v58  ;;  %v778_v47 = vmul.f32 %v1707_v54, %v1038_v13  ;;  %v2137_v54 = vld [vmem:[%s2297_s1 + $0x3] ss:$0 sm:$0xff] }
  0x99   : > { %1265 = vst.msk [vmem:[%s1892_s14 + $0x48] sm:$0xf] %vm1246_vm3, %v1232_v37  ;;  %v1201_v33 = vadd.f32 %v1169_v42, %v1103_v24  ;;  %v1170_v41 = vmul.f32 %v1756_v36, %v2119_v23  ;;  %v517_v17 = vadd.f32 %v485_v57, %v387_v43  ;;  %v583_v10 = vmul.f32 %v2113_v28, %v2078_v56  ;;  %v2175_v42 = vld [vmem:[%s2297_s1 + $0x7] ss:$0 sm:$0xff] }
  0x9a   : > { %v1006_v52 = vadd.f32 %v974_v49, %v907_v55  ;;  %v810_v60 = vadd.f32 %v778_v47, %v712_v4  ;;  %v876_v48 = vmul.f32 %v1723_v1, %v1136_v27  ;;  %v681_v2 = vmul.f32 %v2137_v54, %v941_v30  ;;  %v944_v43 = vld [vmem:[#allocation2 + $0x140] sm:$0xff] }
  0x9b   : > { %v1233_v40 = vpack.c.bf16 %v1201_v33, %v1201_v33  ;;  %v615_v46 = vadd.f32 %v583_v10, %v517_v17  ;;  %v388_v44 = vmul.f32 %v2096_v11, %v940_v31  ;;  %v486_v6 = vmul.f32 %v2102_v18, %v1038_v13  ;;  %v1042_v37 = vld [vmem:[#allocation2 + $0x141] sm:$0xff] }
  0x9c   : > { %v1104_v38 = vadd.f32 %v1072_v62, %v1006_v52  ;;  %v908_v56 = vadd.f32 %v876_v48, %v810_v60  ;;  %v975_v22 = vmul.f32 %v1732_v9, %v942_v12  ;;  %v1073_v1 = vmul.f32 %v1743_v21, %v1040_v20  ;;  %v2157_v21 = vld [vmem:[%s2297_s1 + $0x5] ss:$0 sm:$0xff] }
  0x9d   : > { %1266 = vst.msk [vmem:[%s1892_s14 + $0x4c] sm:$0xf] %vm1246_vm3, %v1233_v40  ;;  %v713_v34 = vadd.f32 %v681_v2, %v615_v46  ;;  %v779_v39 = vmul.f32 %v2149_v16, %v1039_v51  ;;  %v518_v31 = vadd.f32 %v486_v6, %v388_v44  ;;  %v584_v13 = vmul.f32 %v2113_v28, %v1136_v27  ;;  %v1140_v47 = vld [vmem:[#allocation2 + $0x142] sm:$0xff]  ;;  %v945_v2 = vld [vmem:[#allocation2 + $0x150] sm:$0xff] }
  0x9e   : > { %v1202_v50 = vadd.f32 %v1170_v41, %v1104_v38  ;;  %v1007_v35 = vadd.f32 %v975_v22, %v908_v56  ;;  %v1171_v9 = vmul.f32 %v1756_v36, %v1138_v59  ;;  %v877_v7 = vmul.f32 %v2157_v21, %v2119_v23  ;;  %v1043_v56 = vld [vmem:[#allocation2 + $0x151] sm:$0xff] }
  0x9f   : > { %v811_v14 = vadd.f32 %v779_v39, %v713_v34  ;;  %v616_v32 = vadd.f32 %v584_v13, %v518_v31  ;;  %v682_v27 = vmul.f32 %v2137_v54, %v942_v12  ;;  %v389_v29 = vmul.f32 %v2096_v11, %v941_v30 }
  0xa0   : > { %v1234_v45 = vpack.c.bf16 %v1202_v50, %v1202_v50  ;;  %v1105_v0 = vadd.f32 %v1073_v1, %v1007_v35  ;;  %v976_v8 = vmul.f32 %v2168_v63, %v943_v61  ;;  %v487_v3 = vmul.f32 %v2102_v18, %v1039_v51  ;;  %v1141_v1 = vld [vmem:[#allocation2 + $0x152] sm:$0xff] }
  0xa1   : > { %v909_v53 = vadd.f32 %v877_v7, %v811_v14  ;;  %v1074_v25 = vmul.f32 %v2175_v42, %v1041_v5  ;;  %v714_v30 = vadd.f32 %v682_v27, %v616_v32  ;;  %v780_v26 = vmul.f32 %v2149_v16, %v1040_v20 }
  0xa2   : > { %1267 = vst.msk [vmem:[%s1892_s14 + $0x50] sm:$0xf] %vm1246_vm3, %v1234_v45  ;;  %v1203_v58 = vadd.f32 %v1171_v9, %v1105_v0  ;;  %v1172_v15 = vmul.f32 %v1756_v36, %v2161_v19  ;;  %v519_v51 = vadd.f32 %v487_v3, %v389_v29  ;;  %v585_v24 = vmul.f32 %v2113_v28, %v2119_v23  ;;  %v946_v45 = vld [vmem:[#allocation2 + $0x158] sm:$0xff] }
  0xa3   : > { %v1008_v49 = vadd.f32 %v976_v8, %v909_v53  ;;  %v812_v57 = vadd.f32 %v780_v26, %v714_v30  ;;  %v878_v55 = vmul.f32 %v2157_v21, %v1138_v59  ;;  %v683_v62 = vmul.f32 %v2137_v54, %v943_v61  ;;  %v1044_v0 = vld [vmem:[#allocation2 + $0x159] sm:$0xff] }
  0xa4   : > { %v1235_v4 = vpack.c.bf16 %v1203_v58, %v1203_v58  ;;  %v617_v33 = vadd.f32 %v585_v24, %v519_v51  ;;  %v390_v41 = vmul.f32 %v2096_v11, %v942_v12  ;;  %v488_v36 = vmul.f32 %v2102_v18, %v1040_v20  ;;  %v2198_v12 = vld [vmem:[%s2297_s1 + $0x8] ss:$0 sm:$0xff]  ;;  %v1142_v26 = vld [vmem:[#allocation2 + $0x15a] sm:$0xff] }
  0xa5   : > { %v1106_v17 = vadd.f32 %v1074_v25, %v1008_v49  ;;  %v910_v10 = vadd.f32 %v878_v55, %v812_v57  ;;  %v977_v52 = vmul.f32 %v2168_v63, %v944_v43  ;;  %v1075_v60 = vmul.f32 %v2175_v42, %v1042_v37 }
  0xa6   : > { %1268 = vst.msk [vmem:[%s1892_s14 + $0x54] sm:$0xf] %vm1246_vm3, %v1235_v4  ;;  %v715_v23 = vadd.f32 %v683_v62, %v617_v33  ;;  %v781_v48 = vmul.f32 %v2149_v16, %v1041_v5  ;;  %v520_v40 = vadd.f32 %v488_v36, %v390_v41  ;;  %v586_v46 = vmul.f32 %v2113_v28, %v1138_v59  ;;  %v947_v4 = vld [vmem:[#allocation2 + $0x168] sm:$0xff] }
  0xa7   : > { %v1204_v44 = vadd.f32 %v1172_v15, %v1106_v17  ;;  %v1009_v6 = vadd.f32 %v977_v52, %v910_v10  ;;  %v1173_v20 = vmul.f32 %v2198_v12, %v1140_v47  ;;  %v879_v38 = vmul.f32 %v2157_v21, %v2161_v19  ;;  %v1045_v10 = vld [vmem:[#allocation2 + $0x169] sm:$0xff] }
  0xa8   : > { %v813_v22 = vadd.f32 %v781_v48, %v715_v23  ;;  %v618_v34 = vadd.f32 %v586_v46, %v520_v40  ;;  %v684_v39 = vmul.f32 %v2137_v54, %v944_v43  ;;  %v391_v59 = vmul.f32 %v2096_v11, %v943_v61 }
  0xa9   : > { %v1236_v31 = vpack.c.bf16 %v1204_v44, %v1204_v44  ;;  %v1107_v13 = vadd.f32 %v1075_v60, %v1009_v6  ;;  %v978_v50 = vmul.f32 %v2168_v63, %v945_v2  ;;  %v489_v35 = vmul.f32 %v2102_v18, %v1041_v5  ;;  %v1143_v60 = vld [vmem:[#allocation2 + $0x16a] sm:$0xff] }
  0xaa   : > { %v911_v9 = vadd.f32 %v879_v38, %v813_v22  ;;  %v1076_v7 = vmul.f32 %v2175_v42, %v1043_v56  ;;  %v716_v14 = vadd.f32 %v684_v39, %v618_v34  ;;  %v782_v32 = vmul.f32 %v2149_v16, %v1042_v37 }
  0xab   : > { %1269 = vst.msk [vmem:[%s1892_s14 + $0x58] sm:$0xf] %vm1246_vm3, %v1236_v31  ;;  %v1205_v27 = vadd.f32 %v1173_v20, %v1107_v13  ;;  %v1174_v29 = vmul.f32 %v2198_v12, %v1141_v1  ;;  %v521_v61 = vadd.f32 %v489_v35, %v391_v59  ;;  %v587_v8 = vmul.f32 %v2113_v28, %v2161_v19  ;;  %v948_v31 = vld [vmem:[#allocation2 + $0x170] sm:$0xff] }
  0xac   : > { %v1010_v3 = vadd.f32 %v978_v50, %v911_v9  ;;  %v814_v5 = vadd.f32 %v782_v32, %v716_v14  ;;  %v880_v53 = vmul.f32 %v2157_v21, %v1140_v47  ;;  %v685_v25 = vmul.f32 %v2137_v54, %v945_v2  ;;  %v1046_v13 = vld [vmem:[#allocation2 + $0x171] sm:$0xff] }
  0xad   : > { %v1237_v30 = vpack.c.bf16 %v1205_v27, %v1205_v27  ;;  %v619_v58 = vadd.f32 %v587_v8, %v521_v61  ;;  %v392_v15 = vmul.f32 %v2096_v11, %v944_v43  ;;  %v490_v51 = vmul.f32 %v2102_v18, %v1042_v37  ;;  %v1144_v32 = vld [vmem:[#allocation2 + $0x172] sm:$0xff] }
  0xae   : > { %v1108_v24 = vadd.f32 %v1076_v7, %v1010_v3  ;;  %v912_v49 = vadd.f32 %v880_v53, %v814_v5  ;;  %v979_v57 = vmul.f32 %v2168_v63, %v946_v45  ;;  %v1077_v55 = vmul.f32 %v2175_v42, %v1044_v0 }
  0xaf   : > { %1270 = vst.msk [vmem:[%s1892_s14 + $0x5c] sm:$0xf] %vm1246_vm3, %v1237_v30  ;;  %v717_v19 = vadd.f32 %v685_v25, %v619_v58  ;;  %v783_v62 = vmul.f32 %v2149_v16, %v1043_v56  ;;  %v522_v33 = vadd.f32 %v490_v51, %v392_v15  ;;  %v588_v41 = vmul.f32 %v2113_v28, %v1140_v47  ;;  %v949_v30 = vld [vmem:[#allocation2 + $0x180] sm:$0xff] }
  0xb0   : > { %v1206_v36 = vadd.f32 %v1174_v29, %v1108_v24  ;;  %v1011_v17 = vadd.f32 %v979_v57, %v912_v49  ;;  %v1175_v43 = vmul.f32 %v2198_v12, %v1142_v26  ;;  %v881_v37 = vmul.f32 %v2157_v21, %v1141_v1  ;;  %v1047_v49 = vld [vmem:[#allocation2 + $0x181] sm:$0xff] }
  0xb1   : > { %v815_v52 = vadd.f32 %v783_v62, %v717_v19  ;;  %v620_v23 = vadd.f32 %v588_v41, %v522_v33  ;;  %v686_v48 = vmul.f32 %v2137_v54, %v946_v45  ;;  %v393_v40 = vmul.f32 %v2096_v11, %v945_v2 }
  0xb2   : > { %v1238_v46 = vpack.c.bf16 %v1206_v36, %v1206_v36  ;;  %v1109_v44 = vadd.f32 %v1077_v55, %v1011_v17  ;;  %v980_v6 = vmul.f32 %v2168_v63, %v947_v4  ;;  %v491_v47 = vmul.f32 %v2102_v18, %v1043_v56  ;;  %v1145_v17 = vld [vmem:[#allocation2 + $0x182] sm:$0xff] }
  0xb3   : > { %v913_v20 = vadd.f32 %v881_v37, %v815_v52  ;;  %v1078_v38 = vmul.f32 %v2175_v42, %v1045_v10  ;;  %v718_v22 = vadd.f32 %v686_v48, %v620_v23  ;;  %v784_v34 = vmul.f32 %v2149_v16, %v1044_v0 }
  0xb4   : > { %1271 = vst.msk [vmem:[%s1892_s14 + $0x60] sm:$0xf] %vm1246_vm3, %v1238_v46  ;;  %v1207_v39 = vadd.f32 %v1175_v43, %v1109_v44  ;;  %v1176_v59 = vmul.f32 %v2198_v12, %v1143_v60  ;;  %v523_v2 = vadd.f32 %v491_v47, %v393_v40  ;;  %v589_v50 = vmul.f32 %v2113_v28, %v1141_v1  ;;  %v950_v40 = vld [vmem:[#allocation2 + $0x188] sm:$0xff] }
  0xb5   : > { %v1012_v35 = vadd.f32 %v980_v6, %v913_v20  ;;  %v816_v9 = vadd.f32 %v784_v34, %v718_v22  ;;  %v882_v56 = vmul.f32 %v2157_v21, %v1142_v26  ;;  %v687_v7 = vmul.f32 %v2137_v54, %v947_v4  ;;  %v1048_v22 = vld [vmem:[#allocation2 + $0x189] sm:$0xff] }
  0xb6   : > { %v1239_v14 = vpack.c.bf16 %v1207_v39, %v1207_v39  ;;  %v621_v27 = vadd.f32 %v589_v50, %v523_v2  ;;  %v394_v29 = vmul.f32 %v2096_v11, %v946_v45  ;;  %v492_v61 = vmul.f32 %v2102_v18, %v1044_v0 }
  0xb7   : > { %v1110_v8 = vadd.f32 %v1078_v38, %v1012_v35  ;;  %v914_v3 = vadd.f32 %v882_v56, %v816_v9  ;;  %v981_v5 = vmul.f32 %v2168_v63, %v948_v31  ;;  %v1079_v53 = vmul.f32 %v2175_v42, %v1046_v13  ;;  %v951_v9 = vld [vmem:[#allocation2 + $0x198] sm:$0xff]  ;;  %v1146_v56 = vld [vmem:[#allocation2 + $0x18a] sm:$0xff] }
  0xb8   : > { %1272 = vst.msk [vmem:[%s1892_s14 + $0x64] sm:$0xf] %vm1246_vm3, %v1239_v14  ;;  %v719_v1 = vadd.f32 %v687_v7, %v621_v27  ;;  %v785_v25 = vmul.f32 %v2149_v16, %v1045_v10  ;;  %v524_v58 = vadd.f32 %v492_v61, %v394_v29  ;;  %v590_v15 = vmul.f32 %v2113_v28, %v1142_v26 }
  0xb9   : > { %v1208_v51 = vadd.f32 %v1176_v59, %v1110_v8  ;;  %v1013_v24 = vadd.f32 %v981_v5, %v914_v3  ;;  %v1177_v45 = vmul.f32 %v2198_v12, %v1144_v32  ;;  %v883_v0 = vmul.f32 %v2157_v21, %v1143_v60  ;;  %v1049_v3 = vld [vmem:[#allocation2 + $0x199] sm:$0xff] }
  0xba   : > { %v817_v57 = vadd.f32 %v785_v25, %v719_v1  ;;  %v622_v55 = vadd.f32 %v590_v15, %v524_v58  ;;  %v688_v19 = vmul.f32 %v2137_v54, %v948_v31  ;;  %v395_v62 = vmul.f32 %v2096_v11, %v947_v4 }
  0xbb   : > { %v1240_v33 = vpack.c.bf16 %v1208_v51, %v1208_v51  ;;  %v1111_v41 = vadd.f32 %v1079_v53, %v1013_v24  ;;  %v982_v36 = vmul.f32 %v2168_v63, %v949_v30  ;;  %v493_v26 = vmul.f32 %v2102_v18, %v1045_v10  ;;  %v1147_v51 = vld [vmem:[#allocation2 + $0x19a] sm:$0xff] }
  0xbc   : > { %v915_v43 = vadd.f32 %v883_v0, %v817_v57  ;;  %v1080_v37 = vmul.f32 %v2175_v42, %v1047_v49  ;;  %v720_v52 = vadd.f32 %v688_v19, %v622_v55  ;;  %v786_v23 = vmul.f32 %v2149_v16, %v1046_v13  ;;  %v1050_v55 = vld [vmem:[#allocation2 + $0x1a1] sm:$0xff] }
  0xbd   : > { %1273 = vst.msk [vmem:[%s1892_s14 + $0x68] sm:$0xf] %vm1246_vm3, %v1240_v33  ;;  %v1209_v48 = vadd.f32 %v1177_v45, %v1111_v41  ;;  %v525_v46 = vadd.f32 %v493_v26, %v395_v62  ;;  %v591_v4 = vmul.f32 %v2113_v28, %v1143_v60  ;;  %v689_v44 = vmul.f32 %v2137_v54, %v949_v30  ;;  %v952_v30 = vld [vmem:[#allocation2 + $0x1a0] sm:$0xff] }
  0xbe   : > { %v1014_v6 = vadd.f32 %v982_v36, %v915_v43  ;;  %v1178_v47 = vmul.f32 %v2198_v12, %v1145_v17  ;;  %v818_v10 = vadd.f32 %v786_v23, %v720_v52  ;;  %v884_v20 = vmul.f32 %v2157_v21, %v1144_v32  ;;  %v1148_v33 = vld [vmem:[#allocation2 + $0x1a2] sm:$0xff] }
  0xbf   : > { %v1241_v38 = vpack.c.bf16 %v1209_v48, %v1209_v48  ;;  %v623_v34 = vadd.f32 %v591_v4, %v525_v46  ;;  %v396_v39 = vmul.f32 %v2096_v11, %v948_v31  ;;  %v494_v59 = vmul.f32 %v2102_v18, %v1046_v13 }
  0xc0   : > { %v1112_v2 = vadd.f32 %v1080_v37, %v1014_v6  ;;  %v916_v50 = vadd.f32 %v884_v20, %v818_v10  ;;  %v983_v60 = vmul.f32 %v2168_v63, %v950_v40  ;;  %v787_v35 = vmul.f32 %v2149_v16, %v1047_v49 }
  0xc1   : > { %1274 = vst.msk [vmem:[%s1892_s14 + $0x6c] sm:$0xf] %vm1246_vm3, %v1241_v38  ;;  %v721_v7 = vadd.f32 %v689_v44, %v623_v34  ;;  %v526_v14 = vadd.f32 %v494_v59, %v396_v39  ;;  %v592_v27 = vmul.f32 %v2113_v28, %v1144_v32  ;;  %v690_v29 = vmul.f32 %v2137_v54, %v950_v40 }
  0xc2   : > { %v1210_v11 = vadd.f32 %v1178_v47, %v1112_v2  ;;  %v1015_v31 = vadd.f32 %v983_v60, %v916_v50  ;;  %v1081_v18 = vmul.f32 %v2175_v42, %v1048_v22  ;;  %v885_v61 = vmul.f32 %v2157_v21, %v1145_v17 }
  0xc3   : > { %v819_v13 = vadd.f32 %v787_v35, %v721_v7  ;;  %v984_v8 = vmul.f32 %v2168_v63, %v951_v9  ;;  %v624_v5 = vadd.f32 %v592_v27, %v526_v14  ;;  %v1179_v25 = vmul.f32 %v2198_v12, %v1146_v56 }
  0xc4   : > { %v1242_v53 = vpack.c.bf16 %v1210_v11, %v1210_v11  ;;  %v1113_v1 = vadd.f32 %v1081_v18, %v1015_v31  ;;  %v788_v32 = vmul.f32 %v2149_v16, %v1048_v22  ;;  %v1082_v15 = vmul.f32 %v2175_v42, %v1049_v3 }
  0xc5   : > { %v917_v28 = vadd.f32 %v885_v61, %v819_v13  ;;  %v722_v54 = vadd.f32 %v690_v29, %v624_v5  ;;  %v886_v0 = vmul.f32 %v2157_v21, %v1146_v56  ;;  %v985_v49 = vmul.f32 %v2168_v63, %v952_v30 }
  0xc6   : > { %1275 = vst.msk [vmem:[%s1892_s14 + $0x70] sm:$0xf] %vm1246_vm3, %v1242_v53  ;;  %v1211_v58 = vadd.f32 %v1179_v25, %v1113_v1  ;;  %v1180_v62 = vmul.f32 %v2198_v12, %v1147_v51  ;;  %v1083_v17 = vmul.f32 %v2175_v42, %v1050_v55  ;;  %v1181_v21 = vmul.f32 %v2198_v12, %v1148_v33 }
  0xc7   : > { %v1016_v24 = vadd.f32 %v984_v8, %v917_v28  ;;  %v820_v45 = vadd.f32 %v788_v32, %v722_v54 }
  0xc8   : > { %v1243_v57 = vpack.c.bf16 %v1211_v58, %v1211_v58 }
  0xc9   : > { %v1114_v19 = vadd.f32 %v1082_v15, %v1016_v24  ;;  %v918_v16 = vadd.f32 %v886_v0, %v820_v45 }
  0xca   : > { %1276 = vst.msk [vmem:[%s1892_s14 + $0x74] sm:$0xf] %vm1246_vm3, %v1243_v57 }
  0xcb   : > { %v1212_v41 = vadd.f32 %v1180_v62, %v1114_v19  ;;  %v1017_v36 = vadd.f32 %v985_v49, %v918_v16 }
  0xcd   : > { %v1244_v26 = vpack.c.bf16 %v1212_v41, %v1212_v41  ;;  %v1115_v43 = vadd.f32 %v1083_v17, %v1017_v36 }
  0xcf   : > { %1277 = vst.msk [vmem:[%s1892_s14 + $0x78] sm:$0xf] %vm1246_vm3, %v1244_v26  ;;  %v1213_v63 = vadd.f32 %v1181_v21, %v1115_v43 }
  0xd1   : > { %v1245_v37 = vpack.c.bf16 %v1213_v63, %v1213_v63 }
  0xd3   : > { %1278 = vst.msk [vmem:[%s1892_s14 + $0x7c] sm:$0xf] %vm1246_vm3, %v1245_v37 }
  0xd4 PF: > { %s12_s11 = sadd.s32 1, %s1536_s11   ;;  %s2299_s9 = smov %s1532_s10 }
  0xd5   : > { %p9_p5 = scmp.ge.s32.totalorder %s12_s11, 4   ;;  %s2300_s10 = smov %s2302_s12 }
  0xd7   :  { %11 = sbr.rel (!%p9_p5) target bundleno = 2 (0x2), region = 64 }

// kernel: freqlc_block_forward.7
= control target key start
LH: loop header
LB: loop body
LE: loop exit
PB: predicated region body
PF: predicated region fallthrough
CT: control target
= control target key end

     0   :  { %s1557_s15 = smov 0   ;;  %s2860_s0 = inlined_call_operand.vmem [shape: bf16[512,16], index: 0, kind: input, shape index: {}]   ;;  %s2861_s1 = inlined_call_operand.vmem [shape: f32[1,16], index: 1, kind: input, shape index: {}]   ;;  %s2862_s2 = inlined_call_operand.vmem [shape: f32[1,16], index: 2, kind: input, shape index: {}]   ;;  %s2863_s3 = inlined_call_operand.vmem [shape: bf16[16,48], index: 3, kind: input, shape index: {}]   ;;  %s2864_s4 = inlined_call_operand.vmem [shape: bf16[512,48], index: 4, kind: output, shape index: {}]  }
   0x1 LB: > { %s1332_s16 = sadd.s32 4294967295, %s1529_s15   ;;  %p1336_p0 = scmp.ge.s32.totalorder %s1529_s15, 1  ;;  %s1529_s15 = sphi %s1557_s15, %s14_s15  }
   0x2   : > { %p163_p1 = scmp.lt.s32.totalorder %s1529_s15, 3 }
   0x4   : > { %p164_p2 = pnand %p1336_p0, %p163_p1 }
   0x6   : > { %167 = sbr.rel (%p164_p2) target bundleno = 535 (0x217), region = 36 }
   0xb   : > { %s1337_s17 = sshll.u32 %s1332_s16, 5  ;;  %vm266_vm0 = vcmask 130048  }
   0xc   : > { %p190_p3 = scmp.lt.s32.totalorder %s1337_s17, 63 }
   0xe   : > { %s2932_s17 = smov (!%p190_p3, %s1337_s17), 63 }
   0xf   : > { %s1338_s18 = sshll.u32 %s2932_s17, 2 }
  0x10   : > { %s1573_s21 = scalar_lea.vmem %s2860_s0, %s1338_s18  ;;  %s2791_s30 = scalar_lea.vmem %s2864_s4, %s1338_s18 }
  0x11   : > { %v1576_v0 = vld [vmem:[%s1573_s21 + $0x60] sm:$0xff]   ;;  %v1612_v16 = vld [vmem:[%s1573_s21 + $0x48] sm:$0xff]   ;;  %v1660_v38 = vld [vmem:[%s1573_s21 + $0x50] sm:$0xff]  }
  0x12   : > { %v1579_v1 = vld [vmem:[%s1573_s21 + $0x40] sm:$0xff]   ;;  %v1414_v3 = vunpack.c.l.bf16 %v1576_v0  ;;  %v1415_v9 = vunpack.c.h.bf16 %v1576_v0  ;;  %v1402_v19 = vunpack.c.l.bf16 %v1612_v16  ;;  %v1627_v23 = vld [vmem:[%s1573_s21 + $0x68] sm:$0xff]   ;;  %v1403_v25 = vunpack.c.h.bf16 %v1612_v16  ;;  %v1675_v45 = vld [vmem:[%s1573_s21 + $0x70] sm:$0xff]  }
  0x13   : > { %v1582_v2 = vld [vmem:[%s1573_s21] sm:$0xff]   ;;  %v1398_v4 = vunpack.c.l.bf16 %v1579_v1  ;;  %v1399_v10 = vunpack.c.h.bf16 %v1579_v1  ;;  %v1418_v24 = vunpack.c.l.bf16 %v1627_v23  ;;  %v1419_v26 = vunpack.c.h.bf16 %v1627_v23  ;;  %v1642_v30 = vld [vmem:[%s1573_s21 + $0x8] sm:$0xff]   ;;  %v1678_v46 = vld [vmem:[%s1573_s21 + $0x10] sm:$0xff]  }
  0x14   : > { %v1366_v5 = vunpack.c.l.bf16 %v1582_v2  ;;  %v339_v6 = vsel %vm266_vm0, %v1414_v3, 0.0  ;;  %v1367_v11 = vunpack.c.h.bf16 %v1582_v2  ;;  %v342_v12 = vsel %vm266_vm0, %v1415_v9, 0.0  ;;  %v1609_v15 = vld [vmem:[%s1573_s21 + $0x20] sm:$0xff]   ;;  %v1645_v31 = vld [vmem:[%s1573_s21 + $0x28] sm:$0xff]   ;;  %v1693_v53 = vld [vmem:[%s1573_s21 + $0x30] sm:$0xff]  }
  0x15   : > { %v315_v7 = vsel %vm266_vm0, %v1398_v4, 0.0  ;;  %340 = vadd.xlane.f32.xlu1 %v339_v6  ;;  %v318_v13 = vsel %vm266_vm0, %v1399_v10, 0.0  ;;  %v1383_v17 = vunpack.c.h.bf16 %v1609_v15  ;;  %v1382_v18 = vunpack.c.l.bf16 %v1609_v15  ;;  %v1708_v60 = vld [vmem:[%s1573_s21 + $0x58] sm:$0xff]  }
  0x16   : > { %v267_v8 = vsel %vm266_vm0, %v1366_v5, 0.0  ;;  %316 = vadd.xlane.f32.xlu0 %v315_v7  ;;  %v270_v14 = vsel %vm266_vm0, %v1367_v11, 0.0  ;;  %v321_v22 = vsel %vm266_vm0, %v1402_v19, 0.0  ;;  %v345_v27 = vsel %vm266_vm0, %v1418_v24, 0.0  ;;  %v1711_v61 = vld [vmem:[%s1573_s21 + $0x78] sm:$0xff]  }
  0x17   : > { %268 = vadd.xlane.f32.xlu2 %v267_v8  ;;  %v294_v20 = vsel %vm266_vm0, %v1383_v17, 0.0  ;;  %v291_v21 = vsel %vm266_vm0, %v1382_v18, 0.0  ;;  %v324_v28 = vsel %vm266_vm0, %v1403_v25, 0.0  ;;  %v348_v29 = vsel %vm266_vm0, %v1419_v26, 0.0 }
  0x18   : > { %v1371_v32 = vunpack.c.h.bf16 %v1642_v30  ;;  %v1370_v33 = vunpack.c.l.bf16 %v1642_v30  ;;  %v1386_v34 = vunpack.c.l.bf16 %v1645_v31  ;;  %v1406_v39 = vunpack.c.l.bf16 %v1660_v38 }
  0x19   : > { %v1387_v40 = vunpack.c.h.bf16 %v1645_v31  ;;  %v1407_v41 = vunpack.c.h.bf16 %v1660_v38  ;;  %v1423_v47 = vunpack.c.h.bf16 %v1675_v45  ;;  %v1422_v48 = vunpack.c.l.bf16 %v1675_v45 }
  0x1a   : > { %v276_v35 = vsel %vm266_vm0, %v1371_v32, 0.0  ;;  %v273_v36 = vsel %vm266_vm0, %v1370_v33, 0.0  ;;  %v297_v37 = vsel %vm266_vm0, %v1386_v34, 0.0  ;;  %v327_v42 = vsel %vm266_vm0, %v1406_v39, 0.0 }
  0x1b   : > { %v300_v43 = vsel %vm266_vm0, %v1387_v40, 0.0  ;;  %v330_v44 = vsel %vm266_vm0, %v1407_v41, 0.0  ;;  %v1374_v49 = vunpack.c.l.bf16 %v1678_v46  ;;  %v354_v50 = vsel %vm266_vm0, %v1423_v47, 0.0 }
  0x1c   : > { %v351_v51 = vsel %vm266_vm0, %v1422_v48, 0.0  ;;  %v1390_v54 = vunpack.c.l.bf16 %v1693_v53  ;;  %v1375_v55 = vunpack.c.h.bf16 %v1678_v46  ;;  %v1391_v56 = vunpack.c.h.bf16 %v1693_v53 }
  0x1d   : > { %343 = vadd.xlane.f32.xlu1 %v342_v12  ;;  %v279_v52 = vsel %vm266_vm0, %v1374_v49, 0.0  ;;  %v1410_v62 = vunpack.c.l.bf16 %v1708_v60  ;;  %v1426_v63 = vunpack.c.l.bf16 %v1711_v61  ;;  %v1411_v6 = vunpack.c.h.bf16 %v1708_v60 }
  0x1e   : > { %319 = vadd.xlane.f32.xlu0 %v318_v13  ;;  %v303_v57 = vsel %vm266_vm0, %v1390_v54, 0.0  ;;  %v282_v58 = vsel %vm266_vm0, %v1375_v55, 0.0  ;;  %v306_v59 = vsel %vm266_vm0, %v1391_v56, 0.0  ;;  %v1726_v13 = vld [vmem:[%s1573_s21 + $0x18] sm:$0xff]  }
  0x1f   : > { %271 = vadd.xlane.f32.xlu2 %v270_v14  ;;  %v333_v7 = vsel %vm266_vm0, %v1410_v62, 0.0  ;;  %v357_v8 = vsel %vm266_vm0, %v1426_v63, 0.0  ;;  %v336_v12 = vsel %vm266_vm0, %v1411_v6, 0.0  ;;  %v1729_v14 = vld [vmem:[%s1573_s21 + $0x38] sm:$0xff]  }
  0x25   : > { %295 = vadd.xlane.f32.xlu1 %v294_v20  ;;  %v1427_v20 = vunpack.c.h.bf16 %v1711_v61 }
  0x26   : > { %292 = vadd.xlane.f32.xlu0 %v291_v21  ;;  %v1378_v21 = vunpack.c.l.bf16 %v1726_v13 }
  0x27   : > { %322 = vadd.xlane.f32.xlu2 %v321_v22  ;;  %v1394_v22 = vunpack.c.l.bf16 %v1729_v14 }
  0x2d   : > { %346 = vadd.xlane.f32.xlu1 %v345_v27  ;;  %v360_v27 = vsel %vm266_vm0, %v1427_v20, 0.0 }
  0x2e   : > { %325 = vadd.xlane.f32.xlu0 %v324_v28  ;;  %v285_v28 = vsel %vm266_vm0, %v1378_v21, 0.0 }
  0x2f   : > { %349 = vadd.xlane.f32.xlu2 %v348_v29  ;;  %v309_v29 = vsel %vm266_vm0, %v1394_v22, 0.0 }
  0x35   : > { %277 = vadd.xlane.f32.xlu1 %v276_v35  ;;  %v1379_v35 = vunpack.c.h.bf16 %v1726_v13 }
  0x36   : > { %274 = vadd.xlane.f32.xlu0 %v273_v36  ;;  %v1395_v36 = vunpack.c.h.bf16 %v1729_v14 }
  0x37   : > { %298 = vadd.xlane.f32.xlu2 %v297_v37  ;;  %v288_v37 = vsel %vm266_vm0, %v1379_v35, 0.0 }
  0x3d   : > { %328 = vadd.xlane.f32.xlu1 %v327_v42  ;;  %v312_v42 = vsel %vm266_vm0, %v1395_v36, 0.0 }
  0x3e   : > { %301 = vadd.xlane.f32.xlu0 %v300_v43  ;;  %v1531_v43 = vmov 16.0  }
  0x3f   : > { %331 = vadd.xlane.f32.xlu2 %v330_v44  ;;  %1457 = vrcp.f32 %v1531_v43 }
  0x45   : > { %355 = vadd.xlane.f32.xlu1 %v354_v50  ;;  %v1458_v44 = vpop.eup %1457 }
  0x46   : > { %352 = vadd.xlane.f32.xlu0 %v351_v51  ;;  %v364_v50 = vmul.f32 16.0, %v1458_v44  ;;  %vm368_vm1 = vweird.f32 %v1458_v44 }
  0x47   : > { %280 = vadd.xlane.f32.xlu2 %v279_v52 }
  0x48   : > { %v365_v51 = vsub.f32 1.0, %v364_v50 }
  0x4a   : > { %v366_v52 = vmul.f32 %v1458_v44, %v365_v51 }
  0x4d   : > { %304 = vadd.xlane.f32.xlu1 %v303_v57  ;;  %v367_v57 = vadd.f32 %v1458_v44, %v366_v52 }
  0x4e   : > { %283 = vadd.xlane.f32.xlu0 %v282_v58 }
  0x4f   : > { %307 = vadd.xlane.f32.xlu2 %v306_v59  ;;  %v1751_v58 = vsel %vm368_vm1, %v1458_v44, %v367_v57 }
  0x55   : > { %334 = vadd.xlane.f32.xlu1 %v333_v7 }
  0x56   : > { %358 = vadd.xlane.f32.xlu0 %v357_v8 }
  0x57   : > { %337 = vadd.xlane.f32.xlu2 %v336_v12 }
  0x5d   : > { %361 = vadd.xlane.f32.xlu1 %v360_v27 }
  0x5e   : > { %286 = vadd.xlane.f32.xlu0 %v285_v28 }
  0x5f   : > { %310 = vadd.xlane.f32.xlu2 %v309_v29 }
  0x65   : > { %289 = vadd.xlane.f32.xlu1 %v288_v37 }
  0x66   : > { %313 = vadd.xlane.f32.xlu0 %v312_v42 }
  0x88   : > { %v341_v59 = vpop.xlane.xlu1 %340 }
  0x89   : > { %v317_v7 = vpop.xlane.xlu0 %316  ;;  %v394_v8 = vmul.f32 %v1751_v58, %v341_v59 }
  0x8a   : > { %v386_v12 = vmul.f32 %v1751_v58, %v317_v7  ;;  %v269_v27 = vpop.xlane.xlu2 %268 }
  0x8b   : > { %v1757_v28 = vsub.f32 %v1414_v3, %v394_v8  ;;  %v370_v37 = vmul.f32 %v1751_v58, %v269_v27 }
  0x8c   : > { %v1761_v29 = vsub.f32 %v1398_v4, %v386_v12 }
  0x8d   : > { %v458_v43 = vmul.f32 %v1757_v28, %v1757_v28  ;;  %v1772_v3 = vsub.f32 %v1366_v5, %v370_v37 }
  0x8e   : > { %v450_v42 = vmul.f32 %v1761_v29, %v1761_v29 }
  0x8f   : > { %v538_v50 = vsel %vm266_vm0, %v458_v43, 0.0  ;;  %v434_v12 = vmul.f32 %v1772_v3, %v1772_v3 }
  0x90   : > { %v514_v44 = vsel %vm266_vm0, %v450_v42, 0.0  ;;  %v344_v51 = vpop.xlane.xlu1 %343  ;;  %539 = vadd.xlane.f32.xlu2 %v538_v50 }
  0x91   : > { %v320_v52 = vpop.xlane.xlu0 %319  ;;  %515 = vadd.xlane.f32.xlu0 %v514_v44  ;;  %v395_v4 = vmul.f32 %v1751_v58, %v344_v51  ;;  %v466_v43 = vsel %vm266_vm0, %v434_v12, 0.0 }
  0x92   : > { %v387_v57 = vmul.f32 %v1751_v58, %v320_v52  ;;  %v272_v59 = vpop.xlane.xlu2 %271 }
  0x93   : > { %v1778_v7 = vsub.f32 %v1415_v9, %v395_v4  ;;  %v371_v5 = vmul.f32 %v1751_v58, %v272_v59 }
  0x94   : > { %v1782_v8 = vsub.f32 %v1399_v10, %v387_v57 }
  0x95   : > { %v459_v37 = vmul.f32 %v1778_v7, %v1778_v7  ;;  %v1793_v0 = vsub.f32 %v1367_v11, %v371_v5 }
  0x96   : > { %v451_v27 = vmul.f32 %v1782_v8, %v1782_v8 }
  0x97   : > { %v541_v1 = vsel %vm266_vm0, %v459_v37, 0.0  ;;  %v435_v4 = vmul.f32 %v1793_v0, %v1793_v0 }
  0x98   : > { %v517_v9 = vsel %vm266_vm0, %v451_v27, 0.0  ;;  %v296_v10 = vpop.xlane.xlu1 %295  ;;  %467 = vadd.xlane.f32.xlu2 %v466_v43 }
  0x99   : > { %v293_v42 = vpop.xlane.xlu0 %292  ;;  %518 = vadd.xlane.f32.xlu1 %v517_v9  ;;  %542 = vadd.xlane.f32.xlu0 %v541_v1  ;;  %v379_v44 = vmul.f32 %v1751_v58, %v296_v10 }
  0x9a   : > { %v378_v50 = vmul.f32 %v1751_v58, %v293_v42  ;;  %v323_v51 = vpop.xlane.xlu2 %322 }
  0x9b   : > { %v1802_v2 = vsub.f32 %v1383_v17, %v379_v44  ;;  %v388_v52 = vmul.f32 %v1751_v58, %v323_v51 }
  0x9c   : > { %v1806_v11 = vsub.f32 %v1382_v18, %v378_v50  ;;  %v469_v18 = vsel %vm266_vm0, %v435_v4, 0.0 }
  0x9d   : > { %v443_v59 = vmul.f32 %v1802_v2, %v1802_v2  ;;  %v1817_v5 = vsub.f32 %v1402_v19, %v388_v52 }
  0x9e   : > { %v442_v57 = vmul.f32 %v1806_v11, %v1806_v11 }
  0x9f   : > { %v493_v15 = vsel %vm266_vm0, %v443_v59, 0.0  ;;  %v452_v43 = vmul.f32 %v1817_v5, %v1817_v5 }
  0xa0   : > { %v490_v17 = vsel %vm266_vm0, %v442_v57, 0.0  ;;  %v347_v12 = vpop.xlane.xlu1 %346  ;;  %494 = vadd.xlane.f32.xlu2 %v493_v15 }
  0xa1   : > { %v326_v27 = vpop.xlane.xlu0 %325  ;;  %491 = vadd.xlane.f32.xlu1 %v490_v17  ;;  %470 = vadd.xlane.f32.xlu0 %v469_v18  ;;  %v396_v37 = vmul.f32 %v1751_v58, %v347_v12 }
  0xa2   : > { %v389_v9 = vmul.f32 %v1751_v58, %v326_v27  ;;  %v350_v1 = vpop.xlane.xlu2 %349 }
  0xa3   : > { %v1826_v19 = vsub.f32 %v1418_v24, %v396_v37  ;;  %v397_v42 = vmul.f32 %v1751_v58, %v350_v1 }
  0xa4   : > { %v1830_v10 = vsub.f32 %v1403_v25, %v389_v9  ;;  %v520_v25 = vsel %vm266_vm0, %v452_v43, 0.0 }
  0xa5   : > { %v460_v50 = vmul.f32 %v1826_v19, %v1826_v19  ;;  %v1841_v51 = vsub.f32 %v1419_v26, %v397_v42 }
  0xa6   : > { %v453_v44 = vmul.f32 %v1830_v10, %v1830_v10 }
  0xa7   : > { %v544_v16 = vsel %vm266_vm0, %v460_v50, 0.0  ;;  %v461_v18 = vmul.f32 %v1841_v51, %v1841_v51 }
  0xa8   : > { %v523_v24 = vsel %vm266_vm0, %v453_v44, 0.0  ;;  %v278_v52 = vpop.xlane.xlu1 %277 }
  0xa9   : > { %v275_v4 = vpop.xlane.xlu0 %274  ;;  %545 = vadd.xlane.f32.xlu0 %v544_v16  ;;  %521 = vadd.xlane.f32.xlu1 %v520_v25  ;;  %v373_v57 = vmul.f32 %v1751_v58, %v278_v52 }
  0xaa   : > { %v372_v59 = vmul.f32 %v1751_v58, %v275_v4  ;;  %524 = vadd.xlane.f32.xlu2 %v523_v24  ;;  %v299_v17 = vpop.xlane.xlu2 %298 }
  0xab   : > { %v1850_v23 = vsub.f32 %v1371_v32, %v373_v57  ;;  %v380_v15 = vmul.f32 %v1751_v58, %v299_v17 }
  0xac   : > { %v1854_v26 = vsub.f32 %v1370_v33, %v372_v59  ;;  %v547_v33 = vsel %vm266_vm0, %v461_v18, 0.0 }
  0xad   : > { %v437_v27 = vmul.f32 %v1850_v23, %v1850_v23  ;;  %v1865_v37 = vsub.f32 %v1386_v34, %v380_v15 }
  0xae   : > { %v436_v12 = vmul.f32 %v1854_v26, %v1854_v26 }
  0xaf   : > { %v475_v30 = vsel %vm266_vm0, %v437_v27, 0.0  ;;  %v444_v16 = vmul.f32 %v1865_v37, %v1865_v37 }
  0xb0   : > { %v472_v32 = vsel %vm266_vm0, %v436_v12, 0.0  ;;  %v329_v9 = vpop.xlane.xlu1 %328 }
  0xb1   : > { %v302_v1 = vpop.xlane.xlu0 %301  ;;  %476 = vadd.xlane.f32.xlu0 %v475_v30  ;;  %548 = vadd.xlane.f32.xlu1 %v547_v33  ;;  %v390_v42 = vmul.f32 %v1751_v58, %v329_v9 }
  0xb2   : > { %v381_v43 = vmul.f32 %v1751_v58, %v302_v1  ;;  %473 = vadd.xlane.f32.xlu2 %v472_v32  ;;  %v332_v44 = vpop.xlane.xlu2 %331 }
  0xb3   : > { %v1874_v34 = vsub.f32 %v1406_v39, %v390_v42  ;;  %v391_v24 = vmul.f32 %v1751_v58, %v332_v44 }
  0xb4   : > { %v1878_v50 = vsub.f32 %v1387_v40, %v381_v43  ;;  %v496_v40 = vsel %vm266_vm0, %v444_v16, 0.0 }
  0xb5   : > { %v454_v52 = vmul.f32 %v1874_v34, %v1874_v34  ;;  %v1889_v4 = vsub.f32 %v1407_v41, %v391_v24 }
  0xb6   : > { %v445_v25 = vmul.f32 %v1878_v50, %v1878_v50 }
  0xb7   : > { %v526_v31 = vsel %vm266_vm0, %v454_v52, 0.0  ;;  %v455_v27 = vmul.f32 %v1889_v4, %v1889_v4 }
  0xb8   : > { %v499_v39 = vsel %vm266_vm0, %v445_v25, 0.0  ;;  %v356_v57 = vpop.xlane.xlu1 %355 }
  0xb9   : > { %v353_v59 = vpop.xlane.xlu0 %352  ;;  %527 = vadd.xlane.f32.xlu0 %v526_v31  ;;  %497 = vadd.xlane.f32.xlu1 %v496_v40  ;;  %v399_v17 = vmul.f32 %v1751_v58, %v356_v57 }
  0xba   : > { %v398_v15 = vmul.f32 %v1751_v58, %v353_v59  ;;  %500 = vadd.xlane.f32.xlu2 %v499_v39  ;;  %v281_v18 = vpop.xlane.xlu2 %280 }
  0xbb   : > { %v1898_v38 = vsub.f32 %v1423_v47, %v399_v17  ;;  %v374_v12 = vmul.f32 %v1751_v58, %v281_v18 }
  0xbc   : > { %v1902_v41 = vsub.f32 %v1422_v48, %v398_v15  ;;  %v529_v48 = vsel %vm266_vm0, %v455_v27, 0.0 }
  0xbd   : > { %v463_v30 = vmul.f32 %v1898_v38, %v1898_v38  ;;  %v1913_v33 = vsub.f32 %v1374_v49, %v374_v12 }
  0xbe   : > { %v462_v32 = vmul.f32 %v1902_v41, %v1902_v41 }
  0xbf   : > { %v553_v45 = vsel %vm266_vm0, %v463_v30, 0.0  ;;  %v438_v25 = vmul.f32 %v1913_v33, %v1913_v33 }
  0xc0   : > { %v550_v47 = vsel %vm266_vm0, %v462_v32, 0.0  ;;  %v305_v9 = vpop.xlane.xlu1 %304 }
  0xc1   : > { %v284_v1 = vpop.xlane.xlu0 %283  ;;  %554 = vadd.xlane.f32.xlu0 %v553_v45  ;;  %530 = vadd.xlane.f32.xlu1 %v529_v48  ;;  %v382_v42 = vmul.f32 %v1751_v58, %v305_v9 }
  0xc2   : > { %v375_v43 = vmul.f32 %v1751_v58, %v284_v1  ;;  %551 = vadd.xlane.f32.xlu2 %v550_v47  ;;  %v308_v44 = vpop.xlane.xlu2 %307 }
  0xc3   : > { %v1922_v49 = vsub.f32 %v1390_v54, %v382_v42  ;;  %v383_v16 = vmul.f32 %v1751_v58, %v308_v44 }
  0xc4   : > { %v1926_v24 = vsub.f32 %v1375_v55, %v375_v43  ;;  %v478_v55 = vsel %vm266_vm0, %v438_v25, 0.0 }
  0xc5   : > { %v446_v39 = vmul.f32 %v1922_v49, %v1922_v49  ;;  %v1937_v31 = vsub.f32 %v1391_v56, %v383_v16 }
  0xc6   : > { %v439_v52 = vmul.f32 %v1926_v24, %v1926_v24 }
  0xc7   : > { %v502_v46 = vsel %vm266_vm0, %v446_v39, 0.0  ;;  %v447_v18 = vmul.f32 %v1937_v31, %v1937_v31 }
  0xc8   : > { %v481_v54 = vsel %vm266_vm0, %v439_v52, 0.0  ;;  %v335_v40 = vpop.xlane.xlu1 %334 }
  0xc9   : > { %v359_v57 = vpop.xlane.xlu0 %358  ;;  %503 = vadd.xlane.f32.xlu0 %v502_v46  ;;  %479 = vadd.xlane.f32.xlu1 %v478_v55  ;;  %v392_v59 = vmul.f32 %v1751_v58, %v335_v40  ;;  %v505_v47 = vsel %vm266_vm0, %v447_v18, 0.0 }
  0xca   : > { %482 = vadd.xlane.f32.xlu2 %v481_v54  ;;  %v338_v17 = vpop.xlane.xlu2 %337  ;;  %v400_v56 = vmul.f32 %v1751_v58, %v359_v57 }
  0xcb   : > { %v393_v15 = vmul.f32 %v1751_v58, %v338_v17  ;;  %v1946_v53 = vsub.f32 %v1410_v62, %v392_v59 }
  0xcc   : > { %v1961_v30 = vsub.f32 %v1426_v63, %v400_v56 }
  0xcd   : > { %v1953_v12 = vsub.f32 %v1411_v6, %v393_v15  ;;  %v456_v27 = vmul.f32 %v1946_v53, %v1946_v53 }
  0xce   : > { %v464_v44 = vmul.f32 %v1961_v30, %v1961_v30 }
  0xcf   : > { %v457_v32 = vmul.f32 %v1953_v12, %v1953_v12  ;;  %v532_v62 = vsel %vm266_vm0, %v456_v27, 0.0 }
  0xd0   : > { %v362_v45 = vpop.xlane.xlu1 %361 }
  0xd1   : > { %v287_v48 = vpop.xlane.xlu0 %286  ;;  %506 = vadd.xlane.f32.xlu1 %v505_v47  ;;  %v535_v60 = vsel %vm266_vm0, %v457_v32, 0.0  ;;  %v401_v6 = vmul.f32 %v1751_v58, %v362_v45 }
  0xd2   : > { %v376_v9 = vmul.f32 %v1751_v58, %v287_v48  ;;  %533 = vadd.xlane.f32.xlu2 %v532_v62  ;;  %536 = vadd.xlane.f32.xlu0 %v535_v60  ;;  %v311_v1 = vpop.xlane.xlu2 %310 }
  0xd3   : > { %v384_v42 = vmul.f32 %v1751_v58, %v311_v1  ;;  %v1971_v63 = vsub.f32 %v1427_v20, %v401_v6  ;;  %v556_v20 = vsel %vm266_vm0, %v464_v44, 0.0 }
  0xd4   : > { %v1975_v43 = vsub.f32 %v1378_v21, %v376_v9  ;;  %v1363_v9 = vld [vmem:[%s2863_s3] sm:$0xff] }
  0xd5   : > { %v465_v16 = vmul.f32 %v1971_v63, %v1971_v63  ;;  %v1985_v52 = vsub.f32 %v1394_v22, %v384_v42  ;;  %1444 = vmatpush.bf16.msra.mxu2 %v1363_v9  ;;  %1445 = vmatpush.bf16.msra.mxu3 %v1363_v9 }
  0xd6   : > { %2869 = vst [vmem:[#allocation2_spill] sm:$0xff] %v1975_v43  ;;  %v440_v25 = vmul.f32 %v1975_v43, %v1975_v43  ;;  %1129 = vmatpush.bf16.msra.mxu0 %v1363_v9  ;;  %1443 = vmatpush.bf16.msra.mxu1 %v1363_v9 }
  0xd7   : > { %2870 = vst [vmem:[#allocation3_spill] sm:$0xff] %v1985_v52  ;;  %v559_v61 = vsel %vm266_vm0, %v465_v16, 0.0  ;;  %v448_v40 = vmul.f32 %v1985_v52, %v1985_v52 }
  0xd8   : > { %v484_v21 = vsel %vm266_vm0, %v440_v25, 0.0  ;;  %v290_v39 = vpop.xlane.xlu1 %289 }
  0xd9   : > { %v314_v54 = vpop.xlane.xlu0 %313  ;;  %557 = vadd.xlane.f32.xlu1 %v556_v20  ;;  %v377_v46 = vmul.f32 %v1751_v58, %v290_v39  ;;  %v508_v15 = vsel %vm266_vm0, %v448_v40, 0.0 }
  0xda   : > { %v385_v55 = vmul.f32 %v1751_v58, %v314_v54  ;;  %560 = vadd.xlane.f32.xlu2 %v559_v61  ;;  %485 = vadd.xlane.f32.xlu0 %v484_v21 }
  0xdb   : > { %v1996_v22 = vsub.f32 %v1379_v35, %v377_v46 }
  0xdc   : > { %v2000_v57 = vsub.f32 %v1395_v36, %v385_v55 }
  0xdd   : > { %2871 = vst [vmem:[#allocation4_spill] sm:$0xff] %v1996_v22  ;;  %v441_v59 = vmul.f32 %v1996_v22, %v1996_v22 }
  0xde   : > { %2872 = vst [vmem:[#allocation5_spill] sm:$0xff] %v2000_v57  ;;  %v449_v17 = vmul.f32 %v2000_v57, %v2000_v57 }
  0xdf   : > { %v487_v56 = vsel %vm266_vm0, %v441_v59, 0.0 }
  0xe0   : > { %v511_v18 = vsel %vm266_vm0, %v449_v17, 0.0 }
  0xe1   : > { %488 = vadd.xlane.f32.xlu1 %v487_v56 }
  0xe2   : > { %512 = vadd.xlane.f32.xlu0 %v511_v18  ;;  %509 = vadd.xlane.f32.xlu2 %v508_v15 }
 0x103   : > { %v540_v35 = vpop.xlane.xlu2 %539 }
 0x104   : > { %v516_v13 = vpop.xlane.xlu0 %515  ;;  %v586_v36 = vmul.f32 %v540_v35, %v1751_v58 }
 0x105   : > { %v578_v14 = vmul.f32 %v516_v13, %v1751_v58 }
 0x106   : > { %v2013_v32 = vadd.f32 1e-05, %v586_v36 }
 0x107   : > { %v2011_v27 = vadd.f32 1e-05, %v578_v14 }
 0x108   : > { %vm872_vm7 = vweird.f32 %v2013_v32 }
 0x109   : > { %1459 = vrsqrt.f32 %v2011_v27  ;;  %vm792_vm2 = vweird.f32 %v2011_v27 }
 0x10a   : > { %1461 = vrsqrt.f32 %v2013_v32 }
 0x10b   : > { %v468_v60 = vpop.xlane.xlu2 %467 }
 0x10c   : > { %v519_v62 = vpop.xlane.xlu1 %518  ;;  %v543_v47 = vpop.xlane.xlu0 %542  ;;  %v562_v6 = vmul.f32 %v468_v60, %v1751_v58 }
 0x10d   : > { %v579_v45 = vmul.f32 %v519_v62, %v1751_v58  ;;  %v587_v48 = vmul.f32 %v543_v47, %v1751_v58 }
 0x10e   : > { %v2033_v61 = vadd.f32 1e-05, %v562_v6 }
 0x10f   : > { %v2023_v1 = vpop.eup %1459  ;;  %v2025_v42 = vadd.f32 1e-05, %v579_v45  ;;  %v2027_v44 = vadd.f32 1e-05, %v587_v48 }
 0x110   : > { %v2029_v16 = vpop.eup %1461  ;;  %v787_v25 = vmul.f32 %v2023_v1, %v2011_v27  ;;  %vm793_vm3 = vweird.f32 %v2023_v1  ;;  %vm632_vm13 = vweird.f32 %v2033_v61 }
 0x111   : > { %v867_v20 = vmul.f32 %v2029_v16, %v2013_v32  ;;  %1463 = vrsqrt.f32 %v2025_v42  ;;  %vm873_vm4 = vweird.f32 %v2029_v16  ;;  %vm2078_vm6 = vmor %vm792_vm2, %vm793_vm3  ;;  %vm802_vm9 = vweird.f32 %v2025_v42 }
 0x112   : > { %v788_v21 = vmul.f32 %v2023_v1, %v787_v25  ;;  %1465 = vrsqrt.f32 %v2027_v44  ;;  %vm2086_vm8 = vmor %vm872_vm7, %vm873_vm4  ;;  %vm882_vm12 = vweird.f32 %v2027_v44 }
 0x113   : > { %v868_v39 = vmul.f32 %v2029_v16, %v867_v20  ;;  %1467 = vrsqrt.f32 %v2033_v61  ;;  %v495_v17 = vpop.xlane.xlu2 %494 }
 0x114   : > { %v492_v54 = vpop.xlane.xlu1 %491  ;;  %v471_v46 = vpop.xlane.xlu0 %470  ;;  %v789_v55 = vmul.f32 0.5, %v788_v21  ;;  %v571_v56 = vmul.f32 %v495_v17, %v1751_v58 }
 0x115   : > { %v570_v40 = vmul.f32 %v492_v54, %v1751_v58  ;;  %v563_v59 = vmul.f32 %v471_v46, %v1751_v58  ;;  %v869_v15 = vmul.f32 0.5, %v868_v39 }
 0x116   : > { %v790_v47 = vsub.f32 1.5, %v789_v55  ;;  %v2057_v48 = vadd.f32 1e-05, %v571_v56 }
 0x117   : > { %v1464_v18 = vpop.eup %1463  ;;  %v2045_v13 = vadd.f32 1e-05, %v570_v40  ;;  %v2050_v36 = vadd.f32 1e-05, %v563_v59  ;;  %v870_v60 = vsub.f32 1.5, %v869_v15 }
 0x118   : > { %v2047_v35 = vpop.eup %1465  ;;  %v797_v14 = vmul.f32 %v1464_v18, %v2025_v42  ;;  %v791_v46 = vmul.f32 %v2023_v1, %v790_v47  ;;  %vm803_vm5 = vweird.f32 %v1464_v18 }
 0x119   : > { %v2052_v62 = vpop.eup %1467  ;;  %v877_v45 = vmul.f32 %v2047_v35, %v2027_v44  ;;  %1469 = vrsqrt.f32 %v2045_v13  ;;  %v871_v59 = vmul.f32 %v2029_v16, %v870_v60  ;;  %vm2097_vm10 = vmor %vm802_vm9, %vm803_vm5  ;;  %vm883_vm11 = vweird.f32 %v2047_v35  ;;  %v2132_v44 = vld [vmem:[%s2861_s1] ss:$0 sm:$0xff] }
 0x11a   : > { %v798_v6 = vmul.f32 %v1464_v18, %v797_v14  ;;  %v627_v9 = vmul.f32 %v2052_v62, %v2033_v61  ;;  %1471 = vrsqrt.f32 %v2050_v36  ;;  %v795_v32 = vsel %vm2078_vm6, %v2023_v1, %v791_v46  ;;  %vm2137_vm14 = vmor %vm882_vm12, %vm883_vm11 }
 0x11b   : > { %v878_v25 = vmul.f32 %v2047_v35, %v877_v45  ;;  %1473 = vrsqrt.f32 %v2057_v48  ;;  %v875_v42 = vsel %vm2086_vm8, %v2029_v16, %v871_v59  ;;  %v962_v59 = vmul.f32 %v795_v32, %v1761_v29 }
 0x11c   : > { %v799_v20 = vmul.f32 0.5, %v798_v6  ;;  %v628_v21 = vmul.f32 %v2052_v62, %v627_v9  ;;  %v546_v39 = vpop.xlane.xlu0 %545  ;;  %v522_v54 = vpop.xlane.xlu1 %521  ;;  %vm633_vm15 = vweird.f32 %v2052_v62  ;;  %vm712_vm1 = vweird.f32 %v2045_v13 }
 0x11d   : > { %v879_v55 = vmul.f32 0.5, %v878_v25  ;;  %v525_v40 = vpop.xlane.xlu2 %524  ;;  %v588_v15 = vmul.f32 %v546_v39, %v1751_v58  ;;  %v580_v56 = vmul.f32 %v522_v54, %v1751_v58  ;;  %vm2165_vm2 = vmor %vm632_vm13, %vm633_vm15  ;;  %vm642_vm3 = vweird.f32 %v2050_v36 }
 0x11e   : > { %v800_v17 = vsub.f32 1.5, %v799_v20  ;;  %v629_v6 = vmul.f32 0.5, %v628_v21  ;;  %v581_v60 = vmul.f32 %v525_v40, %v1751_v58  ;;  %vm722_vm5 = vweird.f32 %v2057_v48 }
 0x11f   : > { %v2072_v14 = vpop.eup %1469  ;;  %v880_v45 = vsub.f32 1.5, %v879_v55  ;;  %v2102_v21 = vadd.f32 1e-05, %v588_v15  ;;  %v2112_v46 = vadd.f32 1e-05, %v580_v56 }
 0x120   : > { %v801_v25 = vmul.f32 %v1464_v18, %v800_v17  ;;  %v707_v27 = vmul.f32 %v2072_v14, %v2045_v13  ;;  %v2104_v39 = vpop.eup %1471  ;;  %v630_v17 = vsub.f32 1.5, %v629_v6  ;;  %v2119_v47 = vadd.f32 1e-05, %v581_v60 }
 0x121   : > { %v2114_v55 = vpop.eup %1473  ;;  %v881_v40 = vmul.f32 %v2047_v35, %v880_v45  ;;  %v637_v15 = vmul.f32 %v2104_v39, %v2050_v36  ;;  %1475 = vrsqrt.f32 %v2102_v21  ;;  %v970_v60 = vmul.f32 %v875_v42, %v1757_v28 }
 0x122   : > { %v805_v54 = vsel %vm2097_vm10, %v1464_v18, %v801_v25  ;;  %v708_v1 = vmul.f32 %v2072_v14, %v707_v27  ;;  %v717_v18 = vmul.f32 %v2114_v55, %v2057_v48  ;;  %1477 = vrsqrt.f32 %v2112_v46 }
 0x123   : > { %v963_v56 = vmul.f32 %v805_v54, %v1782_v8  ;;  %v638_v45 = vmul.f32 %v2104_v39, %v637_v15  ;;  %v885_v27 = vsel %vm2137_vm14, %v2047_v35, %v881_v40  ;;  %v631_v32 = vmul.f32 %v2052_v62, %v630_v17  ;;  %v2158_v35 = vld [vmem:[%s2862_s2] ss:$0 sm:$0xff] }
 0x124   : > { %v709_v16 = vmul.f32 0.5, %v708_v1  ;;  %v477_v6 = vpop.xlane.xlu0 %476  ;;  %v549_v9 = vpop.xlane.xlu1 %548  ;;  %v718_v29 = vmul.f32 %v2114_v55, %v717_v18  ;;  %1479 = vrsqrt.f32 %v2119_v47  ;;  %v998_v18 = vmul.f32 %v2132_v44, %v962_v59 }
 0x125   : > { %v474_v8 = vpop.xlane.xlu2 %473  ;;  %v639_v20 = vmul.f32 0.5, %v638_v45  ;;  %v565_v42 = vmul.f32 %v477_v6, %v1751_v58  ;;  %v589_v54 = vmul.f32 %v549_v9, %v1751_v58  ;;  %v999_v25 = vmul.f32 %v2132_v44, %v963_v56 }
 0x126   : > { %v710_v28 = vsub.f32 1.5, %v709_v16  ;;  %v719_v1 = vmul.f32 0.5, %v718_v29  ;;  %v564_v15 = vmul.f32 %v474_v8, %v1751_v58  ;;  %v971_v40 = vmul.f32 %v885_v27, %v1778_v7 }
 0x127   : > { %v2170_v16 = vadd.f32 1e-05, %v565_v42  ;;  %v1006_v59 = vmul.f32 %v2132_v44, %v970_v60  ;;  %v2173_v56 = vpop.eup %1475  ;;  %v635_v7 = vsel %vm2165_vm2, %v2052_v62, %v631_v32  ;;  %vm713_vm4 = vweird.f32 %v2072_v14 }
 0x128   : > { %v711_v45 = vmul.f32 %v2072_v14, %v710_v28  ;;  %v2181_v61 = vadd.f32 1e-05, %v589_v54  ;;  %v2183_v6 = vpop.eup %1477  ;;  %v640_v9 = vsub.f32 1.5, %v639_v20  ;;  %v887_v60 = vmul.f32 %v2173_v56, %v2102_v21  ;;  %vm2208_vm7 = vmor %vm712_vm1, %vm713_vm4 }
 0x129   : > { %1481 = vrsqrt.f32 %v2170_v16  ;;  %v2188_v29 = vadd.f32 1e-05, %v564_v15  ;;  %v720_v62 = vsub.f32 1.5, %v719_v1  ;;  %v807_v27 = vmul.f32 %v2183_v6, %v2112_v46 }
 0x12a   : > { %v2190_v8 = vpop.eup %1479  ;;  %v1034_v32 = vadd.f32 %v2158_v35, %v998_v18  ;;  %v1035_v28 = vadd.f32 %v2158_v35, %v999_v25  ;;  %vm643_vm6 = vweird.f32 %v2104_v39  ;;  %v888_v20 = vmul.f32 %v2173_v56, %v887_v60 }
 0x12b   : > { %v817_v42 = vmul.f32 %v2190_v8, %v2119_v47  ;;  %v1007_v54 = vmul.f32 %v2132_v44, %v971_v40  ;;  %v2202_v15 = vmul.f32 %v635_v7, %v1772_v3  ;;  %vm723_vm8 = vweird.f32 %v2114_v55  ;;  %vm2231_vm9 = vmor %vm642_vm3, %vm643_vm6 }
 0x12c   : > { %v808_v18 = vmul.f32 %v2183_v6, %v807_v27  ;;  %1483 = vrsqrt.f32 %v2181_v61  ;;  %v528_v25 = vpop.xlane.xlu0 %527  ;;  %v715_v3 = vsel %vm2208_vm7, %v2072_v14, %v711_v45  ;;  %v641_v40 = vmul.f32 %v2104_v39, %v640_v9  ;;  %v498_v13 = vpop.xlane.xlu1 %497  ;;  %vm2249_vm12 = vmor %vm722_vm5, %vm723_vm8 }
 0x12d   : > { %v818_v17 = vmul.f32 %v2190_v8, %v817_v42  ;;  %1485 = vrsqrt.f32 %v2188_v29  ;;  %v721_v7 = vmul.f32 %v2114_v55, %v720_v62  ;;  %v889_v60 = vmul.f32 0.5, %v888_v20  ;;  %v501_v45 = vpop.xlane.xlu2 %500 }
 0x12e   : > { %v809_v52 = vmul.f32 0.5, %v808_v18  ;;  %v1058_v57 = vpack.c.bf16 %v1035_v28, %v1034_v32  ;;  %v1042_v43 = vadd.f32 %v2158_v35, %v1006_v59  ;;  %v1043_v1 = vadd.f32 %v2158_v35, %v1007_v54 }
 0x12f   : > { %v2222_v27 = vpop.eup %1481  ;;  %v819_v22 = vmul.f32 0.5, %v818_v17  ;;  %v582_v14 = vmul.f32 %v528_v25, %v1751_v58  ;;  %vm892_vm10 = vweird.f32 %v2102_v21  ;;  %vm812_vm11 = vweird.f32 %v2112_v46 }
 0x130   : > { %v657_v59 = vmul.f32 %v2222_v27, %v2170_v16  ;;  %1353 = vmatmul.msk.bf16.vlgmr.msra.gmra.mxu2 %vm266_vm0, %v1058_v57  ;;  %v572_v62 = vmul.f32 %v498_v13, %v1751_v58  ;;  %v954_v32 = vmul.f32 %v715_v3, %v1806_v11  ;;  %v645_v36 = vsel %vm2231_vm9, %v2104_v39, %v641_v40 }
 0x131   : > { %v810_v20 = vsub.f32 1.5, %v809_v52  ;;  %vm822_vm13 = vweird.f32 %v2119_v47  ;;  %v1062_v57 = vpack.c.bf16 %v1043_v1, %v1042_v43  ;;  %v725_v11 = vsel %vm2249_vm12, %v2114_v55, %v721_v7 }
 0x132   : > { %v2254_v42 = vpop.eup %1483  ;;  %v890_v54 = vsub.f32 1.5, %v889_v60  ;;  %v658_v39 = vmul.f32 %v2222_v27, %v657_v59  ;;  %v2260_v18 = vadd.f32 1e-05, %v582_v14  ;;  %vm893_vm14 = vweird.f32 %v2173_v56 }
 0x133   : > { %v2262_v48 = vpop.eup %1485  ;;  %v820_v25 = vsub.f32 1.5, %v819_v22  ;;  %v897_v52 = vmul.f32 %v2254_v42, %v2181_v61  ;;  %1357 = vmatmul.msk.bf16.vlgmr.msra.gmra.mxu3 %vm266_vm0, %v1062_v57  ;;  %v2268_v43 = vadd.f32 1e-05, %v572_v62  ;;  %v947_v3 = vmul.f32 %v645_v36, %v1793_v0  ;;  %vm2304_vm5 = vmor %vm892_vm10, %vm893_vm14 }
 0x134   : > { %vm813_vm15 = vweird.f32 %v2183_v6  ;;  %v647_v55 = vmul.f32 %v2262_v48, %v2188_v29  ;;  %v573_v40 = vmul.f32 %v501_v45, %v1751_v58  ;;  %v955_v17 = vmul.f32 %v725_v11, %v1802_v2  ;;  %v555_v62 = vpop.xlane.xlu0 %554  ;;  %v531_v57 = vpop.xlane.xlu1 %530 }
 0x135   : > { %v811_v22 = vmul.f32 %v2183_v6, %v810_v20  ;;  %vm823_vm1 = vweird.f32 %v2190_v8  ;;  %v898_v13 = vmul.f32 %v2254_v42, %v897_v52  ;;  %v2280_v7 = vmul.f32 %v2173_v56, %v890_v54  ;;  %vm2291_vm3 = vmor %vm812_vm11, %vm813_vm15  ;;  %v552_v11 = vpop.xlane.xlu2 %551 }
 0x136   : > { %v659_v60 = vmul.f32 0.5, %v658_v39  ;;  %v648_v0 = vmul.f32 %v2262_v48, %v647_v55  ;;  %1487 = vrsqrt.f32 %v2260_v18  ;;  %v821_v1 = vmul.f32 %v2190_v8, %v820_v25  ;;  %vm2323_vm7 = vmor %vm822_vm13, %vm823_vm1 }
 0x137   : > { %v899_v14 = vmul.f32 0.5, %v898_v13  ;;  %vm652_vm2 = vweird.f32 %v2188_v29  ;;  %1489 = vrsqrt.f32 %v2268_v43  ;;  %vm663_vm4 = vweird.f32 %v2222_v27 }
 0x138   : > { %v649_v45 = vmul.f32 0.5, %v648_v0  ;;  %v2296_v9 = vadd.f32 1e-05, %v573_v40  ;;  %v982_v59 = vmul.f32 %v2132_v44, %v2202_v15  ;;  %v815_v46 = vsel %vm2291_vm3, %v2183_v6, %v811_v22 }
 0x139   : > { %vm662_vm6 = vweird.f32 %v2170_v16  ;;  %v983_v28 = vmul.f32 %v2132_v44, %v947_v3  ;;  %v990_v20 = vmul.f32 %v2132_v44, %v954_v32  ;;  %v991_v15 = vmul.f32 %v2132_v44, %v955_v17 }
 0x13a   : > { %v895_v21 = vsel %vm2304_vm5, %v2173_v56, %v2280_v7  ;;  %v660_v54 = vsub.f32 1.5, %v659_v60  ;;  %vm902_vm8 = vweird.f32 %v2181_v61  ;;  %v650_v32 = vsub.f32 1.5, %v649_v45  ;;  %vm2382_vm12 = vmor %vm662_vm6, %vm663_vm4 }
 0x13b   : > { %1491 = vrsqrt.f32 %v2296_v9  ;;  %v825_v39 = vsel %vm2323_vm7, %v2190_v8, %v821_v1  ;;  %v900_v25 = vsub.f32 1.5, %v899_v14  ;;  %v1018_v56 = vadd.f32 %v2158_v35, %v982_v59 }
 0x13c   : > { %v1019_v52 = vadd.f32 %v2158_v35, %v983_v28  ;;  %v2334_v47 = vpop.eup %1487  ;;  %v964_v3 = vmul.f32 %v815_v46, %v1817_v5  ;;  %v1026_v55 = vadd.f32 %v2158_v35, %v990_v20  ;;  %v1027_v40 = vadd.f32 %v2158_v35, %v991_v15 }
 0x13d   : > { %v591_v17 = vmul.f32 %v555_v62, %v1751_v58  ;;  %v2340_v22 = vpop.eup %1489  ;;  %v651_v13 = vmul.f32 %v2262_v48, %v650_v32  ;;  %vm653_vm9 = vweird.f32 %v2262_v48  ;;  %v827_v8 = vmul.f32 %v2334_v47, %v2260_v18  ;;  %v504_v32 = vpop.xlane.xlu0 %503 }
 0x13e   : > { %v1050_v7 = vpack.c.bf16 %v1019_v52, %v1018_v56  ;;  %v965_v60 = vmul.f32 %v825_v39, %v1830_v10  ;;  %v661_v5 = vmul.f32 %v2222_v27, %v660_v54  ;;  %vm903_vm10 = vweird.f32 %v2254_v42  ;;  %vm2360_vm11 = vmor %vm652_vm2, %vm653_vm9  ;;  %v483_v56 = vpop.xlane.xlu2 %482 }
 0x13f   : > { %v727_v0 = vmul.f32 %v2340_v22, %v2268_v43  ;;  %v901_v1 = vmul.f32 %v2254_v42, %v900_v25  ;;  %v828_v14 = vmul.f32 %v2334_v47, %v827_v8  ;;  %v1054_v2 = vpack.c.bf16 %v1027_v40, %v1026_v55  ;;  %vm2394_vm13 = vmor %vm902_vm8, %vm903_vm10  ;;  %v480_v25 = vpop.xlane.xlu1 %479 }
 0x140   : > { %1345 = vmatmul.msk.bf16.vlgmr.msra.gmra.mxu0 %vm266_vm0, %v1050_v7  ;;  %v2354_v45 = vadd.f32 1e-05, %v591_v17  ;;  %v583_v36 = vmul.f32 %v531_v57, %v1751_v58  ;;  %v590_v46 = vmul.f32 %v552_v11, %v1751_v58  ;;  %v1000_v28 = vmul.f32 %v2132_v44, %v964_v3 }
 0x141   : > { %v2356_v59 = vpop.eup %1491  ;;  %v728_v62 = vmul.f32 %v2340_v22, %v727_v0  ;;  %v655_v20 = vsel %vm2360_vm11, %v2262_v48, %v651_v13  ;;  %v829_v15 = vmul.f32 0.5, %v828_v14  ;;  %1349 = vmatmul.msk.bf16.vlgmr.msra.gmra.mxu1 %vm266_vm0, %v1054_v2  ;;  %v2376_v6 = vmul.f32 %v895_v21, %v1826_v19 }
 0x142   : > { %v737_v29 = vmul.f32 %v2356_v59, %v2296_v9  ;;  %1493 = vrsqrt.f32 %v2354_v45  ;;  %v2386_v11 = vadd.f32 1e-05, %v583_v36  ;;  %v2388_v54 = vadd.f32 1e-05, %v590_v46 }
 0x143   : > { %v729_v48 = vmul.f32 0.5, %v728_v62  ;;  %vm832_vm14 = vweird.f32 %v2260_v18  ;;  %v1001_v21 = vmul.f32 %v2132_v44, %v965_v60  ;;  %v1036_v39 = vadd.f32 %v2158_v35, %v1000_v28 }
 0x144   : > { %v738_v16 = vmul.f32 %v2356_v59, %v737_v29  ;;  %v665_v52 = vsel %vm2382_vm12, %v2222_v27, %v661_v5  ;;  %v905_v61 = vsel %vm2394_vm13, %v2254_v42, %v901_v1  ;;  %v948_v3 = vmul.f32 %v655_v20, %v1854_v26 }
 0x145   : > { %1495 = vrsqrt.f32 %v2386_v11  ;;  %v830_v55 = vsub.f32 1.5, %v829_v15  ;;  %v1037_v17 = vadd.f32 %v2158_v35, %v1001_v21  ;;  %v730_v13 = vsub.f32 1.5, %v729_v48 }
 0x146   : > { %v739_v40 = vmul.f32 0.5, %v738_v16  ;;  %1497 = vrsqrt.f32 %v2388_v54  ;;  %v574_v8 = vmul.f32 %v504_v32, %v1751_v58  ;;  %v566_v7 = vmul.f32 %v480_v25, %v1751_v58 }
 0x147   : > { %v567_v27 = vmul.f32 %v483_v56, %v1751_v58  ;;  %v949_v42 = vmul.f32 %v665_v52, %v1850_v23  ;;  %vm732_vm15 = vweird.f32 %v2268_v43  ;;  %vm742_vm1 = vweird.f32 %v2296_v9  ;;  %v537_v43 = vpop.xlane.xlu0 %536 }
 0x148   : > { %v2415_v60 = vpop.eup %1493  ;;  %v1059_v26 = vpack.c.bf16 %v1037_v17, %v1036_v39  ;;  %v973_v5 = vmul.f32 %v905_v61, %v1841_v51  ;;  %vm833_vm2 = vweird.f32 %v2334_v47  ;;  %v740_v0 = vsub.f32 1.5, %v739_v40  ;;  %v507_v39 = vpop.xlane.xlu1 %506 }
 0x149   : > { %v917_v1 = vmul.f32 %v2415_v60, %v2354_v45  ;;  %v831_v14 = vmul.f32 %v2334_v47, %v830_v55  ;;  %v2426_v2 = vadd.f32 1e-05, %v574_v8  ;;  %v2428_v23 = vadd.f32 1e-05, %v566_v7  ;;  %vm2449_vm5 = vmor %vm832_vm14, %vm833_vm2 }
 0x14a   : > { %1354 = vmatmul.msk.bf16.gmra.mxu2 %vm266_vm0, %v1059_v26  ;;  %v984_v10 = vmul.f32 %v2132_v44, %v948_v3  ;;  %v731_v51 = vmul.f32 %v2340_v22, %v730_v13  ;;  %vm733_vm3 = vweird.f32 %v2340_v22  ;;  %v2436_v46 = vadd.f32 1e-05, %v567_v27 }
 0x14b   : > { %v2431_v62 = vpop.eup %1495  ;;  %v918_v36 = vmul.f32 %v2415_v60, %v917_v1  ;;  %vm743_vm4 = vweird.f32 %v2356_v59  ;;  %1499 = vrsqrt.f32 %v2426_v2  ;;  %v985_v15 = vmul.f32 %v2132_v44, %v949_v42  ;;  %vm2462_vm7 = vmor %vm732_vm15, %vm733_vm3 }
 0x14c   : > { %v2438_v28 = vpop.eup %1497  ;;  %v837_v20 = vmul.f32 %v2431_v62, %v2386_v11  ;;  %v741_v57 = vmul.f32 %v2356_v59, %v740_v0  ;;  %vm922_vm6 = vweird.f32 %v2354_v45  ;;  %v835_v19 = vsel %vm2449_vm5, %v2334_v47, %v831_v14  ;;  %vm2478_vm8 = vmor %vm742_vm1, %vm743_vm4 }
 0x14d   : > { %v919_v48 = vmul.f32 0.5, %v918_v36  ;;  %v907_v32 = vmul.f32 %v2438_v28, %v2388_v54  ;;  %1501 = vrsqrt.f32 %v2428_v23  ;;  %v1020_v21 = vadd.f32 %v2158_v35, %v984_v10 }
 0x14e   : > { %v838_v16 = vmul.f32 %v2431_v62, %v837_v20  ;;  %v735_v25 = vsel %vm2462_vm7, %v2340_v22, %v731_v51  ;;  %1503 = vrsqrt.f32 %v2436_v46  ;;  %vm842_vm9 = vweird.f32 %v2386_v11 }
 0x14f   : > { %v920_v56 = vsub.f32 1.5, %v919_v48  ;;  %v908_v47 = vmul.f32 %v2438_v28, %v907_v32  ;;  %v1021_v3 = vadd.f32 %v2158_v35, %v985_v15  ;;  %v1008_v22 = vmul.f32 %v2132_v44, %v2376_v6 }
 0x150   : > { %v839_v61 = vmul.f32 0.5, %v838_v16  ;;  %v1009_v55 = vmul.f32 %v2132_v44, %v973_v5  ;;  %v2488_v40 = vmul.f32 %v835_v19, %v1874_v34  ;;  %v745_v9 = vsel %vm2478_vm8, %v2356_v59, %v741_v57  ;;  %v534_v5 = vpop.xlane.xlu2 %533 }
 0x151   : > { %v909_v17 = vmul.f32 0.5, %v908_v47  ;;  %v575_v13 = vmul.f32 %v507_v39, %v1751_v58  ;;  %v2494_v8 = vpop.eup %1499  ;;  %v1051_v27 = vpack.c.bf16 %v1021_v3, %v1020_v21  ;;  %v1044_v42 = vadd.f32 %v2158_v35, %v1008_v22  ;;  %v558_v47 = vpop.xlane.xlu1 %557 }
 0x152   : > { %v840_v7 = vsub.f32 1.5, %v839_v61  ;;  %v1045_v6 = vadd.f32 %v2158_v35, %v1009_v55  ;;  %v956_v26 = vmul.f32 %v735_v25, %v1865_v37  ;;  %v921_v34 = vmul.f32 %v2415_v60, %v920_v56 }
 0x153   : > { %vm923_vm10 = vweird.f32 %v2415_v60  ;;  %vm912_vm11 = vweird.f32 %v2388_v54  ;;  %v747_v59 = vmul.f32 %v2494_v8, %v2426_v2  ;;  %v2504_v0 = vpop.eup %1501  ;;  %v910_v1 = vsub.f32 1.5, %v909_v17  ;;  %1346 = vmatmul.msk.bf16.gmra.mxu0 %vm266_vm0, %v1051_v27 }
 0x154   : > { %v1063_v14 = vpack.c.bf16 %v1045_v6, %v1044_v42  ;;  %v2507_v10 = vadd.f32 1e-05, %v575_v13  ;;  %v585_v37 = vmul.f32 %v537_v43, %v1751_v58  ;;  %v2510_v51 = vpop.eup %1503  ;;  %v957_v36 = vmul.f32 %v745_v9, %v1878_v50  ;;  %vm2521_vm13 = vmor %vm922_vm6, %vm923_vm10  ;;  %v486_v43 = vpop.xlane.xlu0 %485 }
 0x155   : > { %vm843_vm12 = vweird.f32 %v2431_v62  ;;  %v748_v20 = vmul.f32 %v2494_v8, %v747_v59  ;;  %v667_v15 = vmul.f32 %v2504_v0, %v2428_v23  ;;  %v841_v57 = vmul.f32 %v2431_v62, %v840_v7 }
 0x156   : > { %vm913_vm14 = vweird.f32 %v2438_v28  ;;  %v677_v50 = vmul.f32 %v2510_v51, %v2436_v46  ;;  %1358 = vmatmul.msk.bf16.gmra.mxu3 %vm266_vm0, %v1063_v14  ;;  %1505 = vrsqrt.f32 %v2507_v10  ;;  %v925_v48 = vsel %vm2521_vm13, %v2415_v60, %v921_v34  ;;  %vm2546_vm3 = vmor %vm842_vm9, %vm843_vm12 }
 0x157   : > { %v749_v45 = vmul.f32 0.5, %v748_v20  ;;  %vm752_vm15 = vweird.f32 %v2426_v2  ;;  %v668_v32 = vmul.f32 %v2504_v0, %v667_v15  ;;  %v911_v19 = vmul.f32 %v2438_v28, %v910_v1  ;;  %vm2568_vm5 = vmor %vm912_vm11, %vm913_vm14 }
 0x158   : > { %vm753_vm1 = vweird.f32 %v2494_v8  ;;  %vm672_vm2 = vweird.f32 %v2428_v23  ;;  %v678_v18 = vmul.f32 %v2510_v51, %v677_v50  ;;  %v2540_v16 = vadd.f32 1e-05, %v585_v37  ;;  %v561_v34 = vpop.xlane.xlu2 %560 }
 0x159   : > { %v750_v21 = vsub.f32 1.5, %v749_v45  ;;  %v669_v39 = vmul.f32 0.5, %v668_v32  ;;  %v584_v25 = vmul.f32 %v534_v5, %v1751_v58  ;;  %v992_v56 = vmul.f32 %v2132_v44, %v956_v26  ;;  %vm2587_vm7 = vmor %vm752_vm15, %vm753_vm1  ;;  %v489_v60 = vpop.xlane.xlu1 %488 }
 0x15a   : > { %v845_v52 = vsel %vm2546_vm3, %v2431_v62, %v841_v57  ;;  %v679_v61 = vmul.f32 0.5, %v678_v18  ;;  %vm682_vm4 = vweird.f32 %v2436_v46  ;;  %1507 = vrsqrt.f32 %v2540_v16 }
 0x15b   : > { %v993_v11 = vmul.f32 %v2132_v44, %v957_v36  ;;  %v751_v3 = vmul.f32 %v2494_v8, %v750_v21  ;;  %v670_v22 = vsub.f32 1.5, %v669_v39  ;;  %v2559_v55 = vadd.f32 1e-05, %v584_v25 }
 0x15c   : > { %v1028_v9 = vadd.f32 %v2158_v35, %v992_v56  ;;  %v2562_v17 = vpop.eup %1505  ;;  %v680_v13 = vsub.f32 1.5, %v679_v61  ;;  %v592_v27 = vmul.f32 %v558_v47, %v1751_v58  ;;  %v568_v42 = vmul.f32 %v486_v43, %v1751_v58 }
 0x15d   : > { %v1029_v7 = vadd.f32 %v2158_v35, %v993_v11  ;;  %v975_v6 = vmul.f32 %v925_v48, %v1898_v38  ;;  %v915_v26 = vsel %vm2568_vm5, %v2438_v28, %v911_v19  ;;  %vm673_vm6 = vweird.f32 %v2504_v0 }
 0x15e   : > { %v757_v54 = vmul.f32 %v2562_v17, %v2507_v10  ;;  %v967_v59 = vmul.f32 %v845_v52, %v1889_v4  ;;  %v671_v38 = vmul.f32 %v2504_v0, %v670_v22  ;;  %vm683_vm8 = vweird.f32 %v2510_v51  ;;  %vm2611_vm9 = vmor %vm672_vm2, %vm673_vm6  ;;  %v513_v22 = vpop.xlane.xlu0 %512 }
 0x15f   : > { %1509 = vrsqrt.f32 %v2559_v55  ;;  %v755_v28 = vsel %vm2587_vm7, %v2494_v8, %v751_v3  ;;  %v1055_v1 = vpack.c.bf16 %v1029_v7, %v1028_v9  ;;  %v2598_v14 = vadd.f32 1e-05, %v592_v27  ;;  %vm2633_vm12 = vmor %vm682_vm4, %vm683_vm8 }
 0x160   : > { %v758_v4 = vmul.f32 %v2562_v17, %v757_v54  ;;  %v2600_v2 = vpop.eup %1507  ;;  %v974_v37 = vmul.f32 %v915_v26, %v1902_v41  ;;  %v681_v36 = vmul.f32 %v2510_v51, %v680_v13  ;;  %v2604_v20 = vadd.f32 1e-05, %v568_v42 }
 0x161   : > { %v593_v15 = vmul.f32 %v561_v34, %v1751_v58  ;;  %vm762_vm10 = vweird.f32 %v2507_v10  ;;  %vm763_vm11 = vweird.f32 %v2562_v17  ;;  %v857_v41 = vmul.f32 %v2600_v2, %v2540_v16  ;;  %1350 = vmatmul.msk.bf16.gmra.mxu1 %vm266_vm0, %v1055_v1 }
 0x162   : > { %v759_v29 = vmul.f32 0.5, %v758_v4  ;;  %v2621_v57 = vmul.f32 %v755_v28, %v1922_v49  ;;  %v675_v23 = vsel %vm2611_vm9, %v2504_v0, %v671_v38  ;;  %1511 = vrsqrt.f32 %v2598_v14  ;;  %vm2664_vm15 = vmor %vm762_vm10, %vm763_vm11  ;;  %v510_v4 = vpop.xlane.xlu2 %509 }
 0x163   : > { %v2627_v50 = vadd.f32 1e-05, %v593_v15  ;;  %v858_v49 = vmul.f32 %v2600_v2, %v857_v41  ;;  %vm862_vm13 = vweird.f32 %v2540_v16  ;;  %1513 = vrsqrt.f32 %v2604_v20 }
 0x164   : > { %v760_v45 = vsub.f32 1.5, %v759_v29  ;;  %v1002_v0 = vmul.f32 %v2132_v44, %v2488_v40  ;;  %v685_v46 = vsel %vm2633_vm12, %v2510_v51, %v681_v36  ;;  %v1003_v19 = vmul.f32 %v2132_v44, %v967_v59 }
 0x165   : > { %v2642_v32 = vpop.eup %1509  ;;  %1515 = vrsqrt.f32 %v2627_v50  ;;  %v1010_v18 = vmul.f32 %v2132_v44, %v974_v37  ;;  %v950_v21 = vmul.f32 %v675_v23, %v1913_v33  ;;  %v859_v25 = vmul.f32 0.5, %v858_v49 }
 0x166   : > { %v761_v39 = vmul.f32 %v2562_v17, %v760_v45  ;;  %v847_v40 = vmul.f32 %v2642_v32, %v2559_v55  ;;  %vm852_vm14 = vweird.f32 %v2559_v55  ;;  %v1038_v56 = vadd.f32 %v2158_v35, %v1002_v0 }
 0x167   : > { %v1039_v51 = vadd.f32 %v2158_v35, %v1003_v19  ;;  %v1011_v47 = vmul.f32 %v2132_v44, %v975_v6  ;;  %v1046_v43 = vadd.f32 %v2158_v35, %v1010_v18  ;;  %v951_v52 = vmul.f32 %v685_v46, %v1926_v24 }
 0x168   : > { %v860_v61 = vsub.f32 1.5, %v859_v25  ;;  %v848_v11 = vmul.f32 %v2642_v32, %v847_v40  ;;  %v569_v3 = vmul.f32 %v489_v60, %v1751_v58  ;;  %v1512_v9 = vpop.eup %1511  ;;  %v765_v62 = vsel %vm2664_vm15, %v2562_v17, %v761_v39 }
 0x169   : > { %vm863_vm1 = vweird.f32 %v2600_v2  ;;  %v1060_v24 = vpack.c.bf16 %v1039_v51, %v1038_v56  ;;  %v1047_v10 = vadd.f32 %v2158_v35, %v1011_v47  ;;  %v2675_v13 = vpop.eup %1513  ;;  %vm853_vm2 = vweird.f32 %v2642_v32 }
 0x16a   : > { %v861_v7 = vmul.f32 %v2600_v2, %v860_v61  ;;  %v849_v27 = vmul.f32 0.5, %v848_v11  ;;  %v927_v42 = vmul.f32 %v1512_v9, %v2598_v14  ;;  %vm932_vm3 = vweird.f32 %v2598_v14  ;;  %vm2694_vm5 = vmor %vm862_vm13, %vm863_vm1 }
 0x16b   : > { %v1516_v6 = vpop.eup %1515  ;;  %v687_v17 = vmul.f32 %v2675_v13, %v2604_v20  ;;  %1355 = vmatmul.msk.bf16.gmra.mxu2 %vm266_vm0, %v1060_v24  ;;  %v1064_v26 = vpack.c.bf16 %v1047_v10, %v1046_v43  ;;  %v2684_v54 = vadd.f32 1e-05, %v569_v3  ;;  %v577_v34 = vmul.f32 %v513_v22, %v1751_v58  ;;  %vm2710_vm8 = vmor %vm852_vm14, %vm853_vm2 }
 0x16c   : > { %v959_v59 = vmul.f32 %v765_v62, %v1937_v31  ;;  %v850_v5 = vsub.f32 1.5, %v849_v27  ;;  %v928_v38 = vmul.f32 %v1512_v9, %v927_v42  ;;  %v937_v28 = vmul.f32 %v1516_v6, %v2627_v50 }
 0x16d   : > { %vm942_vm4 = vweird.f32 %v2627_v50  ;;  %vm933_vm6 = vweird.f32 %v1512_v9  ;;  %v688_v37 = vmul.f32 %v2675_v13, %v687_v17  ;;  %vm693_vm7 = vweird.f32 %v2675_v13  ;;  %1359 = vmatmul.msk.bf16.gmra.mxu3 %vm266_vm0, %v1064_v26 }
 0x16e   : > { %1517 = vrsqrt.f32 %v2684_v54  ;;  %v865_v31 = vsel %vm2694_vm5, %v2600_v2, %v861_v7  ;;  %v851_v36 = vmul.f32 %v2642_v32, %v850_v5  ;;  %v929_v16 = vmul.f32 0.5, %v928_v38  ;;  %vm934_vm10 = vmor %vm932_vm3, %vm933_vm6 }
 0x16f   : > { %v938_v15 = vmul.f32 %v1516_v6, %v937_v28  ;;  %v689_v29 = vmul.f32 0.5, %v688_v37  ;;  %v2714_v41 = vadd.f32 1e-05, %v577_v34  ;;  %v576_v23 = vmul.f32 %v510_v4, %v1751_v58 }
 0x170   : > { %v986_v48 = vmul.f32 %v2132_v44, %v950_v21  ;;  %v855_v2 = vsel %vm2710_vm8, %v2642_v32, %v851_v36  ;;  %v930_v45 = vsub.f32 1.5, %v929_v16  ;;  %v987_v0 = vmul.f32 %v2132_v44, %v951_v52  ;;  %v2928_v36 = vld [vmem:[#allocation4_spill] sm:$0xff] }
 0x171   : > { %v939_v49 = vmul.f32 0.5, %v938_v15  ;;  %v969_v55 = vmul.f32 %v865_v31, %v1953_v12  ;;  %v690_v46 = vsub.f32 1.5, %v689_v29  ;;  %vm943_vm9 = vweird.f32 %v1516_v6 }
 0x172   : > { %1519 = vrsqrt.f32 %v2714_v41  ;;  %v931_v19 = vmul.f32 %v1512_v9, %v930_v45  ;;  %v2724_v60 = vadd.f32 1e-05, %v576_v23  ;;  %v1022_v58 = vadd.f32 %v2158_v35, %v986_v48  ;;  %vm944_vm11 = vmor %vm942_vm4, %vm943_vm9 }
 0x173   : > { %v940_v18 = vsub.f32 1.5, %v939_v49  ;;  %v968_v39 = vmul.f32 %v855_v2, %v1946_v53  ;;  %v1023_v32 = vadd.f32 %v2158_v35, %v987_v0  ;;  %v994_v12 = vmul.f32 %v2132_v44, %v2621_v57  ;;  %v2929_v2 = vld [vmem:[#allocation5_spill] sm:$0xff] }
 0x174   : > { %v1518_v21 = vpop.eup %1517  ;;  %v995_v25 = vmul.f32 %v2132_v44, %v959_v59  ;;  %v935_v40 = vsel %vm934_vm10, %v1512_v9, %v931_v19  ;;  %v691_v56 = vmul.f32 %v2675_v13, %v690_v46  ;;  %1521 = vrsqrt.f32 %v2724_v60 }
 0x175   : > { %v941_v51 = vmul.f32 %v1516_v6, %v940_v18  ;;  %v697_v47 = vmul.f32 %v1518_v21, %v2684_v54  ;;  %v976_v43 = vmul.f32 %v935_v40, %v1961_v30  ;;  %vm692_vm12 = vweird.f32 %v2604_v20  ;;  %v2930_v18 = vld [vmem:[#allocation3_spill] sm:$0xff] }
 0x176   : > { %v1052_v57 = vpack.c.bf16 %v1023_v32, %v1022_v58  ;;  %vm2745_vm13 = vmor %vm692_vm12, %vm693_vm7  ;;  %v1030_v61 = vadd.f32 %v2158_v35, %v994_v12  ;;  %v1031_v50 = vadd.f32 %v2158_v35, %v995_v25  ;;  %v1004_v11 = vmul.f32 %v2132_v44, %v968_v39 }
 0x177   : > { %v945_v53 = vsel %vm944_vm11, %v1516_v6, %v941_v51  ;;  %v698_v14 = vmul.f32 %v1518_v21, %v697_v47  ;;  %v695_v20 = vsel %vm2745_vm13, %v2675_v13, %v691_v56  ;;  %v1005_v9 = vmul.f32 %v2132_v44, %v969_v55  ;;  %v2927_v6 = vld [vmem:[#allocation2_spill] sm:$0xff] }
 0x178   : > { %v1520_v52 = vpop.eup %1519  ;;  %v977_v30 = vmul.f32 %v945_v53, %v1971_v63  ;;  %1347 = vmatmul.msk.bf16.gmra.mxu0 %vm266_vm0, %v1052_v57  ;;  %v1056_v62 = vpack.c.bf16 %v1031_v50, %v1030_v61  ;;  %v1040_v63 = vadd.f32 %v2158_v35, %v1004_v11  ;;  %v1012_v24 = vmul.f32 %v2132_v44, %v976_v43 }
 0x179   : > { %v699_v3 = vmul.f32 0.5, %v698_v14  ;;  %v777_v22 = vmul.f32 %v1520_v52, %v2714_v41  ;;  %vm703_vm14 = vweird.f32 %v1518_v21  ;;  %v1041_v42 = vadd.f32 %v2158_v35, %v1005_v9 }
 0x17a   : > { %v1013_v10 = vmul.f32 %v2132_v44, %v977_v30  ;;  %v1522_v13 = vpop.eup %1521  ;;  %v952_v17 = vmul.f32 %v695_v20, %v2927_v6  ;;  %1351 = vmatmul.msk.bf16.gmra.mxu1 %vm266_vm0, %v1056_v62  ;;  %v1048_v26 = vadd.f32 %v2158_v35, %v1012_v24  ;;  %vm702_vm15 = vweird.f32 %v2684_v54 }
 0x17b   : > { %v700_v7 = vsub.f32 1.5, %v699_v3  ;;  %v778_v27 = vmul.f32 %v1520_v52, %v777_v22  ;;  %v767_v38 = vmul.f32 %v1522_v13, %v2724_v60  ;;  %vm704_vm1 = vmor %vm702_vm15, %vm703_vm14  ;;  %v1061_v28 = vpack.c.bf16 %v1041_v42, %v1040_v63 }
 0x17c   : > { %v1049_v34 = vadd.f32 %v2158_v35, %v1013_v10  ;;  %vm783_vm2 = vweird.f32 %v1520_v52  ;;  %v988_v15 = vmul.f32 %v2132_v44, %v952_v17  ;;  %vm782_vm3 = vweird.f32 %v2714_v41 }
 0x17d   : > { %v701_v59 = vmul.f32 %v1518_v21, %v700_v7  ;;  %v779_v5 = vmul.f32 0.5, %v778_v27  ;;  %v768_v31 = vmul.f32 %v1522_v13, %v767_v38  ;;  %1356 = vmatmul.msk.bf16.gmra.mxu2 %vm266_vm0, %v1061_v28  ;;  %vm784_vm4 = vmor %vm782_vm3, %vm783_vm2  ;;  %vm773_vm5 = vweird.f32 %v1522_v13 }
 0x17e   : > { %v1065_v4 = vpack.c.bf16 %v1049_v34, %v1048_v26  ;;  %v1024_v49 = vadd.f32 %v2158_v35, %v988_v15  ;;  %vm772_vm6 = vweird.f32 %v2724_v60  ;;  %vm1243_vm8 = vcmask 388096  }
 0x17f   : > { %v705_v1 = vsel %vm704_vm1, %v1518_v21, %v701_v59  ;;  %v780_v37 = vsub.f32 1.5, %v779_v5  ;;  %v769_v54 = vmul.f32 0.5, %v768_v31  ;;  %vm774_vm7 = vmor %vm772_vm6, %vm773_vm5 }
 0x180   : > { %v953_v16 = vmul.f32 %v705_v1, %v2928_v36  ;;  %1360 = vmatmul.msk.bf16.gmra.mxu3 %vm266_vm0, %v1065_v4 }
 0x181   : > { %v781_v8 = vmul.f32 %v1520_v52, %v780_v37  ;;  %v770_v48 = vsub.f32 1.5, %v769_v54 }
 0x182   : > { %v989_v29 = vmul.f32 %v2132_v44, %v953_v16 }
 0x183   : > { %v785_v23 = vsel %vm784_vm4, %v1520_v52, %v781_v8  ;;  %v771_v55 = vmul.f32 %v1522_v13, %v770_v48 }
 0x184   : > { %v961_v45 = vmul.f32 %v785_v23, %v2929_v2  ;;  %v1025_v0 = vadd.f32 %v2158_v35, %v989_v29 }
 0x185   : > { %v775_v19 = vsel %vm774_vm7, %v1522_v13, %v771_v55 }
 0x186   : > { %v1053_v46 = vpack.c.bf16 %v1025_v0, %v1024_v49  ;;  %v997_v41 = vmul.f32 %v2132_v44, %v961_v45  ;;  %v960_v58 = vmul.f32 %v775_v19, %v2930_v18 }
 0x188   : > { %1348 = vmatmul.msk.bf16.gmra.mxu0 %vm266_vm0, %v1053_v46  ;;  %v996_v21 = vmul.f32 %v2132_v44, %v960_v58  ;;  %v1033_v39 = vadd.f32 %v2158_v35, %v997_v41 }
 0x18a   : > { %v1032_v32 = vadd.f32 %v2158_v35, %v996_v21 }
 0x18c   : > { %v1057_v12 = vpack.c.bf16 %v1033_v39, %v1032_v32 }
 0x18e   : > { %1352 = vmatmul.msk.bf16.gmra.mxu1 %vm266_vm0, %v1057_v12 }
 0x1b3   : > { %v1171_v60 = vpop.f32.mrf.mxu2 }
 0x1b4   : > { %v1227_v44 = vpack.c.bf16 %v1171_v60, %v1171_v60 }
 0x1b6   : > { %1260 = vst.msk [vmem:[%s2791_s30 + $0x40] sm:$0xf] %vm1243_vm8, %v1227_v44  ;;  %v1191_v35 = vpop.f32.mrf.mxu3 }
 0x1b7   : > { %v1235_v25 = vpack.c.bf16 %v1191_v35, %v1191_v35 }
 0x1b9   : > { %1268 = vst.msk [vmem:[%s2791_s30 + $0x60] sm:$0xf] %vm1243_vm8, %v1235_v25 }
 0x1bb   : > { %v1173_v40 = vpop.f32.mrf.mxu2 }
 0x1bc   : > { %v1228_v51 = vpack.c.bf16 %v1173_v40, %v1173_v40 }
 0x1bd   : > { %v1131_v56 = vpop.f32.mrf.mxu0 }
 0x1be   : > { %v1211_v47 = vpack.c.bf16 %v1131_v56, %v1131_v56  ;;  %v1151_v43 = vpop.f32.mrf.mxu1  ;;  %1261 = vst.msk [vmem:[%s2791_s30 + $0x44] sm:$0xf] %vm1243_vm8, %v1228_v51  ;;  %v1193_v53 = vpop.f32.mrf.mxu3 }
 0x1bf   : > { %v1219_v14 = vpack.c.bf16 %v1151_v43, %v1151_v43  ;;  %v1236_v57 = vpack.c.bf16 %v1193_v53, %v1193_v53 }
 0x1c0   : > { %1244 = vst.msk [vmem:[%s2791_s30] sm:$0xf] %vm1243_vm8, %v1211_v47 }
 0x1c1   : > { %1252 = vst.msk [vmem:[%s2791_s30 + $0x20] sm:$0xf] %vm1243_vm8, %v1219_v14 }
 0x1c2   : > { %1269 = vst.msk [vmem:[%s2791_s30 + $0x64] sm:$0xf] %vm1243_vm8, %v1236_v57 }
 0x1c5   : > { %v1133_v52 = vpop.f32.mrf.mxu0 }
 0x1c6   : > { %v1212_v33 = vpack.c.bf16 %v1133_v52, %v1133_v52  ;;  %v1153_v30 = vpop.f32.mrf.mxu1 }
 0x1c7   : > { %v1220_v61 = vpack.c.bf16 %v1153_v30, %v1153_v30 }
 0x1c8   : > { %1245 = vst.msk [vmem:[%s2791_s30 + $0x4] sm:$0xf] %vm1243_vm8, %v1212_v33 }
 0x1c9   : > { %1253 = vst.msk [vmem:[%s2791_s30 + $0x24] sm:$0xf] %vm1243_vm8, %v1220_v61 }
 0x1cd   : > { %v1176_v50 = vpop.f32.mrf.mxu2 }
 0x1ce   : > { %v1229_v11 = vpack.c.bf16 %v1176_v50, %v1176_v50 }
 0x1d0   : > { %1262 = vst.msk [vmem:[%s2791_s30 + $0x48] sm:$0xf] %vm1243_vm8, %v1229_v11  ;;  %v1136_v20 = vpop.f32.mrf.mxu0 }
 0x1d1   : > { %v1213_v3 = vpack.c.bf16 %v1136_v20, %v1136_v20 }
 0x1d3   : > { %1246 = vst.msk [vmem:[%s2791_s30 + $0x8] sm:$0xf] %vm1243_vm8, %v1213_v3 }
 0x1d5   : > { %v1178_v22 = vpop.f32.mrf.mxu2 }
 0x1d6   : > { %v1230_v9 = vpack.c.bf16 %v1178_v22, %v1178_v22 }
 0x1d8   : > { %1263 = vst.msk [vmem:[%s2791_s30 + $0x4c] sm:$0xf] %vm1243_vm8, %v1230_v9  ;;  %v1138_v63 = vpop.f32.mrf.mxu0 }
 0x1d9   : > { %v1196_v62 = vpop.f32.mrf.mxu3  ;;  %v1214_v10 = vpack.c.bf16 %v1138_v63, %v1138_v63 }
 0x1da   : > { %v1237_v24 = vpack.c.bf16 %v1196_v62, %v1196_v62 }
 0x1db   : > { %1247 = vst.msk [vmem:[%s2791_s30 + $0xc] sm:$0xf] %vm1243_vm8, %v1214_v10 }
 0x1dc   : > { %1270 = vst.msk [vmem:[%s2791_s30 + $0x68] sm:$0xf] %vm1243_vm8, %v1237_v24 }
 0x1de   : > { %v1156_v7 = vpop.f32.mrf.mxu1 }
 0x1df   : > { %v1221_v27 = vpack.c.bf16 %v1156_v7, %v1156_v7 }
 0x1e1   : > { %1254 = vst.msk [vmem:[%s2791_s30 + $0x28] sm:$0xf] %vm1243_vm8, %v1221_v27  ;;  %v1198_v42 = vpop.f32.mrf.mxu3 }
 0x1e2   : > { %v1238_v13 = vpack.c.bf16 %v1198_v42, %v1198_v42 }
 0x1e4   : > { %1271 = vst.msk [vmem:[%s2791_s30 + $0x6c] sm:$0xf] %vm1243_vm8, %v1238_v13 }
 0x1e6   : > { %v1158_v6 = vpop.f32.mrf.mxu1 }
 0x1e7   : > { %v1222_v17 = vpack.c.bf16 %v1158_v6, %v1158_v6 }
 0x1e9   : > { %1255 = vst.msk [vmem:[%s2791_s30 + $0x2c] sm:$0xf] %vm1243_vm8, %v1222_v17 }
 0x1ee   : > { %v1181_v26 = vpop.f32.mrf.mxu2 }
 0x1ef   : > { %v1231_v34 = vpack.c.bf16 %v1181_v26, %v1181_v26 }
 0x1f0   : > { %v1201_v59 = vpop.f32.mrf.mxu3 }
 0x1f1   : > { %1264 = vst.msk [vmem:[%s2791_s30 + $0x50] sm:$0xf] %vm1243_vm8, %v1231_v34  ;;  %v1239_v5 = vpack.c.bf16 %v1201_v59, %v1201_v59 }
 0x1f3   : > { %1272 = vst.msk [vmem:[%s2791_s30 + $0x70] sm:$0xf] %vm1243_vm8, %v1239_v5 }
 0x1f5   : > { %v1141_v38 = vpop.f32.mrf.mxu0 }
 0x1f6   : > { %v1215_v28 = vpack.c.bf16 %v1141_v38, %v1141_v38  ;;  %v1183_v4 = vpop.f32.mrf.mxu2 }
 0x1f7   : > { %v1232_v1 = vpack.c.bf16 %v1183_v4, %v1183_v4  ;;  %v1161_v31 = vpop.f32.mrf.mxu1 }
 0x1f8   : > { %1248 = vst.msk [vmem:[%s2791_s30 + $0x10] sm:$0xf] %vm1243_vm8, %v1215_v28  ;;  %v1203_v37 = vpop.f32.mrf.mxu3  ;;  %v1223_v16 = vpack.c.bf16 %v1161_v31, %v1161_v31 }
 0x1f9   : > { %1265 = vst.msk [vmem:[%s2791_s30 + $0x54] sm:$0xf] %vm1243_vm8, %v1232_v1  ;;  %v1240_v36 = vpack.c.bf16 %v1203_v37, %v1203_v37 }
 0x1fa   : > { %1256 = vst.msk [vmem:[%s2791_s30 + $0x30] sm:$0xf] %vm1243_vm8, %v1223_v16 }
 0x1fb   : > { %1273 = vst.msk [vmem:[%s2791_s30 + $0x74] sm:$0xf] %vm1243_vm8, %v1240_v36 }
 0x1fd   : > { %v1143_v15 = vpop.f32.mrf.mxu0 }
 0x1fe   : > { %v1216_v8 = vpack.c.bf16 %v1143_v15, %v1143_v15 }
 0x1ff   : > { %v1163_v54 = vpop.f32.mrf.mxu1 }
 0x200   : > { %1249 = vst.msk [vmem:[%s2791_s30 + $0x14] sm:$0xf] %vm1243_vm8, %v1216_v8  ;;  %v1224_v29 = vpack.c.bf16 %v1163_v54, %v1163_v54  ;;  %v1186_v23 = vpop.f32.mrf.mxu2 }
 0x201   : > { %v1233_v2 = vpack.c.bf16 %v1186_v23, %v1186_v23 }
 0x202   : > { %1257 = vst.msk [vmem:[%s2791_s30 + $0x34] sm:$0xf] %vm1243_vm8, %v1224_v29 }
 0x203   : > { %v1206_v48 = vpop.f32.mrf.mxu3  ;;  %1266 = vst.msk [vmem:[%s2791_s30 + $0x58] sm:$0xf] %vm1243_vm8, %v1233_v2 }
 0x204   : > { %v1241_v45 = vpack.c.bf16 %v1206_v48, %v1206_v48 }
 0x205   : > { %v1146_v49 = vpop.f32.mrf.mxu0 }
 0x206   : > { %1274 = vst.msk [vmem:[%s2791_s30 + $0x78] sm:$0xf] %vm1243_vm8, %v1241_v45  ;;  %v1217_v0 = vpack.c.bf16 %v1146_v49, %v1146_v49 }
 0x208   : > { %1250 = vst.msk [vmem:[%s2791_s30 + $0x18] sm:$0xf] %vm1243_vm8, %v1217_v0  ;;  %v1188_v55 = vpop.f32.mrf.mxu2 }
 0x209   : > { %v1234_v41 = vpack.c.bf16 %v1188_v55, %v1188_v55 }
 0x20b   : > { %v1208_v46 = vpop.f32.mrf.mxu3  ;;  %v1166_v18 = vpop.f32.mrf.mxu1  ;;  %1267 = vst.msk [vmem:[%s2791_s30 + $0x5c] sm:$0xf] %vm1243_vm8, %v1234_v41 }
 0x20c   : > { %v1242_v19 = vpack.c.bf16 %v1208_v46, %v1208_v46  ;;  %v1225_v58 = vpack.c.bf16 %v1166_v18, %v1166_v18 }
 0x20d   : > { %v1148_v21 = vpop.f32.mrf.mxu0 }
 0x20e   : > { %1275 = vst.msk [vmem:[%s2791_s30 + $0x7c] sm:$0xf] %vm1243_vm8, %v1242_v19  ;;  %v1218_v39 = vpack.c.bf16 %v1148_v21, %v1148_v21 }
 0x20f   : > { %1258 = vst.msk [vmem:[%s2791_s30 + $0x38] sm:$0xf] %vm1243_vm8, %v1225_v58 }
 0x210   : > { %1251 = vst.msk [vmem:[%s2791_s30 + $0x1c] sm:$0xf] %vm1243_vm8, %v1218_v39 }
 0x213   : > { %v1168_v32 = vpop.f32.mrf.mxu1 }
 0x214   : > { %v1226_v12 = vpack.c.bf16 %v1168_v32, %v1168_v32 }
 0x216   : > { %1259 = vst.msk [vmem:[%s2791_s30 + $0x3c] sm:$0xf] %vm1243_vm8, %v1226_v12 }
 0x217 PF: > { %s14_s15 = sadd.s32 1, %s1529_s15  }
 0x218   : > { %p11_p4 = scmp.ge.s32.totalorder %s14_s15, 4  }
 0x21a   :  { %13 = sbr.rel (!%p11_p4) target bundleno = 1 (0x1), region = 66 }

// kernel: squeeze.3
= control target key start
LH: loop header
LB: loop body
LE: loop exit
PB: predicated region body
PF: predicated region fallthrough
CT: control target
= control target key end

     0   :  { %vm1924_vm0 = vcmask 1047556   ;;  %s4195_s11 = smov 56   ;;  %s4196_s28 = smov 48   ;;  %vm1926_vm1 = vcmask 64512   ;;  %vm2071_vm2 = vcmask 523712   ;;  %vm2246_vm3 = vcmask 458112   ;;  %s4760_s0 = inlined_call_operand.vmem [shape: bf16[1,2,2,2,2,8,8,8], index: 0, kind: input, shape index: {}]   ;;  %s4761_s1 = inlined_call_operand.vmem [shape: bf16[2,8,8,64], index: 1, kind: output, shape index: {}]  }
   0x1   :  { %v3882_v0 = vld [vmem:[%s4760_s0 + $0x98] sm:$0xff]   ;;  %v3883_v1 = vld [vmem:[%s4760_s0 + $0x90] sm:$0xff]   ;;  %v3884_v2 = vld [vmem:[%s4760_s0 + $0x88] sm:$0xff]   ;;  %s4199_s23 = smov 24   ;;  %s4200_s24 = smov 16   ;;  %vm2421_vm4 = vcmask 392512  }
   0x2   :  { %v3720_v3 = vunpack.c.l.bf16 %v3882_v0  ;;  %v3721_v4 = vunpack.c.h.bf16 %v3882_v0  ;;  %v3725_v5 = vunpack.c.h.bf16 %v3883_v1  ;;  %v3724_v6 = vunpack.c.l.bf16 %v3883_v1  ;;  %v3885_v7 = vld [vmem:[%s4760_s0 + $0x80] sm:$0xff]   ;;  %v3898_v10 = vld [vmem:[%s4760_s0 + $0x18] sm:$0xff]   ;;  %v3899_v13 = vld [vmem:[%s4760_s0 + $0x10] sm:$0xff]   ;;  %s4201_s25 = smov 8  }
   0x3   :  { %v3729_v8 = vunpack.c.h.bf16 %v3884_v2  ;;  %v3728_v9 = vunpack.c.l.bf16 %v3884_v2  ;;  %v3733_v11 = vunpack.c.h.bf16 %v3885_v7  ;;  %v3732_v12 = vunpack.c.l.bf16 %v3885_v7  ;;  %v3900_v16 = vld [vmem:[%s4760_s0 + $0x8] sm:$0xff]   ;;  %v3795_v19 = vld [vmem:[%s4760_s0] sm:$0xff]   ;;  %v3878_v22 = vld [vmem:[%s4760_s0 + $0xb8] sm:$0xff]  }
   0x4   :  { %1338 = vst [vmem:[#allocation1 + $0x138] sm:$0xff] %v3721_v4  ;;  %v3785_v14 = vunpack.c.h.bf16 %v3898_v10  ;;  %v3784_v15 = vunpack.c.l.bf16 %v3898_v10  ;;  %v3789_v17 = vunpack.c.h.bf16 %v3899_v13  ;;  %v3788_v18 = vunpack.c.l.bf16 %v3899_v13  ;;  %v3879_v25 = vld [vmem:[%s4760_s0 + $0xb0] sm:$0xff]   ;;  %v3880_v28 = vld [vmem:[%s4760_s0 + $0xa8] sm:$0xff]   ;;  %v3881_v31 = vld [vmem:[%s4760_s0 + $0xa0] sm:$0xff]  }
   0x5   :  { %1353 = vst [vmem:[#allocation1 + $0x130] sm:$0xff] %v3720_v3  ;;  %v3793_v20 = vunpack.c.h.bf16 %v3900_v16  ;;  %v3792_v21 = vunpack.c.l.bf16 %v3900_v16  ;;  %v3797_v23 = vunpack.c.h.bf16 %v3795_v19  ;;  %v3796_v24 = vunpack.c.l.bf16 %v3795_v19  ;;  %v3894_v35 = vld [vmem:[%s4760_s0 + $0x38] sm:$0xff]   ;;  %v3895_v39 = vld [vmem:[%s4760_s0 + $0x30] sm:$0xff]   ;;  %v3896_v44 = vld [vmem:[%s4760_s0 + $0x28] sm:$0xff]  }
   0x6   :  { %1368 = vst [vmem:[#allocation1 + $0x128] sm:$0xff] %v3725_v5  ;;  %v3705_v26 = vunpack.c.h.bf16 %v3878_v22  ;;  %v3704_v27 = vunpack.c.l.bf16 %v3878_v22  ;;  %v3709_v29 = vunpack.c.h.bf16 %v3879_v25  ;;  %v3708_v30 = vunpack.c.l.bf16 %v3879_v25  ;;  %v3897_v49 = vld [vmem:[%s4760_s0 + $0x20] sm:$0xff]   ;;  %v3850_v53 = vld [vmem:[%s4760_s0 + $0x198] sm:$0xff]   ;;  %v3851_v56 = vld [vmem:[%s4760_s0 + $0x190] sm:$0xff]  }
   0x7   :  { %1383 = vst [vmem:[#allocation1 + $0x120] sm:$0xff] %v3724_v6  ;;  %v3713_v32 = vunpack.c.h.bf16 %v3880_v28  ;;  %v3712_v34 = vunpack.c.l.bf16 %v3880_v28  ;;  %v3717_v37 = vunpack.c.h.bf16 %v3881_v31  ;;  %v3716_v38 = vunpack.c.l.bf16 %v3881_v31  ;;  %v3852_v59 = vld [vmem:[%s4760_s0 + $0x188] sm:$0xff]   ;;  %v3853_v62 = vld [vmem:[%s4760_s0 + $0x180] sm:$0xff]   ;;  %v3866_v2 = vld [vmem:[%s4760_s0 + $0x118] sm:$0xff]  }
   0x8   :  { %1398 = vst [vmem:[#allocation1 + $0x118] sm:$0xff] %v3729_v8  ;;  %v3769_v41 = vunpack.c.h.bf16 %v3894_v35  ;;  %v3768_v43 = vunpack.c.l.bf16 %v3894_v35  ;;  %v3773_v46 = vunpack.c.h.bf16 %v3895_v39  ;;  %v3772_v48 = vunpack.c.l.bf16 %v3895_v39  ;;  %v3867_v6 = vld [vmem:[%s4760_s0 + $0x110] sm:$0xff]   ;;  %v3869_v16 = vld [vmem:[%s4760_s0 + $0x100] sm:$0xff]  }
   0x9   :  { %1413 = vst [vmem:[#allocation1 + $0x110] sm:$0xff] %v3728_v9  ;;  %v3777_v51 = vunpack.c.h.bf16 %v3896_v44  ;;  %v3776_v52 = vunpack.c.l.bf16 %v3896_v44  ;;  %v3781_v54 = vunpack.c.h.bf16 %v3897_v49  ;;  %v3780_v55 = vunpack.c.l.bf16 %v3897_v49 }
   0xa   :  { %1428 = vst [vmem:[#allocation1 + $0x108] sm:$0xff] %v3733_v11  ;;  %v3593_v57 = vunpack.c.h.bf16 %v3850_v53  ;;  %v3592_v58 = vunpack.c.l.bf16 %v3850_v53  ;;  %v3597_v60 = vunpack.c.h.bf16 %v3851_v56  ;;  %v3596_v61 = vunpack.c.l.bf16 %v3851_v56  ;;  %v3868_v11 = vld [vmem:[%s4760_s0 + $0x108] sm:$0xff]  }
   0xb   :  { %1443 = vst [vmem:[#allocation1 + $0x100] sm:$0xff] %v3732_v12  ;;  %v3601_v63 = vunpack.c.h.bf16 %v3852_v59  ;;  %v3600_v1 = vunpack.c.l.bf16 %v3852_v59  ;;  %v3605_v4 = vunpack.c.h.bf16 %v3853_v62  ;;  %v3604_v5 = vunpack.c.l.bf16 %v3853_v62 }
   0xc   :  { %1818 = vst [vmem:[#allocation1 + $0x38] sm:$0xff] %v3785_v14  ;;  %v3657_v8 = vunpack.c.h.bf16 %v3866_v2  ;;  %v3656_v10 = vunpack.c.l.bf16 %v3866_v2  ;;  %v3661_v13 = vunpack.c.h.bf16 %v3867_v6  ;;  %v3664_v19 = vunpack.c.l.bf16 %v3868_v11 }
   0xd   :  { %1833 = vst [vmem:[#allocation1 + $0x30] sm:$0xff] %v3784_v15  ;;  %v3660_v15 = vunpack.c.l.bf16 %v3867_v6  ;;  %v3668_v22 = vunpack.c.l.bf16 %v3869_v16  ;;  %vm2596_vm5 = vcmask 326912   ;;  %vm2771_vm6 = vcmask 261312  }
   0xe   :  { %1848 = vst [vmem:[#allocation1 + $0x28] sm:$0xff] %v3789_v17  ;;  %v2076_v33 = vld [vmem:[#allocation1 + $0x107] ss:$8 sm:$0xf0]   ;;  %vm2946_vm7 = vcmask 195712   ;;  %vm3121_vm8 = vcmask 130112  }
   0xf   :  { %1863 = vst [vmem:[#allocation1 + $0x20] sm:$0xff] %v3788_v18  ;;  %v3665_v18 = vunpack.c.h.bf16 %v3868_v11 }
  0x10   :  { %1878 = vst [vmem:[#allocation1 + $0x18] sm:$0xff] %v3793_v20  ;;  %v3846_v20 = vld [vmem:[%s4760_s0 + $0x1b8] sm:$0xff]  }
  0x11   :  { %1893 = vst [vmem:[#allocation1 + $0x10] sm:$0xff] %v3792_v21  ;;  %v3669_v21 = vunpack.c.h.bf16 %v3869_v16  ;;  %v3576_v25 = vunpack.c.l.bf16 %v3846_v20 }
  0x12   :  { %1908 = vst [vmem:[#allocation1 + $0x8] sm:$0xff] %v3797_v23  ;;  %v2074_v36 = vld [vmem:[#allocation1 + $0x107] ss:$8 sm:$0xf]  }
  0x13   :  { %1921 = vst [vmem:[#allocation1] sm:$0xff] %v3796_v24  ;;  %v2078_v42 = vsel %vm1924_vm0, %v2076_v33, %v2074_v36  ;;  %v3847_v23 = vld [vmem:[%s4760_s0 + $0x1b0] sm:$0xff]   ;;  %v3577_v24 = vunpack.c.h.bf16 %v3846_v20  ;;  %v3862_v33 = vld [vmem:[%s4760_s0 + $0x138] sm:$0xff]  }
  0x14   :  { %1218 = vst [vmem:[#allocation1 + $0x178] sm:$0xff] %v3705_v26  ;;  %v3848_v26 = vld [vmem:[%s4760_s0 + $0x1a8] sm:$0xff]   ;;  %v3580_v28 = vunpack.c.l.bf16 %v3847_v23  ;;  %v3641_v39 = vunpack.c.h.bf16 %v3862_v33 }
  0x15   :  { %1233 = vst [vmem:[#allocation1 + $0x170] sm:$0xff] %v3704_v27  ;;  %v3581_v27 = vunpack.c.h.bf16 %v3847_v23 }
  0x16   :  { %1248 = vst [vmem:[#allocation1 + $0x168] sm:$0xff] %v3709_v29  ;;  %v2066_v40 = vld [vmem:[#allocation1 + $0x7] ss:$8 sm:$0xf0]  }
  0x17   :  { %1263 = vst [vmem:[#allocation1 + $0x160] sm:$0xff] %v3708_v30  ;;  %v3849_v29 = vld [vmem:[%s4760_s0 + $0x1a0] sm:$0xff]   ;;  %v3585_v30 = vunpack.c.h.bf16 %v3848_v26 }
  0x18   :  { %1278 = vst [vmem:[#allocation1 + $0x158] sm:$0xff] %v3713_v32  ;;  %v3584_v32 = vunpack.c.l.bf16 %v3848_v26  ;;  %v3589_v35 = vunpack.c.h.bf16 %v3849_v29  ;;  %v3588_v36 = vunpack.c.l.bf16 %v3849_v29 }
  0x19   :  { %1293 = vst [vmem:[#allocation1 + $0x150] sm:$0xff] %v3712_v34 }
  0x1a   :  { %v2064_v45 = vld [vmem:[#allocation1 + $0x7] ss:$8 sm:$0xf]   ;;  %1308 = vst [vmem:[#allocation1 + $0x148] sm:$0xff] %v3717_v37 }
  0x1b   :  { %v2068_v47 = vsel %vm1924_vm0, %v2066_v40, %v2064_v45  ;;  %1323 = vst [vmem:[#allocation1 + $0x140] sm:$0xff] %v3716_v38  ;;  %v3863_v37 = vld [vmem:[%s4760_s0 + $0x130] sm:$0xff]  }
  0x1c   :  { %v3915_v50 = vpack.i.bf16 %v2078_v42, %v2068_v47  ;;  %1698 = vst [vmem:[#allocation1 + $0x78] sm:$0xff] %v3769_v41  ;;  %v3640_v41 = vunpack.c.l.bf16 %v3862_v33  ;;  %v3864_v42 = vld [vmem:[%s4760_s0 + $0x128] sm:$0xff]   ;;  %v3645_v44 = vunpack.c.h.bf16 %v3863_v37  ;;  %v3865_v47 = vld [vmem:[%s4760_s0 + $0x120] sm:$0xff]  }
  0x1d   :  { %1713 = vst [vmem:[#allocation1 + $0x70] sm:$0xff] %v3768_v43  ;;  %v3649_v49 = vunpack.c.h.bf16 %v3864_v42  ;;  %v3652_v53 = vunpack.c.l.bf16 %v3865_v47 }
  0x1e   :  { %3916 = vrot.lane.b32.xlu0 %v3915_v50, %s4195_s11  ;;  %1728 = vst [vmem:[#allocation1 + $0x68] sm:$0xff] %v3773_v46  ;;  %v2120_v0 = vld [vmem:[#allocation1 + $0x147] ss:$8 sm:$0xf0]   ;;  %v3644_v46 = vunpack.c.l.bf16 %v3863_v37  ;;  %v3648_v50 = vunpack.c.l.bf16 %v3864_v42 }
  0x1f   :  { %1743 = vst [vmem:[#allocation1 + $0x60] sm:$0xff] %v3772_v48 }
  0x20   :  { %1758 = vst [vmem:[#allocation1 + $0x58] sm:$0xff] %v3777_v51  ;;  %v3870_v51 = vld [vmem:[%s4760_s0 + $0xf8] sm:$0xff]  }
  0x21   :  { %1773 = vst [vmem:[#allocation1 + $0x50] sm:$0xff] %v3776_v52  ;;  %v3653_v52 = vunpack.c.h.bf16 %v3865_v47  ;;  %v3672_v56 = vunpack.c.l.bf16 %v3870_v51 }
  0x22   :  { %1788 = vst [vmem:[#allocation1 + $0x48] sm:$0xff] %v3781_v54  ;;  %v2118_v3 = vld [vmem:[#allocation1 + $0x147] ss:$8 sm:$0xf]  }
  0x23   :  { %1803 = vst [vmem:[#allocation1 + $0x40] sm:$0xff] %v3780_v55  ;;  %v2122_v9 = vsel %vm1924_vm0, %v2120_v0, %v2118_v3  ;;  %v3871_v54 = vld [vmem:[%s4760_s0 + $0xf0] sm:$0xff]   ;;  %v3673_v55 = vunpack.c.h.bf16 %v3870_v51  ;;  %v3886_v0 = vld [vmem:[%s4760_s0 + $0x78] sm:$0xff]  }
  0x24   :  { %378 = vst [vmem:[#allocation1 + $0x338] sm:$0xff] %v3593_v57  ;;  %v3872_v57 = vld [vmem:[%s4760_s0 + $0xe8] sm:$0xff]   ;;  %v3676_v59 = vunpack.c.l.bf16 %v3871_v54  ;;  %v3737_v6 = vunpack.c.h.bf16 %v3886_v0  ;;  %v3874_v51 = vld [vmem:[%s4760_s0 + $0xd8] sm:$0xff]  }
  0x25   :  { %393 = vst [vmem:[#allocation1 + $0x330] sm:$0xff] %v3592_v58  ;;  %v3677_v58 = vunpack.c.h.bf16 %v3871_v54 }
  0x26   :  { %408 = vst [vmem:[#allocation1 + $0x328] sm:$0xff] %v3597_v60  ;;  %v2109_v7 = vld [vmem:[#allocation1 + $0x47] ss:$8 sm:$0xf0]  }
  0x27   :  { %423 = vst [vmem:[#allocation1 + $0x320] sm:$0xff] %v3596_v61  ;;  %v3873_v60 = vld [vmem:[%s4760_s0 + $0xe0] sm:$0xff]   ;;  %v3681_v61 = vunpack.c.h.bf16 %v3872_v57 }
  0x28   :  { %438 = vst [vmem:[#allocation1 + $0x318] sm:$0xff] %v3601_v63  ;;  %v3680_v63 = vunpack.c.l.bf16 %v3872_v57  ;;  %v3685_v2 = vunpack.c.h.bf16 %v3873_v60  ;;  %v3684_v3 = vunpack.c.l.bf16 %v3873_v60  ;;  %v3688_v60 = vunpack.c.l.bf16 %v3874_v51 }
  0x29   :  { %453 = vst [vmem:[#allocation1 + $0x310] sm:$0xff] %v3600_v1 }
  0x2a   :  { %v2107_v12 = vld [vmem:[#allocation1 + $0x47] ss:$8 sm:$0xf]   ;;  %468 = vst [vmem:[#allocation1 + $0x308] sm:$0xff] %v3605_v4 }
  0x2b   :  { %v2111_v14 = vsel %vm1924_vm0, %v2109_v7, %v2107_v12  ;;  %483 = vst [vmem:[#allocation1 + $0x300] sm:$0xff] %v3604_v5  ;;  %v3887_v4 = vld [vmem:[%s4760_s0 + $0x70] sm:$0xff]  }
  0x2c   :  { %v3925_v17 = vpack.i.bf16 %v2122_v9, %v2111_v14  ;;  %858 = vst [vmem:[#allocation1 + $0x238] sm:$0xff] %v3657_v8  ;;  %v3736_v8 = vunpack.c.l.bf16 %v3886_v0  ;;  %v3888_v9 = vld [vmem:[%s4760_s0 + $0x68] sm:$0xff]   ;;  %v3741_v11 = vunpack.c.h.bf16 %v3887_v4  ;;  %v3889_v14 = vld [vmem:[%s4760_s0 + $0x60] sm:$0xff]  }
  0x2d   :  { %873 = vst [vmem:[#allocation1 + $0x230] sm:$0xff] %v3656_v10  ;;  %v3745_v16 = vunpack.c.h.bf16 %v3888_v9  ;;  %v3748_v20 = vunpack.c.l.bf16 %v3889_v14 }
  0x2e   :  { %3926 = vrot.lane.b32.xlu1 %v3925_v17, %s4195_s11  ;;  %888 = vst [vmem:[#allocation1 + $0x228] sm:$0xff] %v3661_v13  ;;  %v2098_v31 = vld [vmem:[#allocation1 + $0x307] ss:$8 sm:$0xf0]   ;;  %v3740_v13 = vunpack.c.l.bf16 %v3887_v4  ;;  %v3744_v17 = vunpack.c.l.bf16 %v3888_v9 }
  0x2f   :  { %903 = vst [vmem:[#allocation1 + $0x220] sm:$0xff] %v3660_v15  ;;  %v2273_v57 = vld [vmem:[#allocation1 + $0x306] ss:$8 sm:$0xf0]  }
  0x30   :  { %918 = vst [vmem:[#allocation1 + $0x218] sm:$0xff] %v3665_v18  ;;  %v3838_v18 = vld [vmem:[%s4760_s0 + $0x1f8] sm:$0xff]   ;;  %v3891_v9 = vld [vmem:[%s4760_s0 + $0x50] sm:$0xff]  }
  0x31   :  { %933 = vst [vmem:[#allocation1 + $0x210] sm:$0xff] %v3664_v19  ;;  %v3749_v19 = vunpack.c.h.bf16 %v3889_v14  ;;  %v3544_v23 = vunpack.c.l.bf16 %v3838_v18  ;;  %v3892_v14 = vld [vmem:[%s4760_s0 + $0x48] sm:$0xff]  }
  0x32   :  { %948 = vst [vmem:[#allocation1 + $0x208] sm:$0xff] %v3669_v21  ;;  %v2096_v34 = vld [vmem:[#allocation1 + $0x307] ss:$8 sm:$0xf]  }
  0x33   :  { %963 = vst [vmem:[#allocation1 + $0x200] sm:$0xff] %v3668_v22  ;;  %v2100_v40 = vsel %vm1924_vm0, %v2098_v31, %v2096_v34  ;;  %v3839_v21 = vld [vmem:[%s4760_s0 + $0x1f0] sm:$0xff]   ;;  %v3545_v22 = vunpack.c.h.bf16 %v3838_v18  ;;  %v3854_v31 = vld [vmem:[%s4760_s0 + $0x178] sm:$0xff]  }
  0x34   :  { %258 = vst [vmem:[#allocation1 + $0x378] sm:$0xff] %v3577_v24  ;;  %v3840_v24 = vld [vmem:[%s4760_s0 + $0x1e8] sm:$0xff]   ;;  %v3548_v26 = vunpack.c.l.bf16 %v3839_v21  ;;  %v3609_v37 = vunpack.c.h.bf16 %v3854_v31 }
  0x35   :  { %273 = vst [vmem:[#allocation1 + $0x370] sm:$0xff] %v3576_v25  ;;  %v3549_v25 = vunpack.c.h.bf16 %v3839_v21  ;;  %v2284_v18 = vld [vmem:[#allocation1 + $0x46] ss:$8 sm:$0xf0]  }
  0x36   :  { %288 = vst [vmem:[#allocation1 + $0x368] sm:$0xff] %v3581_v27  ;;  %v2087_v38 = vld [vmem:[#allocation1 + $0x207] ss:$8 sm:$0xf0]  }
  0x37   :  { %303 = vst [vmem:[#allocation1 + $0x360] sm:$0xff] %v3580_v28  ;;  %v3841_v27 = vld [vmem:[%s4760_s0 + $0x1e0] sm:$0xff]   ;;  %v3553_v28 = vunpack.c.h.bf16 %v3840_v24 }
  0x38   :  { %318 = vst [vmem:[#allocation1 + $0x358] sm:$0xff] %v3585_v30  ;;  %v3552_v30 = vunpack.c.l.bf16 %v3840_v24  ;;  %v3557_v33 = vunpack.c.h.bf16 %v3841_v27  ;;  %v3556_v34 = vunpack.c.l.bf16 %v3841_v27  ;;  %v3893_v21 = vld [vmem:[%s4760_s0 + $0x40] sm:$0xff]   ;;  %v3761_v24 = vunpack.c.h.bf16 %v3892_v14  ;;  %v3842_v27 = vld [vmem:[%s4760_s0 + $0x1d8] sm:$0xff]  }
  0x39   :  { %333 = vst [vmem:[#allocation1 + $0x350] sm:$0xff] %v3584_v32 }
  0x3a   :  { %v2085_v43 = vld [vmem:[#allocation1 + $0x207] ss:$8 sm:$0xf]   ;;  %348 = vst [vmem:[#allocation1 + $0x348] sm:$0xff] %v3589_v35 }
  0x3b   :  { %v2089_v45 = vsel %vm1924_vm0, %v2087_v38, %v2085_v43  ;;  %363 = vst [vmem:[#allocation1 + $0x340] sm:$0xff] %v3588_v36  ;;  %v3855_v35 = vld [vmem:[%s4760_s0 + $0x170] sm:$0xff]  }
  0x3c   :  { %v3920_v48 = vpack.i.bf16 %v2100_v40, %v2089_v45  ;;  %738 = vst [vmem:[#allocation1 + $0x278] sm:$0xff] %v3641_v39  ;;  %v3608_v39 = vunpack.c.l.bf16 %v3854_v31  ;;  %v3856_v40 = vld [vmem:[%s4760_s0 + $0x168] sm:$0xff]   ;;  %v3613_v42 = vunpack.c.h.bf16 %v3855_v35  ;;  %v3857_v45 = vld [vmem:[%s4760_s0 + $0x160] sm:$0xff]  }
  0x3d   :  { %753 = vst [vmem:[#allocation1 + $0x270] sm:$0xff] %v3640_v41  ;;  %v3620_v54 = vunpack.c.l.bf16 %v3857_v45 }
  0x3e   :  { %3921 = vrot.lane.b32.xlu0 %v3920_v48, %s4195_s11  ;;  %768 = vst [vmem:[#allocation1 + $0x268] sm:$0xff] %v3645_v44  ;;  %v2142_v62 = vld [vmem:[#allocation1 + $0x347] ss:$8 sm:$0xf0]   ;;  %v3612_v44 = vunpack.c.l.bf16 %v3855_v35  ;;  %v3617_v48 = vunpack.c.h.bf16 %v3856_v40 }
  0x3f   :  { %783 = vst [vmem:[#allocation1 + $0x260] sm:$0xff] %v3644_v46  ;;  %v2260_v46 = vld [vmem:[#allocation1 + $0x206] ss:$8 sm:$0xf]  }
  0x40   :  { %798 = vst [vmem:[#allocation1 + $0x258] sm:$0xff] %v3649_v49  ;;  %v2262_v49 = vld [vmem:[#allocation1 + $0x206] ss:$8 sm:$0xf0]  }
  0x41   :  { %813 = vst [vmem:[#allocation1 + $0x250] sm:$0xff] %v3648_v50  ;;  %v3616_v50 = vunpack.c.l.bf16 %v3856_v40 }
  0x42   :  { %828 = vst [vmem:[#allocation1 + $0x248] sm:$0xff] %v3653_v52  ;;  %v2140_v1 = vld [vmem:[#allocation1 + $0x347] ss:$8 sm:$0xf]  }
  0x43   :  { %843 = vst [vmem:[#allocation1 + $0x240] sm:$0xff] %v3652_v53  ;;  %v2144_v7 = vsel %vm1924_vm0, %v2142_v62, %v2140_v1  ;;  %v2271_v52 = vld [vmem:[#allocation1 + $0x306] ss:$8 sm:$0xf]   ;;  %v3621_v53 = vunpack.c.h.bf16 %v3857_v45 }
  0x44   :  { %978 = vst [vmem:[#allocation1 + $0x1f8] sm:$0xff] %v3673_v55  ;;  %v3875_v55 = vld [vmem:[%s4760_s0 + $0xd0] sm:$0xff]   ;;  %v3877_v1 = vld [vmem:[%s4760_s0 + $0xc0] sm:$0xff]  }
  0x45   :  { %993 = vst [vmem:[#allocation1 + $0x1f0] sm:$0xff] %v3672_v56  ;;  %v2264_v56 = vsel %vm1924_vm0, %v2262_v49, %v2260_v46  ;;  %v3693_v62 = vunpack.c.h.bf16 %v3875_v55  ;;  %v3692_v0 = vunpack.c.l.bf16 %v3875_v55 }
  0x46   :  { %1008 = vst [vmem:[#allocation1 + $0x1e8] sm:$0xff] %v3677_v58  ;;  %v2131_v5 = vld [vmem:[#allocation1 + $0x247] ss:$8 sm:$0xf0]   ;;  %v3689_v58 = vunpack.c.h.bf16 %v3874_v51 }
  0x47   :  { %1023 = vst [vmem:[#allocation1 + $0x1e0] sm:$0xff] %v3676_v59  ;;  %v2275_v59 = vsel %vm1924_vm0, %v2273_v57, %v2271_v52 }
  0x48   :  { %1038 = vst [vmem:[#allocation1 + $0x1d8] sm:$0xff] %v3681_v61  ;;  %v3876_v61 = vld [vmem:[%s4760_s0 + $0xc8] sm:$0xff]  }
  0x49   :  { %1053 = vst [vmem:[#allocation1 + $0x1d0] sm:$0xff] %v3680_v63  ;;  %v3960_v63 = vpack.i.bf16 %v2275_v59, %v2264_v56  ;;  %v3696_v4 = vunpack.c.l.bf16 %v3876_v61 }
  0x4a   :  { %v2129_v10 = vld [vmem:[#allocation1 + $0x247] ss:$8 sm:$0xf]   ;;  %1068 = vst [vmem:[#allocation1 + $0x1c8] sm:$0xff] %v3685_v2  ;;  %v3697_v2 = vunpack.c.h.bf16 %v3876_v61 }
  0x4b   :  { %v2133_v12 = vsel %vm1924_vm0, %v2131_v5, %v2129_v10  ;;  %1083 = vst [vmem:[#allocation1 + $0x1c0] sm:$0xff] %v3684_v3  ;;  %v3890_v5 = vld [vmem:[%s4760_s0 + $0x58] sm:$0xff]  }
  0x4c   :  { %v3930_v15 = vpack.i.bf16 %v2144_v7, %v2133_v12  ;;  %1458 = vst [vmem:[#allocation1 + $0xf8] sm:$0xff] %v3737_v6  ;;  %v3701_v7 = vunpack.c.h.bf16 %v3877_v1 }
  0x4d   :  { %1473 = vst [vmem:[#allocation1 + $0xf0] sm:$0xff] %v3736_v8  ;;  %v3700_v8 = vunpack.c.l.bf16 %v3877_v1 }
  0x4e   :  { %3931 = vrot.lane.b32.xlu1 %v3930_v15, %s4195_s11  ;;  %1488 = vst [vmem:[#allocation1 + $0xe8] sm:$0xff] %v3741_v11  ;;  %v2208_v29 = vld [vmem:[#allocation1 + $0x1c7] ss:$8 sm:$0xf0]   ;;  %v3753_v11 = vunpack.c.h.bf16 %v3890_v5 }
  0x4f   :  { %1503 = vst [vmem:[#allocation1 + $0xe0] sm:$0xff] %v3740_v13  ;;  %v3752_v13 = vunpack.c.l.bf16 %v3890_v5  ;;  %v3861_v5 = vld [vmem:[%s4760_s0 + $0x140] sm:$0xff]  }
  0x50   :  { %1518 = vst [vmem:[#allocation1 + $0xd8] sm:$0xff] %v3745_v16  ;;  %v3757_v16 = vunpack.c.h.bf16 %v3891_v9 }
  0x51   :  { %1533 = vst [vmem:[#allocation1 + $0xd0] sm:$0xff] %v3744_v17  ;;  %v2282_v17 = vld [vmem:[#allocation1 + $0x46] ss:$8 sm:$0xf]  }
  0x52   :  { %1548 = vst [vmem:[#allocation1 + $0xc8] sm:$0xff] %v3749_v19  ;;  %v2206_v32 = vld [vmem:[#allocation1 + $0x1c7] ss:$8 sm:$0xf]  }
  0x53   :  { %1563 = vst [vmem:[#allocation1 + $0xc0] sm:$0xff] %v3748_v20  ;;  %v2210_v38 = vsel %vm1924_vm0, %v2208_v29, %v2206_v32  ;;  %v3756_v20 = vunpack.c.l.bf16 %v3891_v9  ;;  %v3764_v29 = vunpack.c.l.bf16 %v3893_v21  ;;  %v3561_v32 = vunpack.c.h.bf16 %v3842_v27 }
  0x54   :  { %18 = vst [vmem:[#allocation1 + $0x3f8] sm:$0xff] %v3545_v22  ;;  %v2293_v22 = vld [vmem:[#allocation1 + $0x146] ss:$8 sm:$0xf]  }
  0x55   :  { %33 = vst [vmem:[#allocation1 + $0x3f0] sm:$0xff] %v3544_v23 }
  0x56   :  { %48 = vst [vmem:[#allocation1 + $0x3e8] sm:$0xff] %v3549_v25  ;;  %v2197_v36 = vld [vmem:[#allocation1 + $0xc7] ss:$8 sm:$0xf0]  }
  0x57   :  { %63 = vst [vmem:[#allocation1 + $0x3e0] sm:$0xff] %v3548_v26  ;;  %v2295_v25 = vld [vmem:[#allocation1 + $0x146] ss:$8 sm:$0xf0]   ;;  %v3760_v26 = vunpack.c.l.bf16 %v3892_v14 }
  0x58   :  { %78 = vst [vmem:[#allocation1 + $0x3d8] sm:$0xff] %v3553_v28  ;;  %v3765_v28 = vunpack.c.h.bf16 %v3893_v21  ;;  %v2297_v31 = vsel %vm1924_vm0, %v2295_v25, %v2293_v22  ;;  %v2470_v21 = vld [vmem:[#allocation1 + $0x145] ss:$8 sm:$0xf0]  }
  0x59   :  { %93 = vst [vmem:[#allocation1 + $0x3d0] sm:$0xff] %v3552_v30  ;;  %v2286_v30 = vsel %vm1924_vm0, %v2284_v18, %v2282_v17 }
  0x5a   :  { %v2195_v41 = vld [vmem:[#allocation1 + $0xc7] ss:$8 sm:$0xf]   ;;  %108 = vst [vmem:[#allocation1 + $0x3c8] sm:$0xff] %v3557_v33  ;;  %v3965_v35 = vpack.i.bf16 %v2297_v31, %v2286_v30 }
  0x5b   :  { %v2199_v43 = vsel %vm1924_vm0, %v2197_v36, %v2195_v41  ;;  %123 = vst [vmem:[#allocation1 + $0x3c0] sm:$0xff] %v3556_v34  ;;  %v3843_v33 = vld [vmem:[%s4760_s0 + $0x1d0] sm:$0xff]   ;;  %v3560_v34 = vunpack.c.l.bf16 %v3842_v27  ;;  %v3844_v36 = vld [vmem:[%s4760_s0 + $0x1c8] sm:$0xff]  }
  0x5c   :  { %v3945_v47 = vpack.i.bf16 %v2210_v38, %v2199_v43  ;;  %498 = vst [vmem:[#allocation1 + $0x2f8] sm:$0xff] %v3609_v37  ;;  %v3565_v37 = vunpack.c.h.bf16 %v3843_v33  ;;  %v3569_v41 = vunpack.c.h.bf16 %v3844_v36  ;;  %v3568_v46 = vunpack.c.l.bf16 %v3844_v36  ;;  %v2239_v27 = vld [vmem:[#allocation1 + $0x6] ss:$8 sm:$0xf]  }
  0x5d   :  { %513 = vst [vmem:[#allocation1 + $0x2f0] sm:$0xff] %v3608_v39  ;;  %v3564_v39 = vunpack.c.l.bf16 %v3843_v33  ;;  %v2251_v33 = vld [vmem:[#allocation1 + $0x106] ss:$8 sm:$0xf0]  }
  0x5e   :  { %3946 = vrot.lane.b32.xlu0 %v3945_v47, %s4195_s11  ;;  %528 = vst [vmem:[#allocation1 + $0x2e8] sm:$0xff] %v3613_v42  ;;  %v2230_v3 = vld [vmem:[#allocation1 + $0x3c7] ss:$8 sm:$0xf0]  }
  0x5f   :  { %543 = vst [vmem:[#allocation1 + $0x2e0] sm:$0xff] %v3612_v44  ;;  %v3845_v42 = vld [vmem:[%s4760_s0 + $0x1c0] sm:$0xff]   ;;  %v3858_v47 = vld [vmem:[%s4760_s0 + $0x158] sm:$0xff]  }
  0x60   :  { %558 = vst [vmem:[#allocation1 + $0x2d8] sm:$0xff] %v3617_v48  ;;  %v3573_v49 = vunpack.c.h.bf16 %v3845_v42  ;;  %v3572_v52 = vunpack.c.l.bf16 %v3845_v42  ;;  %v3625_v56 = vunpack.c.h.bf16 %v3858_v47  ;;  %v3624_v61 = vunpack.c.l.bf16 %v3858_v47  ;;  %v2414_v36 = vld [vmem:[#allocation1 + $0x5] ss:$8 sm:$0xf]  }
  0x61   :  { %573 = vst [vmem:[#allocation1 + $0x2d0] sm:$0xff] %v3616_v50 }
  0x62   :  { %588 = vst [vmem:[#allocation1 + $0x2c8] sm:$0xff] %v3621_v53  ;;  %v2228_v6 = vld [vmem:[#allocation1 + $0x3c7] ss:$8 sm:$0xf]  }
  0x63   :  { %603 = vst [vmem:[#allocation1 + $0x2c0] sm:$0xff] %v3620_v54  ;;  %v2232_v12 = vsel %vm1924_vm0, %v2230_v3, %v2228_v6  ;;  %v3859_v53 = vld [vmem:[%s4760_s0 + $0x150] sm:$0xff]  }
  0x64   :  { %1098 = vst [vmem:[#allocation1 + $0x1b8] sm:$0xff] %v3689_v58  ;;  %v2405_v3 = vld [vmem:[#allocation1 + $0x3c6] ss:$8 sm:$0xf0]  }
  0x65   :  { %1113 = vst [vmem:[#allocation1 + $0x1b0] sm:$0xff] %v3688_v60 }
  0x66   :  { %1128 = vst [vmem:[#allocation1 + $0x1a8] sm:$0xff] %v3693_v62  ;;  %3961 = vrot.lane.b32.xlu0 %v3960_v63, %s4196_s28  ;;  %v2219_v10 = vld [vmem:[#allocation1 + $0x2c7] ss:$8 sm:$0xf0]  }
  0x67   :  { %1143 = vst [vmem:[#allocation1 + $0x1a0] sm:$0xff] %v3692_v0  ;;  %v2394_v58 = vld [vmem:[#allocation1 + $0x2c6] ss:$8 sm:$0xf0]  }
  0x68   :  { %1158 = vst [vmem:[#allocation1 + $0x198] sm:$0xff] %v3697_v2  ;;  %v3860_v62 = vld [vmem:[%s4760_s0 + $0x148] sm:$0xff]   ;;  %v3629_v2 = vunpack.c.h.bf16 %v3859_v53  ;;  %s4197_s0 = smov 40  }
  0x69   :  { %1173 = vst [vmem:[#allocation1 + $0x190] sm:$0xff] %v3696_v4  ;;  %v2403_v63 = vld [vmem:[#allocation1 + $0x3c6] ss:$8 sm:$0xf]   ;;  %v3628_v4 = vunpack.c.l.bf16 %v3859_v53  ;;  %v3633_v6 = vunpack.c.h.bf16 %v3860_v62 }
  0x6a   :  { %v2217_v15 = vld [vmem:[#allocation1 + $0x2c7] ss:$8 sm:$0xf]   ;;  %1188 = vst [vmem:[#allocation1 + $0x188] sm:$0xff] %v3701_v7  ;;  %v3632_v7 = vunpack.c.l.bf16 %v3860_v62  ;;  %v2407_v9 = vsel %vm1924_vm0, %v2405_v3, %v2403_v63 }
  0x6b   :  { %v2221_v19 = vsel %vm1924_vm0, %v2219_v10, %v2217_v15  ;;  %1203 = vst [vmem:[#allocation1 + $0x180] sm:$0xff] %v3700_v8  ;;  %v2392_v57 = vld [vmem:[#allocation1 + $0x2c6] ss:$8 sm:$0xf]   ;;  %v3637_v10 = vunpack.c.h.bf16 %v3861_v5 }
  0x6c   :  { %v3950_v23 = vpack.i.bf16 %v2232_v12, %v2221_v19  ;;  %1578 = vst [vmem:[#allocation1 + $0xb8] sm:$0xff] %v3753_v11  ;;  %v2396_v8 = vsel %vm1924_vm0, %v2394_v58, %v2392_v57  ;;  %v3636_v11 = vunpack.c.l.bf16 %v3861_v5  ;;  %v2457_v15 = vld [vmem:[#allocation1 + $0x45] ss:$8 sm:$0xf]  }
  0x6d   :  { %1593 = vst [vmem:[#allocation1 + $0xb0] sm:$0xff] %v3752_v13  ;;  %v3990_v12 = vpack.i.bf16 %v2407_v9, %v2396_v8  ;;  %v2315_v57 = vld [vmem:[#allocation1 + $0x346] ss:$8 sm:$0xf]  }
  0x6e   :  { %3951 = vrot.lane.b32.xlu1 %v3950_v23, %s4195_s11  ;;  %1608 = vst [vmem:[#allocation1 + $0xa8] sm:$0xff] %v3757_v16  ;;  %v2164_v38 = vld [vmem:[#allocation1 + $0x187] ss:$8 sm:$0xf0]  }
  0x6f   :  { %1623 = vst [vmem:[#allocation1 + $0xa0] sm:$0xff] %v3756_v20  ;;  %v2339_v40 = vld [vmem:[#allocation1 + $0x186] ss:$8 sm:$0xf0]  }
  0x70   :  { %1638 = vst [vmem:[#allocation1 + $0x98] sm:$0xff] %v3761_v24  ;;  %v2459_v16 = vld [vmem:[#allocation1 + $0x45] ss:$8 sm:$0xf0]  }
  0x71   :  { %1653 = vst [vmem:[#allocation1 + $0x90] sm:$0xff] %v3760_v26  ;;  %v2461_v19 = vsel %vm1924_vm0, %v2459_v16, %v2457_v15  ;;  %v2468_v20 = vld [vmem:[#allocation1 + $0x145] ss:$8 sm:$0xf]  }
  0x72   :  { %1668 = vst [vmem:[#allocation1 + $0x88] sm:$0xff] %v3765_v28  ;;  %v2162_v43 = vld [vmem:[#allocation1 + $0x187] ss:$8 sm:$0xf]   ;;  %v2472_v24 = vsel %vm1924_vm0, %v2470_v21, %v2468_v20 }
  0x73   :  { %1683 = vst [vmem:[#allocation1 + $0x80] sm:$0xff] %v3764_v29  ;;  %v2337_v44 = vld [vmem:[#allocation1 + $0x186] ss:$8 sm:$0xf]   ;;  %v2166_v50 = vsel %vm1924_vm0, %v2164_v38, %v2162_v43  ;;  %v4005_v29 = vpack.i.bf16 %v2472_v24, %v2461_v19 }
  0x74   :  { %138 = vst [vmem:[#allocation1 + $0x3b8] sm:$0xff] %v3561_v32  ;;  %v2341_v51 = vsel %vm1924_vm0, %v2339_v40, %v2337_v44  ;;  %v2241_v28 = vld [vmem:[#allocation1 + $0x6] ss:$8 sm:$0xf0]  }
  0x75   :  { %153 = vst [vmem:[#allocation1 + $0x3b0] sm:$0xff] %v3560_v34  ;;  %v2249_v32 = vld [vmem:[#allocation1 + $0x106] ss:$8 sm:$0xf]   ;;  %v2243_v44 = vsel %vm1924_vm0, %v2241_v28, %v2239_v27 }
  0x76   :  { %3966 = vrot.lane.b32.xlu1 %v3965_v35, %s4196_s28  ;;  %v2153_v45 = vld [vmem:[#allocation1 + $0x87] ss:$8 sm:$0xf0]   ;;  %168 = vst [vmem:[#allocation1 + $0x3a8] sm:$0xff] %v3565_v37 }
  0x77   :  { %v2328_v48 = vld [vmem:[#allocation1 + $0x86] ss:$8 sm:$0xf0]   ;;  %183 = vst [vmem:[#allocation1 + $0x3a0] sm:$0xff] %v3564_v39 }
  0x78   :  { %198 = vst [vmem:[#allocation1 + $0x398] sm:$0xff] %v3569_v41  ;;  %v2416_v37 = vld [vmem:[#allocation1 + $0x5] ss:$8 sm:$0xf0]  }
  0x79   :  { %213 = vst [vmem:[#allocation1 + $0x390] sm:$0xff] %v3568_v46  ;;  %v2424_v40 = vld [vmem:[#allocation1 + $0x105] ss:$8 sm:$0xf]  }
  0x7a   :  { %v2151_v54 = vld [vmem:[#allocation1 + $0x87] ss:$8 sm:$0xf]   ;;  %v2326_v55 = vld [vmem:[#allocation1 + $0x86] ss:$8 sm:$0xf]  }
  0x7b   :  { %v2155_v59 = vsel %vm1924_vm0, %v2153_v45, %v2151_v54  ;;  %v2330_v60 = vsel %vm1924_vm0, %v2328_v48, %v2326_v55  ;;  %228 = vst [vmem:[#allocation1 + $0x388] sm:$0xff] %v3573_v49  ;;  %v2426_v41 = vld [vmem:[#allocation1 + $0x105] ss:$8 sm:$0xf0]   ;;  %v2253_v48 = vsel %vm1924_vm0, %v2251_v33, %v2249_v32  ;;  %v2418_v49 = vsel %vm1924_vm0, %v2416_v37, %v2414_v36 }
  0x7c   :  { %v3935_v0 = vpack.i.bf16 %v2166_v50, %v2155_v59  ;;  %v3975_v1 = vpack.i.bf16 %v2341_v51, %v2330_v60  ;;  %243 = vst [vmem:[#allocation1 + $0x380] sm:$0xff] %v3572_v52  ;;  %v2428_v50 = vsel %vm1924_vm0, %v2426_v41, %v2424_v40  ;;  %v3955_v53 = vpack.i.bf16 %v2253_v48, %v2243_v44  ;;  %v2304_v55 = vld [vmem:[#allocation1 + $0x246] ss:$8 sm:$0xf]  }
  0x7d   :  { %618 = vst [vmem:[#allocation1 + $0x2b8] sm:$0xff] %v3625_v56  ;;  %v3995_v54 = vpack.i.bf16 %v2428_v50, %v2418_v49  ;;  %v2306_v56 = vld [vmem:[#allocation1 + $0x246] ss:$8 sm:$0xf0]  }
  0x7e   :  { %3936 = vrot.lane.b32.xlu2 %v3935_v0, %s4195_s11  ;;  %3976 = vrot.lane.b32.xlu0 %v3975_v1, %s4196_s28  ;;  %633 = vst [vmem:[#allocation1 + $0x2b0] sm:$0xff] %v3624_v61  ;;  %v2186_v13 = vld [vmem:[#allocation1 + $0x387] ss:$8 sm:$0xf0]   ;;  %v2308_v5 = vsel %vm1924_vm0, %v2306_v56, %v2304_v55 }
  0x7f   :  { %648 = vst [vmem:[#allocation1 + $0x2a8] sm:$0xff] %v3629_v2  ;;  %v2361_v14 = vld [vmem:[#allocation1 + $0x386] ss:$8 sm:$0xf0]  }
  0x80   :  { %663 = vst [vmem:[#allocation1 + $0x2a0] sm:$0xff] %v3628_v4  ;;  %v2536_v47 = vld [vmem:[#allocation1 + $0x385] ss:$8 sm:$0xf0]  }
  0x81   :  { %678 = vst [vmem:[#allocation1 + $0x298] sm:$0xff] %v3633_v6  ;;  %v2317_v58 = vld [vmem:[#allocation1 + $0x346] ss:$8 sm:$0xf0]  }
  0x82   :  { %693 = vst [vmem:[#allocation1 + $0x290] sm:$0xff] %v3632_v7  ;;  %v2479_v59 = vld [vmem:[#allocation1 + $0x245] ss:$8 sm:$0xf]   ;;  %v2319_v6 = vsel %vm1924_vm0, %v2317_v58, %v2315_v57 }
  0x83   :  { %708 = vst [vmem:[#allocation1 + $0x288] sm:$0xff] %v3637_v10  ;;  %v2184_v17 = vld [vmem:[#allocation1 + $0x387] ss:$8 sm:$0xf]  }
  0x84   :  { %723 = vst [vmem:[#allocation1 + $0x280] sm:$0xff] %v3636_v11  ;;  %v2359_v18 = vld [vmem:[#allocation1 + $0x386] ss:$8 sm:$0xf]   ;;  %v2188_v25 = vsel %vm1924_vm0, %v2186_v13, %v2184_v17 }
  0x85   :  { %v2363_v26 = vsel %vm1924_vm0, %v2361_v14, %v2359_v18  ;;  %v2534_v46 = vld [vmem:[#allocation1 + $0x385] ss:$8 sm:$0xf]   ;;  %v2589_v63 = vld [vmem:[#allocation1 + $0x4] ss:$8 sm:$0xf]  }
  0x86   :  { %3991 = vrot.lane.b32.xlu0 %v3990_v12, %s4196_s28  ;;  %v2538_v51 = vsel %vm1924_vm0, %v2536_v47, %v2534_v46  ;;  %v2481_v60 = vld [vmem:[#allocation1 + $0x245] ss:$8 sm:$0xf0]   ;;  %v2591_v0 = vld [vmem:[#allocation1 + $0x4] ss:$8 sm:$0xf0]   ;;  %v3970_v12 = vpack.i.bf16 %v2319_v6, %v2308_v5 }
  0x87   :  { %v2175_v22 = vld [vmem:[#allocation1 + $0x287] ss:$8 sm:$0xf0]   ;;  %v2350_v23 = vld [vmem:[#allocation1 + $0x286] ss:$8 sm:$0xf0]   ;;  %v2593_v3 = vsel %vm1924_vm0, %v2591_v0, %v2589_v63  ;;  %v2483_v7 = vsel %vm1924_vm0, %v2481_v60, %v2479_v59 }
  0x88   :  { %v2525_v43 = vld [vmem:[#allocation1 + $0x285] ss:$8 sm:$0xf0]   ;;  %v2599_v1 = vld [vmem:[#allocation1 + $0x104] ss:$8 sm:$0xf]  }
  0x89   :  { %v2490_v61 = vld [vmem:[#allocation1 + $0x345] ss:$8 sm:$0xf]   ;;  %v2601_v2 = vld [vmem:[#allocation1 + $0x104] ss:$8 sm:$0xf0]  }
  0x8a   :  { %v2492_v62 = vld [vmem:[#allocation1 + $0x345] ss:$8 sm:$0xf0]   ;;  %v2603_v4 = vsel %vm1924_vm0, %v2601_v2, %v2599_v1  ;;  %v2654_v10 = vld [vmem:[#allocation1 + $0x244] ss:$8 sm:$0xf]  }
  0x8b   :  { %v2173_v30 = vld [vmem:[#allocation1 + $0x287] ss:$8 sm:$0xf]   ;;  %v2348_v31 = vld [vmem:[#allocation1 + $0x286] ss:$8 sm:$0xf]   ;;  %v2494_v8 = vsel %vm1924_vm0, %v2492_v62, %v2490_v61  ;;  %v4035_v9 = vpack.i.bf16 %v2603_v4, %v2593_v3 }
  0x8c   :  { %v2177_v34 = vsel %vm1924_vm0, %v2175_v22, %v2173_v30  ;;  %v2352_v35 = vsel %vm1924_vm0, %v2350_v23, %v2348_v31  ;;  %v2523_v42 = vld [vmem:[#allocation1 + $0x285] ss:$8 sm:$0xf]   ;;  %v2656_v11 = vld [vmem:[#allocation1 + $0x244] ss:$8 sm:$0xf0]   ;;  %v4010_v13 = vpack.i.bf16 %v2494_v8, %v2483_v7 }
  0x8d   :  { %v3940_v38 = vpack.i.bf16 %v2188_v25, %v2177_v34  ;;  %v3980_v39 = vpack.i.bf16 %v2363_v26, %v2352_v35  ;;  %v2527_v45 = vsel %vm1924_vm0, %v2525_v43, %v2523_v42  ;;  %v2370_v14 = vld [vmem:[#allocation1 + $0xc6] ss:$8 sm:$0xf]   ;;  %v2665_v18 = vld [vmem:[#allocation1 + $0x344] ss:$8 sm:$0xf]   ;;  %v2658_v24 = vsel %vm1924_vm0, %v2656_v11, %v2654_v10 }
  0x8e   :  { %4006 = vrot.lane.b32.xlu0 %v4005_v29, %s4197_s0  ;;  %v4020_v52 = vpack.i.bf16 %v2538_v51, %v2527_v45  ;;  %v2372_v15 = vld [vmem:[#allocation1 + $0xc6] ss:$8 sm:$0xf0]   ;;  %v2667_v19 = vld [vmem:[#allocation1 + $0x344] ss:$8 sm:$0xf0]  }
  0x8f   :  { %3941 = vrot.lane.b32.xlu2 %v3940_v38, %s4195_s11  ;;  %3981 = vrot.lane.b32.xlu1 %v3980_v39, %s4196_s28  ;;  %v2381_v16 = vld [vmem:[#allocation1 + $0x1c6] ss:$8 sm:$0xf]   ;;  %v2545_v20 = vld [vmem:[#allocation1 + $0xc5] ss:$8 sm:$0xf]   ;;  %v2669_v25 = vsel %vm1924_vm0, %v2667_v19, %v2665_v18  ;;  %v2374_v26 = vsel %vm1924_vm0, %v2372_v15, %v2370_v14 }
  0x90   :  { %v2383_v17 = vld [vmem:[#allocation1 + $0x1c6] ss:$8 sm:$0xf0]   ;;  %v2547_v21 = vld [vmem:[#allocation1 + $0xc5] ss:$8 sm:$0xf0]   ;;  %v4050_v30 = vpack.i.bf16 %v2669_v25, %v2658_v24 }
  0x91   :  { %v2556_v22 = vld [vmem:[#allocation1 + $0x1c5] ss:$8 sm:$0xf]   ;;  %s4198_s11 = smov 32   ;;  %v2385_v27 = vsel %vm1924_vm0, %v2383_v17, %v2381_v16  ;;  %v2549_v28 = vsel %vm1924_vm0, %v2547_v21, %v2545_v20 }
  0x92   :  { %v2558_v23 = vld [vmem:[#allocation1 + $0x1c5] ss:$8 sm:$0xf0]   ;;  %v2720_v31 = vld [vmem:[#allocation1 + $0xc4] ss:$8 sm:$0xf]   ;;  %v3985_v33 = vpack.i.bf16 %v2385_v27, %v2374_v26 }
  0x93   :  { %v2560_v29 = vsel %vm1924_vm0, %v2558_v23, %v2556_v22  ;;  %v2722_v32 = vld [vmem:[#allocation1 + $0xc4] ss:$8 sm:$0xf0]   ;;  %v2435_v35 = vld [vmem:[#allocation1 + $0x205] ss:$8 sm:$0xf]  }
  0x94   :  { %v4025_v34 = vpack.i.bf16 %v2560_v29, %v2549_v28  ;;  %v2437_v36 = vld [vmem:[#allocation1 + $0x205] ss:$8 sm:$0xf0]   ;;  %v2731_v39 = vld [vmem:[#allocation1 + $0x1c4] ss:$8 sm:$0xf]   ;;  %v2724_v45 = vsel %vm1924_vm0, %v2722_v32, %v2720_v31 }
  0x95   :  { %v2446_v37 = vld [vmem:[#allocation1 + $0x305] ss:$8 sm:$0xf]   ;;  %v2733_v40 = vld [vmem:[#allocation1 + $0x1c4] ss:$8 sm:$0xf0]   ;;  %v2439_v47 = vsel %vm1924_vm0, %v2437_v36, %v2435_v35 }
  0x96   :  { %4021 = vrot.lane.b32.xlu0 %v4020_v52, %s4197_s0  ;;  %v2448_v38 = vld [vmem:[#allocation1 + $0x305] ss:$8 sm:$0xf0]   ;;  %v2610_v41 = vld [vmem:[#allocation1 + $0x204] ss:$8 sm:$0xf]   ;;  %v2735_v46 = vsel %vm1924_vm0, %v2733_v40, %v2731_v39 }
  0x97   :  { %3956 = vrot.lane.b32.xlu2 %v3955_v53, %s4196_s28  ;;  %3996 = vrot.lane.b32.xlu1 %v3995_v54, %s4197_s0  ;;  %v2612_v42 = vld [vmem:[#allocation1 + $0x204] ss:$8 sm:$0xf0]   ;;  %v2450_v48 = vsel %vm1924_vm0, %v2448_v38, %v2446_v37  ;;  %v4065_v51 = vpack.i.bf16 %v2735_v46, %v2724_v45  ;;  %v2785_v52 = vld [vmem:[#allocation1 + $0x203] ss:$8 sm:$0xf]  }
  0x98   :  { %v2621_v43 = vld [vmem:[#allocation1 + $0x304] ss:$8 sm:$0xf]   ;;  %v2614_v49 = vsel %vm1924_vm0, %v2612_v42, %v2610_v41  ;;  %v2787_v53 = vld [vmem:[#allocation1 + $0x203] ss:$8 sm:$0xf0]   ;;  %v4000_v54 = vpack.i.bf16 %v2450_v48, %v2439_v47 }
  0x99   :  { %v2623_v44 = vld [vmem:[#allocation1 + $0x304] ss:$8 sm:$0xf0]   ;;  %v2501_v56 = vld [vmem:[#allocation1 + $0x85] ss:$8 sm:$0xf]   ;;  %v2789_v2 = vsel %vm1924_vm0, %v2787_v53, %v2785_v52 }
  0x9a   :  { %v2625_v50 = vsel %vm1924_vm0, %v2623_v44, %v2621_v43  ;;  %v2503_v57 = vld [vmem:[#allocation1 + $0x85] ss:$8 sm:$0xf0]   ;;  %v2796_v60 = vld [vmem:[#allocation1 + $0x303] ss:$8 sm:$0xf]  }
  0x9b   :  { %v4040_v55 = vpack.i.bf16 %v2625_v50, %v2614_v49  ;;  %v2512_v58 = vld [vmem:[#allocation1 + $0x185] ss:$8 sm:$0xf]   ;;  %v2798_v61 = vld [vmem:[#allocation1 + $0x303] ss:$8 sm:$0xf0]   ;;  %v2505_v4 = vsel %vm1924_vm0, %v2503_v57, %v2501_v56  ;;  %v3917_v50 = vpop.permute.xlu0 %3916 }
  0x9c   :  { %v2514_v59 = vld [vmem:[#allocation1 + $0x185] ss:$8 sm:$0xf0]   ;;  %v2676_v62 = vld [vmem:[#allocation1 + $0x84] ss:$8 sm:$0xf]   ;;  %v2800_v3 = vsel %vm1924_vm0, %v2798_v61, %v2796_v60  ;;  %v3919_v61 = vunpack.i.h.bf16 %v3917_v50 }
  0x9d   :  { %v2678_v63 = vld [vmem:[#allocation1 + $0x84] ss:$8 sm:$0xf0]   ;;  %v2516_v5 = vsel %vm1924_vm0, %v2514_v59, %v2512_v58  ;;  %v4080_v8 = vpack.i.bf16 %v2800_v3, %v2789_v2  ;;  %v2853_v10 = vld [vmem:[#allocation1 + $0x83] ss:$8 sm:$0xf0]  }
  0x9e   :  { %4036 = vrot.lane.b32.xlu0 %v4035_v9, %s4198_s11  ;;  %v2687_v0 = vld [vmem:[#allocation1 + $0x184] ss:$8 sm:$0xf]   ;;  %v2680_v6 = vsel %vm1924_vm0, %v2678_v63, %v2676_v62  ;;  %v2851_v9 = vld [vmem:[#allocation1 + $0x83] ss:$8 sm:$0xf]   ;;  %v4015_v11 = vpack.i.bf16 %v2516_v5, %v2505_v4  ;;  %v3918_v62 = vunpack.i.l.bf16 %v3917_v50 }
  0x9f   :  { %3971 = vrot.lane.b32.xlu2 %v3970_v12, %s4196_s28  ;;  %4011 = vrot.lane.b32.xlu1 %v4010_v13, %s4197_s0  ;;  %v2689_v1 = vld [vmem:[#allocation1 + $0x184] ss:$8 sm:$0xf0]   ;;  %v2567_v13 = vld [vmem:[#allocation1 + $0x2c5] ss:$8 sm:$0xf]   ;;  %v2855_v23 = vsel %vm1924_vm0, %v2853_v10, %v2851_v9 }
  0xa0   :  { %v2691_v7 = vsel %vm1924_vm0, %v2689_v1, %v2687_v0  ;;  %v2569_v14 = vld [vmem:[#allocation1 + $0x2c5] ss:$8 sm:$0xf0]   ;;  %v2862_v17 = vld [vmem:[#allocation1 + $0x183] ss:$8 sm:$0xf]  }
  0xa1   :  { %v4055_v12 = vpack.i.bf16 %v2691_v7, %v2680_v6  ;;  %v2578_v15 = vld [vmem:[#allocation1 + $0x3c5] ss:$8 sm:$0xf]   ;;  %v2864_v18 = vld [vmem:[#allocation1 + $0x183] ss:$8 sm:$0xf0]   ;;  %v2571_v25 = vsel %vm1924_vm0, %v2569_v14, %v2567_v13 }
  0xa2   :  { %v2580_v16 = vld [vmem:[#allocation1 + $0x3c5] ss:$8 sm:$0xf0]   ;;  %v2742_v19 = vld [vmem:[#allocation1 + $0x2c4] ss:$8 sm:$0xf]   ;;  %v2866_v24 = vsel %vm1924_vm0, %v2864_v18, %v2862_v17 }
  0xa3   :  { %v2744_v20 = vld [vmem:[#allocation1 + $0x2c4] ss:$8 sm:$0xf0]   ;;  %v2582_v26 = vsel %vm1924_vm0, %v2580_v16, %v2578_v15  ;;  %v4095_v29 = vpack.i.bf16 %v2866_v24, %v2855_v23  ;;  %v2919_v35 = vld [vmem:[#allocation1 + $0x2c3] ss:$8 sm:$0xf0]  }
  0xa4   :  { %v2753_v21 = vld [vmem:[#allocation1 + $0x3c4] ss:$8 sm:$0xf]   ;;  %v2746_v27 = vsel %vm1924_vm0, %v2744_v20, %v2742_v19  ;;  %v4030_v36 = vpack.i.bf16 %v2582_v26, %v2571_v25  ;;  %v2928_v38 = vld [vmem:[#allocation1 + $0x3c3] ss:$8 sm:$0xf]  }
  0xa5   :  { %v2755_v22 = vld [vmem:[#allocation1 + $0x3c4] ss:$8 sm:$0xf0]   ;;  %v2930_v39 = vld [vmem:[#allocation1 + $0x3c3] ss:$8 sm:$0xf0]  }
  0xa6   :  { %4051 = vrot.lane.b32.xlu0 %v4050_v30, %s4198_s11  ;;  %v2757_v28 = vsel %vm1924_vm0, %v2755_v22, %v2753_v21  ;;  %v2632_v30 = vld [vmem:[#allocation1 + $0x44] ss:$8 sm:$0xf]   ;;  %v2807_v40 = vld [vmem:[#allocation1 + $0x43] ss:$8 sm:$0xf]   ;;  %v2932_v45 = vsel %vm1924_vm0, %v2930_v39, %v2928_v38 }
  0xa7   :  { %3986 = vrot.lane.b32.xlu2 %v3985_v33, %s4196_s28  ;;  %4026 = vrot.lane.b32.xlu1 %v4025_v34, %s4197_s0  ;;  %v2634_v31 = vld [vmem:[#allocation1 + $0x44] ss:$8 sm:$0xf0]   ;;  %v2917_v34 = vld [vmem:[#allocation1 + $0x2c3] ss:$8 sm:$0xf]   ;;  %v4070_v37 = vpack.i.bf16 %v2757_v28, %v2746_v27 }
  0xa8   :  { %v2643_v32 = vld [vmem:[#allocation1 + $0x144] ss:$8 sm:$0xf]   ;;  %v2809_v41 = vld [vmem:[#allocation1 + $0x43] ss:$8 sm:$0xf0]   ;;  %v2921_v44 = vsel %vm1924_vm0, %v2919_v35, %v2917_v34  ;;  %v2636_v46 = vsel %vm1924_vm0, %v2634_v31, %v2632_v30 }
  0xa9   :  { %v2645_v33 = vld [vmem:[#allocation1 + $0x144] ss:$8 sm:$0xf0]   ;;  %v2818_v42 = vld [vmem:[#allocation1 + $0x143] ss:$8 sm:$0xf]   ;;  %v2811_v52 = vsel %vm1924_vm0, %v2809_v41, %v2807_v40  ;;  %v4110_v56 = vpack.i.bf16 %v2932_v45, %v2921_v44 }
  0xaa   :  { %v2820_v43 = vld [vmem:[#allocation1 + $0x143] ss:$8 sm:$0xf0]   ;;  %v2647_v47 = vsel %vm1924_vm0, %v2645_v33, %v2643_v32  ;;  %v1922_v48 = vld [vmem:[#allocation1] ss:$8 sm:$0xf]  }
  0xab   :  { %v1923_v49 = vld [vmem:[#allocation1] ss:$8 sm:$0xf0]   ;;  %v2822_v53 = vsel %vm1924_vm0, %v2820_v43, %v2818_v42  ;;  %v2982_v57 = vld [vmem:[#allocation1 + $0x42] ss:$8 sm:$0xf]   ;;  %v4045_v3 = vpack.i.bf16 %v2647_v47, %v2636_v46 }
  0xac   :  { %v2984_v58 = vld [vmem:[#allocation1 + $0x42] ss:$8 sm:$0xf0]   ;;  %v1958_v63 = vld [vmem:[#allocation1 + $0x100] ss:$8 sm:$0xf0]   ;;  %v4085_v4 = vpack.i.bf16 %v2822_v53, %v2811_v52 }
  0xad   :  { %v2993_v59 = vld [vmem:[#allocation1 + $0x142] ss:$8 sm:$0xf]   ;;  %v1929_v1 = vld [vmem:[#allocation1 + $0x40] ss:$8 sm:$0xf]   ;;  %v2986_v20 = vsel %vm1924_vm0, %v2984_v58, %v2982_v57 }
  0xae   :  { %4066 = vrot.lane.b32.xlu0 %v4065_v51, %s4198_s11  ;;  %v3927_v51 = vpop.permute.xlu1 %3926  ;;  %v2995_v60 = vld [vmem:[#allocation1 + $0x142] ss:$8 sm:$0xf0]   ;;  %v1931_v2 = vld [vmem:[#allocation1 + $0x40] ss:$8 sm:$0xf0]  }
  0xaf   :  { %4001 = vrot.lane.b32.xlu2 %v4000_v54, %s4197_s0  ;;  %4041 = vrot.lane.b32.xlu1 %v4040_v55, %s4198_s11  ;;  %v1925_v54 = vsel %vm1924_vm0, %v1923_v49, %v1922_v48  ;;  %v1956_v55 = vld [vmem:[#allocation1 + $0x100] ss:$8 sm:$0xf]   ;;  %v2698_v5 = vld [vmem:[#allocation1 + $0x284] ss:$8 sm:$0xf]   ;;  %v1933_v13 = vsel %vm1924_vm0, %v1931_v2, %v1929_v1  ;;  %v3928_v15 = vunpack.i.l.bf16 %v3927_v51  ;;  %v3929_v17 = vunpack.i.h.bf16 %v3927_v51 }
  0xb0   :  { %1927 = vst.msk [vmem:[#allocation0] sm:$0xff] %vm1926_vm1, %v1925_v54   ;;  %v1960_v0 = vsel %vm1924_vm0, %v1958_v63, %v1956_v55  ;;  %v2700_v6 = vld [vmem:[#allocation1 + $0x284] ss:$8 sm:$0xf0]   ;;  %v2997_v21 = vsel %vm1924_vm0, %v2995_v60, %v2993_v59  ;;  %v4522_v25 = vpop.permute.xlu0 %3921 }
  0xb1   :  { %v2709_v7 = vld [vmem:[#allocation1 + $0x384] ss:$8 sm:$0xf]   ;;  %v2873_v9 = vld [vmem:[#allocation1 + $0x283] ss:$8 sm:$0xf]   ;;  %v2702_v27 = vsel %vm1924_vm0, %v2700_v6, %v2698_v5  ;;  %v4125_v32 = vpack.i.bf16 %v2997_v21, %v2986_v20  ;;  %v3923_v59 = vunpack.i.l.bf16 %v4522_v25 }
  0xb2   :  { %v2875_v10 = vld [vmem:[#allocation1 + $0x283] ss:$8 sm:$0xf0]   ;;  %1963 = vst.msk [vmem:[#allocation0 + $0x20] sm:$0xff] %vm1926_vm1, %v1960_v0  }
  0xb3   :  { %v1965_v14 = vld [vmem:[#allocation1 + $0x140] ss:$8 sm:$0xf]   ;;  %2072 = vst.msk [vmem:[#allocation0] sm:$0xff] %vm2071_vm2, %v3918_v62  }
  0xb4   :  { %v1967_v16 = vld [vmem:[#allocation1 + $0x140] ss:$8 sm:$0xf0]   ;;  %2083 = vst.msk [vmem:[#allocation0 + $0x20] sm:$0xff] %vm2071_vm2, %v3919_v61  }
  0xb5   :  { %v1969_v18 = vsel %vm1924_vm0, %v1967_v16, %v1965_v14  ;;  %v1938_v19 = vld [vmem:[#allocation1 + $0x80] ss:$8 sm:$0xf]   ;;  %1936 = vst.msk [vmem:[#allocation0 + $0x8] sm:$0xff] %vm1926_vm1, %v1933_v13  }
  0xb6   :  { %4081 = vrot.lane.b32.xlu0 %v4080_v8, %s4199_s23  ;;  %v2711_v8 = vld [vmem:[#allocation1 + $0x384] ss:$8 sm:$0xf0]   ;;  %v1940_v22 = vld [vmem:[#allocation1 + $0x80] ss:$8 sm:$0xf0]  }
  0xb7   :  { %4016 = vrot.lane.b32.xlu2 %v4015_v11, %s4197_s0  ;;  %4056 = vrot.lane.b32.xlu1 %v4055_v12, %s4198_s11  ;;  %v2884_v11 = vld [vmem:[#allocation1 + $0x383] ss:$8 sm:$0xf]   ;;  %1972 = vst.msk [vmem:[#allocation0 + $0x28] sm:$0xff] %vm1926_vm1, %v1969_v18   ;;  %v1942_v23 = vsel %vm1924_vm0, %v1940_v22, %v1938_v19  ;;  %v2713_v28 = vsel %vm1924_vm0, %v2711_v8, %v2709_v7 }
  0xb8   :  { %v2886_v12 = vld [vmem:[#allocation1 + $0x383] ss:$8 sm:$0xf0]   ;;  %v1974_v24 = vld [vmem:[#allocation1 + $0x180] ss:$8 sm:$0xf]   ;;  %v4060_v34 = vpack.i.bf16 %v2713_v28, %v2702_v27 }
  0xb9   :  { %v2888_v30 = vsel %vm1924_vm0, %v2886_v12, %v2884_v11  ;;  %2116 = vst.msk [vmem:[#allocation0 + $0x8] sm:$0xff] %vm2071_vm2, %v3928_v15   ;;  %v1976_v31 = vld [vmem:[#allocation1 + $0x180] ss:$8 sm:$0xf0]  }
  0xba   :  { %2127 = vst.msk [vmem:[#allocation0 + $0x28] sm:$0xff] %vm2071_vm2, %v3929_v17   ;;  %v1978_v33 = vsel %vm1924_vm0, %v1976_v31, %v1974_v24  ;;  %v2774_v38 = vld [vmem:[#allocation1 + $0x103] ss:$8 sm:$0xf]  }
  0xbb   :  { %1945 = vst.msk [vmem:[#allocation0 + $0x10] sm:$0xff] %vm1926_vm1, %v1942_v23   ;;  %v2776_v39 = vld [vmem:[#allocation1 + $0x103] ss:$8 sm:$0xf0]  }
  0xbc   :  { %v2939_v40 = vld [vmem:[#allocation1 + $0x2] ss:$8 sm:$0xf]   ;;  %1981 = vst.msk [vmem:[#allocation0 + $0x30] sm:$0xff] %vm1926_vm1, %v1978_v33   ;;  %v2778_v52 = vsel %vm1924_vm0, %v2776_v39, %v2774_v38 }
  0xbd   :  { %v2941_v41 = vld [vmem:[#allocation1 + $0x2] ss:$8 sm:$0xf0]   ;;  %v1992_v55 = vld [vmem:[#allocation1 + $0x200] ss:$8 sm:$0xf]  }
  0xbe   :  { %4096 = vrot.lane.b32.xlu0 %v4095_v29, %s4199_s23  ;;  %v2877_v29 = vsel %vm1924_vm0, %v2875_v10, %v2873_v9  ;;  %v2949_v42 = vld [vmem:[#allocation1 + $0x102] ss:$8 sm:$0xf]   ;;  %v2943_v53 = vsel %vm1924_vm0, %v2941_v41, %v2939_v40  ;;  %v1994_v57 = vld [vmem:[#allocation1 + $0x200] ss:$8 sm:$0xf0]  }
  0xbf   :  { %4031 = vrot.lane.b32.xlu2 %v4030_v36, %s4197_s0  ;;  %4071 = vrot.lane.b32.xlu1 %v4070_v37, %s4198_s11  ;;  %v4100_v35 = vpack.i.bf16 %v2888_v30, %v2877_v29  ;;  %v2764_v36 = vld [vmem:[#allocation1 + $0x3] ss:$8 sm:$0xf]   ;;  %v2951_v43 = vld [vmem:[#allocation1 + $0x102] ss:$8 sm:$0xf0]   ;;  %v1996_v2 = vsel %vm1924_vm0, %v1994_v57, %v1992_v55 }
  0xc0   :  { %v4524_v26 = vpop.permute.xlu1 %3931  ;;  %v2766_v37 = vld [vmem:[#allocation1 + $0x3] ss:$8 sm:$0xf0]   ;;  %v3048_v44 = vld [vmem:[#allocation1 + $0x282] ss:$8 sm:$0xf]   ;;  %v2953_v54 = vsel %vm1924_vm0, %v2951_v43, %v2949_v42 }
  0xc1   :  { %v3050_v45 = vld [vmem:[#allocation1 + $0x282] ss:$8 sm:$0xf0]   ;;  %v2768_v51 = vsel %vm1924_vm0, %v2766_v37, %v2764_v36  ;;  %v2028_v58 = vld [vmem:[#allocation1 + $0x300] ss:$8 sm:$0xf]   ;;  %v4115_v7 = vpack.i.bf16 %v2953_v54, %v2943_v53  ;;  %v3933_v14 = vunpack.i.l.bf16 %v4524_v26  ;;  %v3934_v26 = vunpack.i.h.bf16 %v4524_v26 }
  0xc2   :  { %v3059_v46 = vld [vmem:[#allocation1 + $0x382] ss:$8 sm:$0xf]   ;;  %v3052_v47 = vsel %vm1924_vm0, %v3050_v45, %v3048_v44  ;;  %v2829_v60 = vld [vmem:[#allocation1 + $0x243] ss:$8 sm:$0xf]   ;;  %v4075_v6 = vpack.i.bf16 %v2778_v52, %v2768_v51 }
  0xc3   :  { %v3061_v48 = vld [vmem:[#allocation1 + $0x382] ss:$8 sm:$0xf0]   ;;  %v2831_v61 = vld [vmem:[#allocation1 + $0x243] ss:$8 sm:$0xf0]  }
  0xc4   :  { %v3063_v49 = vsel %vm1924_vm0, %v3061_v48, %v3059_v46  ;;  %v2840_v62 = vld [vmem:[#allocation1 + $0x343] ss:$8 sm:$0xf]   ;;  %v3004_v0 = vld [vmem:[#allocation1 + $0x242] ss:$8 sm:$0xf]   ;;  %v2833_v18 = vsel %vm1924_vm0, %v2831_v61, %v2829_v60 }
  0xc5   :  { %v2842_v63 = vld [vmem:[#allocation1 + $0x343] ss:$8 sm:$0xf0]   ;;  %v3006_v1 = vld [vmem:[#allocation1 + $0x242] ss:$8 sm:$0xf0]  }
  0xc6   :  { %4111 = vrot.lane.b32.xlu0 %v4110_v56, %s4199_s23  ;;  %v4140_v56 = vpack.i.bf16 %v3063_v49, %v3052_v47  ;;  %v2001_v5 = vld [vmem:[#allocation1 + $0x240] ss:$8 sm:$0xf]   ;;  %v3015_v8 = vld [vmem:[#allocation1 + $0x342] ss:$8 sm:$0xf]   ;;  %v2844_v19 = vsel %vm1924_vm0, %v2842_v63, %v2840_v62  ;;  %v3008_v20 = vsel %vm1924_vm0, %v3006_v1, %v3004_v0 }
  0xc7   :  { %4046 = vrot.lane.b32.xlu2 %v4045_v3, %s4198_s11  ;;  %4086 = vrot.lane.b32.xlu1 %v4085_v4, %s4199_s23  ;;  %v3924_v3 = vunpack.i.h.bf16 %v4522_v25  ;;  %v2030_v4 = vld [vmem:[#allocation1 + $0x300] ss:$8 sm:$0xf0]   ;;  %v3017_v9 = vld [vmem:[#allocation1 + $0x342] ss:$8 sm:$0xf0]   ;;  %v4090_v33 = vpack.i.bf16 %v2844_v19, %v2833_v18 }
  0xc8   :  { %1999 = vst.msk [vmem:[#allocation0 + $0x40] sm:$0xff] %vm1926_vm1, %v1996_v2   ;;  %v2032_v10 = vsel %vm1924_vm0, %v2030_v4, %v2028_v58  ;;  %v2003_v11 = vld [vmem:[#allocation1 + $0x240] ss:$8 sm:$0xf0]   ;;  %v3019_v24 = vsel %vm1924_vm0, %v3017_v9, %v3015_v8 }
  0xc9   :  { %2035 = vst.msk [vmem:[#allocation0 + $0x60] sm:$0xff] %vm1926_vm1, %v2032_v10   ;;  %v2005_v12 = vsel %vm1924_vm0, %v2003_v11, %v2001_v5  ;;  %v2037_v13 = vld [vmem:[#allocation1 + $0x340] ss:$8 sm:$0xf]  }
  0xca   :  { %2094 = vst.msk [vmem:[#allocation0 + $0x40] sm:$0xff] %vm2071_vm2, %v3923_v59   ;;  %v2039_v15 = vld [vmem:[#allocation1 + $0x340] ss:$8 sm:$0xf0]  }
  0xcb   :  { %2105 = vst.msk [vmem:[#allocation0 + $0x60] sm:$0xff] %vm2071_vm2, %v3924_v3   ;;  %v2041_v16 = vsel %vm1924_vm0, %v2039_v15, %v2037_v13  ;;  %v2010_v17 = vld [vmem:[#allocation1 + $0x280] ss:$8 sm:$0xf]  }
  0xcc   :  { %2008 = vst.msk [vmem:[#allocation0 + $0x48] sm:$0xff] %vm1926_vm1, %v2005_v12   ;;  %v2012_v22 = vld [vmem:[#allocation1 + $0x280] ss:$8 sm:$0xf0]  }
  0xcd   :  { %2044 = vst.msk [vmem:[#allocation0 + $0x68] sm:$0xff] %vm1926_vm1, %v2041_v16   ;;  %v2046_v28 = vld [vmem:[#allocation1 + $0x380] ss:$8 sm:$0xf]  }
  0xce   :  { %4126 = vrot.lane.b32.xlu0 %v4125_v32, %s4200_s24  ;;  %2138 = vst.msk [vmem:[#allocation0 + $0x48] sm:$0xff] %vm2071_vm2, %v3933_v14   ;;  %v2048_v29 = vld [vmem:[#allocation1 + $0x380] ss:$8 sm:$0xf0]   ;;  %v2014_v32 = vsel %vm1924_vm0, %v2012_v22, %v2010_v17 }
  0xcf   :  { %4061 = vrot.lane.b32.xlu2 %v4060_v34, %s4198_s11  ;;  %4101 = vrot.lane.b32.xlu1 %v4100_v35, %s4199_s23  ;;  %v2895_v30 = vld [vmem:[#allocation1 + $0xc3] ss:$8 sm:$0xf]   ;;  %v4130_v34 = vpack.i.bf16 %v3019_v24, %v3008_v20  ;;  %v3070_v37 = vld [vmem:[#allocation1 + $0xc2] ss:$8 sm:$0xf]   ;;  %v2050_v39 = vsel %vm1924_vm0, %v2048_v29, %v2046_v28 }
  0xd0   :  { %v4540_v50 = vpop.permute.xlu0 %3946  ;;  %v2897_v31 = vld [vmem:[#allocation1 + $0xc3] ss:$8 sm:$0xf0]   ;;  %v3072_v38 = vld [vmem:[#allocation1 + $0xc2] ss:$8 sm:$0xf0]  }
  0xd1   :  { %v2906_v35 = vld [vmem:[#allocation1 + $0x1c3] ss:$8 sm:$0xf]   ;;  %v3081_v40 = vld [vmem:[#allocation1 + $0x1c2] ss:$8 sm:$0xf]   ;;  %v2899_v43 = vsel %vm1924_vm0, %v2897_v31, %v2895_v30  ;;  %v3074_v48 = vsel %vm1924_vm0, %v3072_v38, %v3070_v37  ;;  %v3949_v4 = vunpack.i.h.bf16 %v4540_v50  ;;  %v3948_v50 = vunpack.i.l.bf16 %v4540_v50 }
  0xd2   :  { %v2908_v36 = vld [vmem:[#allocation1 + $0x1c3] ss:$8 sm:$0xf0]   ;;  %2149 = vst.msk [vmem:[#allocation0 + $0x68] sm:$0xff] %vm2071_vm2, %v3934_v26  }
  0xd3   :  { %v3083_v41 = vld [vmem:[#allocation1 + $0x1c2] ss:$8 sm:$0xf0]   ;;  %2017 = vst.msk [vmem:[#allocation0 + $0x50] sm:$0xff] %vm1926_vm1, %v2014_v32   ;;  %v2910_v47 = vsel %vm1924_vm0, %v2908_v36, %v2906_v35 }
  0xd4   :  { %2053 = vst.msk [vmem:[#allocation0 + $0x70] sm:$0xff] %vm1926_vm1, %v2050_v39   ;;  %v3114_v42 = vld [vmem:[#allocation1 + $0x1] ss:$8 sm:$0xf]   ;;  %v3085_v49 = vsel %vm1924_vm0, %v3083_v41, %v3081_v40  ;;  %v4105_v58 = vpack.i.bf16 %v2910_v47, %v2899_v43 }
  0xd5   :  { %v3116_v44 = vld [vmem:[#allocation1 + $0x1] ss:$8 sm:$0xf0]   ;;  %v2960_v54 = vld [vmem:[#allocation1 + $0x202] ss:$8 sm:$0xf]   ;;  %v4145_v59 = vpack.i.bf16 %v3085_v49, %v3074_v48 }
  0xd6   :  { %4141 = vrot.lane.b32.xlu0 %v4140_v56, %s4200_s24  ;;  %v3124_v45 = vld [vmem:[#allocation1 + $0x101] ss:$8 sm:$0xf]   ;;  %v3118_v51 = vsel %vm1924_vm0, %v3116_v44, %v3114_v42  ;;  %v2962_v55 = vld [vmem:[#allocation1 + $0x202] ss:$8 sm:$0xf0]  }
  0xd7   :  { %4076 = vrot.lane.b32.xlu2 %v4075_v6, %s4199_s23  ;;  %4116 = vrot.lane.b32.xlu1 %v4115_v7, %s4200_s24  ;;  %v3126_v52 = vld [vmem:[#allocation1 + $0x101] ss:$8 sm:$0xf0]   ;;  %v1947_v57 = vld [vmem:[#allocation1 + $0xc0] ss:$8 sm:$0xf]   ;;  %v2964_v12 = vsel %vm1924_vm0, %v2962_v55, %v2960_v54 }
  0xd8   :  { %v3937_v21 = vpop.permute.xlu2 %3936  ;;  %v4564_v23 = vpop.permute.xlu0 %3961  ;;  %v3128_v53 = vsel %vm1924_vm0, %v3126_v52, %v3124_v45  ;;  %v2971_v60 = vld [vmem:[#allocation1 + $0x302] ss:$8 sm:$0xf]   ;;  %v3135_v62 = vld [vmem:[#allocation1 + $0x201] ss:$8 sm:$0xf]  }
  0xd9   :  { %v3939_v25 = vunpack.i.h.bf16 %v3937_v21  ;;  %v3938_v27 = vunpack.i.l.bf16 %v3937_v21  ;;  %v4155_v56 = vpack.i.bf16 %v3128_v53, %v3118_v51  ;;  %v2973_v61 = vld [vmem:[#allocation1 + $0x302] ss:$8 sm:$0xf0]   ;;  %v3137_v63 = vld [vmem:[#allocation1 + $0x201] ss:$8 sm:$0xf0]  }
  0xda   :  { %v3146_v0 = vld [vmem:[#allocation1 + $0x301] ss:$8 sm:$0xf]   ;;  %v1949_v2 = vld [vmem:[#allocation1 + $0xc0] ss:$8 sm:$0xf0]   ;;  %v2975_v16 = vsel %vm1924_vm0, %v2973_v61, %v2971_v60  ;;  %v3139_v17 = vsel %vm1924_vm0, %v3137_v63, %v3135_v62 }
  0xdb   :  { %2160 = vst.msk [vmem:[#allocation0 + $0x10] sm:$0xff] %vm2071_vm2, %v3938_v27   ;;  %v3148_v1 = vld [vmem:[#allocation1 + $0x301] ss:$8 sm:$0xf0]   ;;  %v1951_v5 = vsel %vm1924_vm0, %v1949_v2, %v1947_v57 }
  0xdc   :  { %2171 = vst.msk [vmem:[#allocation0 + $0x30] sm:$0xff] %vm2071_vm2, %v3939_v25   ;;  %v1983_v3 = vld [vmem:[#allocation1 + $0x1c0] ss:$8 sm:$0xf]   ;;  %v3150_v18 = vsel %vm1924_vm0, %v3148_v1, %v3146_v0  ;;  %v4120_v25 = vpack.i.bf16 %v2975_v16, %v2964_v12 }
  0xdd   :  { %v1985_v6 = vld [vmem:[#allocation1 + $0x1c0] ss:$8 sm:$0xf0]   ;;  %1954 = vst.msk [vmem:[#allocation0 + $0x18] sm:$0xff] %vm1926_vm1, %v1951_v5   ;;  %v4160_v27 = vpack.i.bf16 %v3150_v18, %v3139_v17 }
  0xde   :  { %4156 = vrot.lane.b32.xlu0 %v4155_v56, %s4201_s25  ;;  %v2019_v7 = vld [vmem:[#allocation1 + $0x2c0] ss:$8 sm:$0xf]   ;;  %v1987_v8 = vsel %vm1924_vm0, %v1985_v6, %v1983_v3  ;;  %2204 = vst.msk [vmem:[#allocation0 + $0x18] sm:$0xff] %vm2071_vm2, %v3948_v50  }
  0xdf   :  { %4091 = vrot.lane.b32.xlu2 %v4090_v33, %s4199_s23  ;;  %4131 = vrot.lane.b32.xlu1 %v4130_v34, %s4200_s24  ;;  %v2021_v9 = vld [vmem:[#allocation1 + $0x2c0] ss:$8 sm:$0xf0]   ;;  %1990 = vst.msk [vmem:[#allocation0 + $0x38] sm:$0xff] %vm1926_vm1, %v1987_v8   ;;  %v3963_v33 = vunpack.i.l.bf16 %v4564_v23  ;;  %v3964_v23 = vunpack.i.h.bf16 %v4564_v23 }
  0xe0   :  { %v4580_v46 = vpop.permute.xlu1 %3951  ;;  %v2023_v10 = vsel %vm1924_vm0, %v2021_v9, %v2019_v7  ;;  %v2055_v11 = vld [vmem:[#allocation1 + $0x3c0] ss:$8 sm:$0xf]   ;;  %2215 = vst.msk [vmem:[#allocation0 + $0x38] sm:$0xff] %vm2071_vm2, %v3949_v4  }
  0xe1   :  { %v3953_v13 = vunpack.i.l.bf16 %v4580_v46  ;;  %v2057_v14 = vld [vmem:[#allocation1 + $0x3c0] ss:$8 sm:$0xf0]   ;;  %2026 = vst.msk [vmem:[#allocation0 + $0x58] sm:$0xff] %vm1926_vm1, %v2023_v10   ;;  %v3954_v24 = vunpack.i.h.bf16 %v4580_v46 }
  0xe2   :  { %v2059_v19 = vsel %vm1924_vm0, %v2057_v14, %v2055_v11  ;;  %v3026_v26 = vld [vmem:[#allocation1 + $0x82] ss:$8 sm:$0xf]   ;;  %v3179_v31 = vld [vmem:[#allocation1 + $0x241] ss:$8 sm:$0xf]  }
  0xe3   :  { %2062 = vst.msk [vmem:[#allocation0 + $0x78] sm:$0xff] %vm1926_vm1, %v2059_v19   ;;  %v3028_v28 = vld [vmem:[#allocation1 + $0x82] ss:$8 sm:$0xf0]  }
  0xe4   :  { %2226 = vst.msk [vmem:[#allocation0 + $0x58] sm:$0xff] %vm2071_vm2, %v3953_v13   ;;  %v3037_v29 = vld [vmem:[#allocation1 + $0x182] ss:$8 sm:$0xf]   ;;  %v3030_v40 = vsel %vm1924_vm0, %v3028_v28, %v3026_v26 }
  0xe5   :  { %v3039_v30 = vld [vmem:[#allocation1 + $0x182] ss:$8 sm:$0xf0]   ;;  %v3181_v32 = vld [vmem:[#allocation1 + $0x241] ss:$8 sm:$0xf0]  }
  0xe6   :  { %2237 = vst.msk [vmem:[#allocation0 + $0x78] sm:$0xff] %vm2071_vm2, %v3954_v24   ;;  %v3183_v34 = vsel %vm1924_vm0, %v3181_v32, %v3179_v31  ;;  %v3190_v35 = vld [vmem:[#allocation1 + $0x341] ss:$8 sm:$0xf]   ;;  %v3041_v41 = vsel %vm1924_vm0, %v3039_v30, %v3037_v29 }
  0xe7   :  { %4106 = vrot.lane.b32.xlu2 %v4105_v58, %s4199_s23  ;;  %4146 = vrot.lane.b32.xlu1 %v4145_v59, %s4200_s24  ;;  %v3192_v36 = vld [vmem:[#allocation1 + $0x341] ss:$8 sm:$0xf0]   ;;  %2269 = vst.msk [vmem:[#allocation0 + $0x40] sm:$0xff] %vm2246_vm3, %v3963_v33   ;;  %v4135_v54 = vpack.i.bf16 %v3041_v41, %v3030_v40 }
  0xe8   :  { %v3967_v15 = vpop.permute.xlu1 %3966  ;;  %v3201_v37 = vld [vmem:[#allocation1 + $0x81] ss:$8 sm:$0xf]   ;;  %v3194_v42 = vsel %vm1924_vm0, %v3192_v36, %v3190_v35  ;;  %2280 = vst.msk [vmem:[#allocation0 + $0x60] sm:$0xff] %vm2246_vm3, %v3964_v23  }
  0xe9   :  { %v3942_v20 = vpop.permute.xlu2 %3941  ;;  %v3969_v38 = vunpack.i.h.bf16 %v3967_v15  ;;  %v3203_v43 = vld [vmem:[#allocation1 + $0x81] ss:$8 sm:$0xf0]   ;;  %v4170_v46 = vpack.i.bf16 %v3194_v42, %v3183_v34  ;;  %v3968_v53 = vunpack.i.l.bf16 %v3967_v15  ;;  %v3092_v56 = vld [vmem:[#allocation1 + $0x2c2] ss:$8 sm:$0xf]  }
  0xea   :  { %v3944_v21 = vunpack.i.h.bf16 %v3942_v20  ;;  %v3943_v22 = vunpack.i.l.bf16 %v3942_v20  ;;  %v3212_v44 = vld [vmem:[#allocation1 + $0x181] ss:$8 sm:$0xf]   ;;  %v3205_v47 = vsel %vm1924_vm0, %v3203_v43, %v3201_v37  ;;  %v3094_v57 = vld [vmem:[#allocation1 + $0x2c2] ss:$8 sm:$0xf0]  }
  0xeb   :  { %v3214_v48 = vld [vmem:[#allocation1 + $0x181] ss:$8 sm:$0xf0]   ;;  %4171 = vrot.lane.b32.xlu0 %v4170_v46, %s4201_s25  ;;  %2302 = vst.msk [vmem:[#allocation0 + $0x28] sm:$0xff] %vm2246_vm3, %v3969_v38   ;;  %v3096_v2 = vsel %vm1924_vm0, %v3094_v57, %v3092_v56 }
  0xec   :  { %2182 = vst.msk [vmem:[#allocation0 + $0x50] sm:$0xff] %vm2071_vm2, %v3943_v22   ;;  %v3216_v52 = vsel %vm1924_vm0, %v3214_v48, %v3212_v44  ;;  %v3103_v58 = vld [vmem:[#allocation1 + $0x3c2] ss:$8 sm:$0xf]  }
  0xed   :  { %2193 = vst.msk [vmem:[#allocation0 + $0x70] sm:$0xff] %vm2071_vm2, %v3944_v21   ;;  %v4175_v55 = vpack.i.bf16 %v3216_v52, %v3205_v47  ;;  %v3105_v59 = vld [vmem:[#allocation1 + $0x3c2] ss:$8 sm:$0xf0]  }
  0xee   :  { %2291 = vst.msk [vmem:[#allocation0 + $0x8] sm:$0xff] %vm2246_vm3, %v3968_v53   ;;  %v3245_v60 = vld [vmem:[#allocation1 + $0xc1] ss:$8 sm:$0xf]   ;;  %v3107_v3 = vsel %vm1924_vm0, %v3105_v59, %v3103_v58 }
  0xef   :  { %4121 = vrot.lane.b32.xlu2 %v4120_v25, %s4200_s24  ;;  %4161 = vrot.lane.b32.xlu1 %v4160_v27, %s4201_s25  ;;  %v3247_v62 = vld [vmem:[#allocation1 + $0xc1] ss:$8 sm:$0xf0]   ;;  %v4150_v16 = vpack.i.bf16 %v3107_v3, %v3096_v2 }
  0xf0   :  { %v3977_v39 = vpop.permute.xlu0 %3976  ;;  %v3256_v63 = vld [vmem:[#allocation1 + $0x1c1] ss:$8 sm:$0xf]   ;;  %v3249_v4 = vsel %vm1924_vm0, %v3247_v62, %v3245_v60 }
  0xf1   :  { %v3957_v45 = vpop.permute.xlu2 %3956  ;;  %v3979_v61 = vunpack.i.h.bf16 %v3977_v39  ;;  %v3978_v0 = vunpack.i.l.bf16 %v3977_v39  ;;  %v3258_v5 = vld [vmem:[#allocation1 + $0x1c1] ss:$8 sm:$0xf0]  }
  0xf2   :  { %v3959_v49 = vunpack.i.h.bf16 %v3957_v45  ;;  %v3958_v51 = vunpack.i.l.bf16 %v3957_v45  ;;  %v3267_v6 = vld [vmem:[#allocation1 + $0x2c1] ss:$8 sm:$0xf]   ;;  %v3260_v7 = vsel %vm1924_vm0, %v3258_v5, %v3256_v63 }
  0xf3   :  { %v3269_v8 = vld [vmem:[#allocation1 + $0x2c1] ss:$8 sm:$0xf0]   ;;  %v4185_v13 = vpack.i.bf16 %v3260_v7, %v3249_v4  ;;  %2346 = vst.msk [vmem:[#allocation0 + $0x30] sm:$0xff] %vm2246_vm3, %v3979_v61  }
  0xf4   :  { %2258 = vst.msk [vmem:[#allocation0 + $0x20] sm:$0xff] %vm2246_vm3, %v3959_v49   ;;  %v3278_v9 = vld [vmem:[#allocation1 + $0x3c1] ss:$8 sm:$0xf]   ;;  %v3271_v14 = vsel %vm1924_vm0, %v3269_v8, %v3267_v6 }
  0xf5   :  { %2247 = vst.msk [vmem:[#allocation0] sm:$0xff] %vm2246_vm3, %v3958_v51   ;;  %v3280_v15 = vld [vmem:[#allocation1 + $0x3c1] ss:$8 sm:$0xf0]   ;;  %4186 = vrot.lane.b32.xlu0 %v4185_v13, %s4201_s25 }
  0xf6   :  { %v3282_v17 = vsel %vm1924_vm0, %v3280_v15, %v3278_v9  ;;  %2335 = vst.msk [vmem:[#allocation0 + $0x10] sm:$0xff] %vm2246_vm3, %v3978_v0   ;;  %v3157_v18 = vld [vmem:[#allocation1 + $0x41] ss:$8 sm:$0xf]  }
  0xf7   :  { %4136 = vrot.lane.b32.xlu2 %v4135_v54, %s4200_s24  ;;  %4176 = vrot.lane.b32.xlu1 %v4175_v55, %s4201_s25  ;;  %v4190_v20 = vpack.i.bf16 %v3282_v17, %v3271_v14  ;;  %v3159_v21 = vld [vmem:[#allocation1 + $0x41] ss:$8 sm:$0xf0]  }
  0xf8   :  { %v3992_v1 = vpop.permute.xlu0 %3991  ;;  %v3168_v22 = vld [vmem:[#allocation1 + $0x141] ss:$8 sm:$0xf]   ;;  %v3161_v27 = vsel %vm1924_vm0, %v3159_v21, %v3157_v18 }
  0xf9   :  { %v3972_v50 = vpop.permute.xlu2 %3971  ;;  %v3993_v10 = vunpack.i.l.bf16 %v3992_v1  ;;  %v3994_v19 = vunpack.i.h.bf16 %v3992_v1  ;;  %v3170_v24 = vld [vmem:[#allocation1 + $0x141] ss:$8 sm:$0xf0]  }
  0xfa   :  { %v3974_v11 = vunpack.i.h.bf16 %v3972_v50  ;;  %v3973_v12 = vunpack.i.l.bf16 %v3972_v50  ;;  %v3172_v26 = vsel %vm1924_vm0, %v3170_v24, %v3168_v22  ;;  %v3223_v36 = vld [vmem:[#allocation1 + $0x281] ss:$8 sm:$0xf]  }
  0xfb   :  { %2401 = vst.msk [vmem:[#allocation0 + $0x58] sm:$0xff] %vm2246_vm3, %v3993_v10   ;;  %v4165_v23 = vpack.i.bf16 %v3172_v26, %v3161_v27  ;;  %v3225_v37 = vld [vmem:[#allocation1 + $0x281] ss:$8 sm:$0xf0]  }
  0xfc   :  { %2324 = vst.msk [vmem:[#allocation0 + $0x68] sm:$0xff] %vm2246_vm3, %v3974_v11   ;;  %v3234_v38 = vld [vmem:[#allocation1 + $0x381] ss:$8 sm:$0xf]   ;;  %v3227_v41 = vsel %vm1924_vm0, %v3225_v37, %v3223_v36 }
  0xfd   :  { %2313 = vst.msk [vmem:[#allocation0 + $0x48] sm:$0xff] %vm2246_vm3, %v3973_v12   ;;  %v3236_v39 = vld [vmem:[#allocation1 + $0x381] ss:$8 sm:$0xf0]  }
  0xfe   :  { %2412 = vst.msk [vmem:[#allocation0 + $0x78] sm:$0xff] %vm2246_vm3, %v3994_v19   ;;  %v3238_v42 = vsel %vm1924_vm0, %v3236_v39, %v3234_v38 }
  0xff   :  { %4151 = vrot.lane.b32.xlu2 %v4150_v16, %s4200_s24  ;;  %4191 = vrot.lane.b32.xlu1 %v4190_v20, %s4201_s25  ;;  %v4180_v52 = vpack.i.bf16 %v3238_v42, %v3227_v41 }
 0x100   :  { %v4007_v25 = vpop.permute.xlu0 %4006 }
 0x101   :  { %v4009_v28 = vunpack.i.h.bf16 %v4007_v25  ;;  %v4008_v29 = vunpack.i.l.bf16 %v4007_v25  ;;  %v3987_v30 = vpop.permute.xlu2 %3986  ;;  %v3982_v31 = vpop.permute.xlu1 %3981 }
 0x102   :  { %v3989_v32 = vunpack.i.h.bf16 %v3987_v30  ;;  %v3988_v33 = vunpack.i.l.bf16 %v3987_v30  ;;  %v3984_v34 = vunpack.i.h.bf16 %v3982_v31  ;;  %v3983_v35 = vunpack.i.l.bf16 %v3982_v31 }
 0x103   :  { %2466 = vst.msk [vmem:[#allocation0 + $0x8] sm:$0xff] %vm2421_vm4, %v4008_v29  }
 0x104   :  { %2477 = vst.msk [vmem:[#allocation0 + $0x28] sm:$0xff] %vm2421_vm4, %v4009_v28  }
 0x105   :  { %2390 = vst.msk [vmem:[#allocation0 + $0x38] sm:$0xff] %vm2246_vm3, %v3989_v32  }
 0x106   :  { %2379 = vst.msk [vmem:[#allocation0 + $0x18] sm:$0xff] %vm2246_vm3, %v3988_v33  }
 0x107   :  { %2368 = vst.msk [vmem:[#allocation0 + $0x70] sm:$0xff] %vm2246_vm3, %v3984_v34   ;;  %4166 = vrot.lane.b32.xlu2 %v4165_v23, %s4201_s25 }
 0x108   :  { %2357 = vst.msk [vmem:[#allocation0 + $0x50] sm:$0xff] %vm2246_vm3, %v3983_v35   ;;  %v4022_v40 = vpop.permute.xlu0 %4021 }
 0x109   :  { %v4024_v43 = vunpack.i.h.bf16 %v4022_v40  ;;  %v4023_v44 = vunpack.i.l.bf16 %v4022_v40  ;;  %v4002_v45 = vpop.permute.xlu2 %4001  ;;  %v3997_v46 = vpop.permute.xlu1 %3996 }
 0x10a   :  { %v4004_v47 = vunpack.i.h.bf16 %v4002_v45  ;;  %v4003_v48 = vunpack.i.l.bf16 %v4002_v45  ;;  %v3999_v49 = vunpack.i.h.bf16 %v3997_v46  ;;  %v3998_v51 = vunpack.i.l.bf16 %v3997_v46 }
 0x10b   :  { %2532 = vst.msk [vmem:[#allocation0 + $0x50] sm:$0xff] %vm2421_vm4, %v4023_v44  }
 0x10c   :  { %2543 = vst.msk [vmem:[#allocation0 + $0x70] sm:$0xff] %vm2421_vm4, %v4024_v43  }
 0x10d   :  { %2455 = vst.msk [vmem:[#allocation0 + $0x60] sm:$0xff] %vm2421_vm4, %v4004_v47  }
 0x10e   :  { %2444 = vst.msk [vmem:[#allocation0 + $0x40] sm:$0xff] %vm2421_vm4, %v4003_v48  }
 0x10f   :  { %2433 = vst.msk [vmem:[#allocation0 + $0x20] sm:$0xff] %vm2421_vm4, %v3999_v49   ;;  %4181 = vrot.lane.b32.xlu2 %v4180_v52, %s4201_s25 }
 0x110   :  { %2422 = vst.msk [vmem:[#allocation0] sm:$0xff] %vm2421_vm4, %v3998_v51   ;;  %v4037_v53 = vpop.permute.xlu0 %4036 }
 0x111   :  { %v4039_v54 = vunpack.i.h.bf16 %v4037_v53  ;;  %v4038_v55 = vunpack.i.l.bf16 %v4037_v53  ;;  %v4017_v56 = vpop.permute.xlu2 %4016  ;;  %v4012_v57 = vpop.permute.xlu1 %4011 }
 0x112   :  { %v4019_v58 = vunpack.i.h.bf16 %v4017_v56  ;;  %v4018_v59 = vunpack.i.l.bf16 %v4017_v56  ;;  %v4014_v60 = vunpack.i.h.bf16 %v4012_v57  ;;  %v4013_v61 = vunpack.i.l.bf16 %v4012_v57 }
 0x113   :  { %2597 = vst.msk [vmem:[#allocation0] sm:$0xff] %vm2596_vm5, %v4038_v55  }
 0x114   :  { %2608 = vst.msk [vmem:[#allocation0 + $0x20] sm:$0xff] %vm2596_vm5, %v4039_v54  }
 0x115   :  { %2521 = vst.msk [vmem:[#allocation0 + $0x30] sm:$0xff] %vm2421_vm4, %v4019_v58  }
 0x116   :  { %2510 = vst.msk [vmem:[#allocation0 + $0x10] sm:$0xff] %vm2421_vm4, %v4018_v59  }
 0x117   :  { %2499 = vst.msk [vmem:[#allocation0 + $0x68] sm:$0xff] %vm2421_vm4, %v4014_v60  }
 0x118   :  { %2488 = vst.msk [vmem:[#allocation0 + $0x48] sm:$0xff] %vm2421_vm4, %v4013_v61   ;;  %v4052_v62 = vpop.permute.xlu0 %4051 }
 0x119   :  { %v4054_v63 = vunpack.i.h.bf16 %v4052_v62  ;;  %v4053_v0 = vunpack.i.l.bf16 %v4052_v62  ;;  %v4032_v1 = vpop.permute.xlu2 %4031  ;;  %v4027_v2 = vpop.permute.xlu1 %4026 }
 0x11a   :  { %v4034_v3 = vunpack.i.h.bf16 %v4032_v1  ;;  %v4033_v4 = vunpack.i.l.bf16 %v4032_v1  ;;  %v4029_v5 = vunpack.i.h.bf16 %v4027_v2  ;;  %v4028_v6 = vunpack.i.l.bf16 %v4027_v2 }
 0x11b   :  { %2663 = vst.msk [vmem:[#allocation0 + $0x48] sm:$0xff] %vm2596_vm5, %v4053_v0  }
 0x11c   :  { %2674 = vst.msk [vmem:[#allocation0 + $0x68] sm:$0xff] %vm2596_vm5, %v4054_v63  }
 0x11d   :  { %2576 = vst.msk [vmem:[#allocation0 + $0x58] sm:$0xff] %vm2421_vm4, %v4033_v4  }
 0x11e   :  { %2587 = vst.msk [vmem:[#allocation0 + $0x78] sm:$0xff] %vm2421_vm4, %v4034_v3  }
 0x11f   :  { %2565 = vst.msk [vmem:[#allocation0 + $0x38] sm:$0xff] %vm2421_vm4, %v4029_v5  }
 0x120   :  { %2554 = vst.msk [vmem:[#allocation0 + $0x18] sm:$0xff] %vm2421_vm4, %v4028_v6   ;;  %v4067_v50 = vpop.permute.xlu0 %4066 }
 0x121   :  { %v4069_v7 = vunpack.i.h.bf16 %v4067_v50  ;;  %v4068_v8 = vunpack.i.l.bf16 %v4067_v50  ;;  %v4047_v9 = vpop.permute.xlu2 %4046  ;;  %v4042_v10 = vpop.permute.xlu1 %4041 }
 0x122   :  { %v4049_v11 = vunpack.i.h.bf16 %v4047_v9  ;;  %v4048_v12 = vunpack.i.l.bf16 %v4047_v9  ;;  %v4044_v13 = vunpack.i.h.bf16 %v4042_v10  ;;  %v4043_v14 = vunpack.i.l.bf16 %v4042_v10 }
 0x123   :  { %2729 = vst.msk [vmem:[#allocation0 + $0x18] sm:$0xff] %vm2596_vm5, %v4068_v8  }
 0x124   :  { %2740 = vst.msk [vmem:[#allocation0 + $0x38] sm:$0xff] %vm2596_vm5, %v4069_v7  }
 0x125   :  { %2641 = vst.msk [vmem:[#allocation0 + $0x8] sm:$0xff] %vm2596_vm5, %v4048_v12  }
 0x126   :  { %2652 = vst.msk [vmem:[#allocation0 + $0x28] sm:$0xff] %vm2596_vm5, %v4049_v11  }
 0x127   :  { %2630 = vst.msk [vmem:[#allocation0 + $0x60] sm:$0xff] %vm2596_vm5, %v4044_v13  }
 0x128   :  { %2619 = vst.msk [vmem:[#allocation0 + $0x40] sm:$0xff] %vm2596_vm5, %v4043_v14   ;;  %v4082_v15 = vpop.permute.xlu0 %4081 }
 0x129   :  { %v4084_v16 = vunpack.i.h.bf16 %v4082_v15  ;;  %v4083_v17 = vunpack.i.l.bf16 %v4082_v15  ;;  %v4062_v18 = vpop.permute.xlu2 %4061  ;;  %v4057_v19 = vpop.permute.xlu1 %4056 }
 0x12a   :  { %v4064_v20 = vunpack.i.h.bf16 %v4062_v18  ;;  %v4063_v21 = vunpack.i.l.bf16 %v4062_v18  ;;  %v4059_v22 = vunpack.i.h.bf16 %v4057_v19  ;;  %v4058_v24 = vunpack.i.l.bf16 %v4057_v19 }
 0x12b   :  { %2794 = vst.msk [vmem:[#allocation0 + $0x40] sm:$0xff] %vm2771_vm6, %v4083_v17  }
 0x12c   :  { %2805 = vst.msk [vmem:[#allocation0 + $0x60] sm:$0xff] %vm2771_vm6, %v4084_v16  }
 0x12d   :  { %2707 = vst.msk [vmem:[#allocation0 + $0x50] sm:$0xff] %vm2596_vm5, %v4063_v21  }
 0x12e   :  { %2718 = vst.msk [vmem:[#allocation0 + $0x70] sm:$0xff] %vm2596_vm5, %v4064_v20  }
 0x12f   :  { %2696 = vst.msk [vmem:[#allocation0 + $0x30] sm:$0xff] %vm2596_vm5, %v4059_v22  }
 0x130   :  { %2685 = vst.msk [vmem:[#allocation0 + $0x10] sm:$0xff] %vm2596_vm5, %v4058_v24   ;;  %v4097_v25 = vpop.permute.xlu0 %4096 }
 0x131   :  { %v4099_v27 = vunpack.i.h.bf16 %v4097_v25  ;;  %v4098_v26 = vunpack.i.l.bf16 %v4097_v25  ;;  %v4077_v28 = vpop.permute.xlu2 %4076  ;;  %v4072_v29 = vpop.permute.xlu1 %4071 }
 0x132   :  { %v4079_v30 = vunpack.i.h.bf16 %v4077_v28  ;;  %v4078_v31 = vunpack.i.l.bf16 %v4077_v28  ;;  %v4073_v32 = vunpack.i.l.bf16 %v4072_v29  ;;  %v4074_v33 = vunpack.i.h.bf16 %v4072_v29 }
 0x133   :  { %2860 = vst.msk [vmem:[#allocation0 + $0x10] sm:$0xff] %vm2771_vm6, %v4098_v26  }
 0x134   :  { %2871 = vst.msk [vmem:[#allocation0 + $0x30] sm:$0xff] %vm2771_vm6, %v4099_v27  }
 0x135   :  { %2772 = vst.msk [vmem:[#allocation0] sm:$0xff] %vm2771_vm6, %v4078_v31  }
 0x136   :  { %2783 = vst.msk [vmem:[#allocation0 + $0x20] sm:$0xff] %vm2771_vm6, %v4079_v30  }
 0x137   :  { %2751 = vst.msk [vmem:[#allocation0 + $0x58] sm:$0xff] %vm2596_vm5, %v4073_v32  }
 0x138   :  { %2762 = vst.msk [vmem:[#allocation0 + $0x78] sm:$0xff] %vm2596_vm5, %v4074_v33   ;;  %v4112_v34 = vpop.permute.xlu0 %4111 }
 0x139   :  { %v4114_v35 = vunpack.i.h.bf16 %v4112_v34  ;;  %v4113_v23 = vunpack.i.l.bf16 %v4112_v34  ;;  %v4092_v36 = vpop.permute.xlu2 %4091  ;;  %v4087_v37 = vpop.permute.xlu1 %4086 }
 0x13a   :  { %v4094_v38 = vunpack.i.h.bf16 %v4092_v36  ;;  %v4093_v39 = vunpack.i.l.bf16 %v4092_v36  ;;  %v4088_v40 = vunpack.i.l.bf16 %v4087_v37  ;;  %v4089_v41 = vunpack.i.h.bf16 %v4087_v37 }
 0x13b   :  { %2926 = vst.msk [vmem:[#allocation0 + $0x58] sm:$0xff] %vm2771_vm6, %v4113_v23  }
 0x13c   :  { %2937 = vst.msk [vmem:[#allocation0 + $0x78] sm:$0xff] %vm2771_vm6, %v4114_v35  }
 0x13d   :  { %2838 = vst.msk [vmem:[#allocation0 + $0x48] sm:$0xff] %vm2771_vm6, %v4093_v39  }
 0x13e   :  { %2849 = vst.msk [vmem:[#allocation0 + $0x68] sm:$0xff] %vm2771_vm6, %v4094_v38  }
 0x13f   :  { %2816 = vst.msk [vmem:[#allocation0 + $0x8] sm:$0xff] %vm2771_vm6, %v4088_v40  }
 0x140   :  { %2827 = vst.msk [vmem:[#allocation0 + $0x28] sm:$0xff] %vm2771_vm6, %v4089_v41   ;;  %v4127_v42 = vpop.permute.xlu0 %4126 }
 0x141   :  { %v4129_v43 = vunpack.i.h.bf16 %v4127_v42  ;;  %v4128_v44 = vunpack.i.l.bf16 %v4127_v42  ;;  %v4107_v45 = vpop.permute.xlu2 %4106  ;;  %v4102_v46 = vpop.permute.xlu1 %4101 }
 0x142   :  { %v4109_v47 = vunpack.i.h.bf16 %v4107_v45  ;;  %v4108_v48 = vunpack.i.l.bf16 %v4107_v45  ;;  %v4103_v49 = vunpack.i.l.bf16 %v4102_v46  ;;  %v4104_v51 = vunpack.i.h.bf16 %v4102_v46 }
 0x143   :  { %2991 = vst.msk [vmem:[#allocation0 + $0x8] sm:$0xff] %vm2946_vm7, %v4128_v44  }
 0x144   :  { %3002 = vst.msk [vmem:[#allocation0 + $0x28] sm:$0xff] %vm2946_vm7, %v4129_v43  }
 0x145   :  { %2904 = vst.msk [vmem:[#allocation0 + $0x18] sm:$0xff] %vm2771_vm6, %v4108_v48  }
 0x146   :  { %2915 = vst.msk [vmem:[#allocation0 + $0x38] sm:$0xff] %vm2771_vm6, %v4109_v47  }
 0x147   :  { %2882 = vst.msk [vmem:[#allocation0 + $0x50] sm:$0xff] %vm2771_vm6, %v4103_v49  }
 0x148   :  { %2893 = vst.msk [vmem:[#allocation0 + $0x70] sm:$0xff] %vm2771_vm6, %v4104_v51   ;;  %v4142_v52 = vpop.permute.xlu0 %4141 }
 0x149   :  { %v4144_v53 = vunpack.i.h.bf16 %v4142_v52  ;;  %v4143_v54 = vunpack.i.l.bf16 %v4142_v52  ;;  %v4122_v55 = vpop.permute.xlu2 %4121  ;;  %v4117_v56 = vpop.permute.xlu1 %4116 }
 0x14a   :  { %v4124_v57 = vunpack.i.h.bf16 %v4122_v55  ;;  %v4123_v58 = vunpack.i.l.bf16 %v4122_v55  ;;  %v4118_v59 = vunpack.i.l.bf16 %v4117_v56  ;;  %v4119_v60 = vunpack.i.h.bf16 %v4117_v56 }
 0x14b   :  { %3057 = vst.msk [vmem:[#allocation0 + $0x50] sm:$0xff] %vm2946_vm7, %v4143_v54  }
 0x14c   :  { %3068 = vst.msk [vmem:[#allocation0 + $0x70] sm:$0xff] %vm2946_vm7, %v4144_v53  }
 0x14d   :  { %2969 = vst.msk [vmem:[#allocation0 + $0x40] sm:$0xff] %vm2946_vm7, %v4123_v58  }
 0x14e   :  { %2980 = vst.msk [vmem:[#allocation0 + $0x60] sm:$0xff] %vm2946_vm7, %v4124_v57  }
 0x14f   :  { %2947 = vst.msk [vmem:[#allocation0] sm:$0xff] %vm2946_vm7, %v4118_v59  }
 0x150   :  { %2958 = vst.msk [vmem:[#allocation0 + $0x20] sm:$0xff] %vm2946_vm7, %v4119_v60   ;;  %v4157_v3 = vpop.permute.xlu0 %4156 }
 0x151   :  { %v4137_v61 = vpop.permute.xlu2 %4136  ;;  %v4132_v62 = vpop.permute.xlu1 %4131  ;;  %v4159_v4 = vunpack.i.h.bf16 %v4157_v3  ;;  %v4158_v5 = vunpack.i.l.bf16 %v4157_v3 }
 0x152   :  { %v4139_v63 = vunpack.i.h.bf16 %v4137_v61  ;;  %v4138_v0 = vunpack.i.l.bf16 %v4137_v61  ;;  %v4133_v1 = vunpack.i.l.bf16 %v4132_v62  ;;  %v4134_v2 = vunpack.i.h.bf16 %v4132_v62 }
 0x153   :  { %3122 = vst.msk [vmem:[#allocation0] sm:$0xff] %vm3121_vm8, %v4158_v5  }
 0x154   :  { %3035 = vst.msk [vmem:[#allocation0 + $0x10] sm:$0xff] %vm2946_vm7, %v4138_v0  }
 0x155   :  { %3046 = vst.msk [vmem:[#allocation0 + $0x30] sm:$0xff] %vm2946_vm7, %v4139_v63  }
 0x156   :  { %3013 = vst.msk [vmem:[#allocation0 + $0x48] sm:$0xff] %vm2946_vm7, %v4133_v1  }
 0x157   :  { %3024 = vst.msk [vmem:[#allocation0 + $0x68] sm:$0xff] %vm2946_vm7, %v4134_v2  }
 0x158   :  { %3133 = vst.msk [vmem:[#allocation0 + $0x20] sm:$0xff] %vm3121_vm8, %v4159_v4  }
 0x159   :  { %v4152_v6 = vpop.permute.xlu2 %4151  ;;  %v4147_v50 = vpop.permute.xlu1 %4146 }
 0x15a   :  { %v4154_v7 = vunpack.i.h.bf16 %v4152_v6  ;;  %v4153_v8 = vunpack.i.l.bf16 %v4152_v6  ;;  %v4148_v9 = vunpack.i.l.bf16 %v4147_v50  ;;  %v4149_v10 = vunpack.i.h.bf16 %v4147_v50  ;;  %v3290_v20 = vld [vmem:[#allocation0] sm:$0xff] }
 0x15c   :  { %3101 = vst.msk [vmem:[#allocation0 + $0x58] sm:$0xff] %vm2946_vm7, %v4153_v8  }
 0x15d   :  { %3112 = vst.msk [vmem:[#allocation0 + $0x78] sm:$0xff] %vm2946_vm7, %v4154_v7   ;;  %v4172_v17 = vpop.permute.xlu0 %4171 }
 0x15e   :  { %3079 = vst.msk [vmem:[#allocation0 + $0x18] sm:$0xff] %vm2946_vm7, %v4148_v9   ;;  %v4174_v18 = vunpack.i.h.bf16 %v4172_v17  ;;  %v4173_v19 = vunpack.i.l.bf16 %v4172_v17 }
 0x15f   :  { %3090 = vst.msk [vmem:[#allocation0 + $0x38] sm:$0xff] %vm2946_vm7, %v4149_v10   ;;  %v3317_v24 = vld [vmem:[#allocation0 + $0x20] sm:$0xff] }
 0x160   :  { %3188 = vst.msk [vmem:[#allocation0 + $0x48] sm:$0xff] %vm3121_vm8, %v4173_v19  }
 0x161   :  { %v4167_v11 = vpop.permute.xlu2 %4166  ;;  %v4162_v12 = vpop.permute.xlu1 %4161  ;;  %3199 = vst.msk [vmem:[#allocation0 + $0x68] sm:$0xff] %vm3121_vm8, %v4174_v18  }
 0x162   :  { %v4169_v13 = vunpack.i.h.bf16 %v4167_v11  ;;  %v4168_v14 = vunpack.i.l.bf16 %v4167_v11  ;;  %v4163_v15 = vunpack.i.l.bf16 %v4162_v12  ;;  %v4164_v16 = vunpack.i.h.bf16 %v4162_v12 }
 0x164   :  { %3166 = vst.msk [vmem:[#allocation0 + $0x8] sm:$0xff] %vm3121_vm8, %v4168_v14  }
 0x165   :  { %3177 = vst.msk [vmem:[#allocation0 + $0x28] sm:$0xff] %vm3121_vm8, %v4169_v13  }
 0x166   :  { %3144 = vst.msk [vmem:[#allocation0 + $0x40] sm:$0xff] %vm3121_vm8, %v4163_v15  }
 0x167   :  { %3155 = vst.msk [vmem:[#allocation0 + $0x60] sm:$0xff] %vm3121_vm8, %v4164_v16   ;;  %v4187_v33 = vpop.permute.xlu0 %4186  ;;  %v3352_v35 = vld [vmem:[#allocation0 + $0x48] sm:$0xff] }
 0x168   :  { %v3380_v36 = vld [vmem:[#allocation0 + $0x68] sm:$0xff]  ;;  %v4188_v38 = vunpack.i.l.bf16 %v4187_v33  ;;  %v4189_v40 = vunpack.i.h.bf16 %v4187_v33 }
 0x169   :  { %v4177_v21 = vpop.permute.xlu1 %4176  ;;  %v4182_v22 = vpop.permute.xlu2 %4181 }
 0x16a   :  { %v4179_v25 = vunpack.i.h.bf16 %v4177_v21  ;;  %v4178_v27 = vunpack.i.l.bf16 %v4177_v21  ;;  %v4183_v30 = vunpack.i.l.bf16 %v4182_v22  ;;  %v4184_v32 = vunpack.i.h.bf16 %v4182_v22  ;;  %3254 = vst.msk [vmem:[#allocation0 + $0x18] sm:$0xff] %vm3121_vm8, %v4188_v38  }
 0x16b   :  { %v3296_v26 = vld [vmem:[#allocation0 + $0x8] sm:$0xff]  ;;  %3265 = vst.msk [vmem:[#allocation0 + $0x38] sm:$0xff] %vm3121_vm8, %v4189_v40  }
 0x16c   :  { %v3324_v28 = vld [vmem:[#allocation0 + $0x28] sm:$0xff]  ;;  %v3801_v29 = vpack.c.bf16 %v3296_v26, %v3290_v20  ;;  %3210 = vst.msk [vmem:[#allocation0 + $0x10] sm:$0xff] %vm3121_vm8, %v4178_v27  }
 0x16d   :  { %v3811_v31 = vpack.c.bf16 %v3324_v28, %v3317_v24  ;;  %3221 = vst.msk [vmem:[#allocation0 + $0x30] sm:$0xff] %vm3121_vm8, %v4179_v25   ;;  %v3345_v34 = vld [vmem:[#allocation0 + $0x40] sm:$0xff] }
 0x16e   :  { %3802 = vst [vmem:[%s4761_s1] sm:$0xff] %v3801_v29   ;;  %v3373_v23 = vld [vmem:[#allocation0 + $0x60] sm:$0xff]  ;;  %v3821_v37 = vpack.c.bf16 %v3352_v35, %v3345_v34 }
 0x16f   :  { %3902 = vst [vmem:[%s4761_s1 + $0x10] sm:$0xff] %v3811_v31   ;;  %v3831_v39 = vpack.c.bf16 %v3380_v36, %v3373_v23 }
 0x170   :  { %3232 = vst.msk [vmem:[#allocation0 + $0x50] sm:$0xff] %vm3121_vm8, %v4183_v30  }
 0x171   :  { %3243 = vst.msk [vmem:[#allocation0 + $0x70] sm:$0xff] %vm3121_vm8, %v4184_v32   ;;  %v4192_v41 = vpop.permute.xlu1 %4191  ;;  %v3310_v46 = vld [vmem:[#allocation0 + $0x18] sm:$0xff] }
 0x172   :  { %3904 = vst [vmem:[%s4761_s1 + $0x20] sm:$0xff] %v3821_v37   ;;  %v4193_v42 = vunpack.i.l.bf16 %v4192_v41  ;;  %v4194_v43 = vunpack.i.h.bf16 %v4192_v41  ;;  %v3338_v51 = vld [vmem:[#allocation0 + $0x38] sm:$0xff] }
 0x173   :  { %3906 = vst [vmem:[%s4761_s1 + $0x30] sm:$0xff] %v3831_v39   ;;  %v3303_v44 = vld [vmem:[#allocation0 + $0x10] sm:$0xff] }
 0x174   :  { %3276 = vst.msk [vmem:[#allocation0 + $0x58] sm:$0xff] %vm3121_vm8, %v4193_v42   ;;  %v3331_v47 = vld [vmem:[#allocation0 + $0x30] sm:$0xff]  ;;  %v3806_v49 = vpack.c.bf16 %v3310_v46, %v3303_v44 }
 0x175   :  { %3287 = vst.msk [vmem:[#allocation0 + $0x78] sm:$0xff] %vm3121_vm8, %v4194_v43   ;;  %v3816_v52 = vpack.c.bf16 %v3338_v51, %v3331_v47 }
 0x176   :  { %3901 = vst [vmem:[%s4761_s1 + $0x8] sm:$0xff] %v3806_v49  }
 0x177   :  { %v3359_v45 = vld [vmem:[#allocation0 + $0x50] sm:$0xff]  ;;  %3903 = vst [vmem:[%s4761_s1 + $0x18] sm:$0xff] %v3816_v52  }
 0x178   :  { %v3387_v48 = vld [vmem:[#allocation0 + $0x70] sm:$0xff] }
 0x17b   :  { %v3366_v53 = vld [vmem:[#allocation0 + $0x58] sm:$0xff] }
 0x17c   :  { %v3826_v54 = vpack.c.bf16 %v3366_v53, %v3359_v45  ;;  %v3394_v55 = vld [vmem:[#allocation0 + $0x78] sm:$0xff] }
 0x17d   :  { %v3836_v56 = vpack.c.bf16 %v3394_v55, %v3387_v48 }
 0x17e   :  { %3905 = vst [vmem:[%s4761_s1 + $0x28] sm:$0xff] %v3826_v54  }
 0x17f   :  { %3907 = vst [vmem:[%s4761_s1 + $0x38] sm:$0xff] %v3836_v56  }

// kernel: freqlc_block_forward.9
= control target key start
LH: loop header
LB: loop body
LE: loop exit
PB: predicated region body
PF: predicated region fallthrough
CT: control target
= control target key end

     0   :  { %s1124_s24 = smov [#allocation3]   ;;  %s1342_s0 = inlined_call_operand.vmem [shape: f32[2], index: 0, kind: input, shape index: {}]   ;;  %s1343_s1 = inlined_call_operand.vmem [shape: bf16[2,8,8,64], index: 1, kind: input, shape index: {}]   ;;  %s1344_s2 = inlined_call_operand.vmem [shape: bf16[2,8,8,64], index: 2, kind: input, shape index: {}]   ;;  %s1345_s3 = inlined_call_operand.vmem [shape: bf16[2,8,8,64], index: 3, kind: input, shape index: {}]   ;;  %s1346_s4 = inlined_call_operand.vmem [shape: bf16[64,64], index: 4, kind: input, shape index: {}]   ;;  %s1347_s5 = inlined_call_operand.vmem [shape: f32[1,64], index: 5, kind: input, shape index: {}]   ;;  %s1348_s6 = inlined_call_operand.vmem [shape: bf16[2,8,8,64], index: 6, kind: output, shape index: {}]  }
   0x1   :  { %s12_s23 = sshll.u32 %s1342_s0, 4  ;;  %s13_s23 = int_to_ptr.vmem [resolvable:$true] %s12_s23 }
   0x2   :  { %15 = dma.vmem_to_smem %s13_s23, 16, %s1124_s24, [#allocation2] }
   0x3   :  { %1102 = dma.done.wait [#allocation2], 16 }
   0x4   :  { %1103 = vsyncadd [#allocation2], 4294967280 }
   0x5   :  { %18 = sfence }
   0x6   :  { %s1163_s25 = smov 0   ;;  %s1165_s26 = smov 0  }
   0x7   :  { %s1167_s27 = smov 0   ;;  %s1169_s28 = smov 0  }
   0x8   :  { %s1171_s29 = smov 0  }
   0x9 LB: > { %s33_s0 = sadd.s32 1, %s1114_s27  ;;  %s36_s30 = sadd.s32 1, %s1118_s28  ;;  %s1122_s29 = sphi %s1171_s29, %s24_s29   ;;  %s1118_s28 = sphi %s1169_s28, %s1352_s28   ;;  %s1114_s27 = sphi %s1167_s27, %s1351_s27   ;;  %s1110_s26 = sphi %s1165_s26, %s1350_s26   ;;  %s1106_s25 = sphi %s1163_s25, %s1349_s25  }
   0xa   : > { %p34_p0 = scmp.ge.s32.totalorder %s33_s0, 2  ;;  %p941_p1 = scmp.ge.s32.totalorder %s1122_s29, 1 }
   0xb   : > { %p251_p2 = scmp.lt.s32.totalorder %s1122_s29, 5 }
   0xc   : > { %s1354_s0 = smov (%p34_p0, %s33_s0), 0  ;;  %s1356_s30 = smov (!%p34_p0, %s36_s30), %s1118_s28 }
   0xd   : > { %p252_p3 = pnand %p941_p1, %p251_p2  ;;  %p38_p4 = scmp.ge.s32.totalorder %s1356_s30, 2 }
   0xe   : > { %s942_s7 = sshll.u32 (!%p252_p3), %s1110_s26, 2  ;;  %p306_p5 = scmp.lt.s32.totalorder (!%p252_p3), %s1106_s25, 1 }
   0xf   : > { %s1358_s30 = smov (%p38_p4, %s1356_s30), 0  ;;  %255 = sbr.rel (%p252_p3) target bundleno = 577 (0x241), region = 40 }
  0x10   : > { %p308_p6 = scmp.lt.s32.totalorder (!%p252_p3), %s942_s7, 7  ;;  %s590_s18 = sld [smem:[#allocation3 + %s1106_s25]] (!%p252_p3) }
  0x14   : > { %s307_s8 = scalar_select %p306_p5, %s1106_s25, 1  ;;  %vm404_vm0 = vcmask 523264   ;;  %vm672_vm1 = vcmask 64512   ;;  %v995_v29 = vld [vmem:[%s1346_s4 + $0x18] sm:$0xff]  ;;  %v994_v30 = vld [vmem:[%s1346_s4 + $0x10] sm:$0xff]  ;;  %v993_v31 = vld [vmem:[%s1346_s4 + $0x8] sm:$0xff] }
  0x15   : > { %s1360_s7 = smov (!%p308_p6, %s942_s7), 7  ;;  %415 = vmatpush.bf16.msra.mxu0 %v995_v29  ;;  %v992_v32 = vld [vmem:[%s1346_s4] sm:$0xff]  ;;  %vm724_vm2 = vcmask 1043456  }
  0x16   : > { %s943_s9 = sshll.u32 %s307_s8, 3  ;;  %v667_v12 = vstv %s590_s18 }
  0x17   : > { %s311_s10 = sadd.s32 %s943_s9, %s1360_s7 }
  0x18   : > { %s1197_s11 = sshll.u32 %s311_s10, 2 }
  0x19   : > { %s323_s14 = scalar_lea.vmem %s1344_s2, %s1197_s11  ;;  %s313_s17 = scalar_lea.vmem %s1343_s1, %s1197_s11  ;;  %416 = vmatpush.bf16.msra.mxu0 %v994_v30 }
  0x1a   : > { %v350_v0 = vld [vmem:[%s323_s14] sm:$0xf]  ;;  %v351_v1 = vld [vmem:[%s323_s14 + $0x4] sm:$0xf]  ;;  %v353_v2 = vld [vmem:[%s323_s14 + $0xc] sm:$0xf]  ;;  %s1233_s7 = scalar_lea.vmem %s1345_s3, %s1197_s11  ;;  %s1312_s15 = scalar_lea.vmem %s1348_s6, %s1197_s11 }
  0x1b   : > { %v595_v3 = vsel %vm404_vm0, %v350_v0, 0  ;;  %v614_v4 = vsel %vm404_vm0, %v351_v1, 0  ;;  %v652_v5 = vsel %vm404_vm0, %v353_v2, 0  ;;  %v352_v6 = vld [vmem:[%s323_s14 + $0x8] sm:$0xf]  ;;  %v990_v33 = vld [vmem:[%s1233_s7] sm:$0xff] }
  0x1c   : > { %604 = vmatpush.bf16.xpose.msra.mxu1 %v595_v3  ;;  %623 = vmatpush.bf16.xpose.msra.mxu2 %v614_v4  ;;  %v633_v7 = vsel %vm404_vm0, %v352_v6, 0  ;;  %v346_v8 = vld [vmem:[%s313_s17] sm:$0xf]  ;;  %v347_v9 = vld [vmem:[%s313_s17 + $0x4] sm:$0xf]  ;;  %v991_v41 = vld [vmem:[%s1233_s7 + $0x8] sm:$0xff] }
  0x1d   : > { %642 = vmatpush.bf16.xpose.msra.mxu3 %v633_v7  ;;  %v348_v10 = vld [vmem:[%s313_s17 + $0x8] sm:$0xf]  ;;  %v349_v11 = vld [vmem:[%s313_s17 + $0xc] sm:$0xf]  ;;  %417 = vmatpush.bf16.msra.mxu0 %v993_v31  ;;  %v354_v37 = vld [vmem:[%s1233_s7] sm:$0xf] }
  0x1e   : > { %v726_v38 = vsel %vm724_vm2, %v354_v37, 0  ;;  %v355_v57 = vld [vmem:[%s1233_s7 + $0x4] sm:$0xf]  ;;  %v357_v59 = vld [vmem:[%s1233_s7 + $0xc] sm:$0xf] }
  0x1f   : > { %v745_v58 = vsel %vm724_vm2, %v355_v57, 0  ;;  %v783_v60 = vsel %vm724_vm2, %v357_v59, 0  ;;  %v356_v61 = vld [vmem:[%s1233_s7 + $0x8] sm:$0xf] }
  0x20   : > { %v764_v62 = vsel %vm724_vm2, %v356_v61, 0 }
  0x21   : > { %418 = vmatpush.bf16.msra.mxu0 %v992_v32 }
  0x23   : > { %980 = vmatmul.msk.bf16.vlgmr.msra.gmra.mxu1 %vm404_vm0, %v346_v8  ;;  %981 = vmatmul.msk.bf16.vlgmr.msra.gmra.mxu2 %vm404_vm0, %v347_v9 }
  0x24   : > { %661 = vmatpush.bf16.xpose.msrb.mxu1 %v652_v5  ;;  %982 = vmatmul.msk.bf16.vlgmr.msra.gmra.mxu3 %vm404_vm0, %v348_v10 }
  0x25   : > { %978 = vmatmul.msk.bf16.vlgmr.msra.gmra.mxu0 %vm404_vm0, %v990_v33  ;;  %735 = vmatpush.bf16.msrb.mxu2 %v726_v38 }
  0x26   : > { %754 = vmatpush.bf16.msrb.mxu3 %v745_v58 }
  0x29   : > { %792 = vmatpush.bf16.msra.mxu2 %v783_v60 }
  0x2c   : > { %773 = vmatpush.bf16.msra.mxu1 %v764_v62 }
  0x33   : > { %983 = vmatmul.msk.bf16.vlgmr.msrb.gmra.mxu1 %vm404_vm0, %v349_v11 }
  0x35   : > { %979 = vmatmul.msk.bf16.gmra.mxu0 %vm404_vm0, %v991_v41 }
  0xa0   : > { %v606_v13 = vpop.f32.mrf.mxu1 }
  0xa1   : > { %v668_v14 = vmul.f32 %v667_v12, %v606_v13 }
  0xa2   : > { %v420_v8 = vpop.f32.mrf.mxu0 }
  0xa3   : > { %v673_v15 = vsel %vm672_vm1, %v668_v14, -inf }
  0xa4   : > { %674 = vmax.xlane.f32.xlu0 %v673_v15 }
  0xa6   : > { %v625_v16 = vpop.f32.mrf.mxu2 }
  0xa7   : > { %v669_v17 = vmul.f32 %v667_v12, %v625_v16  ;;  %v644_v19 = vpop.f32.mrf.mxu3  ;;  %v1037_v16 = vld [vmem:[%s1347_s5] ss:$0 sm:$0xff] }
  0xa8   : > { %v608_v18 = vpop.f32.mrf.mxu1  ;;  %v670_v26 = vmul.f32 %v667_v12, %v644_v19 }
  0xa9   : > { %v676_v20 = vsel %vm672_vm1, %v669_v17, -inf  ;;  %v1260_v18 = vadd.f32 %v1037_v16, %v420_v8 }
  0xaa   : > { %v679_v28 = vsel %vm672_vm1, %v670_v26, -inf  ;;  %v422_v13 = vpop.f32.mrf.mxu0 }
  0xac   : > { %677 = vmax.xlane.f32.xlu0 %v676_v20  ;;  %v1264_v20 = vmul.f32 0.70710677, %v1260_v18 }
  0xae   : > { %v627_v21 = vpop.f32.mrf.mxu2 }
  0xaf   : > { %v646_v23 = vpop.f32.mrf.mxu3  ;;  %v1267_v21 = vand.u32 2147483647, %v1264_v20 }
  0xb0   : > { %v663_v22 = vpop.f32.mrf.mxu1 }
  0xb1   : > { %v671_v24 = vmul.f32 %v667_v12, %v663_v22  ;;  %v1269_v22 = vadd.f32 %v1037_v16, %v422_v13  ;;  %v442_v23 = vmul.f32 0.3275911, %v1267_v21 }
  0xb2   : > { %v425_v19 = vpop.f32.mrf.mxu0 }
  0xb3   : > { %v682_v25 = vsel %vm672_vm1, %v671_v24, -inf  ;;  %v1280_v29 = vadd.f32 %v1037_v16, %v425_v19 }
  0xb4   : > { %683 = vmax.xlane.f32.xlu1 %v682_v25 }
  0xb5   : > { %v1287_v32 = vmul.f32 0.70710677, %v1280_v29 }
  0xb8   : > { %v665_v27 = vpop.f32.mrf.mxu1 }
  0xba   : > { %v427_v25 = vpop.f32.mrf.mxu0 }
  0xbc   : > { %680 = vmax.xlane.f32.xlu1 %v679_v28  ;;  %v1278_v28 = vadd.f32 %v1037_v16, %v427_v25 }
  0xbe   : > { %v1284_v31 = vmul.f32 0.70710677, %v1278_v28 }
 0x117   : > { %v675_v34 = vpop.xlane.xlu0 %674 }
 0x118   : > { %v685_v35 = vsub.f32 %v668_v14, %v675_v34  ;;  %v1290_v34 = vand.u32 2147483647, %v1284_v31 }
 0x11a   : > { %v689_v36 = vmul.f32 1.442695, %v685_v35  ;;  %v445_v37 = vmul.f32 0.3275911, %v1290_v34 }
 0x11c   : > { %1038 = vpow2.f32 %v689_v36  ;;  %v1293_v36 = vand.u32 2147483647, %v1287_v32 }
 0x11f   : > { %v678_v39 = vpop.xlane.xlu0 %677 }
 0x120   : > { %v686_v40 = vsub.f32 %v669_v17, %v678_v39  ;;  %v444_v39 = vmul.f32 0.3275911, %v1293_v36 }
 0x122   : > { %v1039_v42 = vpop.eup %1038  ;;  %v691_v43 = vmul.f32 1.442695, %v686_v40  ;;  %v449_v40 = vadd.f32 1.0, %v445_v37 }
 0x123   : > { %v697_v44 = vsel %vm672_vm1, %v1039_v42, 0.0 }
 0x124   : > { %1040 = vpow2.f32 %v691_v43  ;;  %698 = vadd.xlane.f32.xlu2 %v697_v44  ;;  %v448_v43 = vadd.f32 1.0, %v444_v39  ;;  %vm500_vm11 = vweird.f32 %v449_v40  ;;  %v504_v8 = vand.u32 2147483647, %v449_v40 }
 0x126   : > { %vm485_vm13 = vweird.f32 %v448_v43  ;;  %v489_v13 = vand.u32 2147483647, %v448_v43 }
 0x127   : > { %v684_v45 = vpop.xlane.xlu1 %683 }
 0x128   : > { %v688_v46 = vsub.f32 %v671_v24, %v684_v45  ;;  %v1273_v24 = vmul.f32 0.70710677, %v1269_v22  ;;  %vm490_vm2 = vcmp.eq.f32.partialorder %v489_v13, 8.507059e+37 }
 0x12a   : > { %v1041_v47 = vpop.eup %1040  ;;  %v695_v48 = vmul.f32 1.442695, %v688_v46  ;;  %v1276_v27 = vand.u32 2147483647, %v1273_v24 }
 0x12b   : > { %v700_v49 = vsel %vm672_vm1, %v1041_v47, 0.0 }
 0x12c   : > { %1042 = vpow2.f32 %v695_v48  ;;  %701 = vadd.xlane.f32.xlu2 %v700_v49  ;;  %v443_v30 = vmul.f32 0.3275911, %v1276_v27 }
 0x12e   : > { %v447_v33 = vadd.f32 1.0, %v443_v30 }
 0x12f   : > { %v681_v50 = vpop.xlane.xlu1 %680 }
 0x130   : > { %v687_v51 = vsub.f32 %v670_v26, %v681_v50  ;;  %v446_v26 = vadd.f32 1.0, %v442_v23  ;;  %vm470_vm7 = vweird.f32 %v447_v33  ;;  %v476_v57 = vand.u32 2147483648, %v447_v33 }
 0x131   : > { %v474_v61 = vand.u32 2147483647, %v447_v33 }
 0x132   : > { %v1043_v52 = vpop.eup %1042  ;;  %v693_v53 = vmul.f32 1.442695, %v687_v51  ;;  %vm455_vm3 = vweird.f32 %v446_v26  ;;  %v461_v46 = vand.u32 2147483648, %v446_v26  ;;  %v459_v49 = vand.u32 2147483647, %v446_v26 }
 0x133   : > { %v706_v54 = vsel %vm672_vm1, %v1043_v52, 0.0  ;;  %vm475_vm10 = vcmp.eq.f32.partialorder %v474_v61, 8.507059e+37  ;;  %v548_v61 = vsub.f32 0.0, %v1293_v36 }
 0x134   : > { %1044 = vpow2.f32 %v693_v53  ;;  %707 = vadd.xlane.f32.xlu0 %v706_v54  ;;  %vm460_vm6 = vcmp.eq.f32.partialorder %v459_v49, 8.507059e+37 }
 0x13a   : > { %v1045_v55 = vpop.eup %1044 }
 0x13b   : > { %v703_v56 = vsel %vm672_vm1, %v1045_v55, 0.0 }
 0x13c   : > { %704 = vadd.xlane.f32.xlu1 %v703_v56 }
 0x197   : > { %v699_v63 = vpop.xlane.xlu2 %698 }
 0x198   : > { %1046 = vrcp.f32 %v699_v63 }
 0x19e   : > { %v1047_v0 = vpop.eup %1046 }
 0x19f   : > { %v713_v1 = vmul.f32 %v1047_v0, %v1039_v42  ;;  %v702_v2 = vpop.xlane.xlu2 %701  ;;  %v477_v0 = vor.u32 1.1754944e-38, %v476_v57 }
 0x1a0   : > { %1048 = vrcp.f32 %v702_v2 }
 0x1a1   : > { %v717_v3 = vpack.c.bf16 %v713_v1, %v713_v1 }
 0x1a3   : > { %984 = vmatmul.msk.bf16.vlgmr.msrb.gmra.mxu2 %vm672_vm1, %v717_v3 }
 0x1a6   : > { %v1049_v4 = vpop.eup %1048 }
 0x1a7   : > { %v714_v5 = vmul.f32 %v1049_v4, %v1041_v47  ;;  %v708_v6 = vpop.xlane.xlu0 %707 }
 0x1a8   : > { %1050 = vrcp.f32 %v708_v6 }
 0x1a9   : > { %v718_v7 = vpack.c.bf16 %v714_v5, %v714_v5  ;;  %v506_v5 = vand.u32 2147483648, %v449_v40 }
 0x1ab   : > { %985 = vmatmul.msk.bf16.vlgmr.msrb.gmra.mxu3 %vm672_vm1, %v718_v7 }
 0x1ae   : > { %v1051_v9 = vpop.eup %1050 }
 0x1af   : > { %v716_v10 = vmul.f32 %v1051_v9, %v1043_v52  ;;  %v705_v11 = vpop.xlane.xlu1 %704  ;;  %v462_v52 = vor.u32 1.1754944e-38, %v461_v46  ;;  %v491_v9 = vand.u32 2147483648, %v448_v43 }
 0x1b0   : > { %1052 = vrcp.f32 %v705_v11 }
 0x1b1   : > { %v720_v12 = vpack.c.bf16 %v716_v10, %v716_v10  ;;  %1054 = vrcp.f32 %v446_v26  ;;  %v492_v16 = vor.u32 1.1754944e-38, %v491_v9 }
 0x1b2   : > { %1056 = vrcp.f32 %v447_v33 }
 0x1b3   : > { %987 = vmatmul.msk.bf16.vlgmr.msra.gmra.mxu2 %vm672_vm1, %v720_v12  ;;  %1058 = vrcp.f32 %v449_v40 }
 0x1b4   : > { %1060 = vrcp.f32 %v448_v43 }
 0x1b6   : > { %v1053_v14 = vpop.eup %1052 }
 0x1b7   : > { %v715_v15 = vmul.f32 %v1053_v14, %v1045_v55  ;;  %v1055_v35 = vpop.eup %1054  ;;  %v507_v14 = vor.u32 1.1754944e-38, %v506_v5 }
 0x1b8   : > { %v451_v38 = vmul.f32 %v1055_v35, %v446_v26  ;;  %v1057_v42 = vpop.eup %1056  ;;  %vm456_vm4 = vweird.f32 %v1055_v35  ;;  %v546_v26 = vsub.f32 0.0, %v1267_v21 }
 0x1b9   : > { %v719_v17 = vpack.c.bf16 %v715_v15, %v715_v15  ;;  %v466_v45 = vmul.f32 %v1057_v42, %v447_v33  ;;  %v1059_v50 = vpop.eup %1058  ;;  %vm457_vm5 = vmor %vm455_vm3, %vm456_vm4  ;;  %vm471_vm8 = vweird.f32 %v1057_v42  ;;  %vm570_vm3 = vcmp.ge.f32.partialorder %v1264_v20, 0.0 }
 0x1ba   : > { %v452_v41 = vsub.f32 1.0, %v451_v38  ;;  %v1061_v51 = vpop.eup %1060  ;;  %v496_v54 = vmul.f32 %v1059_v50, %v449_v40  ;;  %vm472_vm9 = vmor %vm470_vm7, %vm471_vm8  ;;  %vm501_vm12 = vweird.f32 %v1059_v50  ;;  %v550_v39 = vmul.f32 %v546_v26, %v1267_v21 }
 0x1bb   : > { %986 = vmatmul.msk.bf16.vlgmr.msra.gmra.mxu1 %vm672_vm1, %v719_v17  ;;  %v467_v47 = vsub.f32 1.0, %v466_v45  ;;  %v481_v56 = vmul.f32 %v1061_v51, %v448_v43  ;;  %vm486_vm14 = vweird.f32 %v1061_v51  ;;  %vm502_vm15 = vmor %vm500_vm11, %vm501_vm12  ;;  %vm505_vm1 = vcmp.eq.f32.partialorder %v504_v8, 8.507059e+37 }
 0x1bc   : > { %v453_v44 = vmul.f32 %v1055_v35, %v452_v41  ;;  %v497_v59 = vsub.f32 1.0, %v496_v54  ;;  %vm487_vm0 = vmor %vm485_vm13, %vm486_vm14  ;;  %v547_v45 = vsub.f32 0.0, %v1276_v27  ;;  %v549_v21 = vsub.f32 0.0, %v1290_v34 }
 0x1bd   : > { %v468_v53 = vmul.f32 %v1057_v42, %v467_v47  ;;  %v482_v62 = vsub.f32 1.0, %v481_v56  ;;  %vm571_vm4 = vcmp.ge.f32.partialorder %v1273_v24, 0.0  ;;  %vm572_vm7 = vcmp.ge.f32.partialorder %v1287_v32, 0.0 }
 0x1be   : > { %v454_v48 = vadd.f32 %v1055_v35, %v453_v44  ;;  %v498_v1 = vmul.f32 %v1059_v50, %v497_v59  ;;  %v554_v44 = vmul.f32 1.442695, %v550_v39 }
 0x1bf   : > { %v469_v60 = vadd.f32 %v1057_v42, %v468_v53  ;;  %v483_v3 = vmul.f32 %v1061_v51, %v482_v62 }
 0x1c0   : > { %v458_v55 = vsel %vm457_vm5, %v1055_v35, %v454_v48  ;;  %v499_v7 = vadd.f32 %v1059_v50, %v498_v1  ;;  %1062 = vpow2.f32 %v554_v44  ;;  %vm806_vm5 = vcmask 519168  }
 0x1c1   : > { %v463_v58 = vsel %vm460_vm6, %v462_v52, %v458_v55  ;;  %v473_v2 = vsel %vm472_vm9, %v1057_v42, %v469_v60  ;;  %v484_v12 = vadd.f32 %v1061_v51, %v483_v3  ;;  %vm573_vm6 = vcmp.ge.f32.partialorder %v1284_v31, 0.0 }
 0x1c2   : > { %v510_v63 = vmul.f32 1.0614054, %v463_v58  ;;  %v478_v6 = vsel %vm475_vm10, %v477_v0, %v473_v2  ;;  %v503_v15 = vsel %vm502_vm15, %v1059_v50, %v499_v7  ;;  %v551_v50 = vmul.f32 %v547_v45, %v1276_v27 }
 0x1c3   : > { %v511_v11 = vmul.f32 1.0614054, %v478_v6  ;;  %v488_v23 = vsel %vm487_vm0, %v1061_v51, %v484_v12  ;;  %v508_v25 = vsel %vm505_vm1, %v507_v14, %v503_v15  ;;  %v552_v2 = vmul.f32 %v548_v61, %v1293_v36 }
 0x1c4   : > { %v514_v4 = vadd.f32 -1.4531521, %v510_v63  ;;  %v493_v30 = vsel %vm490_vm2, %v492_v16, %v488_v23  ;;  %v513_v37 = vmul.f32 1.0614054, %v508_v25  ;;  %v556_v55 = vmul.f32 1.442695, %v551_v50 }
 0x1c5   : > { %v515_v19 = vadd.f32 -1.4531521, %v511_v11  ;;  %v512_v38 = vmul.f32 1.0614054, %v493_v30  ;;  %v553_v63 = vmul.f32 %v549_v21, %v1290_v34  ;;  %v558_v9 = vmul.f32 1.442695, %v552_v2 }
 0x1c6   : > { %v518_v10 = vmul.f32 %v514_v4, %v463_v58  ;;  %v517_v42 = vadd.f32 -1.4531521, %v513_v37  ;;  %v1063_v60 = vpop.eup %1062  ;;  %1064 = vpow2.f32 %v556_v55 }
 0x1c7   : > { %v519_v35 = vmul.f32 %v515_v19, %v478_v6  ;;  %v516_v43 = vadd.f32 -1.4531521, %v512_v38  ;;  %v560_v4 = vmul.f32 1.442695, %v553_v63 }
 0x1c8   : > { %v522_v17 = vadd.f32 1.4214138, %v518_v10  ;;  %v521_v48 = vmul.f32 %v517_v42, %v508_v25 }
 0x1c9   : > { %v523_v41 = vadd.f32 1.4214138, %v519_v35  ;;  %v520_v49 = vmul.f32 %v516_v43, %v493_v30  ;;  %1066 = vpow2.f32 %v560_v4 }
 0x1ca   : > { %v526_v33 = vmul.f32 %v522_v17, %v463_v58  ;;  %v525_v53 = vadd.f32 1.4214138, %v521_v48  ;;  %1068 = vpow2.f32 %v558_v9 }
 0x1cb   : > { %v527_v47 = vmul.f32 %v523_v41, %v478_v6  ;;  %v524_v54 = vadd.f32 1.4214138, %v520_v49 }
 0x1cc   : > { %v530_v40 = vadd.f32 -0.28449672, %v526_v33  ;;  %v529_v59 = vmul.f32 %v525_v53, %v508_v25 }
 0x1cd   : > { %v531_v52 = vadd.f32 -0.28449672, %v527_v47  ;;  %v528_v62 = vmul.f32 %v524_v54, %v493_v30 }
 0x1ce   : > { %v534_v46 = vmul.f32 %v530_v40, %v463_v58  ;;  %v533_v27 = vadd.f32 -0.28449672, %v529_v59 }
 0x1cf   : > { %v535_v57 = vmul.f32 %v531_v52, %v478_v6  ;;  %v532_v3 = vadd.f32 -0.28449672, %v528_v62 }
 0x1d0   : > { %v538_v51 = vadd.f32 0.2548296, %v534_v46  ;;  %v537_v8 = vmul.f32 %v533_v27, %v508_v25 }
 0x1d1   : > { %v539_v1 = vadd.f32 0.2548296, %v535_v57  ;;  %v536_v10 = vmul.f32 %v532_v3, %v493_v30 }
 0x1d2   : > { %v542_v56 = vmul.f32 %v538_v51, %v463_v58  ;;  %v1065_v58 = vpop.eup %1064  ;;  %v541_v13 = vadd.f32 0.2548296, %v537_v8  ;;  %v432_v51 = vmul.f32 0.5, %v1280_v29 }
 0x1d3   : > { %v543_v7 = vmul.f32 %v539_v1, %v478_v6  ;;  %v540_v34 = vadd.f32 0.2548296, %v536_v10  ;;  %v1067_v16 = vpop.eup %1066  ;;  %v430_v6 = vmul.f32 0.5, %v1260_v18  ;;  %v431_v18 = vmul.f32 0.5, %v1269_v22 }
 0x1d4   : > { %v562_v0 = vmul.f32 %v1063_v60, %v542_v56  ;;  %v545_v36 = vmul.f32 %v541_v13, %v508_v25  ;;  %v1069_v19 = vpop.eup %1068  ;;  %v433_v22 = vmul.f32 0.5, %v1278_v28 }
 0x1d5   : > { %v563_v12 = vmul.f32 %v1065_v58, %v543_v7  ;;  %v544_v17 = vmul.f32 %v540_v34, %v493_v30 }
 0x1d6   : > { %v566_v5 = vsub.f32 1.0, %v562_v0  ;;  %v565_v33 = vmul.f32 %v1067_v16, %v545_v36 }
 0x1d7   : > { %v567_v15 = vsub.f32 1.0, %v563_v12  ;;  %v564_v35 = vmul.f32 %v1069_v19, %v544_v17 }
 0x1d8   : > { %v574_v11 = vsub.f32 0.0, %v566_v5  ;;  %v569_v39 = vsub.f32 1.0, %v565_v33 }
 0x1d9   : > { %v575_v26 = vsub.f32 0.0, %v567_v15  ;;  %v568_v25 = vsub.f32 1.0, %v564_v35 }
 0x1da   : > { %v578_v14 = vsel %vm570_vm3, %v566_v5, %v574_v11  ;;  %v577_v24 = vsub.f32 0.0, %v569_v39 }
 0x1db   : > { %v582_v23 = vadd.f32 1.0, %v578_v14  ;;  %v579_v20 = vsel %vm571_vm4, %v567_v15, %v575_v26  ;;  %v576_v42 = vsub.f32 0.0, %v568_v25 }
 0x1dc   : > { %v583_v41 = vadd.f32 1.0, %v579_v20  ;;  %v581_v46 = vsel %vm573_vm6, %v569_v39, %v577_v24 }
 0x1dd   : > { %v586_v37 = vmul.f32 %v582_v23, %v430_v6  ;;  %v580_v48 = vsel %vm572_vm7, %v568_v25, %v576_v42  ;;  %v585_v50 = vadd.f32 1.0, %v581_v46 }
 0x1de   : > { %v587_v43 = vmul.f32 %v583_v41, %v431_v18  ;;  %v584_v31 = vadd.f32 1.0, %v580_v48 }
 0x1df   : > { %v589_v52 = vmul.f32 %v585_v50, %v433_v22 }
 0x1e0   : > { %v588_v55 = vmul.f32 %v584_v31, %v432_v51 }
 0x226   : > { %v737_v38 = vpop.f32.mrf.mxu2 }
 0x227   : > { %v798_v40 = vmul.f32 %v737_v38, %v586_v37 }
 0x229   : > { %v802_v30 = vpack.c.bf16 %v798_v40, %v798_v40 }
 0x22b   : > { %807 = vst.msk [vmem:[%s1312_s15] sm:$0xf] %vm806_vm5, %v802_v30 }
 0x22e   : > { %v739_v44 = vpop.f32.mrf.mxu2  ;;  %v756_v45 = vpop.f32.mrf.mxu3 }
 0x22f   : > { %v799_v47 = vmul.f32 %v756_v45, %v587_v43 }
 0x231   : > { %v803_v49 = vpack.c.bf16 %v799_v47, %v799_v47 }
 0x233   : > { %808 = vst.msk [vmem:[%s1312_s15 + $0x4] sm:$0xf] %vm806_vm5, %v803_v49 }
 0x236   : > { %v758_v53 = vpop.f32.mrf.mxu3  ;;  %v794_v32 = vpop.f32.mrf.mxu2 }
 0x237   : > { %v801_v54 = vmul.f32 %v794_v32, %v589_v52 }
 0x238   : > { %v775_v21 = vpop.f32.mrf.mxu1 }
 0x239   : > { %v805_v56 = vpack.c.bf16 %v801_v54, %v801_v54  ;;  %v800_v57 = vmul.f32 %v775_v21, %v588_v55 }
 0x23b   : > { %810 = vst.msk [vmem:[%s1312_s15 + $0xc] sm:$0xf] %vm806_vm5, %v805_v56  ;;  %v804_v59 = vpack.c.bf16 %v800_v57, %v800_v57 }
 0x23d   : > { %809 = vst.msk [vmem:[%s1312_s15 + $0x8] sm:$0xf] %vm806_vm5, %v804_v59 }
 0x23e   : > { %v796_v28 = vpop.f32.mrf.mxu2 }
 0x240   : > { %v777_v60 = vpop.f32.mrf.mxu1 }
 0x241 PF: > { %s24_s29 = sadd.s32 1, %s1122_s29   ;;  %s1349_s25 = smov %s1114_s27 }
 0x242   : > { %p21_p7 = scmp.ge.s32.totalorder %s24_s29, 6   ;;  %s1350_s26 = smov %s1118_s28 }
 0x243   : > { %s1351_s27 = smov %s1354_s0  ;;  %s1352_s28 = smov %s1358_s30 }
 0x244   :  { %23 = sbr.rel (!%p21_p7) target bundleno = 9 (0x9), region = 76 }

// kernel: freqlc_block_forward.10
= control target key start
LH: loop header
LB: loop body
LE: loop exit
PB: predicated region body
PF: predicated region fallthrough
CT: control target
= control target key end

     0   :  { %s710_s12 = smov 0   ;;  %s856_s0 = inlined_call_operand.vmem [shape: bf16[512,16], index: 0, kind: input, shape index: {}]   ;;  %s857_s1 = inlined_call_operand.vmem [shape: bf16[16,16], index: 1, kind: input, shape index: {}]   ;;  %s858_s2 = inlined_call_operand.vmem [shape: f32[1,16], index: 2, kind: input, shape index: {}]   ;;  %s859_s3 = inlined_call_operand.vmem [shape: bf16[512,16], index: 3, kind: output, shape index: {}]  }
   0x1 LB: > { %s558_s13 = sadd.s32 4294967295, %s688_s12   ;;  %p562_p0 = scmp.ge.s32.totalorder %s688_s12, 1  ;;  %s688_s12 = sphi %s710_s12, %s13_s12  }
   0x2   : > { %p138_p1 = scmp.lt.s32.totalorder %s688_s12, 3 }
   0x4   : > { %p139_p2 = pnand %p562_p0, %p138_p1 }
   0x5   : > { %s563_s16 = sshll.u32 (!%p139_p2), %s558_s13, 5 }
   0x6   : > { %142 = sbr.rel (%p139_p2) target bundleno = 211 (0xd3), region = 32  ;;  %p163_p3 = scmp.lt.s32.totalorder (!%p139_p2), %s563_s16, 63 }
   0xb   : > { %v669_v0 = vld [vmem:[%s857_s1] sm:$0xff]  ;;  %s861_s16 = smov (!%p163_p3, %s563_s16), 63  ;;  %vm299_vm0 = vcmask 130048   ;;  %vm469_vm1 = vcmask 125952  }
   0xc   : > { %355 = vmatpush.bf16.msra.mxu0 %v669_v0  ;;  %670 = vmatpush.bf16.msra.mxu1 %v669_v0  ;;  %s564_s17 = sshll.u32 %s861_s16, 2  ;;  %v748_v17 = vld [vmem:[%s858_s2] ss:$0 sm:$0xff] }
   0xd   : > { %671 = vmatpush.bf16.msra.mxu2 %v669_v0  ;;  %672 = vmatpush.bf16.msra.mxu3 %v669_v0  ;;  %s166_s20 = scalar_lea.vmem %s856_s0, %s564_s17  ;;  %s757_s25 = scalar_lea.vmem %s859_s3, %s564_s17 }
   0xe   : > { %v653_v1 = vld [vmem:[%s166_s20] sm:$0xff]  ;;  %v654_v5 = vld [vmem:[%s166_s20 + $0x8] sm:$0xff]  ;;  %v655_v9 = vld [vmem:[%s166_s20 + $0x10] sm:$0xff] }
   0xf   : > { %v657_v2 = vld [vmem:[%s166_s20 + $0x20] sm:$0xff]  ;;  %635 = vmatmul.msk.bf16.vlgmr.msra.gmra.mxu0 %vm299_vm0, %v653_v1  ;;  %v658_v6 = vld [vmem:[%s166_s20 + $0x28] sm:$0xff]  ;;  %v659_v10 = vld [vmem:[%s166_s20 + $0x30] sm:$0xff] }
  0x10   : > { %v661_v3 = vld [vmem:[%s166_s20 + $0x40] sm:$0xff]  ;;  %639 = vmatmul.msk.bf16.vlgmr.msra.gmra.mxu1 %vm299_vm0, %v657_v2  ;;  %v662_v7 = vld [vmem:[%s166_s20 + $0x48] sm:$0xff]  ;;  %v663_v11 = vld [vmem:[%s166_s20 + $0x50] sm:$0xff] }
  0x11   : > { %v665_v4 = vld [vmem:[%s166_s20 + $0x60] sm:$0xff]  ;;  %643 = vmatmul.msk.bf16.vlgmr.msra.gmra.mxu2 %vm299_vm0, %v661_v3  ;;  %v666_v8 = vld [vmem:[%s166_s20 + $0x68] sm:$0xff]  ;;  %v667_v12 = vld [vmem:[%s166_s20 + $0x70] sm:$0xff] }
  0x12   : > { %647 = vmatmul.msk.bf16.vlgmr.msra.gmra.mxu3 %vm299_vm0, %v665_v4  ;;  %v656_v13 = vld [vmem:[%s166_s20 + $0x18] sm:$0xff] }
  0x13   : > { %v660_v14 = vld [vmem:[%s166_s20 + $0x38] sm:$0xff] }
  0x14   : > { %v664_v15 = vld [vmem:[%s166_s20 + $0x58] sm:$0xff] }
  0x15   : > { %v668_v16 = vld [vmem:[%s166_s20 + $0x78] sm:$0xff] }
  0x1f   : > { %636 = vmatmul.msk.bf16.gmra.mxu0 %vm299_vm0, %v654_v5 }
  0x20   : > { %640 = vmatmul.msk.bf16.gmra.mxu1 %vm299_vm0, %v658_v6 }
  0x21   : > { %644 = vmatmul.msk.bf16.gmra.mxu2 %vm299_vm0, %v662_v7 }
  0x22   : > { %648 = vmatmul.msk.bf16.gmra.mxu3 %vm299_vm0, %v666_v8 }
  0x2f   : > { %637 = vmatmul.msk.bf16.gmra.mxu0 %vm299_vm0, %v655_v9 }
  0x30   : > { %641 = vmatmul.msk.bf16.gmra.mxu1 %vm299_vm0, %v659_v10 }
  0x31   : > { %645 = vmatmul.msk.bf16.gmra.mxu2 %vm299_vm0, %v663_v11 }
  0x32   : > { %649 = vmatmul.msk.bf16.gmra.mxu3 %vm299_vm0, %v667_v12 }
  0x3f   : > { %638 = vmatmul.msk.bf16.gmra.mxu0 %vm299_vm0, %v656_v13 }
  0x40   : > { %642 = vmatmul.msk.bf16.gmra.mxu1 %vm299_vm0, %v660_v14 }
  0x41   : > { %646 = vmatmul.msk.bf16.gmra.mxu2 %vm299_vm0, %v664_v15 }
  0x42   : > { %650 = vmatmul.msk.bf16.gmra.mxu3 %vm299_vm0, %v668_v16 }
  0x8c   : > { %v357_v18 = vpop.f32.mrf.mxu0 }
  0x8d   : > { %v377_v19 = vpop.f32.mrf.mxu1  ;;  %v358_v20 = vadd.f32 %v748_v17, %v357_v18 }
  0x8e   : > { %v378_v21 = vadd.f32 %v748_v17, %v377_v19 }
  0x8f   : > { %v437_v22 = vpack.c.bf16 %v358_v20, %v358_v20 }
  0x90   : > { %v445_v23 = vpack.c.bf16 %v378_v21, %v378_v21 }
  0x91   : > { %470 = vst.msk [vmem:[%s757_s25] sm:$0xf] %vm469_vm1, %v437_v22 }
  0x92   : > { %478 = vst.msk [vmem:[%s757_s25 + $0x20] sm:$0xf] %vm469_vm1, %v445_v23 }
  0x94   : > { %v397_v24 = vpop.f32.mrf.mxu2  ;;  %v359_v28 = vpop.f32.mrf.mxu0 }
  0x95   : > { %v417_v25 = vpop.f32.mrf.mxu3  ;;  %v398_v26 = vadd.f32 %v748_v17, %v397_v24  ;;  %v379_v29 = vpop.f32.mrf.mxu1  ;;  %v360_v30 = vadd.f32 %v748_v17, %v359_v28 }
  0x96   : > { %v418_v27 = vadd.f32 %v748_v17, %v417_v25  ;;  %v380_v31 = vadd.f32 %v748_v17, %v379_v29 }
  0x97   : > { %v453_v32 = vpack.c.bf16 %v398_v26, %v398_v26  ;;  %v438_v34 = vpack.c.bf16 %v360_v30, %v360_v30 }
  0x98   : > { %v461_v33 = vpack.c.bf16 %v418_v27, %v418_v27  ;;  %v446_v35 = vpack.c.bf16 %v380_v31, %v380_v31 }
  0x99   : > { %486 = vst.msk [vmem:[%s757_s25 + $0x40] sm:$0xf] %vm469_vm1, %v453_v32 }
  0x9a   : > { %494 = vst.msk [vmem:[%s757_s25 + $0x60] sm:$0xf] %vm469_vm1, %v461_v33 }
  0x9b   : > { %471 = vst.msk [vmem:[%s757_s25 + $0x4] sm:$0xf] %vm469_vm1, %v438_v34 }
  0x9c   : > { %479 = vst.msk [vmem:[%s757_s25 + $0x24] sm:$0xf] %vm469_vm1, %v446_v35  ;;  %v399_v36 = vpop.f32.mrf.mxu2  ;;  %v362_v40 = vpop.f32.mrf.mxu0 }
  0x9d   : > { %v419_v37 = vpop.f32.mrf.mxu3  ;;  %v400_v38 = vadd.f32 %v748_v17, %v399_v36  ;;  %v382_v41 = vpop.f32.mrf.mxu1  ;;  %v363_v42 = vadd.f32 %v748_v17, %v362_v40 }
  0x9e   : > { %v420_v39 = vadd.f32 %v748_v17, %v419_v37  ;;  %v383_v43 = vadd.f32 %v748_v17, %v382_v41 }
  0x9f   : > { %v454_v44 = vpack.c.bf16 %v400_v38, %v400_v38  ;;  %v439_v46 = vpack.c.bf16 %v363_v42, %v363_v42 }
  0xa0   : > { %v462_v45 = vpack.c.bf16 %v420_v39, %v420_v39  ;;  %v447_v47 = vpack.c.bf16 %v383_v43, %v383_v43 }
  0xa1   : > { %487 = vst.msk [vmem:[%s757_s25 + $0x44] sm:$0xf] %vm469_vm1, %v454_v44 }
  0xa2   : > { %495 = vst.msk [vmem:[%s757_s25 + $0x64] sm:$0xf] %vm469_vm1, %v462_v45 }
  0xa3   : > { %472 = vst.msk [vmem:[%s757_s25 + $0x8] sm:$0xf] %vm469_vm1, %v439_v46 }
  0xa4   : > { %480 = vst.msk [vmem:[%s757_s25 + $0x28] sm:$0xf] %vm469_vm1, %v447_v47  ;;  %v402_v48 = vpop.f32.mrf.mxu2  ;;  %v364_v52 = vpop.f32.mrf.mxu0 }
  0xa5   : > { %v422_v49 = vpop.f32.mrf.mxu3  ;;  %v403_v50 = vadd.f32 %v748_v17, %v402_v48  ;;  %v384_v53 = vpop.f32.mrf.mxu1  ;;  %v365_v54 = vadd.f32 %v748_v17, %v364_v52 }
  0xa6   : > { %v423_v51 = vadd.f32 %v748_v17, %v422_v49  ;;  %v385_v55 = vadd.f32 %v748_v17, %v384_v53 }
  0xa7   : > { %v455_v56 = vpack.c.bf16 %v403_v50, %v403_v50  ;;  %v440_v58 = vpack.c.bf16 %v365_v54, %v365_v54 }
  0xa8   : > { %v463_v57 = vpack.c.bf16 %v423_v51, %v423_v51  ;;  %v448_v59 = vpack.c.bf16 %v385_v55, %v385_v55 }
  0xa9   : > { %488 = vst.msk [vmem:[%s757_s25 + $0x48] sm:$0xf] %vm469_vm1, %v455_v56 }
  0xaa   : > { %496 = vst.msk [vmem:[%s757_s25 + $0x68] sm:$0xf] %vm469_vm1, %v463_v57 }
  0xab   : > { %473 = vst.msk [vmem:[%s757_s25 + $0xc] sm:$0xf] %vm469_vm1, %v440_v58 }
  0xac   : > { %481 = vst.msk [vmem:[%s757_s25 + $0x2c] sm:$0xf] %vm469_vm1, %v448_v59  ;;  %v404_v60 = vpop.f32.mrf.mxu2  ;;  %v367_v0 = vpop.f32.mrf.mxu0 }
  0xad   : > { %v424_v61 = vpop.f32.mrf.mxu3  ;;  %v405_v62 = vadd.f32 %v748_v17, %v404_v60  ;;  %v387_v1 = vpop.f32.mrf.mxu1  ;;  %v368_v2 = vadd.f32 %v748_v17, %v367_v0 }
  0xae   : > { %v425_v63 = vadd.f32 %v748_v17, %v424_v61  ;;  %v388_v3 = vadd.f32 %v748_v17, %v387_v1 }
  0xaf   : > { %v456_v4 = vpack.c.bf16 %v405_v62, %v405_v62  ;;  %v441_v6 = vpack.c.bf16 %v368_v2, %v368_v2 }
  0xb0   : > { %v464_v5 = vpack.c.bf16 %v425_v63, %v425_v63  ;;  %v449_v7 = vpack.c.bf16 %v388_v3, %v388_v3 }
  0xb1   : > { %489 = vst.msk [vmem:[%s757_s25 + $0x4c] sm:$0xf] %vm469_vm1, %v456_v4 }
  0xb2   : > { %497 = vst.msk [vmem:[%s757_s25 + $0x6c] sm:$0xf] %vm469_vm1, %v464_v5 }
  0xb3   : > { %474 = vst.msk [vmem:[%s757_s25 + $0x10] sm:$0xf] %vm469_vm1, %v441_v6 }
  0xb4   : > { %482 = vst.msk [vmem:[%s757_s25 + $0x30] sm:$0xf] %vm469_vm1, %v449_v7  ;;  %v407_v8 = vpop.f32.mrf.mxu2  ;;  %v369_v12 = vpop.f32.mrf.mxu0 }
  0xb5   : > { %v427_v9 = vpop.f32.mrf.mxu3  ;;  %v408_v10 = vadd.f32 %v748_v17, %v407_v8  ;;  %v389_v13 = vpop.f32.mrf.mxu1  ;;  %v370_v14 = vadd.f32 %v748_v17, %v369_v12 }
  0xb6   : > { %v428_v11 = vadd.f32 %v748_v17, %v427_v9  ;;  %v390_v15 = vadd.f32 %v748_v17, %v389_v13 }
  0xb7   : > { %v457_v16 = vpack.c.bf16 %v408_v10, %v408_v10  ;;  %v442_v19 = vpack.c.bf16 %v370_v14, %v370_v14 }
  0xb8   : > { %v465_v18 = vpack.c.bf16 %v428_v11, %v428_v11  ;;  %v450_v20 = vpack.c.bf16 %v390_v15, %v390_v15 }
  0xb9   : > { %490 = vst.msk [vmem:[%s757_s25 + $0x50] sm:$0xf] %vm469_vm1, %v457_v16 }
  0xba   : > { %498 = vst.msk [vmem:[%s757_s25 + $0x70] sm:$0xf] %vm469_vm1, %v465_v18 }
  0xbb   : > { %475 = vst.msk [vmem:[%s757_s25 + $0x14] sm:$0xf] %vm469_vm1, %v442_v19 }
  0xbc   : > { %483 = vst.msk [vmem:[%s757_s25 + $0x34] sm:$0xf] %vm469_vm1, %v450_v20  ;;  %v409_v21 = vpop.f32.mrf.mxu2  ;;  %v372_v25 = vpop.f32.mrf.mxu0 }
  0xbd   : > { %v429_v22 = vpop.f32.mrf.mxu3  ;;  %v410_v23 = vadd.f32 %v748_v17, %v409_v21  ;;  %v392_v26 = vpop.f32.mrf.mxu1  ;;  %v373_v27 = vadd.f32 %v748_v17, %v372_v25 }
  0xbe   : > { %v430_v24 = vadd.f32 %v748_v17, %v429_v22  ;;  %v393_v28 = vadd.f32 %v748_v17, %v392_v26 }
  0xbf   : > { %v458_v29 = vpack.c.bf16 %v410_v23, %v410_v23  ;;  %v443_v31 = vpack.c.bf16 %v373_v27, %v373_v27 }
  0xc0   : > { %v466_v30 = vpack.c.bf16 %v430_v24, %v430_v24  ;;  %v451_v32 = vpack.c.bf16 %v393_v28, %v393_v28 }
  0xc1   : > { %491 = vst.msk [vmem:[%s757_s25 + $0x54] sm:$0xf] %vm469_vm1, %v458_v29 }
  0xc2   : > { %499 = vst.msk [vmem:[%s757_s25 + $0x74] sm:$0xf] %vm469_vm1, %v466_v30 }
  0xc3   : > { %476 = vst.msk [vmem:[%s757_s25 + $0x18] sm:$0xf] %vm469_vm1, %v443_v31 }
  0xc4   : > { %484 = vst.msk [vmem:[%s757_s25 + $0x38] sm:$0xf] %vm469_vm1, %v451_v32  ;;  %v412_v33 = vpop.f32.mrf.mxu2  ;;  %v374_v37 = vpop.f32.mrf.mxu0 }
  0xc5   : > { %v432_v34 = vpop.f32.mrf.mxu3  ;;  %v413_v35 = vadd.f32 %v748_v17, %v412_v33  ;;  %v394_v38 = vpop.f32.mrf.mxu1  ;;  %v375_v39 = vadd.f32 %v748_v17, %v374_v37 }
  0xc6   : > { %v433_v36 = vadd.f32 %v748_v17, %v432_v34  ;;  %v395_v40 = vadd.f32 %v748_v17, %v394_v38 }
  0xc7   : > { %v459_v41 = vpack.c.bf16 %v413_v35, %v413_v35  ;;  %v444_v43 = vpack.c.bf16 %v375_v39, %v375_v39 }
  0xc8   : > { %v467_v42 = vpack.c.bf16 %v433_v36, %v433_v36  ;;  %v452_v44 = vpack.c.bf16 %v395_v40, %v395_v40 }
  0xc9   : > { %492 = vst.msk [vmem:[%s757_s25 + $0x58] sm:$0xf] %vm469_vm1, %v459_v41 }
  0xca   : > { %500 = vst.msk [vmem:[%s757_s25 + $0x78] sm:$0xf] %vm469_vm1, %v467_v42 }
  0xcb   : > { %477 = vst.msk [vmem:[%s757_s25 + $0x1c] sm:$0xf] %vm469_vm1, %v444_v43 }
  0xcc   : > { %485 = vst.msk [vmem:[%s757_s25 + $0x3c] sm:$0xf] %vm469_vm1, %v452_v44  ;;  %v414_v45 = vpop.f32.mrf.mxu2 }
  0xcd   : > { %v434_v46 = vpop.f32.mrf.mxu3  ;;  %v415_v47 = vadd.f32 %v748_v17, %v414_v45 }
  0xce   : > { %v435_v48 = vadd.f32 %v748_v17, %v434_v46 }
  0xcf   : > { %v460_v49 = vpack.c.bf16 %v415_v47, %v415_v47 }
  0xd0   : > { %v468_v50 = vpack.c.bf16 %v435_v48, %v435_v48 }
  0xd1   : > { %493 = vst.msk [vmem:[%s757_s25 + $0x5c] sm:$0xf] %vm469_vm1, %v460_v49 }
  0xd2   : > { %501 = vst.msk [vmem:[%s757_s25 + $0x7c] sm:$0xf] %vm469_vm1, %v468_v50 }
  0xd3 PF: > { %s13_s12 = sadd.s32 1, %s688_s12  }
  0xd4   : > { %p10_p4 = scmp.ge.s32.totalorder %s13_s12, 4  }
  0xd6   :  { %12 = sbr.rel (!%p10_p4) target bundleno = 1 (0x1), region = 62 }

// kernel: freqlc_block_forward.11
= control target key start
LH: loop header
LB: loop body
LE: loop exit
PB: predicated region body
PF: predicated region fallthrough
CT: control target
= control target key end

     0   :  { %9 = vsyncpa [#allocation3], 0  ;;  %s1798_s0 = inlined_call_operand.vmem [shape: bf16[32,16,16], index: 0, kind: input, shape index: {}]   ;;  %s1799_s1 = inlined_call_operand.vmem [shape: bf16[32,16,16], index: 1, kind: input, shape index: {}]   ;;  %s1800_s2 = inlined_call_operand.vmem [shape: bf16[16,16], index: 2, kind: input, shape index: {}]   ;;  %s1801_s3 = inlined_call_operand.vmem [shape: bf16[16,16], index: 3, kind: input, shape index: {}]   ;;  %s1802_s4 = inlined_call_operand.hbm [shape: f32[32,16,16], index: 4, kind: output, shape index: {}]  }
   0x1   :  { %11 = vsyncpa [#allocation3 + $0x1], 0  ;;  %s1532_s15 = smov 0   ;;  %s1534_s16 = smov 0  }
   0x2   :  { %s1536_s17 = smov 0   ;;  %s1538_s18 = smov 0  }
   0x3 LB: > { %s1553_s19 = sadd.s32 4294967295, %s1503_s18   ;;  %s1146_s20 = sadd.s32 4294967294, %s1503_s18   ;;  %s1503_s18 = sphi %s1538_s18, %s1808_s18   ;;  %s1499_s17 = sphi %s1536_s17, %s1807_s17   ;;  %s1495_s16 = sphi %s1534_s16, %s1806_s16   ;;  %s1491_s15 = sphi %s1532_s15, %s1805_s15  }
   0x4   : > { %s1557_s21 = sadd.s32 1, %s1503_s18   ;;  %s118_s22 = sadd.s32 1, %s1499_s17 }
   0x5   : > { %s115_s23 = ssub.s32 %s1503_s18, %s1557_s21  ;;  %p128_p0 = scmp.ne.s32.totalorder %s1499_s17, %s1495_s16 }
   0x6   : > { %p116_p1 = scmp.eq.s32.totalorder %s115_s23, 0  ;;  %p129_p2 = scmp.eq.s32.totalorder %s1553_s19, 1 }
   0x7   : > { %p134_p3 = scmp.ne.s32.totalorder %s1495_s16, %s1491_s15  ;;  %p135_p4 = scmp.eq.s32.totalorder %s1146_s20, 1 }
   0x8   : > { %s1568_s24 = scalar_select %p116_p1, %s1499_s17, %s118_s22  }
   0x9   : > { %p1570_p5 = por %p129_p2, %p128_p0  ;;  %p1574_p6 = por %p135_p4, %p134_p3 }
   0xa   : > { %p1149_p7 = scmp.ge.s32.totalorder %s1503_s18, 1  ;;  %p179_p8 = scmp.lt.s32.totalorder %s1503_s18, 3 }
   0xc   : > { %p180_p9 = pnand %p1149_p7, %p179_p8 }
   0xd   : > { %s1151_s29 = sshll.u32 (!%p180_p9), %s1553_s19, 4  ;;  %s209_s13 = sand.u32 (!%p180_p9), 1, %s1495_s16  }
   0xe   : > { %183 = sbr.rel (%p180_p9) target bundleno = 465 (0x1d1), region = 36  ;;  %p213_p10 = scmp.lt.s32.totalorder (!%p180_p9), %s1151_s29, 31 }
   0xf   : > { %s1150_s14 = sshll.u32 (!%p180_p9), %s209_s13, 8  ;;  %s1238_s22 = sshll.u32 (!%p180_p9), %s1553_s19, 8 }
  0x10   : > { %s1698_s20 = scalar_lea.vmem (!%p180_p9), [#allocation2], %s1150_s14  ;;  %s1068_s28 = scalar_lea.hbm (!%p180_p9), %s1802_s4, %s1238_s22 }
  0x11   : > { %s1056_s19 = scalar_lea.sflag (!%p180_p9), [#allocation3], %s209_s13  ;;  %s1461_s9 = scalar_lea.hbm (!%p180_p9), %s1802_s4, 512 }
  0x13   : > { %v1235_v0 = vld [vmem:[%s1800_s2] sm:$0xff]  ;;  %s1810_s29 = smov (!%p213_p10, %s1151_s29), 31  ;;  %vm508_vm0 = vcmask 130048  }
  0x14   : > { %564 = vmatpush.bf16.msra.mxu0 %v1235_v0  ;;  %1398 = vmatpush.bf16.msra.mxu2 %v1235_v0  ;;  %s1233_s30 = sshll.u32 %s1810_s29, 3  ;;  %s1069_s29 = sshll.u32 %s1698_s20, 4  ;;  %s1070_s29 = int_to_ptr.vmem [resolvable:$true] %s1069_s29 }
  0x15   : > { %1397 = vmatpush.bf16.msra.mxu1 %v1235_v0  ;;  %1399 = vmatpush.bf16.msra.mxu3 %v1235_v0  ;;  %s1587_s7 = scalar_lea.vmem %s1798_s0, %s1233_s30  ;;  %s1592_s10 = scalar_lea.vmem %s1799_s1, %s1233_s30 }
  0x16   : > { %v1240_v1 = vld [vmem:[%s1587_s7] sm:$0xff]   ;;  %v1367_v9 = vld [vmem:[%s1587_s7 + $0x8] sm:$0xff]   ;;  %v1368_v26 = vld [vmem:[%s1587_s7 + $0x10] sm:$0xff]   ;;  %s1071_s30 = sshll.u32 %s1068_s28, 4  ;;  %s1072_s30 = int_to_ptr.hbm [resolvable:$true] %s1071_s30 }
  0x17   : > { %v1304_v2 = vld [vmem:[%s1592_s10] sm:$0xff]   ;;  %v1241_v3 = vunpack.c.l.bf16 %v1240_v1  ;;  %v1242_v4 = vunpack.c.h.bf16 %v1240_v1  ;;  %v1382_v10 = vld [vmem:[%s1592_s10 + $0x8] sm:$0xff]   ;;  %v1245_v13 = vunpack.c.l.bf16 %v1367_v9  ;;  %v1246_v14 = vunpack.c.h.bf16 %v1367_v9  ;;  %v1383_v27 = vld [vmem:[%s1592_s10 + $0x10] sm:$0xff]   ;;  %s1455_s5 = sshra.s32 %s1072_s30, 4  ;;  %s1456_s5 = int_to_ptr.hbm [resolvable:$true] %s1455_s5 }
  0x18   : > { %v1305_v5 = vunpack.c.l.bf16 %v1304_v2  ;;  %v1306_v6 = vunpack.c.h.bf16 %v1304_v2  ;;  %v1309_v17 = vunpack.c.l.bf16 %v1382_v10  ;;  %v1310_v18 = vunpack.c.h.bf16 %v1382_v10  ;;  %v1369_v39 = vld [vmem:[%s1587_s7 + $0x18] sm:$0xff]   ;;  %v1370_v52 = vld [vmem:[%s1587_s7 + $0x20] sm:$0xff]   ;;  %v1376_v59 = vld [vmem:[%s1587_s7 + $0x50] sm:$0xff]   ;;  %s1457_s6 = scalar_lea.hbm %s1456_s5, 256  ;;  %p1462_p0 = scmp.lt.s32.totalorder %s1456_s5, %s1802_s4 }
  0x19   : > { %v1249_v28 = vunpack.c.l.bf16 %v1368_v26  ;;  %v1250_v30 = vunpack.c.h.bf16 %v1368_v26  ;;  %v1313_v31 = vunpack.c.l.bf16 %v1383_v27  ;;  %v1314_v32 = vunpack.c.h.bf16 %v1383_v27  ;;  %v1384_v40 = vld [vmem:[%s1592_s10 + $0x18] sm:$0xff]   ;;  %v1385_v53 = vld [vmem:[%s1592_s10 + $0x20] sm:$0xff]   ;;  %v1391_v60 = vld [vmem:[%s1592_s10 + $0x50] sm:$0xff]   ;;  %p1458_p11 = scmp.ne.s32.totalorder %s1456_s5, %s1457_s6  ;;  %p1463_p1 = scmp.lt.s32.totalorder %s1461_s9, %s1457_s6 }
  0x1a   : > { %v356_v7 = vadd.f32 %v1305_v5, %v1241_v3  ;;  %v357_v8 = vadd.f32 %v1306_v6, %v1242_v4  ;;  %v358_v20 = vadd.f32 %v1309_v17, %v1245_v13  ;;  %v359_v21 = vadd.f32 %v1310_v18, %v1246_v14  ;;  %v1374_v5 = vld [vmem:[%s1587_s7 + $0x40] sm:$0xff]  }
  0x1b   : > { %v360_v33 = vadd.f32 %v1313_v31, %v1249_v28  ;;  %v361_v34 = vadd.f32 %v1314_v32, %v1250_v30  ;;  %v1253_v41 = vunpack.c.l.bf16 %v1369_v39  ;;  %v1254_v42 = vunpack.c.h.bf16 %v1369_v39  ;;  %v1389_v6 = vld [vmem:[%s1592_s10 + $0x40] sm:$0xff]   ;;  %p1459_p12 = pnand %p1458_p11, %p1570_p5  ;;  %p1464_p2 = por %p1463_p1, %p1462_p0 }
  0x1c   : > { %v388_v11 = vpack.c.bf16 %v356_v7, %v356_v7  ;;  %v389_v12 = vpack.c.bf16 %v357_v8, %v357_v8  ;;  %v390_v22 = vpack.c.bf16 %v358_v20, %v358_v20  ;;  %v391_v23 = vpack.c.bf16 %v359_v21, %v359_v21 }
  0x1d   : > { %v392_v35 = vpack.c.bf16 %v360_v33, %v360_v33  ;;  %v393_v36 = vpack.c.bf16 %v361_v34, %v361_v34  ;;  %v1317_v43 = vunpack.c.l.bf16 %v1384_v40  ;;  %v1318_v44 = vunpack.c.h.bf16 %v1384_v40  ;;  %p1460_p13 = pneg %p1459_p12 }
  0x1e   : > { %v454_v15 = vunpack.c.l.b16 %v388_v11  ;;  %v455_v16 = vunpack.c.l.b16 %v389_v12  ;;  %v456_v24 = vunpack.c.l.b16 %v390_v22  ;;  %v457_v25 = vunpack.c.l.b16 %v391_v23  ;;  %v1386_v22 = vld [vmem:[%s1592_s10 + $0x28] sm:$0xff]  }
  0x1f   : > { %v458_v37 = vunpack.c.l.b16 %v392_v35  ;;  %v459_v38 = vunpack.c.l.b16 %v393_v36  ;;  %v362_v46 = vadd.f32 %v1317_v43, %v1253_v41  ;;  %v363_v47 = vadd.f32 %v1318_v44, %v1254_v42  ;;  %v1377_v36 = vld [vmem:[%s1587_s7 + $0x58] sm:$0xff]   ;;  %v1394_v43 = vld [vmem:[%s1592_s10 + $0x68] sm:$0xff]   ;;  %p1465_p3 = pnand %p1464_p2, %p1460_p13 }
  0x20   : > { %v486_v19 = vpack.c.b16 %v455_v16, %v454_v15  ;;  %v487_v29 = vpack.c.b16 %v457_v25, %v456_v24  ;;  %v1257_v55 = vunpack.c.l.bf16 %v1370_v52  ;;  %v1258_v56 = vunpack.c.h.bf16 %v1370_v52 }
  0x21   : > { %v488_v45 = vpack.c.b16 %v459_v38, %v458_v37  ;;  %v394_v48 = vpack.c.bf16 %v362_v46, %v362_v46  ;;  %v395_v49 = vpack.c.bf16 %v363_v47, %v363_v47  ;;  %v1321_v57 = vunpack.c.l.bf16 %v1385_v53  ;;  %v1392_v37 = vld [vmem:[%s1592_s10 + $0x58] sm:$0xff]   ;;  %v1379_v38 = vld [vmem:[%s1587_s7 + $0x68] sm:$0xff]  }
  0x22   : > { %1161 = vmatmul.msk.bf16.vlgmr.msra.gmra.mxu0 %vm508_vm0, %v486_v19  ;;  %v1322_v58 = vunpack.c.h.bf16 %v1385_v53  ;;  %v1281_v61 = vunpack.c.l.bf16 %v1376_v59  ;;  %v1282_v62 = vunpack.c.h.bf16 %v1376_v59  ;;  %v1345_v63 = vunpack.c.l.bf16 %v1391_v60  ;;  %v1371_v19 = vld [vmem:[%s1587_s7 + $0x28] sm:$0xff]  }
  0x23   : > { %v460_v50 = vunpack.c.l.b16 %v394_v48  ;;  %v461_v51 = vunpack.c.l.b16 %v395_v49  ;;  %v1346_v0 = vunpack.c.h.bf16 %v1391_v60  ;;  %v364_v1 = vadd.f32 %v1321_v57, %v1257_v55 }
  0x24   : > { %v365_v2 = vadd.f32 %v1322_v58, %v1258_v56  ;;  %v376_v3 = vadd.f32 %v1345_v63, %v1281_v61  ;;  %v1273_v7 = vunpack.c.l.bf16 %v1374_v5  ;;  %v1274_v8 = vunpack.c.h.bf16 %v1374_v5 }
  0x25   : > { %v489_v54 = vpack.c.b16 %v461_v51, %v460_v50  ;;  %v377_v4 = vadd.f32 %v1346_v0, %v1282_v62  ;;  %v1337_v9 = vunpack.c.l.bf16 %v1389_v6  ;;  %v1338_v10 = vunpack.c.h.bf16 %v1389_v6  ;;  %v1375_v50 = vld [vmem:[%s1587_s7 + $0x48] sm:$0xff]   ;;  %v1372_v6 = vld [vmem:[%s1587_s7 + $0x30] sm:$0xff]  }
  0x26   : > { %v408_v11 = vpack.c.bf16 %v376_v3, %v376_v3  ;;  %v396_v15 = vpack.c.bf16 %v364_v1, %v364_v1  ;;  %v397_v16 = vpack.c.bf16 %v365_v2, %v365_v2  ;;  %v1261_v28 = vunpack.c.l.bf16 %v1371_v19  ;;  %v1390_v51 = vld [vmem:[%s1592_s10 + $0x48] sm:$0xff]  }
  0x27   : > { %v409_v12 = vpack.c.bf16 %v377_v4, %v377_v4  ;;  %v372_v13 = vadd.f32 %v1337_v9, %v1273_v7  ;;  %v373_v14 = vadd.f32 %v1338_v10, %v1274_v8  ;;  %v1325_v30 = vunpack.c.l.bf16 %v1386_v22  ;;  %v1387_v7 = vld [vmem:[%s1592_s10 + $0x30] sm:$0xff]  }
  0x28   : > { %v474_v17 = vunpack.c.l.b16 %v408_v11  ;;  %v462_v26 = vunpack.c.l.b16 %v396_v15  ;;  %v463_v27 = vunpack.c.l.b16 %v397_v16  ;;  %v1326_v31 = vunpack.c.h.bf16 %v1386_v22 }
  0x29   : > { %v475_v18 = vunpack.c.l.b16 %v409_v12  ;;  %v404_v20 = vpack.c.bf16 %v372_v13, %v372_v13  ;;  %v405_v21 = vpack.c.bf16 %v373_v14, %v373_v14  ;;  %v366_v34 = vadd.f32 %v1325_v30, %v1261_v28 }
  0x2a   : > { %v490_v33 = vpack.c.b16 %v463_v27, %v462_v26  ;;  %v1285_v39 = vunpack.c.l.bf16 %v1377_v36  ;;  %v1286_v40 = vunpack.c.h.bf16 %v1377_v36  ;;  %v1349_v41 = vunpack.c.l.bf16 %v1392_v37  ;;  %v1380_v26 = vld [vmem:[%s1587_s7 + $0x70] sm:$0xff]  }
  0x2b   : > { %v496_v23 = vpack.c.b16 %v475_v18, %v474_v17  ;;  %v470_v24 = vunpack.c.l.b16 %v404_v20  ;;  %v471_v25 = vunpack.c.l.b16 %v405_v21  ;;  %v1350_v42 = vunpack.c.h.bf16 %v1392_v37 }
  0x2c   : > { %v1293_v44 = vunpack.c.l.bf16 %v1379_v38  ;;  %v1357_v46 = vunpack.c.l.bf16 %v1394_v43  ;;  %v1358_v47 = vunpack.c.h.bf16 %v1394_v43  ;;  %v378_v48 = vadd.f32 %v1349_v41, %v1285_v39 }
  0x2d   : > { %1171 = vmatmul.msk.bf16.vlgmr.msra.gmra.mxu2 %vm508_vm0, %v496_v23  ;;  %v494_v32 = vpack.c.b16 %v471_v25, %v470_v24  ;;  %v379_v49 = vadd.f32 %v1350_v42, %v1286_v40  ;;  %v1278_v55 = vunpack.c.h.bf16 %v1375_v50  ;;  %v1341_v58 = vunpack.c.l.bf16 %v1390_v51  ;;  %v1378_v24 = vld [vmem:[%s1587_s7 + $0x60] sm:$0xff]  }
  0x2e   : > { %v382_v52 = vadd.f32 %v1357_v46, %v1293_v44  ;;  %v410_v56 = vpack.c.bf16 %v378_v48, %v378_v48  ;;  %v1342_v59 = vunpack.c.h.bf16 %v1390_v51  ;;  %v398_v60 = vpack.c.bf16 %v366_v34, %v366_v34  ;;  %v1393_v25 = vld [vmem:[%s1592_s10 + $0x60] sm:$0xff]  }
  0x2f   : > { %1169 = vmatmul.msk.bf16.vlgmr.msra.gmra.mxu1 %vm508_vm0, %v494_v32  ;;  %v411_v57 = vpack.c.bf16 %v379_v49, %v379_v49  ;;  %v1265_v16 = vunpack.c.l.bf16 %v1372_v6  ;;  %v1266_v17 = vunpack.c.h.bf16 %v1372_v6  ;;  %v1329_v18 = vunpack.c.l.bf16 %v1387_v7 }
  0x30   : > { %v414_v62 = vpack.c.bf16 %v382_v52, %v382_v52  ;;  %v476_v0 = vunpack.c.l.b16 %v410_v56  ;;  %v375_v3 = vadd.f32 %v1342_v59, %v1278_v55  ;;  %v464_v12 = vunpack.c.l.b16 %v398_v60  ;;  %v1388_v55 = vld [vmem:[%s1592_s10 + $0x38] sm:$0xff]  }
  0x31   : > { %v477_v1 = vunpack.c.l.b16 %v411_v57  ;;  %v368_v22 = vadd.f32 %v1329_v18, %v1265_v16  ;;  %v1289_v27 = vunpack.c.l.bf16 %v1378_v24  ;;  %v1290_v28 = vunpack.c.h.bf16 %v1378_v24 }
  0x32   : > { %1162 = vmatmul.msk.bf16.gmra.mxu0 %vm508_vm0, %v487_v29  ;;  %v1262_v29 = vunpack.c.h.bf16 %v1371_v19  ;;  %v480_v4 = vunpack.c.l.b16 %v414_v62  ;;  %v407_v10 = vpack.c.bf16 %v375_v3, %v375_v3  ;;  %v1330_v19 = vunpack.c.h.bf16 %v1387_v7  ;;  %v1396_v62 = vld [vmem:[%s1592_s10 + $0x78] sm:$0xff]  }
  0x33   : > { %v497_v8 = vpack.c.b16 %v477_v1, %v476_v0  ;;  %v1354_v30 = vunpack.c.h.bf16 %v1393_v25  ;;  %v1297_v32 = vunpack.c.l.bf16 %v1380_v26  ;;  %v400_v42 = vpack.c.bf16 %v368_v22, %v368_v22 }
  0x34   : > { %v367_v35 = vadd.f32 %v1326_v31, %v1262_v29  ;;  %v473_v15 = vunpack.c.l.b16 %v407_v10  ;;  %v369_v23 = vadd.f32 %v1330_v19, %v1266_v17  ;;  %v1353_v29 = vunpack.c.l.bf16 %v1393_v25  ;;  %v1395_v31 = vld [vmem:[%s1592_s10 + $0x70] sm:$0xff]  }
  0x35   : > { %v1361_v34 = vunpack.c.l.bf16 %v1395_v31  ;;  %v381_v37 = vadd.f32 %v1354_v30, %v1290_v28  ;;  %v466_v51 = vunpack.c.l.b16 %v400_v42  ;;  %v1333_v59 = vunpack.c.l.bf16 %v1388_v55 }
  0x36   : > { %v399_v61 = vpack.c.bf16 %v367_v35, %v367_v35  ;;  %v1362_v35 = vunpack.c.h.bf16 %v1395_v31  ;;  %v380_v36 = vadd.f32 %v1353_v29, %v1289_v27  ;;  %v401_v43 = vpack.c.bf16 %v369_v23, %v369_v23 }
  0x37   : > { %v413_v41 = vpack.c.bf16 %v381_v37, %v381_v37  ;;  %v1334_v60 = vunpack.c.h.bf16 %v1388_v55  ;;  %v1365_v1 = vunpack.c.l.bf16 %v1396_v62 }
  0x38   : > { %v465_v13 = vunpack.c.l.b16 %v399_v61  ;;  %v412_v40 = vpack.c.bf16 %v380_v36, %v380_v36  ;;  %v467_v52 = vunpack.c.l.b16 %v401_v43  ;;  %v1381_v61 = vld [vmem:[%s1587_s7 + $0x78] sm:$0xff]  }
  0x39   : > { %v1302_v0 = vunpack.c.h.bf16 %v1381_v61 }
  0x3a   : > { %v491_v21 = vpack.c.b16 %v465_v13, %v464_v12  ;;  %v478_v46 = vunpack.c.l.b16 %v412_v40  ;;  %v492_v56 = vpack.c.b16 %v467_v52, %v466_v51 }
  0x3d   : > { %1172 = vmatmul.msk.bf16.gmra.mxu2 %vm508_vm0, %v497_v8 }
  0x42   : > { %1163 = vmatmul.msk.bf16.gmra.mxu0 %vm508_vm0, %v488_v45  ;;  %v1294_v45 = vunpack.c.h.bf16 %v1379_v38  ;;  %v384_v38 = vadd.f32 %v1361_v34, %v1297_v32 }
  0x44   : > { %v383_v53 = vadd.f32 %v1358_v47, %v1294_v45  ;;  %v416_v44 = vpack.c.bf16 %v384_v38, %v384_v38  ;;  %v479_v47 = vunpack.c.l.b16 %v413_v41  ;;  %v1645_v38 = vld [vmem:[%s1801_s3] sm:$0xff] }
  0x46   : > { %v415_v63 = vpack.c.bf16 %v383_v53, %v383_v53  ;;  %v482_v48 = vunpack.c.l.b16 %v416_v44 }
  0x48   : > { %v481_v5 = vunpack.c.l.b16 %v415_v63  ;;  %v1301_v63 = vunpack.c.l.bf16 %v1381_v61 }
  0x4a   : > { %v499_v11 = vpack.c.b16 %v481_v5, %v480_v4  ;;  %v386_v5 = vadd.f32 %v1365_v1, %v1301_v63 }
  0x4c   : > { %1174 = vmatmul.msk.bf16.vlgmr.msra.gmra.mxu3 %vm508_vm0, %v499_v11  ;;  %v418_v7 = vpack.c.bf16 %v386_v5, %v386_v5 }
  0x4e   : > { %v484_v11 = vunpack.c.l.b16 %v418_v7 }
  0x52   : > { %1164 = vmatmul.msk.bf16.gmra.mxu0 %vm508_vm0, %v489_v54  ;;  %v1277_v54 = vunpack.c.l.bf16 %v1375_v50  ;;  %v498_v50 = vpack.c.b16 %v479_v47, %v478_v46 }
  0x54   : > { %v374_v2 = vadd.f32 %v1341_v58, %v1277_v54  ;;  %1173 = vmatmul.msk.bf16.gmra.mxu2 %vm508_vm0, %v498_v50  ;;  %v1373_v54 = vld [vmem:[%s1587_s7 + $0x38] sm:$0xff]  }
  0x55   : > { %v1269_v57 = vunpack.c.l.bf16 %v1373_v54  ;;  %v1270_v58 = vunpack.c.h.bf16 %v1373_v54 }
  0x56   : > { %v406_v9 = vpack.c.bf16 %v374_v2, %v374_v2  ;;  %v1366_v2 = vunpack.c.h.bf16 %v1396_v62 }
  0x57   : > { %v370_v3 = vadd.f32 %v1333_v59, %v1269_v57  ;;  %v371_v4 = vadd.f32 %v1334_v60, %v1270_v58 }
  0x58   : > { %v472_v14 = vunpack.c.l.b16 %v406_v9  ;;  %v387_v6 = vadd.f32 %v1366_v2, %v1302_v0 }
  0x59   : > { %v402_v9 = vpack.c.bf16 %v370_v3, %v370_v3  ;;  %v403_v10 = vpack.c.bf16 %v371_v4, %v371_v4 }
  0x5a   : > { %v495_v20 = vpack.c.b16 %v473_v15, %v472_v14  ;;  %v419_v8 = vpack.c.bf16 %v387_v6, %v387_v6 }
  0x5b   : > { %v468_v14 = vunpack.c.l.b16 %v402_v9  ;;  %v469_v15 = vunpack.c.l.b16 %v403_v10 }
  0x5c   : > { %1170 = vmatmul.msk.bf16.gmra.mxu1 %vm508_vm0, %v495_v20  ;;  %v485_v12 = vunpack.c.l.b16 %v419_v8 }
  0x5d   : > { %v493_v16 = vpack.c.b16 %v469_v15, %v468_v14 }
  0x5e   : > { %v501_v13 = vpack.c.b16 %v485_v12, %v484_v11 }
  0x62   : > { %1165 = vmatmul.msk.bf16.gmra.mxu0 %vm508_vm0, %v490_v33  ;;  %v1298_v33 = vunpack.c.h.bf16 %v1380_v26 }
  0x64   : > { %v385_v39 = vadd.f32 %v1362_v35, %v1298_v33 }
  0x66   : > { %v417_v45 = vpack.c.bf16 %v385_v39, %v385_v39 }
  0x68   : > { %v483_v49 = vunpack.c.l.b16 %v417_v45 }
  0x6a   : > { %v500_v53 = vpack.c.b16 %v483_v49, %v482_v48 }
  0x6c   : > { %1175 = vmatmul.msk.bf16.gmra.mxu3 %vm508_vm0, %v500_v53 }
  0x72   : > { %1166 = vmatmul.msk.bf16.gmra.mxu0 %vm508_vm0, %v491_v21 }
  0x7c   : > { %1176 = vmatmul.msk.bf16.gmra.mxu3 %vm508_vm0, %v501_v13 }
  0x82   : > { %1167 = vmatmul.msk.bf16.gmra.mxu0 %vm508_vm0, %v492_v56 }
  0x92   : > { %1168 = vmatmul.msk.bf16.gmra.mxu0 %vm508_vm0, %v493_v16 }
  0x9f   : > { %v566_v17 = vpop.f32.mrf.mxu0 }
  0xa0   : > { %v646_v18 = vpack.c.bf16 %v566_v17, %v566_v17 }
  0xa2   : > { %v687_v21 = vunpack.c.l.b16 %v646_v18 }
  0xa7   : > { %v568_v19 = vpop.f32.mrf.mxu0 }
  0xa8   : > { %v647_v20 = vpack.c.bf16 %v568_v19, %v568_v19 }
  0xaa   : > { %v688_v22 = vunpack.c.l.b16 %v647_v20 }
  0xac   : > { %v689_v23 = vpack.c.b16 %v688_v22, %v687_v21  ;;  %v606_v48 = vpop.f32.mrf.mxu1 }
  0xad   : > { %v662_v60 = vpack.c.bf16 %v606_v48, %v606_v48 }
  0xae   : > { %701 = vmatpush.bf16.msrb.mxu1 %v689_v23 }
  0xaf   : > { %v571_v24 = vpop.f32.mrf.mxu0  ;;  %v873_v5 = vunpack.c.l.b16 %v662_v60 }
  0xb0   : > { %v648_v25 = vpack.c.bf16 %v571_v24, %v571_v24  ;;  %v1653_v46 = vpop.f32.mrf.mxu2 }
  0xb1   : > { %1181 = vmatmul.msk.bf16.vlgmr.msrb.gmra.mxu1 %vm508_vm0, %v1645_v38 }
  0xb2   : > { %v712_v28 = vunpack.c.l.b16 %v648_v25 }
  0xb4   : > { %v608_v56 = vpop.f32.mrf.mxu1 }
  0xb5   : > { %v663_v61 = vpack.c.bf16 %v608_v56, %v608_v56 }
  0xb7   : > { %v573_v26 = vpop.f32.mrf.mxu0  ;;  %v874_v6 = vunpack.c.l.b16 %v663_v61 }
  0xb8   : > { %v649_v27 = vpack.c.bf16 %v573_v26, %v573_v26  ;;  %v1657_v49 = vpop.f32.mrf.mxu2 }
  0xb9   : > { %v875_v12 = vpack.c.b16 %v874_v6, %v873_v5 }
  0xba   : > { %v713_v29 = vunpack.c.l.b16 %v649_v27 }
  0xbc   : > { %v714_v30 = vpack.c.b16 %v713_v29, %v712_v28 }
  0xbe   : > { %723 = vmatpush.bf16.msrb.mxu2 %v714_v30 }
  0xbf   : > { %v576_v31 = vpop.f32.mrf.mxu0 }
  0xc0   : > { %v650_v32 = vpack.c.bf16 %v576_v31, %v576_v31  ;;  %v621_v57 = vpop.f32.mrf.mxu2 }
  0xc1   : > { %1182 = vmatmul.msk.bf16.vlgmr.msrb.gmra.mxu2 %vm508_vm0, %v1645_v38  ;;  %v668_v1 = vpack.c.bf16 %v621_v57, %v621_v57 }
  0xc2   : > { %v735_v35 = vunpack.c.l.b16 %v650_v32 }
  0xc3   : > { %v942_v10 = vunpack.c.l.b16 %v668_v1 }
  0xc7   : > { %v578_v33 = vpop.f32.mrf.mxu0 }
  0xc8   : > { %v651_v34 = vpack.c.bf16 %v578_v33, %v578_v33  ;;  %v623_v62 = vpop.f32.mrf.mxu2 }
  0xc9   : > { %v669_v2 = vpack.c.bf16 %v623_v62, %v623_v62 }
  0xca   : > { %v736_v36 = vunpack.c.l.b16 %v651_v34 }
  0xcb   : > { %v943_v11 = vunpack.c.l.b16 %v669_v2 }
  0xcc   : > { %v737_v37 = vpack.c.b16 %v736_v36, %v735_v35 }
  0xcd   : > { %v944_v15 = vpack.c.b16 %v943_v11, %v942_v10 }
  0xce   : > { %746 = vmatpush.bf16.msrb.mxu3 %v737_v37 }
  0xcf   : > { %v581_v39 = vpop.f32.mrf.mxu0  ;;  %v1659_v58 = vpop.f32.mrf.mxu3 }
  0xd0   : > { %v652_v40 = vpack.c.bf16 %v581_v39, %v581_v39 }
  0xd1   : > { %1185 = vmatmul.msk.bf16.vlgmr.msrb.gmra.mxu3 %vm508_vm0, %v1645_v38 }
  0xd2   : > { %v758_v43 = vunpack.c.l.b16 %v652_v40 }
  0xd7   : > { %v583_v41 = vpop.f32.mrf.mxu0  ;;  %v1663_v3 = vpop.f32.mrf.mxu3 }
  0xd8   : > { %v653_v42 = vpack.c.bf16 %v583_v41, %v583_v41  ;;  %v626_v14 = vpop.f32.mrf.mxu2 }
  0xd9   : > { %v611_v0 = vpop.f32.mrf.mxu1  ;;  %v670_v21 = vpack.c.bf16 %v626_v14, %v626_v14 }
  0xda   : > { %v759_v44 = vunpack.c.l.b16 %v653_v42  ;;  %v664_v19 = vpack.c.bf16 %v611_v0, %v611_v0 }
  0xdb   : > { %v965_v32 = vunpack.c.l.b16 %v670_v21 }
  0xdc   : > { %v760_v45 = vpack.c.b16 %v759_v44, %v758_v43  ;;  %v896_v28 = vunpack.c.l.b16 %v664_v19 }
  0xde   : > { %769 = vmatpush.bf16.msra.mxu1 %v760_v45  ;;  %v666_v45 = vpack.c.bf16 %v1653_v46, %v1653_v46 }
  0xdf   : > { %v586_v47 = vpop.f32.mrf.mxu0 }
  0xe0   : > { %v654_v50 = vpack.c.bf16 %v586_v47, %v586_v47  ;;  %v628_v23 = vpop.f32.mrf.mxu2  ;;  %v667_v47 = vpack.c.bf16 %v1657_v49, %v1657_v49  ;;  %v919_v57 = vunpack.c.l.b16 %v666_v45 }
  0xe1   : > { %1188 = vmatmul.msk.bf16.vlgmr.msra.gmra.mxu1 %vm508_vm0, %v1645_v38  ;;  %v613_v18 = vpop.f32.mrf.mxu1  ;;  %v671_v25 = vpack.c.bf16 %v628_v23, %v628_v23 }
  0xe2   : > { %v781_v53 = vunpack.c.l.b16 %v654_v50  ;;  %v665_v20 = vpack.c.bf16 %v613_v18, %v613_v18 }
  0xe3   : > { %v966_v36 = vunpack.c.l.b16 %v671_v25 }
  0xe4   : > { %v897_v29 = vunpack.c.l.b16 %v665_v20 }
  0xe5   : > { %v967_v41 = vpack.c.b16 %v966_v36, %v965_v32 }
  0xe6   : > { %v898_v39 = vpack.c.b16 %v897_v29, %v896_v28 }
  0xe7   : > { %v588_v51 = vpop.f32.mrf.mxu0 }
  0xe8   : > { %v655_v52 = vpack.c.bf16 %v588_v51, %v588_v51 }
  0xea   : > { %v782_v54 = vunpack.c.l.b16 %v655_v52 }
  0xec   : > { %v783_v55 = vpack.c.b16 %v782_v54, %v781_v53  ;;  %v672_v54 = vpack.c.bf16 %v1659_v58, %v1659_v58 }
  0xee   : > { %792 = vmatpush.bf16.msra.mxu2 %v783_v55  ;;  %v673_v55 = vpack.c.bf16 %v1663_v3, %v1663_v3 }
  0xef   : > { %v591_v59 = vpop.f32.mrf.mxu0  ;;  %v636_v16 = vpop.f32.mrf.mxu3 }
  0xf0   : > { %v656_v63 = vpack.c.bf16 %v591_v59, %v591_v59  ;;  %v674_v22 = vpack.c.bf16 %v636_v16, %v636_v16  ;;  %v920_v59 = vunpack.c.l.b16 %v667_v47  ;;  %v989_v49 = vunpack.c.l.b16 %v673_v55 }
  0xf1   : > { %1191 = vmatmul.msk.bf16.vlgmr.msra.gmra.mxu2 %vm508_vm0, %v1645_v38 }
  0xf2   : > { %v804_v8 = vunpack.c.l.b16 %v656_v63  ;;  %v1011_v33 = vunpack.c.l.b16 %v674_v22  ;;  %v988_v63 = vunpack.c.l.b16 %v672_v54  ;;  %v921_v1 = vpack.c.b16 %v920_v59, %v919_v57 }
  0xf4   : > { %v990_v58 = vpack.c.b16 %v989_v49, %v988_v63 }
  0xf7   : > { %v593_v4 = vpop.f32.mrf.mxu0  ;;  %v638_v26 = vpop.f32.mrf.mxu3 }
  0xf8   : > { %v657_v7 = vpack.c.bf16 %v593_v4, %v593_v4  ;;  %v675_v30 = vpack.c.bf16 %v638_v26, %v638_v26 }
  0xfa   : > { %v805_v9 = vunpack.c.l.b16 %v657_v7  ;;  %v1012_v37 = vunpack.c.l.b16 %v675_v30 }
  0xfc   : > { %v806_v13 = vpack.c.b16 %v805_v9, %v804_v8  ;;  %v1013_v42 = vpack.c.b16 %v1012_v37, %v1011_v33 }
  0xfe   : > { %815 = vmatpush.bf16.msra.mxu3 %v806_v13 }
  0xff   : > { %v596_v17 = vpop.f32.mrf.mxu0  ;;  %v641_v43 = vpop.f32.mrf.mxu3 }
 0x100   : > { %v658_v24 = vpack.c.bf16 %v596_v17, %v596_v17  ;;  %v676_v52 = vpack.c.bf16 %v641_v43, %v641_v43 }
 0x101   : > { %1194 = vmatmul.msk.bf16.vlgmr.msra.gmra.mxu3 %vm508_vm0, %v1645_v38 }
 0x102   : > { %884 = vmatpush.bf16.msrb.mxu3 %v875_v12  ;;  %v827_v34 = vunpack.c.l.b16 %v658_v24  ;;  %v1034_v46 = vunpack.c.l.b16 %v676_v52 }
 0x106   : > { %953 = vmatpush.bf16.msra.mxu3 %v944_v15 }
 0x107   : > { %v598_v27 = vpop.f32.mrf.mxu0  ;;  %v643_v50 = vpop.f32.mrf.mxu3 }
 0x108   : > { %v659_v31 = vpack.c.bf16 %v598_v27, %v598_v27  ;;  %v677_v53 = vpack.c.bf16 %v643_v50, %v643_v50 }
 0x10a   : > { %v828_v35 = vunpack.c.l.b16 %v659_v31  ;;  %v1035_v62 = vunpack.c.l.b16 %v677_v53 }
 0x10c   : > { %v829_v40 = vpack.c.b16 %v828_v35, %v827_v34  ;;  %v1036_v2 = vpack.c.b16 %v1035_v62, %v1034_v46 }
 0x10e   : > { %838 = vmatpush.bf16.msrb.mxu1 %v829_v40 }
 0x10f   : > { %v601_v44 = vpop.f32.mrf.mxu0 }
 0x110   : > { %v660_v48 = vpack.c.bf16 %v601_v44, %v601_v44 }
 0x111   : > { %1197 = vmatmul.msk.bf16.vlgmr.msrb.gmra.mxu1 %vm508_vm0, %v1645_v38  ;;  %1203 = vmatmul.msk.bf16.vlgmr.msrb.gmra.mxu3 %vm508_vm0, %v1645_v38 }
 0x112   : > { %907 = vmatpush.bf16.msra.mxu1 %v898_v39  ;;  %1022 = vmatpush.bf16.msrb.mxu3 %v1013_v42  ;;  %v850_v60 = vunpack.c.l.b16 %v660_v48 }
 0x116   : > { %976 = vmatpush.bf16.msrb.mxu1 %v967_v41 }
 0x117   : > { %v603_v51 = vpop.f32.mrf.mxu0 }
 0x118   : > { %v661_v56 = vpack.c.bf16 %v603_v51, %v603_v51 }
 0x11a   : > { %v851_v61 = vunpack.c.l.b16 %v661_v56 }
 0x11c   : > { %v852_v0 = vpack.c.b16 %v851_v61, %v850_v60 }
 0x11e   : > { %861 = vmatpush.bf16.msrb.mxu2 %v852_v0 }
 0x121   : > { %1200 = vmatmul.msk.bf16.vlgmr.msrb.gmra.mxu2 %vm508_vm0, %v1645_v38  ;;  %1206 = vmatmul.msk.bf16.vlgmr.msra.gmra.mxu1 %vm508_vm0, %v1645_v38 }
 0x122   : > { %930 = vmatpush.bf16.msra.mxu2 %v921_v1  ;;  %1212 = vmatmul.msk.bf16.vlgmr.msra.gmra.mxu3 %vm508_vm0, %v1645_v38 }
 0x123   : > { %1045 = vmatpush.bf16.msra.mxu1 %v1036_v2 }
 0x126   : > { %999 = vmatpush.bf16.msrb.mxu2 %v990_v58 }
 0x12e   : > { %v703_v3 = vpop.f32.mrf.mxu1 }
 0x12f   : > { %708 = vst.msk [vmem:[%s1698_s20] sm:$0xff] %vm508_vm0, %v703_v3 }
 0x131   : > { %1209 = vmatmul.msk.bf16.vlgmr.msra.gmra.mxu2 %vm508_vm0, %v1645_v38  ;;  %1215 = vmatmul.msk.bf16.vlgmr.msrb.gmra.mxu1 %vm508_vm0, %v1645_v38 }
 0x132   : > { %1221 = vmatmul.msk.bf16.vlgmr.msrb.gmra.mxu3 %vm508_vm0, %v1645_v38 }
 0x141   : > { %1218 = vmatmul.msk.bf16.vlgmr.msrb.gmra.mxu2 %vm508_vm0, %v1645_v38  ;;  %1224 = vmatmul.msk.bf16.vlgmr.msra.gmra.mxu1 %vm508_vm0, %v1645_v38  ;;  %v705_v38 = vpop.f32.mrf.mxu1 }
 0x142   : > { %709 = vst.msk [vmem:[%s1698_s20 + $0x8] sm:$0xff] %vm508_vm0, %v705_v38 }
 0x144   : > { %v725_v4 = vpop.f32.mrf.mxu2 }
 0x145   : > { %1183 = vst.msk [vmem:[%s1698_s20 + $0x10] sm:$0xff] %vm508_vm0, %v725_v4 }
 0x14c   : > { %v727_v6 = vpop.f32.mrf.mxu2 }
 0x14d   : > { %1184 = vst.msk [vmem:[%s1698_s20 + $0x18] sm:$0xff] %vm508_vm0, %v727_v6 }
 0x154   : > { %v748_v5 = vpop.f32.mrf.mxu3 }
 0x155   : > { %1186 = vst.msk [vmem:[%s1698_s20 + $0x20] sm:$0xff] %vm508_vm0, %v748_v5 }
 0x15c   : > { %v750_v7 = vpop.f32.mrf.mxu3 }
 0x15d   : > { %1187 = vst.msk [vmem:[%s1698_s20 + $0x28] sm:$0xff] %vm508_vm0, %v750_v7 }
 0x15e   : > { %v771_v8 = vpop.f32.mrf.mxu1 }
 0x15f   : > { %1189 = vst.msk [vmem:[%s1698_s20 + $0x30] sm:$0xff] %vm508_vm0, %v771_v8 }
 0x166   : > { %v773_v9 = vpop.f32.mrf.mxu1 }
 0x167   : > { %1190 = vst.msk [vmem:[%s1698_s20 + $0x38] sm:$0xff] %vm508_vm0, %v773_v9 }
 0x174   : > { %v794_v10 = vpop.f32.mrf.mxu2 }
 0x175   : > { %1192 = vst.msk [vmem:[%s1698_s20 + $0x40] sm:$0xff] %vm508_vm0, %v794_v10 }
 0x17c   : > { %v796_v11 = vpop.f32.mrf.mxu2 }
 0x17d   : > { %1193 = vst.msk [vmem:[%s1698_s20 + $0x48] sm:$0xff] %vm508_vm0, %v796_v11 }
 0x184   : > { %v817_v12 = vpop.f32.mrf.mxu3 }
 0x185   : > { %1195 = vst.msk [vmem:[%s1698_s20 + $0x50] sm:$0xff] %vm508_vm0, %v817_v12 }
 0x18c   : > { %v819_v13 = vpop.f32.mrf.mxu3 }
 0x18d   : > { %1196 = vst.msk [vmem:[%s1698_s20 + $0x58] sm:$0xff] %vm508_vm0, %v819_v13 }
 0x18e   : > { %v840_v14 = vpop.f32.mrf.mxu1 }
 0x18f   : > { %1198 = vst.msk [vmem:[%s1698_s20 + $0x60] sm:$0xff] %vm508_vm0, %v840_v14 }
 0x194   : > { %v886_v15 = vpop.f32.mrf.mxu3 }
 0x195   : > { %1204 = vst.msk [vmem:[%s1698_s20 + $0x80] sm:$0xff] %vm508_vm0, %v886_v15 }
 0x196   : > { %v842_v16 = vpop.f32.mrf.mxu1 }
 0x197   : > { %1199 = vst.msk [vmem:[%s1698_s20 + $0x68] sm:$0xff] %vm508_vm0, %v842_v16 }
 0x19c   : > { %v888_v17 = vpop.f32.mrf.mxu3 }
 0x19d   : > { %1205 = vst.msk [vmem:[%s1698_s20 + $0x88] sm:$0xff] %vm508_vm0, %v888_v17 }
 0x19e   : > { %v909_v18 = vpop.f32.mrf.mxu1 }
 0x19f   : > { %1207 = vst.msk [vmem:[%s1698_s20 + $0x90] sm:$0xff] %vm508_vm0, %v909_v18 }
 0x1a4   : > { %v863_v19 = vpop.f32.mrf.mxu2 }
 0x1a5   : > { %1201 = vst.msk [vmem:[%s1698_s20 + $0x70] sm:$0xff] %vm508_vm0, %v863_v19  ;;  %v955_v20 = vpop.f32.mrf.mxu3 }
 0x1a6   : > { %v911_v21 = vpop.f32.mrf.mxu1  ;;  %1213 = vst.msk [vmem:[%s1698_s20 + $0xb0] sm:$0xff] %vm508_vm0, %v955_v20 }
 0x1a7   : > { %1208 = vst.msk [vmem:[%s1698_s20 + $0x98] sm:$0xff] %vm508_vm0, %v911_v21 }
 0x1ac   : > { %v865_v22 = vpop.f32.mrf.mxu2 }
 0x1ad   : > { %1202 = vst.msk [vmem:[%s1698_s20 + $0x78] sm:$0xff] %vm508_vm0, %v865_v22  ;;  %v957_v23 = vpop.f32.mrf.mxu3 }
 0x1ae   : > { %v978_v24 = vpop.f32.mrf.mxu1  ;;  %1214 = vst.msk [vmem:[%s1698_s20 + $0xb8] sm:$0xff] %vm508_vm0, %v957_v23 }
 0x1af   : > { %1216 = vst.msk [vmem:[%s1698_s20 + $0xc0] sm:$0xff] %vm508_vm0, %v978_v24 }
 0x1b4   : > { %v932_v25 = vpop.f32.mrf.mxu2 }
 0x1b5   : > { %1210 = vst.msk [vmem:[%s1698_s20 + $0xa0] sm:$0xff] %vm508_vm0, %v932_v25  ;;  %v1024_v26 = vpop.f32.mrf.mxu3 }
 0x1b6   : > { %v980_v27 = vpop.f32.mrf.mxu1  ;;  %1222 = vst.msk [vmem:[%s1698_s20 + $0xe0] sm:$0xff] %vm508_vm0, %v1024_v26 }
 0x1b7   : > { %1217 = vst.msk [vmem:[%s1698_s20 + $0xc8] sm:$0xff] %vm508_vm0, %v980_v27 }
 0x1bc   : > { %v934_v28 = vpop.f32.mrf.mxu2 }
 0x1bd   : > { %1211 = vst.msk [vmem:[%s1698_s20 + $0xa8] sm:$0xff] %vm508_vm0, %v934_v28  ;;  %v1026_v29 = vpop.f32.mrf.mxu3 }
 0x1be   : > { %v1047_v30 = vpop.f32.mrf.mxu1  ;;  %1223 = vst.msk [vmem:[%s1698_s20 + $0xe8] sm:$0xff] %vm508_vm0, %v1026_v29 }
 0x1bf   : > { %1225 = vst.msk [vmem:[%s1698_s20 + $0xf0] sm:$0xff] %vm508_vm0, %v1047_v30 }
 0x1c4   : > { %v1001_v31 = vpop.f32.mrf.mxu2 }
 0x1c5   : > { %1219 = vst.msk [vmem:[%s1698_s20 + $0xd0] sm:$0xff] %vm508_vm0, %v1001_v31 }
 0x1c6   : > { %v1049_v32 = vpop.f32.mrf.mxu1 }
 0x1c7   : > { %1226 = vst.msk [vmem:[%s1698_s20 + $0xf8] sm:$0xff] %vm508_vm0, %v1049_v32 }
 0x1cc   : > { %v1003_v33 = vpop.f32.mrf.mxu2 }
 0x1cd   : > { %1220 = vst.msk [vmem:[%s1698_s20 + $0xd8] sm:$0xff] %vm508_vm0, %v1003_v33 }
 0x1ce   : > { %1468 = shalt.err (!%p1465_p3)
}
 0x1cf   : > { %s1505_s12 = smov 128   ;;  %s1506_s13 = smov 8  }
 0x1d0   : > { %1400 = dma.vmem_to_hbm [thread:$0]  (%p1570_p5), %s1070_s29, 4096, %s1072_s30, %s1056_s19, %s1505_s12, %s1505_s12, %s1506_s13  }
 0x1d1 PF: > { %p1406_p4 = scmp.ge.s32.totalorder %s1503_s18, 2  ;;  %s1086_s14 = sand.u32 1, %s1491_s15  }
 0x1d2   : > { %s1087_s20 = scalar_lea.sflag [#allocation3], %s1086_s14 }
 0x1d3   : > { %p1403_p7 = pnand %p1406_p4, %p1574_p6 }
 0x1d5   : > { %p1404_p8 = pneg %p1403_p7 }
 0x1d7   : > { %1486 = dma.done.wait (%p1404_p8), %s1087_s20, 4096  }
 0x1d8   : > { %1488 = vsyncadd (%p1404_p8), %s1087_s20, 4294963200  ;;  %p14_p9 = scmp.ge.s32.totalorder %s1557_s21, 4   ;;  %s1805_s15 = smov %s1495_s16 }
 0x1d9   : > { %s1806_s16 = smov %s1499_s17  ;;  %s1807_s17 = smov %s1568_s24 }
 0x1da   : > { %s1808_s18 = smov %s1557_s21  ;;  %16 = sbr.rel (!%p14_p9) target bundleno = 3 (0x3), region = 89 }
 0x1df   :  { %1093 = vsyncpa [#allocation3], 1 }
 0x1e0   :  { %1095 = vsyncpa [#allocation3 + $0x1], 1 }

</bundles_post_ra>
